<compile_context>
chip_gen: v7x
topology: tpu7x:2x2x1
jax: 0.10.0
libtpu: 0.0.40
codegen_flags: <defaults>
</compile_context>

<pallas_src>
import functools

import numpy as np
import jax
import jax.numpy as jnp
from jax import lax
from jax.experimental import pallas as pl
from jax.experimental.pallas import tpu as pltpu


# ---------------------------------------------------------------------------
# Fused single-kernel forward
# ---------------------------------------------------------------------------
def _dqn_fused_kernel(p1_ref, w1_ref, sc1_ref, sh1_ref,
                      s2m_ref, w2_ref, sc2_ref, sh2_ref,
                      s3m_ref, w3_ref, sc3_ref, sh3_ref,
                      wf1_ref, bf1_ref, wf2_ref, bf2_ref,
                      out_ref, *, tb, n2, n3):
    """Entire DQN forward for a block of `tb` batch elements, all in VMEM."""
    bf16 = jnp.bfloat16
    dot = lambda a, b: jnp.dot(a, b, preferred_element_type=jnp.float32)

    # ---- conv1 (pre-im2col'd) as GEMM + folded BN + ReLU ------------------
    y1 = dot(p1_ref[...], w1_ref[...])                       # (tb*196, 32) f32
    y1 = jnp.maximum(y1 * sc1_ref[...] + sh1_ref[...], 0.0).astype(bf16)

    # ---- conv2: per-tap selection matmul + channel matmul, accumulate -----
    c2 = w2_ref.shape[-1]
    acc2 = jnp.zeros((tb * n2, c2), jnp.float32)
    for t in range(s2m_ref.shape[0]):
        g = dot(s2m_ref[t], y1).astype(bf16)                 # exact row gather (0/1 matrix)
        acc2 = acc2 + dot(g, w2_ref[t])
    y2 = jnp.maximum(acc2 * sc2_ref[...] + sh2_ref[...], 0.0).astype(bf16)

    # ---- conv3: same trick (stride 1) --------------------------------------
    c3 = w3_ref.shape[-1]
    acc3 = jnp.zeros((n3 * tb, c3), jnp.float32)             # rows ordered (spatial, batch)
    for t in range(s3m_ref.shape[0]):
        g = dot(s3m_ref[t], y2).astype(bf16)
        acc3 = acc3 + dot(g, w3_ref[t])
    y3 = jnp.maximum(acc3 * sc3_ref[...] + sh3_ref[...], 0.0).astype(bf16)

    # ---- fc1: contract over (spatial position, channel) --------------------
    nh = wf1_ref.shape[-1]
    acc = jnp.zeros((tb, nh), jnp.float32)
    for p in range(n3):
        acc = acc + dot(y3[p * tb:(p + 1) * tb, :], wf1_ref[p])
    h = jnp.maximum(acc + bf1_ref[...], 0.0).astype(bf16)

    # ---- fc2 ---------------------------------------------------------------
    out = dot(h, wf2_ref[...]) + bf2_ref[...]
    out_ref[0] = out.astype(out_ref.dtype)


# ---------------------------------------------------------------------------
# Trace-time helpers (one-time glue; folded under jit)
# ---------------------------------------------------------------------------
def _im2col_nhwc(x, k, stride):
    """x: (B, H, W, C) -> (B*oh*ow, k*k*C), feature order (ki, kj, c)."""
    B, H, W, C = x.shape
    oh = (H - k) // stride + 1
    ow = (W - k) // stride + 1
    cols = []
    for i in range(k):
        for j in range(k):
            cols.append(x[:, i:i + stride * oh:stride, j:j + stride * ow:stride, :])
    patches = jnp.concatenate(cols, axis=-1)                  # (B, oh, ow, k*k*C)
    return patches.reshape(B * oh * ow, k * k * C), oh, ow


def _selection(tb, ih, iw, k, stride, spatial_major_out):
    """0/1 per-tap row-gather matrices: (k*k, tb*oh*ow, tb*ih*iw)."""
    oh = (ih - k) // stride + 1
    ow = (iw - k) // stride + 1
    S = np.zeros((k * k, tb * oh * ow, tb * ih * iw), np.float32)
    for i in range(k):
        for j in range(k):
            t = i * k + j
            for b in range(tb):
                for oy in range(oh):
                    for ox in range(ow):
                        if spatial_major_out:
                            ro = (oy * ow + ox) * tb + b
                        else:
                            ro = b * oh * ow + oy * ow + ox
                        ri = b * ih * iw + (stride * oy + i) * iw + (stride * ox + j)
                        S[t, ro, ri] = 1.0
    return S, oh, ow


def _fold_bn(gamma, beta, mean, var, conv_bias, eps=1e-5):
    scale = gamma / jnp.sqrt(var + eps)
    shift = beta + scale * (conv_bias - mean)
    return (scale.reshape(1, -1).astype(jnp.float32),
            shift.reshape(1, -1).astype(jnp.float32))


def _full_spec(shape):
    nd = len(shape)
    return pl.BlockSpec(shape, lambda i, _n=nd: (0,) * _n)


# ---------------------------------------------------------------------------
# DQN forward (wrapper)
# ---------------------------------------------------------------------------
@jax.jit
def dqn_forward(x, p):
    B, C, H, W = x.shape
    k1, st1, k2, st2, k3, st3 = 8, 4, 4, 2, 3, 1
    bf16 = jnp.bfloat16

    # batch tiling: TB rows per grid step; multiple blocks shard across TCs (v7x)
    TB = B if B <= 4 else 4
    Bp = -(-B // TB) * TB
    if Bp != B:
        x = jnp.concatenate([x, jnp.zeros((Bp - B, C, H, W), x.dtype)], axis=0)
    nb = Bp // TB

    # channels-last input + conv1 im2col (trace-time glue on the raw input only)
    x_nhwc = jnp.transpose(x, (0, 2, 3, 1))
    patches, oh1, ow1 = _im2col_nhwc(x_nhwc, k1, st1)
    patches = patches.astype(bf16)                             # (Bp*196, k1*k1*C)
    n1 = oh1 * ow1

    # weight repacking (channels-last, tap-major) -- cheap, one-time under jit
    w1m = jnp.transpose(p["conv1_w"], (2, 3, 1, 0)).reshape(k1 * k1 * C, -1).astype(bf16)
    w2m = jnp.transpose(p["conv2_w"], (2, 3, 1, 0)).reshape(k2 * k2, 32, 64).astype(bf16)
    w3m = jnp.transpose(p["conv3_w"], (2, 3, 1, 0)).reshape(k3 * k3, 64, 64).astype(bf16)

    sc1, sh1 = _fold_bn(p["bn1_g"], p["bn1_b"], p["bn1_m"], p["bn1_v"], p["conv1_b"])
    sc2, sh2 = _fold_bn(p["bn2_g"], p["bn2_b"], p["bn2_m"], p["bn2_v"], p["conv2_b"])
    sc3, sh3 = _fold_bn(p["bn3_g"], p["bn3_b"], p["bn3_m"], p["bn3_v"], p["conv3_b"])

    # in-kernel "im2col" selection matrices for conv2 / conv3 (exact 0/1 in bf16)
    S2_np, oh2, ow2 = _selection(TB, oh1, ow1, k2, st2, spatial_major_out=False)
    S3_np, oh3, ow3 = _selection(TB, oh2, ow2, k3, st3, spatial_major_out=True)
    n2, n3 = oh2 * ow2, oh3 * ow3
    S2 = jnp.asarray(S2_np, bf16)
    S3 = jnp.asarray(S3_np, bf16)

    nh = p["fc1_w"].shape[0]
    nout = p["fc2_w"].shape[0]
    assert p["fc1_w"].shape[1] == 64 * n3, "input spatial size inconsistent with classifier"
    # fc1 columns are PyTorch NCHW-flatten order (c*n3 + spatial); regroup as (spatial, c, out)
    wf1 = jnp.transpose(p["fc1_w"].reshape(nh, 64, n3), (2, 1, 0)).astype(bf16)
    bf1 = p["fc1_b"].reshape(1, nh).astype(jnp.float32)
    wf2 = jnp.transpose(p["fc2_w"]).astype(bf16)               # (nh, nout)
    bf2 = p["fc2_b"].reshape(1, nout).astype(jnp.float32)

    kernel = functools.partial(_dqn_fused_kernel, tb=TB, n2=n2, n3=n3)

    in_arrays = [patches, w1m, sc1, sh1, S2, w2m, sc2, sh2,
                 S3, w3m, sc3, sh3, wf1, bf1, wf2, bf2]
    in_specs = [pl.BlockSpec((TB * n1, patches.shape[1]), lambda i: (i, 0))] + \
               [_full_spec(a.shape) for a in in_arrays[1:]]

    out = pl.pallas_call(
        kernel,
        out_shape=jax.ShapeDtypeStruct((nb, TB, nout), jnp.float32),
        grid=(nb,),
        in_specs=in_specs,
        out_specs=pl.BlockSpec((1, TB, nout), lambda i: (i, 0, 0)),
        compiler_params=pltpu.CompilerParams(dimension_semantics=("parallel",)),
    )(*in_arrays)

    return out.reshape(Bp, nout)[:B]


# ---------------------------------------------------------------------------
# Deterministic parameter init (matches nn.Module shapes)
# ---------------------------------------------------------------------------
def init_params(key, input_size, output_size):
    ks = jax.random.split(key, 20)
    n = lambda k, s, sc=0.05: sc * jax.random.normal(k, s, jnp.float32)
    return {
        "conv1_w": n(ks[0], (32, input_size, 8, 8)),
        "conv1_b": n(ks[1], (32,)),
        "bn1_g": 1.0 + 0.1 * jax.random.normal(ks[2], (32,), jnp.float32),
        "bn1_b": n(ks[3], (32,)),
        "bn1_m": 0.1 * jax.random.normal(ks[4], (32,), jnp.float32),
        "bn1_v": 1.0 + 0.1 * jnp.abs(jax.random.normal(ks[5], (32,), jnp.float32)),
        "conv2_w": n(ks[6], (64, 32, 4, 4)),
        "conv2_b": n(ks[7], (64,)),
        "bn2_g": 1.0 + 0.1 * jax.random.normal(ks[8], (64,), jnp.float32),
        "bn2_b": n(ks[9], (64,)),
        "bn2_m": 0.1 * jax.random.normal(ks[10], (64,), jnp.float32),
        "bn2_v": 1.0 + 0.1 * jnp.abs(jax.random.normal(ks[11], (64,), jnp.float32)),
        "conv3_w": n(ks[12], (64, 64, 3, 3)),
        "conv3_b": n(ks[13], (64,)),
        "bn3_g": 1.0 + 0.1 * jax.random.normal(ks[14], (64,), jnp.float32),
        "bn3_b": n(ks[15], (64,)),
        "bn3_m": 0.1 * jax.random.normal(ks[16], (64,), jnp.float32),
        "bn3_v": 1.0 + 0.1 * jnp.abs(jax.random.normal(ks[17], (64,), jnp.float32)),
        "fc1_w": n(ks[18], (512, 64 * 4 * 4)),
        "fc1_b": jnp.zeros((512,), jnp.float32),
        "fc2_w": n(ks[19], (output_size, 512)),
        "fc2_b": jnp.zeros((output_size,), jnp.float32),
    }


# ---------------------------------------------------------------------------
# Pure-JAX f32 reference (correctness sanity check)
# ---------------------------------------------------------------------------
def reference_forward(x, p, eps=1e-5):
    def bn(y, g, b, m, v):
        return g[None, :, None, None] * (y - m[None, :, None, None]) / \
            jnp.sqrt(v[None, :, None, None] + eps) + b[None, :, None, None]

    def conv(y, w, b, s):
        out = lax.conv_general_dilated(
            y, w, (s, s), "VALID",
            dimension_numbers=("NCHW", "OIHW", "NCHW"),
            precision=lax.Precision.HIGHEST)
        return out + b[None, :, None, None]

    y = jax.nn.relu(bn(conv(x, p["conv1_w"], p["conv1_b"], 4),
                       p["bn1_g"], p["bn1_b"], p["bn1_m"], p["bn1_v"]))
    y = jax.nn.relu(bn(conv(y, p["conv2_w"], p["conv2_b"], 2),
                       p["bn2_g"], p["bn2_b"], p["bn2_m"], p["bn2_v"]))
    y = jax.nn.relu(bn(conv(y, p["conv3_w"], p["conv3_b"], 1),
                       p["bn3_g"], p["bn3_b"], p["bn3_m"], p["bn3_v"]))
    y = y.reshape(y.shape[0], -1)
    y = jax.nn.relu(jnp.dot(y, p["fc1_w"].T, precision=lax.Precision.HIGHEST) + p["fc1_b"])
    y = jnp.dot(y, p["fc2_w"].T, precision=lax.Precision.HIGHEST) + p["fc2_b"]
    return y


if __name__ == "__main__":
    key = jax.random.PRNGKey(0)
    kx, kp = jax.random.split(key)

    input_size, output_size = 4, 6   # 4 stacked frames, 6 actions
    B = 2
    # 60x60 input so the conv stack yields the 64*4*4 features the classifier expects.
    x = jax.random.normal(kx, (B, input_size, 60, 60), jnp.float32)
    params = init_params(kp, input_size, output_size)

    out = jax.block_until_ready(dqn_forward(x, params))
    assert out.shape == (B, output_size), out.shape

    ref = jax.block_until_ready(reference_forward(x, params))
    # bf16-MXU kernel vs f32 reference -> loosened tolerance (precision trade, not a bug).
    max_err = float(jnp.max(jnp.abs(out - ref)))
    assert jnp.allclose(out, ref, rtol=5e-2, atol=5e-2), f"max_err={max_err}"

    print("KERNEL_OK")
</pallas_src>

<mosaic_0001>
module attributes {stable_mosaic.version = 11 : i64} {
  func.func @_dqn_fused_kernel(%arg0: i32, %arg1: memref<392x256xbf16, #tpu.memory_space<vmem>>, %arg2: memref<256x32xbf16, #tpu.memory_space<vmem>>, %arg3: memref<1x32xf32, #tpu.memory_space<vmem>>, %arg4: memref<1x32xf32, #tpu.memory_space<vmem>>, %arg5: memref<16x72x392xbf16, #tpu.memory_space<vmem>>, %arg6: memref<16x32x64xbf16, #tpu.memory_space<vmem>>, %arg7: memref<1x64xf32, #tpu.memory_space<vmem>>, %arg8: memref<1x64xf32, #tpu.memory_space<vmem>>, %arg9: memref<9x32x72xbf16, #tpu.memory_space<vmem>>, %arg10: memref<9x64x64xbf16, #tpu.memory_space<vmem>>, %arg11: memref<1x64xf32, #tpu.memory_space<vmem>>, %arg12: memref<1x64xf32, #tpu.memory_space<vmem>>, %arg13: memref<16x64x512xbf16, #tpu.memory_space<vmem>>, %arg14: memref<1x512xf32, #tpu.memory_space<vmem>>, %arg15: memref<512x6xbf16, #tpu.memory_space<vmem>>, %arg16: memref<1x6xf32, #tpu.memory_space<vmem>>, %arg17: memref<1x2x6xf32, #tpu.memory_space<vmem>>) attributes {dimension_semantics = [#tpu.dimension_semantics<parallel>], iteration_bounds = array<i64: 1>, scalar_prefetch = 0 : i64, scratch_operands = 0 : i64, tpu.core_type = #tpu.core_type<tc>, window_params = [{transform_indices = @transform_0, window_bounds = array<i64: 392, 256>}, {pipeline_mode = #tpu.pipeline_mode<synchronous>, transform_indices = @transform_1, window_bounds = array<i64: 256, 32>}, {pipeline_mode = #tpu.pipeline_mode<synchronous>, transform_indices = @transform_2, window_bounds = array<i64: 1, 32>}, {pipeline_mode = #tpu.pipeline_mode<synchronous>, transform_indices = @transform_3, window_bounds = array<i64: 1, 32>}, {pipeline_mode = #tpu.pipeline_mode<synchronous>, transform_indices = @transform_4, window_bounds = array<i64: 16, 72, 392>}, {pipeline_mode = #tpu.pipeline_mode<synchronous>, transform_indices = @transform_5, window_bounds = array<i64: 16, 32, 64>}, {pipeline_mode = #tpu.pipeline_mode<synchronous>, transform_indices = @transform_6, window_bounds = array<i64: 1, 64>}, {pipeline_mode = #tpu.pipeline_mode<synchronous>, transform_indices = @transform_7, window_bounds = array<i64: 1, 64>}, {pipeline_mode = #tpu.pipeline_mode<synchronous>, transform_indices = @transform_8, window_bounds = array<i64: 9, 32, 72>}, {pipeline_mode = #tpu.pipeline_mode<synchronous>, transform_indices = @transform_9, window_bounds = array<i64: 9, 64, 64>}, {pipeline_mode = #tpu.pipeline_mode<synchronous>, transform_indices = @transform_10, window_bounds = array<i64: 1, 64>}, {pipeline_mode = #tpu.pipeline_mode<synchronous>, transform_indices = @transform_11, window_bounds = array<i64: 1, 64>}, {pipeline_mode = #tpu.pipeline_mode<synchronous>, transform_indices = @transform_12, window_bounds = array<i64: 16, 64, 512>}, {pipeline_mode = #tpu.pipeline_mode<synchronous>, transform_indices = @transform_13, window_bounds = array<i64: 1, 512>}, {pipeline_mode = #tpu.pipeline_mode<synchronous>, transform_indices = @transform_14, window_bounds = array<i64: 512, 6>}, {pipeline_mode = #tpu.pipeline_mode<synchronous>, transform_indices = @transform_15, window_bounds = array<i64: 1, 6>}, {transform_indices = @transform_16, window_bounds = array<i64: 1, 2, 6>}]} {
    %c0 = arith.constant 0 : index
    %c0_0 = arith.constant 0 : index
    %0 = vector.load %arg1[%c0, %c0_0] : memref<392x256xbf16, #tpu.memory_space<vmem>>, vector<392x256xbf16>
    %c0_1 = arith.constant 0 : index
    %c0_2 = arith.constant 0 : index
    %1 = vector.load %arg2[%c0_1, %c0_2] : memref<256x32xbf16, #tpu.memory_space<vmem>>, vector<256x32xbf16>
    %cst = arith.constant dense<0.000000e+00> : vector<392x32xf32>
    %2 = tpu.matmul %0, %1, %cst {dimension_numbers = #tpu.dot_dimension_numbers<[1], [0], [0], [1], [0, 0, 1, 1], [], []>} : vector<392x256xbf16>, vector<256x32xbf16>, vector<392x32xf32> -> vector<392x32xf32>
    %c0_3 = arith.constant 0 : index
    %c0_4 = arith.constant 0 : index
    %3 = vector.load %arg3[%c0_3, %c0_4] : memref<1x32xf32, #tpu.memory_space<vmem>>, vector<1x32xf32>
    %4 = vector.broadcast %3 : vector<1x32xf32> to vector<392x32xf32>
    %5 = arith.mulf %2, %4 : vector<392x32xf32>
    %c0_5 = arith.constant 0 : index
    %c0_6 = arith.constant 0 : index
    %6 = vector.load %arg4[%c0_5, %c0_6] : memref<1x32xf32, #tpu.memory_space<vmem>>, vector<1x32xf32>
    %7 = vector.broadcast %6 : vector<1x32xf32> to vector<392x32xf32>
    %8 = arith.addf %5, %7 : vector<392x32xf32>
    %cst_7 = arith.constant 0.000000e+00 : f32
    %9 = vector.broadcast %cst_7 : f32 to vector<392x32xf32>
    %10 = arith.maximumf %8, %9 : vector<392x32xf32>
    %11 = arith.truncf %10 : vector<392x32xf32> to vector<392x32xbf16>
    %cst_8 = arith.constant 0.000000e+00 : f32
    %12 = vector.broadcast %cst_8 : f32 to vector<72x64xf32>
    %c0_9 = arith.constant 0 : index
    %c0_10 = arith.constant 0 : index
    %c0_11 = arith.constant 0 : index
    %13 = vector.load %arg5[%c0_9, %c0_10, %c0_11] : memref<16x72x392xbf16, #tpu.memory_space<vmem>>, vector<1x72x392xbf16>
    %14 = vector.shape_cast %13 : vector<1x72x392xbf16> to vector<72x392xbf16>
    %cst_12 = arith.constant dense<0.000000e+00> : vector<72x32xf32>
    %15 = tpu.matmul %14, %11, %cst_12 {dimension_numbers = #tpu.dot_dimension_numbers<[1], [0], [0], [1], [0, 0, 1, 1], [], []>} : vector<72x392xbf16>, vector<392x32xbf16>, vector<72x32xf32> -> vector<72x32xf32>
    %16 = arith.truncf %15 : vector<72x32xf32> to vector<72x32xbf16>
    %c0_13 = arith.constant 0 : index
    %c0_14 = arith.constant 0 : index
    %c0_15 = arith.constant 0 : index
    %17 = vector.load %arg6[%c0_13, %c0_14, %c0_15] : memref<16x32x64xbf16, #tpu.memory_space<vmem>>, vector<1x32x64xbf16>
    %18 = vector.shape_cast %17 : vector<1x32x64xbf16> to vector<32x64xbf16>
    %cst_16 = arith.constant dense<0.000000e+00> : vector<72x64xf32>
    %19 = tpu.matmul %16, %18, %cst_16 {dimension_numbers = #tpu.dot_dimension_numbers<[1], [0], [0], [1], [0, 0, 1, 1], [], []>} : vector<72x32xbf16>, vector<32x64xbf16>, vector<72x64xf32> -> vector<72x64xf32>
    %20 = arith.addf %12, %19 : vector<72x64xf32>
    %c1 = arith.constant 1 : index
    %c0_17 = arith.constant 0 : index
    %c0_18 = arith.constant 0 : index
    %21 = vector.load %arg5[%c1, %c0_17, %c0_18] : memref<16x72x392xbf16, #tpu.memory_space<vmem>>, vector<1x72x392xbf16>
    %22 = vector.shape_cast %21 : vector<1x72x392xbf16> to vector<72x392xbf16>
    %cst_19 = arith.constant dense<0.000000e+00> : vector<72x32xf32>
    %23 = tpu.matmul %22, %11, %cst_19 {dimension_numbers = #tpu.dot_dimension_numbers<[1], [0], [0], [1], [0, 0, 1, 1], [], []>} : vector<72x392xbf16>, vector<392x32xbf16>, vector<72x32xf32> -> vector<72x32xf32>
    %24 = arith.truncf %23 : vector<72x32xf32> to vector<72x32xbf16>
    %c1_20 = arith.constant 1 : index
    %c0_21 = arith.constant 0 : index
    %c0_22 = arith.constant 0 : index
    %25 = vector.load %arg6[%c1_20, %c0_21, %c0_22] : memref<16x32x64xbf16, #tpu.memory_space<vmem>>, vector<1x32x64xbf16>
    %26 = vector.shape_cast %25 : vector<1x32x64xbf16> to vector<32x64xbf16>
    %cst_23 = arith.constant dense<0.000000e+00> : vector<72x64xf32>
    %27 = tpu.matmul %24, %26, %cst_23 {dimension_numbers = #tpu.dot_dimension_numbers<[1], [0], [0], [1], [0, 0, 1, 1], [], []>} : vector<72x32xbf16>, vector<32x64xbf16>, vector<72x64xf32> -> vector<72x64xf32>
    %28 = arith.addf %20, %27 : vector<72x64xf32>
    %c2 = arith.constant 2 : index
    %c0_24 = arith.constant 0 : index
    %c0_25 = arith.constant 0 : index
    %29 = vector.load %arg5[%c2, %c0_24, %c0_25] : memref<16x72x392xbf16, #tpu.memory_space<vmem>>, vector<1x72x392xbf16>
    %30 = vector.shape_cast %29 : vector<1x72x392xbf16> to vector<72x392xbf16>
    %cst_26 = arith.constant dense<0.000000e+00> : vector<72x32xf32>
    %31 = tpu.matmul %30, %11, %cst_26 {dimension_numbers = #tpu.dot_dimension_numbers<[1], [0], [0], [1], [0, 0, 1, 1], [], []>} : vector<72x392xbf16>, vector<392x32xbf16>, vector<72x32xf32> -> vector<72x32xf32>
    %32 = arith.truncf %31 : vector<72x32xf32> to vector<72x32xbf16>
    %c2_27 = arith.constant 2 : index
    %c0_28 = arith.constant 0 : index
    %c0_29 = arith.constant 0 : index
    %33 = vector.load %arg6[%c2_27, %c0_28, %c0_29] : memref<16x32x64xbf16, #tpu.memory_space<vmem>>, vector<1x32x64xbf16>
    %34 = vector.shape_cast %33 : vector<1x32x64xbf16> to vector<32x64xbf16>
    %cst_30 = arith.constant dense<0.000000e+00> : vector<72x64xf32>
    %35 = tpu.matmul %32, %34, %cst_30 {dimension_numbers = #tpu.dot_dimension_numbers<[1], [0], [0], [1], [0, 0, 1, 1], [], []>} : vector<72x32xbf16>, vector<32x64xbf16>, vector<72x64xf32> -> vector<72x64xf32>
    %36 = arith.addf %28, %35 : vector<72x64xf32>
    %c3 = arith.constant 3 : index
    %c0_31 = arith.constant 0 : index
    %c0_32 = arith.constant 0 : index
    %37 = vector.load %arg5[%c3, %c0_31, %c0_32] : memref<16x72x392xbf16, #tpu.memory_space<vmem>>, vector<1x72x392xbf16>
    %38 = vector.shape_cast %37 : vector<1x72x392xbf16> to vector<72x392xbf16>
    %cst_33 = arith.constant dense<0.000000e+00> : vector<72x32xf32>
    %39 = tpu.matmul %38, %11, %cst_33 {dimension_numbers = #tpu.dot_dimension_numbers<[1], [0], [0], [1], [0, 0, 1, 1], [], []>} : vector<72x392xbf16>, vector<392x32xbf16>, vector<72x32xf32> -> vector<72x32xf32>
    %40 = arith.truncf %39 : vector<72x32xf32> to vector<72x32xbf16>
    %c3_34 = arith.constant 3 : index
    %c0_35 = arith.constant 0 : index
    %c0_36 = arith.constant 0 : index
    %41 = vector.load %arg6[%c3_34, %c0_35, %c0_36] : memref<16x32x64xbf16, #tpu.memory_space<vmem>>, vector<1x32x64xbf16>
    %42 = vector.shape_cast %41 : vector<1x32x64xbf16> to vector<32x64xbf16>
    %cst_37 = arith.constant dense<0.000000e+00> : vector<72x64xf32>
    %43 = tpu.matmul %40, %42, %cst_37 {dimension_numbers = #tpu.dot_dimension_numbers<[1], [0], [0], [1], [0, 0, 1, 1], [], []>} : vector<72x32xbf16>, vector<32x64xbf16>, vector<72x64xf32> -> vector<72x64xf32>
    %44 = arith.addf %36, %43 : vector<72x64xf32>
    %c4 = arith.constant 4 : index
    %c0_38 = arith.constant 0 : index
    %c0_39 = arith.constant 0 : index
    %45 = vector.load %arg5[%c4, %c0_38, %c0_39] : memref<16x72x392xbf16, #tpu.memory_space<vmem>>, vector<1x72x392xbf16>
    %46 = vector.shape_cast %45 : vector<1x72x392xbf16> to vector<72x392xbf16>
    %cst_40 = arith.constant dense<0.000000e+00> : vector<72x32xf32>
    %47 = tpu.matmul %46, %11, %cst_40 {dimension_numbers = #tpu.dot_dimension_numbers<[1], [0], [0], [1], [0, 0, 1, 1], [], []>} : vector<72x392xbf16>, vector<392x32xbf16>, vector<72x32xf32> -> vector<72x32xf32>
    %48 = arith.truncf %47 : vector<72x32xf32> to vector<72x32xbf16>
    %c4_41 = arith.constant 4 : index
    %c0_42 = arith.constant 0 : index
    %c0_43 = arith.constant 0 : index
    %49 = vector.load %arg6[%c4_41, %c0_42, %c0_43] : memref<16x32x64xbf16, #tpu.memory_space<vmem>>, vector<1x32x64xbf16>
    %50 = vector.shape_cast %49 : vector<1x32x64xbf16> to vector<32x64xbf16>
    %cst_44 = arith.constant dense<0.000000e+00> : vector<72x64xf32>
    %51 = tpu.matmul %48, %50, %cst_44 {dimension_numbers = #tpu.dot_dimension_numbers<[1], [0], [0], [1], [0, 0, 1, 1], [], []>} : vector<72x32xbf16>, vector<32x64xbf16>, vector<72x64xf32> -> vector<72x64xf32>
    %52 = arith.addf %44, %51 : vector<72x64xf32>
    %c5 = arith.constant 5 : index
    %c0_45 = arith.constant 0 : index
    %c0_46 = arith.constant 0 : index
    %53 = vector.load %arg5[%c5, %c0_45, %c0_46] : memref<16x72x392xbf16, #tpu.memory_space<vmem>>, vector<1x72x392xbf16>
    %54 = vector.shape_cast %53 : vector<1x72x392xbf16> to vector<72x392xbf16>
    %cst_47 = arith.constant dense<0.000000e+00> : vector<72x32xf32>
    %55 = tpu.matmul %54, %11, %cst_47 {dimension_numbers = #tpu.dot_dimension_numbers<[1], [0], [0], [1], [0, 0, 1, 1], [], []>} : vector<72x392xbf16>, vector<392x32xbf16>, vector<72x32xf32> -> vector<72x32xf32>
    %56 = arith.truncf %55 : vector<72x32xf32> to vector<72x32xbf16>
    %c5_48 = arith.constant 5 : index
    %c0_49 = arith.constant 0 : index
    %c0_50 = arith.constant 0 : index
    %57 = vector.load %arg6[%c5_48, %c0_49, %c0_50] : memref<16x32x64xbf16, #tpu.memory_space<vmem>>, vector<1x32x64xbf16>
    %58 = vector.shape_cast %57 : vector<1x32x64xbf16> to vector<32x64xbf16>
    %cst_51 = arith.constant dense<0.000000e+00> : vector<72x64xf32>
    %59 = tpu.matmul %56, %58, %cst_51 {dimension_numbers = #tpu.dot_dimension_numbers<[1], [0], [0], [1], [0, 0, 1, 1], [], []>} : vector<72x32xbf16>, vector<32x64xbf16>, vector<72x64xf32> -> vector<72x64xf32>
    %60 = arith.addf %52, %59 : vector<72x64xf32>
    %c6 = arith.constant 6 : index
    %c0_52 = arith.constant 0 : index
    %c0_53 = arith.constant 0 : index
    %61 = vector.load %arg5[%c6, %c0_52, %c0_53] : memref<16x72x392xbf16, #tpu.memory_space<vmem>>, vector<1x72x392xbf16>
    %62 = vector.shape_cast %61 : vector<1x72x392xbf16> to vector<72x392xbf16>
    %cst_54 = arith.constant dense<0.000000e+00> : vector<72x32xf32>
    %63 = tpu.matmul %62, %11, %cst_54 {dimension_numbers = #tpu.dot_dimension_numbers<[1], [0], [0], [1], [0, 0, 1, 1], [], []>} : vector<72x392xbf16>, vector<392x32xbf16>, vector<72x32xf32> -> vector<72x32xf32>
    %64 = arith.truncf %63 : vector<72x32xf32> to vector<72x32xbf16>
    %c6_55 = arith.constant 6 : index
    %c0_56 = arith.constant 0 : index
    %c0_57 = arith.constant 0 : index
    %65 = vector.load %arg6[%c6_55, %c0_56, %c0_57] : memref<16x32x64xbf16, #tpu.memory_space<vmem>>, vector<1x32x64xbf16>
    %66 = vector.shape_cast %65 : vector<1x32x64xbf16> to vector<32x64xbf16>
    %cst_58 = arith.constant dense<0.000000e+00> : vector<72x64xf32>
    %67 = tpu.matmul %64, %66, %cst_58 {dimension_numbers = #tpu.dot_dimension_numbers<[1], [0], [0], [1], [0, 0, 1, 1], [], []>} : vector<72x32xbf16>, vector<32x64xbf16>, vector<72x64xf32> -> vector<72x64xf32>
    %68 = arith.addf %60, %67 : vector<72x64xf32>
    %c7 = arith.constant 7 : index
    %c0_59 = arith.constant 0 : index
    %c0_60 = arith.constant 0 : index
    %69 = vector.load %arg5[%c7, %c0_59, %c0_60] : memref<16x72x392xbf16, #tpu.memory_space<vmem>>, vector<1x72x392xbf16>
    %70 = vector.shape_cast %69 : vector<1x72x392xbf16> to vector<72x392xbf16>
    %cst_61 = arith.constant dense<0.000000e+00> : vector<72x32xf32>
    %71 = tpu.matmul %70, %11, %cst_61 {dimension_numbers = #tpu.dot_dimension_numbers<[1], [0], [0], [1], [0, 0, 1, 1], [], []>} : vector<72x392xbf16>, vector<392x32xbf16>, vector<72x32xf32> -> vector<72x32xf32>
    %72 = arith.truncf %71 : vector<72x32xf32> to vector<72x32xbf16>
    %c7_62 = arith.constant 7 : index
    %c0_63 = arith.constant 0 : index
    %c0_64 = arith.constant 0 : index
    %73 = vector.load %arg6[%c7_62, %c0_63, %c0_64] : memref<16x32x64xbf16, #tpu.memory_space<vmem>>, vector<1x32x64xbf16>
    %74 = vector.shape_cast %73 : vector<1x32x64xbf16> to vector<32x64xbf16>
    %cst_65 = arith.constant dense<0.000000e+00> : vector<72x64xf32>
    %75 = tpu.matmul %72, %74, %cst_65 {dimension_numbers = #tpu.dot_dimension_numbers<[1], [0], [0], [1], [0, 0, 1, 1], [], []>} : vector<72x32xbf16>, vector<32x64xbf16>, vector<72x64xf32> -> vector<72x64xf32>
    %76 = arith.addf %68, %75 : vector<72x64xf32>
    %c8 = arith.constant 8 : index
    %c0_66 = arith.constant 0 : index
    %c0_67 = arith.constant 0 : index
    %77 = vector.load %arg5[%c8, %c0_66, %c0_67] : memref<16x72x392xbf16, #tpu.memory_space<vmem>>, vector<1x72x392xbf16>
    %78 = vector.shape_cast %77 : vector<1x72x392xbf16> to vector<72x392xbf16>
    %cst_68 = arith.constant dense<0.000000e+00> : vector<72x32xf32>
    %79 = tpu.matmul %78, %11, %cst_68 {dimension_numbers = #tpu.dot_dimension_numbers<[1], [0], [0], [1], [0, 0, 1, 1], [], []>} : vector<72x392xbf16>, vector<392x32xbf16>, vector<72x32xf32> -> vector<72x32xf32>
    %80 = arith.truncf %79 : vector<72x32xf32> to vector<72x32xbf16>
    %c8_69 = arith.constant 8 : index
    %c0_70 = arith.constant 0 : index
    %c0_71 = arith.constant 0 : index
    %81 = vector.load %arg6[%c8_69, %c0_70, %c0_71] : memref<16x32x64xbf16, #tpu.memory_space<vmem>>, vector<1x32x64xbf16>
    %82 = vector.shape_cast %81 : vector<1x32x64xbf16> to vector<32x64xbf16>
    %cst_72 = arith.constant dense<0.000000e+00> : vector<72x64xf32>
    %83 = tpu.matmul %80, %82, %cst_72 {dimension_numbers = #tpu.dot_dimension_numbers<[1], [0], [0], [1], [0, 0, 1, 1], [], []>} : vector<72x32xbf16>, vector<32x64xbf16>, vector<72x64xf32> -> vector<72x64xf32>
    %84 = arith.addf %76, %83 : vector<72x64xf32>
    %c9 = arith.constant 9 : index
    %c0_73 = arith.constant 0 : index
    %c0_74 = arith.constant 0 : index
    %85 = vector.load %arg5[%c9, %c0_73, %c0_74] : memref<16x72x392xbf16, #tpu.memory_space<vmem>>, vector<1x72x392xbf16>
    %86 = vector.shape_cast %85 : vector<1x72x392xbf16> to vector<72x392xbf16>
    %cst_75 = arith.constant dense<0.000000e+00> : vector<72x32xf32>
    %87 = tpu.matmul %86, %11, %cst_75 {dimension_numbers = #tpu.dot_dimension_numbers<[1], [0], [0], [1], [0, 0, 1, 1], [], []>} : vector<72x392xbf16>, vector<392x32xbf16>, vector<72x32xf32> -> vector<72x32xf32>
    %88 = arith.truncf %87 : vector<72x32xf32> to vector<72x32xbf16>
    %c9_76 = arith.constant 9 : index
    %c0_77 = arith.constant 0 : index
    %c0_78 = arith.constant 0 : index
    %89 = vector.load %arg6[%c9_76, %c0_77, %c0_78] : memref<16x32x64xbf16, #tpu.memory_space<vmem>>, vector<1x32x64xbf16>
    %90 = vector.shape_cast %89 : vector<1x32x64xbf16> to vector<32x64xbf16>
    %cst_79 = arith.constant dense<0.000000e+00> : vector<72x64xf32>
    %91 = tpu.matmul %88, %90, %cst_79 {dimension_numbers = #tpu.dot_dimension_numbers<[1], [0], [0], [1], [0, 0, 1, 1], [], []>} : vector<72x32xbf16>, vector<32x64xbf16>, vector<72x64xf32> -> vector<72x64xf32>
    %92 = arith.addf %84, %91 : vector<72x64xf32>
    %c10 = arith.constant 10 : index
    %c0_80 = arith.constant 0 : index
    %c0_81 = arith.constant 0 : index
    %93 = vector.load %arg5[%c10, %c0_80, %c0_81] : memref<16x72x392xbf16, #tpu.memory_space<vmem>>, vector<1x72x392xbf16>
    %94 = vector.shape_cast %93 : vector<1x72x392xbf16> to vector<72x392xbf16>
    %cst_82 = arith.constant dense<0.000000e+00> : vector<72x32xf32>
    %95 = tpu.matmul %94, %11, %cst_82 {dimension_numbers = #tpu.dot_dimension_numbers<[1], [0], [0], [1], [0, 0, 1, 1], [], []>} : vector<72x392xbf16>, vector<392x32xbf16>, vector<72x32xf32> -> vector<72x32xf32>
    %96 = arith.truncf %95 : vector<72x32xf32> to vector<72x32xbf16>
    %c10_83 = arith.constant 10 : index
    %c0_84 = arith.constant 0 : index
    %c0_85 = arith.constant 0 : index
    %97 = vector.load %arg6[%c10_83, %c0_84, %c0_85] : memref<16x32x64xbf16, #tpu.memory_space<vmem>>, vector<1x32x64xbf16>
    %98 = vector.shape_cast %97 : vector<1x32x64xbf16> to vector<32x64xbf16>
    %cst_86 = arith.constant dense<0.000000e+00> : vector<72x64xf32>
    %99 = tpu.matmul %96, %98, %cst_86 {dimension_numbers = #tpu.dot_dimension_numbers<[1], [0], [0], [1], [0, 0, 1, 1], [], []>} : vector<72x32xbf16>, vector<32x64xbf16>, vector<72x64xf32> -> vector<72x64xf32>
    %100 = arith.addf %92, %99 : vector<72x64xf32>
    %c11 = arith.constant 11 : index
    %c0_87 = arith.constant 0 : index
    %c0_88 = arith.constant 0 : index
    %101 = vector.load %arg5[%c11, %c0_87, %c0_88] : memref<16x72x392xbf16, #tpu.memory_space<vmem>>, vector<1x72x392xbf16>
    %102 = vector.shape_cast %101 : vector<1x72x392xbf16> to vector<72x392xbf16>
    %cst_89 = arith.constant dense<0.000000e+00> : vector<72x32xf32>
    %103 = tpu.matmul %102, %11, %cst_89 {dimension_numbers = #tpu.dot_dimension_numbers<[1], [0], [0], [1], [0, 0, 1, 1], [], []>} : vector<72x392xbf16>, vector<392x32xbf16>, vector<72x32xf32> -> vector<72x32xf32>
    %104 = arith.truncf %103 : vector<72x32xf32> to vector<72x32xbf16>
    %c11_90 = arith.constant 11 : index
    %c0_91 = arith.constant 0 : index
    %c0_92 = arith.constant 0 : index
    %105 = vector.load %arg6[%c11_90, %c0_91, %c0_92] : memref<16x32x64xbf16, #tpu.memory_space<vmem>>, vector<1x32x64xbf16>
    %106 = vector.shape_cast %105 : vector<1x32x64xbf16> to vector<32x64xbf16>
    %cst_93 = arith.constant dense<0.000000e+00> : vector<72x64xf32>
    %107 = tpu.matmul %104, %106, %cst_93 {dimension_numbers = #tpu.dot_dimension_numbers<[1], [0], [0], [1], [0, 0, 1, 1], [], []>} : vector<72x32xbf16>, vector<32x64xbf16>, vector<72x64xf32> -> vector<72x64xf32>
    %108 = arith.addf %100, %107 : vector<72x64xf32>
    %c12 = arith.constant 12 : index
    %c0_94 = arith.constant 0 : index
    %c0_95 = arith.constant 0 : index
    %109 = vector.load %arg5[%c12, %c0_94, %c0_95] : memref<16x72x392xbf16, #tpu.memory_space<vmem>>, vector<1x72x392xbf16>
    %110 = vector.shape_cast %109 : vector<1x72x392xbf16> to vector<72x392xbf16>
    %cst_96 = arith.constant dense<0.000000e+00> : vector<72x32xf32>
    %111 = tpu.matmul %110, %11, %cst_96 {dimension_numbers = #tpu.dot_dimension_numbers<[1], [0], [0], [1], [0, 0, 1, 1], [], []>} : vector<72x392xbf16>, vector<392x32xbf16>, vector<72x32xf32> -> vector<72x32xf32>
    %112 = arith.truncf %111 : vector<72x32xf32> to vector<72x32xbf16>
    %c12_97 = arith.constant 12 : index
    %c0_98 = arith.constant 0 : index
    %c0_99 = arith.constant 0 : index
    %113 = vector.load %arg6[%c12_97, %c0_98, %c0_99] : memref<16x32x64xbf16, #tpu.memory_space<vmem>>, vector<1x32x64xbf16>
    %114 = vector.shape_cast %113 : vector<1x32x64xbf16> to vector<32x64xbf16>
    %cst_100 = arith.constant dense<0.000000e+00> : vector<72x64xf32>
    %115 = tpu.matmul %112, %114, %cst_100 {dimension_numbers = #tpu.dot_dimension_numbers<[1], [0], [0], [1], [0, 0, 1, 1], [], []>} : vector<72x32xbf16>, vector<32x64xbf16>, vector<72x64xf32> -> vector<72x64xf32>
    %116 = arith.addf %108, %115 : vector<72x64xf32>
    %c13 = arith.constant 13 : index
    %c0_101 = arith.constant 0 : index
    %c0_102 = arith.constant 0 : index
    %117 = vector.load %arg5[%c13, %c0_101, %c0_102] : memref<16x72x392xbf16, #tpu.memory_space<vmem>>, vector<1x72x392xbf16>
    %118 = vector.shape_cast %117 : vector<1x72x392xbf16> to vector<72x392xbf16>
    %cst_103 = arith.constant dense<0.000000e+00> : vector<72x32xf32>
    %119 = tpu.matmul %118, %11, %cst_103 {dimension_numbers = #tpu.dot_dimension_numbers<[1], [0], [0], [1], [0, 0, 1, 1], [], []>} : vector<72x392xbf16>, vector<392x32xbf16>, vector<72x32xf32> -> vector<72x32xf32>
    %120 = arith.truncf %119 : vector<72x32xf32> to vector<72x32xbf16>
    %c13_104 = arith.constant 13 : index
    %c0_105 = arith.constant 0 : index
    %c0_106 = arith.constant 0 : index
    %121 = vector.load %arg6[%c13_104, %c0_105, %c0_106] : memref<16x32x64xbf16, #tpu.memory_space<vmem>>, vector<1x32x64xbf16>
    %122 = vector.shape_cast %121 : vector<1x32x64xbf16> to vector<32x64xbf16>
    %cst_107 = arith.constant dense<0.000000e+00> : vector<72x64xf32>
    %123 = tpu.matmul %120, %122, %cst_107 {dimension_numbers = #tpu.dot_dimension_numbers<[1], [0], [0], [1], [0, 0, 1, 1], [], []>} : vector<72x32xbf16>, vector<32x64xbf16>, vector<72x64xf32> -> vector<72x64xf32>
    %124 = arith.addf %116, %123 : vector<72x64xf32>
    %c14 = arith.constant 14 : index
    %c0_108 = arith.constant 0 : index
    %c0_109 = arith.constant 0 : index
    %125 = vector.load %arg5[%c14, %c0_108, %c0_109] : memref<16x72x392xbf16, #tpu.memory_space<vmem>>, vector<1x72x392xbf16>
    %126 = vector.shape_cast %125 : vector<1x72x392xbf16> to vector<72x392xbf16>
    %cst_110 = arith.constant dense<0.000000e+00> : vector<72x32xf32>
    %127 = tpu.matmul %126, %11, %cst_110 {dimension_numbers = #tpu.dot_dimension_numbers<[1], [0], [0], [1], [0, 0, 1, 1], [], []>} : vector<72x392xbf16>, vector<392x32xbf16>, vector<72x32xf32> -> vector<72x32xf32>
    %128 = arith.truncf %127 : vector<72x32xf32> to vector<72x32xbf16>
    %c14_111 = arith.constant 14 : index
    %c0_112 = arith.constant 0 : index
    %c0_113 = arith.constant 0 : index
    %129 = vector.load %arg6[%c14_111, %c0_112, %c0_113] : memref<16x32x64xbf16, #tpu.memory_space<vmem>>, vector<1x32x64xbf16>
    %130 = vector.shape_cast %129 : vector<1x32x64xbf16> to vector<32x64xbf16>
    %cst_114 = arith.constant dense<0.000000e+00> : vector<72x64xf32>
    %131 = tpu.matmul %128, %130, %cst_114 {dimension_numbers = #tpu.dot_dimension_numbers<[1], [0], [0], [1], [0, 0, 1, 1], [], []>} : vector<72x32xbf16>, vector<32x64xbf16>, vector<72x64xf32> -> vector<72x64xf32>
    %132 = arith.addf %124, %131 : vector<72x64xf32>
    %c15 = arith.constant 15 : index
    %c0_115 = arith.constant 0 : index
    %c0_116 = arith.constant 0 : index
    %133 = vector.load %arg5[%c15, %c0_115, %c0_116] : memref<16x72x392xbf16, #tpu.memory_space<vmem>>, vector<1x72x392xbf16>
    %134 = vector.shape_cast %133 : vector<1x72x392xbf16> to vector<72x392xbf16>
    %cst_117 = arith.constant dense<0.000000e+00> : vector<72x32xf32>
    %135 = tpu.matmul %134, %11, %cst_117 {dimension_numbers = #tpu.dot_dimension_numbers<[1], [0], [0], [1], [0, 0, 1, 1], [], []>} : vector<72x392xbf16>, vector<392x32xbf16>, vector<72x32xf32> -> vector<72x32xf32>
    %136 = arith.truncf %135 : vector<72x32xf32> to vector<72x32xbf16>
    %c15_118 = arith.constant 15 : index
    %c0_119 = arith.constant 0 : index
    %c0_120 = arith.constant 0 : index
    %137 = vector.load %arg6[%c15_118, %c0_119, %c0_120] : memref<16x32x64xbf16, #tpu.memory_space<vmem>>, vector<1x32x64xbf16>
    %138 = vector.shape_cast %137 : vector<1x32x64xbf16> to vector<32x64xbf16>
    %cst_121 = arith.constant dense<0.000000e+00> : vector<72x64xf32>
    %139 = tpu.matmul %136, %138, %cst_121 {dimension_numbers = #tpu.dot_dimension_numbers<[1], [0], [0], [1], [0, 0, 1, 1], [], []>} : vector<72x32xbf16>, vector<32x64xbf16>, vector<72x64xf32> -> vector<72x64xf32>
    %140 = arith.addf %132, %139 : vector<72x64xf32>
    %c0_122 = arith.constant 0 : index
    %c0_123 = arith.constant 0 : index
    %141 = vector.load %arg7[%c0_122, %c0_123] : memref<1x64xf32, #tpu.memory_space<vmem>>, vector<1x64xf32>
    %142 = vector.broadcast %141 : vector<1x64xf32> to vector<72x64xf32>
    %143 = arith.mulf %140, %142 : vector<72x64xf32>
    %c0_124 = arith.constant 0 : index
    %c0_125 = arith.constant 0 : index
    %144 = vector.load %arg8[%c0_124, %c0_125] : memref<1x64xf32, #tpu.memory_space<vmem>>, vector<1x64xf32>
    %145 = vector.broadcast %144 : vector<1x64xf32> to vector<72x64xf32>
    %146 = arith.addf %143, %145 : vector<72x64xf32>
    %cst_126 = arith.constant 0.000000e+00 : f32
    %147 = vector.broadcast %cst_126 : f32 to vector<72x64xf32>
    %148 = arith.maximumf %146, %147 : vector<72x64xf32>
    %149 = arith.truncf %148 : vector<72x64xf32> to vector<72x64xbf16>
    %cst_127 = arith.constant 0.000000e+00 : f32
    %150 = vector.broadcast %cst_127 : f32 to vector<32x64xf32>
    %c0_128 = arith.constant 0 : index
    %c0_129 = arith.constant 0 : index
    %c0_130 = arith.constant 0 : index
    %151 = vector.load %arg9[%c0_128, %c0_129, %c0_130] : memref<9x32x72xbf16, #tpu.memory_space<vmem>>, vector<1x32x72xbf16>
    %152 = vector.shape_cast %151 : vector<1x32x72xbf16> to vector<32x72xbf16>
    %cst_131 = arith.constant dense<0.000000e+00> : vector<32x64xf32>
    %153 = tpu.matmul %152, %149, %cst_131 {dimension_numbers = #tpu.dot_dimension_numbers<[1], [0], [0], [1], [0, 0, 1, 1], [], []>} : vector<32x72xbf16>, vector<72x64xbf16>, vector<32x64xf32> -> vector<32x64xf32>
    %154 = arith.truncf %153 : vector<32x64xf32> to vector<32x64xbf16>
    %c0_132 = arith.constant 0 : index
    %c0_133 = arith.constant 0 : index
    %c0_134 = arith.constant 0 : index
    %155 = vector.load %arg10[%c0_132, %c0_133, %c0_134] : memref<9x64x64xbf16, #tpu.memory_space<vmem>>, vector<1x64x64xbf16>
    %156 = vector.shape_cast %155 : vector<1x64x64xbf16> to vector<64x64xbf16>
    %cst_135 = arith.constant dense<0.000000e+00> : vector<32x64xf32>
    %157 = tpu.matmul %154, %156, %cst_135 {dimension_numbers = #tpu.dot_dimension_numbers<[1], [0], [0], [1], [0, 0, 1, 1], [], []>} : vector<32x64xbf16>, vector<64x64xbf16>, vector<32x64xf32> -> vector<32x64xf32>
    %158 = arith.addf %150, %157 : vector<32x64xf32>
    %c1_136 = arith.constant 1 : index
    %c0_137 = arith.constant 0 : index
    %c0_138 = arith.constant 0 : index
    %159 = vector.load %arg9[%c1_136, %c0_137, %c0_138] : memref<9x32x72xbf16, #tpu.memory_space<vmem>>, vector<1x32x72xbf16>
    %160 = vector.shape_cast %159 : vector<1x32x72xbf16> to vector<32x72xbf16>
    %cst_139 = arith.constant dense<0.000000e+00> : vector<32x64xf32>
    %161 = tpu.matmul %160, %149, %cst_139 {dimension_numbers = #tpu.dot_dimension_numbers<[1], [0], [0], [1], [0, 0, 1, 1], [], []>} : vector<32x72xbf16>, vector<72x64xbf16>, vector<32x64xf32> -> vector<32x64xf32>
    %162 = arith.truncf %161 : vector<32x64xf32> to vector<32x64xbf16>
    %c1_140 = arith.constant 1 : index
    %c0_141 = arith.constant 0 : index
    %c0_142 = arith.constant 0 : index
    %163 = vector.load %arg10[%c1_140, %c0_141, %c0_142] : memref<9x64x64xbf16, #tpu.memory_space<vmem>>, vector<1x64x64xbf16>
    %164 = vector.shape_cast %163 : vector<1x64x64xbf16> to vector<64x64xbf16>
    %cst_143 = arith.constant dense<0.000000e+00> : vector<32x64xf32>
    %165 = tpu.matmul %162, %164, %cst_143 {dimension_numbers = #tpu.dot_dimension_numbers<[1], [0], [0], [1], [0, 0, 1, 1], [], []>} : vector<32x64xbf16>, vector<64x64xbf16>, vector<32x64xf32> -> vector<32x64xf32>
    %166 = arith.addf %158, %165 : vector<32x64xf32>
    %c2_144 = arith.constant 2 : index
    %c0_145 = arith.constant 0 : index
    %c0_146 = arith.constant 0 : index
    %167 = vector.load %arg9[%c2_144, %c0_145, %c0_146] : memref<9x32x72xbf16, #tpu.memory_space<vmem>>, vector<1x32x72xbf16>
    %168 = vector.shape_cast %167 : vector<1x32x72xbf16> to vector<32x72xbf16>
    %cst_147 = arith.constant dense<0.000000e+00> : vector<32x64xf32>
    %169 = tpu.matmul %168, %149, %cst_147 {dimension_numbers = #tpu.dot_dimension_numbers<[1], [0], [0], [1], [0, 0, 1, 1], [], []>} : vector<32x72xbf16>, vector<72x64xbf16>, vector<32x64xf32> -> vector<32x64xf32>
    %170 = arith.truncf %169 : vector<32x64xf32> to vector<32x64xbf16>
    %c2_148 = arith.constant 2 : index
    %c0_149 = arith.constant 0 : index
    %c0_150 = arith.constant 0 : index
    %171 = vector.load %arg10[%c2_148, %c0_149, %c0_150] : memref<9x64x64xbf16, #tpu.memory_space<vmem>>, vector<1x64x64xbf16>
    %172 = vector.shape_cast %171 : vector<1x64x64xbf16> to vector<64x64xbf16>
    %cst_151 = arith.constant dense<0.000000e+00> : vector<32x64xf32>
    %173 = tpu.matmul %170, %172, %cst_151 {dimension_numbers = #tpu.dot_dimension_numbers<[1], [0], [0], [1], [0, 0, 1, 1], [], []>} : vector<32x64xbf16>, vector<64x64xbf16>, vector<32x64xf32> -> vector<32x64xf32>
    %174 = arith.addf %166, %173 : vector<32x64xf32>
    %c3_152 = arith.constant 3 : index
    %c0_153 = arith.constant 0 : index
    %c0_154 = arith.constant 0 : index
    %175 = vector.load %arg9[%c3_152, %c0_153, %c0_154] : memref<9x32x72xbf16, #tpu.memory_space<vmem>>, vector<1x32x72xbf16>
    %176 = vector.shape_cast %175 : vector<1x32x72xbf16> to vector<32x72xbf16>
    %cst_155 = arith.constant dense<0.000000e+00> : vector<32x64xf32>
    %177 = tpu.matmul %176, %149, %cst_155 {dimension_numbers = #tpu.dot_dimension_numbers<[1], [0], [0], [1], [0, 0, 1, 1], [], []>} : vector<32x72xbf16>, vector<72x64xbf16>, vector<32x64xf32> -> vector<32x64xf32>
    %178 = arith.truncf %177 : vector<32x64xf32> to vector<32x64xbf16>
    %c3_156 = arith.constant 3 : index
    %c0_157 = arith.constant 0 : index
    %c0_158 = arith.constant 0 : index
    %179 = vector.load %arg10[%c3_156, %c0_157, %c0_158] : memref<9x64x64xbf16, #tpu.memory_space<vmem>>, vector<1x64x64xbf16>
    %180 = vector.shape_cast %179 : vector<1x64x64xbf16> to vector<64x64xbf16>
    %cst_159 = arith.constant dense<0.000000e+00> : vector<32x64xf32>
    %181 = tpu.matmul %178, %180, %cst_159 {dimension_numbers = #tpu.dot_dimension_numbers<[1], [0], [0], [1], [0, 0, 1, 1], [], []>} : vector<32x64xbf16>, vector<64x64xbf16>, vector<32x64xf32> -> vector<32x64xf32>
    %182 = arith.addf %174, %181 : vector<32x64xf32>
    %c4_160 = arith.constant 4 : index
    %c0_161 = arith.constant 0 : index
    %c0_162 = arith.constant 0 : index
    %183 = vector.load %arg9[%c4_160, %c0_161, %c0_162] : memref<9x32x72xbf16, #tpu.memory_space<vmem>>, vector<1x32x72xbf16>
    %184 = vector.shape_cast %183 : vector<1x32x72xbf16> to vector<32x72xbf16>
    %cst_163 = arith.constant dense<0.000000e+00> : vector<32x64xf32>
    %185 = tpu.matmul %184, %149, %cst_163 {dimension_numbers = #tpu.dot_dimension_numbers<[1], [0], [0], [1], [0, 0, 1, 1], [], []>} : vector<32x72xbf16>, vector<72x64xbf16>, vector<32x64xf32> -> vector<32x64xf32>
    %186 = arith.truncf %185 : vector<32x64xf32> to vector<32x64xbf16>
    %c4_164 = arith.constant 4 : index
    %c0_165 = arith.constant 0 : index
    %c0_166 = arith.constant 0 : index
    %187 = vector.load %arg10[%c4_164, %c0_165, %c0_166] : memref<9x64x64xbf16, #tpu.memory_space<vmem>>, vector<1x64x64xbf16>
    %188 = vector.shape_cast %187 : vector<1x64x64xbf16> to vector<64x64xbf16>
    %cst_167 = arith.constant dense<0.000000e+00> : vector<32x64xf32>
    %189 = tpu.matmul %186, %188, %cst_167 {dimension_numbers = #tpu.dot_dimension_numbers<[1], [0], [0], [1], [0, 0, 1, 1], [], []>} : vector<32x64xbf16>, vector<64x64xbf16>, vector<32x64xf32> -> vector<32x64xf32>
    %190 = arith.addf %182, %189 : vector<32x64xf32>
    %c5_168 = arith.constant 5 : index
    %c0_169 = arith.constant 0 : index
    %c0_170 = arith.constant 0 : index
    %191 = vector.load %arg9[%c5_168, %c0_169, %c0_170] : memref<9x32x72xbf16, #tpu.memory_space<vmem>>, vector<1x32x72xbf16>
    %192 = vector.shape_cast %191 : vector<1x32x72xbf16> to vector<32x72xbf16>
    %cst_171 = arith.constant dense<0.000000e+00> : vector<32x64xf32>
    %193 = tpu.matmul %192, %149, %cst_171 {dimension_numbers = #tpu.dot_dimension_numbers<[1], [0], [0], [1], [0, 0, 1, 1], [], []>} : vector<32x72xbf16>, vector<72x64xbf16>, vector<32x64xf32> -> vector<32x64xf32>
    %194 = arith.truncf %193 : vector<32x64xf32> to vector<32x64xbf16>
    %c5_172 = arith.constant 5 : index
    %c0_173 = arith.constant 0 : index
    %c0_174 = arith.constant 0 : index
    %195 = vector.load %arg10[%c5_172, %c0_173, %c0_174] : memref<9x64x64xbf16, #tpu.memory_space<vmem>>, vector<1x64x64xbf16>
    %196 = vector.shape_cast %195 : vector<1x64x64xbf16> to vector<64x64xbf16>
    %cst_175 = arith.constant dense<0.000000e+00> : vector<32x64xf32>
    %197 = tpu.matmul %194, %196, %cst_175 {dimension_numbers = #tpu.dot_dimension_numbers<[1], [0], [0], [1], [0, 0, 1, 1], [], []>} : vector<32x64xbf16>, vector<64x64xbf16>, vector<32x64xf32> -> vector<32x64xf32>
    %198 = arith.addf %190, %197 : vector<32x64xf32>
    %c6_176 = arith.constant 6 : index
    %c0_177 = arith.constant 0 : index
    %c0_178 = arith.constant 0 : index
    %199 = vector.load %arg9[%c6_176, %c0_177, %c0_178] : memref<9x32x72xbf16, #tpu.memory_space<vmem>>, vector<1x32x72xbf16>
    %200 = vector.shape_cast %199 : vector<1x32x72xbf16> to vector<32x72xbf16>
    %cst_179 = arith.constant dense<0.000000e+00> : vector<32x64xf32>
    %201 = tpu.matmul %200, %149, %cst_179 {dimension_numbers = #tpu.dot_dimension_numbers<[1], [0], [0], [1], [0, 0, 1, 1], [], []>} : vector<32x72xbf16>, vector<72x64xbf16>, vector<32x64xf32> -> vector<32x64xf32>
    %202 = arith.truncf %201 : vector<32x64xf32> to vector<32x64xbf16>
    %c6_180 = arith.constant 6 : index
    %c0_181 = arith.constant 0 : index
    %c0_182 = arith.constant 0 : index
    %203 = vector.load %arg10[%c6_180, %c0_181, %c0_182] : memref<9x64x64xbf16, #tpu.memory_space<vmem>>, vector<1x64x64xbf16>
    %204 = vector.shape_cast %203 : vector<1x64x64xbf16> to vector<64x64xbf16>
    %cst_183 = arith.constant dense<0.000000e+00> : vector<32x64xf32>
    %205 = tpu.matmul %202, %204, %cst_183 {dimension_numbers = #tpu.dot_dimension_numbers<[1], [0], [0], [1], [0, 0, 1, 1], [], []>} : vector<32x64xbf16>, vector<64x64xbf16>, vector<32x64xf32> -> vector<32x64xf32>
    %206 = arith.addf %198, %205 : vector<32x64xf32>
    %c7_184 = arith.constant 7 : index
    %c0_185 = arith.constant 0 : index
    %c0_186 = arith.constant 0 : index
    %207 = vector.load %arg9[%c7_184, %c0_185, %c0_186] : memref<9x32x72xbf16, #tpu.memory_space<vmem>>, vector<1x32x72xbf16>
    %208 = vector.shape_cast %207 : vector<1x32x72xbf16> to vector<32x72xbf16>
    %cst_187 = arith.constant dense<0.000000e+00> : vector<32x64xf32>
    %209 = tpu.matmul %208, %149, %cst_187 {dimension_numbers = #tpu.dot_dimension_numbers<[1], [0], [0], [1], [0, 0, 1, 1], [], []>} : vector<32x72xbf16>, vector<72x64xbf16>, vector<32x64xf32> -> vector<32x64xf32>
    %210 = arith.truncf %209 : vector<32x64xf32> to vector<32x64xbf16>
    %c7_188 = arith.constant 7 : index
    %c0_189 = arith.constant 0 : index
    %c0_190 = arith.constant 0 : index
    %211 = vector.load %arg10[%c7_188, %c0_189, %c0_190] : memref<9x64x64xbf16, #tpu.memory_space<vmem>>, vector<1x64x64xbf16>
    %212 = vector.shape_cast %211 : vector<1x64x64xbf16> to vector<64x64xbf16>
    %cst_191 = arith.constant dense<0.000000e+00> : vector<32x64xf32>
    %213 = tpu.matmul %210, %212, %cst_191 {dimension_numbers = #tpu.dot_dimension_numbers<[1], [0], [0], [1], [0, 0, 1, 1], [], []>} : vector<32x64xbf16>, vector<64x64xbf16>, vector<32x64xf32> -> vector<32x64xf32>
    %214 = arith.addf %206, %213 : vector<32x64xf32>
    %c8_192 = arith.constant 8 : index
    %c0_193 = arith.constant 0 : index
    %c0_194 = arith.constant 0 : index
    %215 = vector.load %arg9[%c8_192, %c0_193, %c0_194] : memref<9x32x72xbf16, #tpu.memory_space<vmem>>, vector<1x32x72xbf16>
    %216 = vector.shape_cast %215 : vector<1x32x72xbf16> to vector<32x72xbf16>
    %cst_195 = arith.constant dense<0.000000e+00> : vector<32x64xf32>
    %217 = tpu.matmul %216, %149, %cst_195 {dimension_numbers = #tpu.dot_dimension_numbers<[1], [0], [0], [1], [0, 0, 1, 1], [], []>} : vector<32x72xbf16>, vector<72x64xbf16>, vector<32x64xf32> -> vector<32x64xf32>
    %218 = arith.truncf %217 : vector<32x64xf32> to vector<32x64xbf16>
    %c8_196 = arith.constant 8 : index
    %c0_197 = arith.constant 0 : index
    %c0_198 = arith.constant 0 : index
    %219 = vector.load %arg10[%c8_196, %c0_197, %c0_198] : memref<9x64x64xbf16, #tpu.memory_space<vmem>>, vector<1x64x64xbf16>
    %220 = vector.shape_cast %219 : vector<1x64x64xbf16> to vector<64x64xbf16>
    %cst_199 = arith.constant dense<0.000000e+00> : vector<32x64xf32>
    %221 = tpu.matmul %218, %220, %cst_199 {dimension_numbers = #tpu.dot_dimension_numbers<[1], [0], [0], [1], [0, 0, 1, 1], [], []>} : vector<32x64xbf16>, vector<64x64xbf16>, vector<32x64xf32> -> vector<32x64xf32>
    %222 = arith.addf %214, %221 : vector<32x64xf32>
    %c0_200 = arith.constant 0 : index
    %c0_201 = arith.constant 0 : index
    %223 = vector.load %arg11[%c0_200, %c0_201] : memref<1x64xf32, #tpu.memory_space<vmem>>, vector<1x64xf32>
    %224 = vector.broadcast %223 : vector<1x64xf32> to vector<32x64xf32>
    %225 = arith.mulf %222, %224 : vector<32x64xf32>
    %c0_202 = arith.constant 0 : index
    %c0_203 = arith.constant 0 : index
    %226 = vector.load %arg12[%c0_202, %c0_203] : memref<1x64xf32, #tpu.memory_space<vmem>>, vector<1x64xf32>
    %227 = vector.broadcast %226 : vector<1x64xf32> to vector<32x64xf32>
    %228 = arith.addf %225, %227 : vector<32x64xf32>
    %cst_204 = arith.constant 0.000000e+00 : f32
    %229 = vector.broadcast %cst_204 : f32 to vector<32x64xf32>
    %230 = arith.maximumf %228, %229 : vector<32x64xf32>
    %231 = arith.truncf %230 : vector<32x64xf32> to vector<32x64xbf16>
    %cst_205 = arith.constant 0.000000e+00 : f32
    %232 = vector.broadcast %cst_205 : f32 to vector<2x512xf32>
    %233 = vector.extract_strided_slice %231 {offsets = [0, 0], sizes = [2, 64], strides = [1, 1]} : vector<32x64xbf16> to vector<2x64xbf16>
    %c0_206 = arith.constant 0 : index
    %c0_207 = arith.constant 0 : index
    %c0_208 = arith.constant 0 : index
    %234 = vector.load %arg13[%c0_206, %c0_207, %c0_208] : memref<16x64x512xbf16, #tpu.memory_space<vmem>>, vector<1x64x512xbf16>
    %235 = vector.shape_cast %234 : vector<1x64x512xbf16> to vector<64x512xbf16>
    %cst_209 = arith.constant dense<0.000000e+00> : vector<2x512xf32>
    %236 = tpu.matmul %233, %235, %cst_209 {dimension_numbers = #tpu.dot_dimension_numbers<[1], [0], [0], [1], [0, 0, 1, 1], [], []>} : vector<2x64xbf16>, vector<64x512xbf16>, vector<2x512xf32> -> vector<2x512xf32>
    %237 = arith.addf %232, %236 : vector<2x512xf32>
    %238 = vector.extract_strided_slice %231 {offsets = [2, 0], sizes = [2, 64], strides = [1, 1]} : vector<32x64xbf16> to vector<2x64xbf16>
    %c1_210 = arith.constant 1 : index
    %c0_211 = arith.constant 0 : index
    %c0_212 = arith.constant 0 : index
    %239 = vector.load %arg13[%c1_210, %c0_211, %c0_212] : memref<16x64x512xbf16, #tpu.memory_space<vmem>>, vector<1x64x512xbf16>
    %240 = vector.shape_cast %239 : vector<1x64x512xbf16> to vector<64x512xbf16>
    %cst_213 = arith.constant dense<0.000000e+00> : vector<2x512xf32>
    %241 = tpu.matmul %238, %240, %cst_213 {dimension_numbers = #tpu.dot_dimension_numbers<[1], [0], [0], [1], [0, 0, 1, 1], [], []>} : vector<2x64xbf16>, vector<64x512xbf16>, vector<2x512xf32> -> vector<2x512xf32>
    %242 = arith.addf %237, %241 : vector<2x512xf32>
    %243 = vector.extract_strided_slice %231 {offsets = [4, 0], sizes = [2, 64], strides = [1, 1]} : vector<32x64xbf16> to vector<2x64xbf16>
    %c2_214 = arith.constant 2 : index
    %c0_215 = arith.constant 0 : index
    %c0_216 = arith.constant 0 : index
    %244 = vector.load %arg13[%c2_214, %c0_215, %c0_216] : memref<16x64x512xbf16, #tpu.memory_space<vmem>>, vector<1x64x512xbf16>
    %245 = vector.shape_cast %244 : vector<1x64x512xbf16> to vector<64x512xbf16>
    %cst_217 = arith.constant dense<0.000000e+00> : vector<2x512xf32>
    %246 = tpu.matmul %243, %245, %cst_217 {dimension_numbers = #tpu.dot_dimension_numbers<[1], [0], [0], [1], [0, 0, 1, 1], [], []>} : vector<2x64xbf16>, vector<64x512xbf16>, vector<2x512xf32> -> vector<2x512xf32>
    %247 = arith.addf %242, %246 : vector<2x512xf32>
    %248 = vector.extract_strided_slice %231 {offsets = [6, 0], sizes = [2, 64], strides = [1, 1]} : vector<32x64xbf16> to vector<2x64xbf16>
    %c3_218 = arith.constant 3 : index
    %c0_219 = arith.constant 0 : index
    %c0_220 = arith.constant 0 : index
    %249 = vector.load %arg13[%c3_218, %c0_219, %c0_220] : memref<16x64x512xbf16, #tpu.memory_space<vmem>>, vector<1x64x512xbf16>
    %250 = vector.shape_cast %249 : vector<1x64x512xbf16> to vector<64x512xbf16>
    %cst_221 = arith.constant dense<0.000000e+00> : vector<2x512xf32>
    %251 = tpu.matmul %248, %250, %cst_221 {dimension_numbers = #tpu.dot_dimension_numbers<[1], [0], [0], [1], [0, 0, 1, 1], [], []>} : vector<2x64xbf16>, vector<64x512xbf16>, vector<2x512xf32> -> vector<2x512xf32>
    %252 = arith.addf %247, %251 : vector<2x512xf32>
    %253 = vector.extract_strided_slice %231 {offsets = [8, 0], sizes = [2, 64], strides = [1, 1]} : vector<32x64xbf16> to vector<2x64xbf16>
    %c4_222 = arith.constant 4 : index
    %c0_223 = arith.constant 0 : index
    %c0_224 = arith.constant 0 : index
    %254 = vector.load %arg13[%c4_222, %c0_223, %c0_224] : memref<16x64x512xbf16, #tpu.memory_space<vmem>>, vector<1x64x512xbf16>
    %255 = vector.shape_cast %254 : vector<1x64x512xbf16> to vector<64x512xbf16>
    %cst_225 = arith.constant dense<0.000000e+00> : vector<2x512xf32>
    %256 = tpu.matmul %253, %255, %cst_225 {dimension_numbers = #tpu.dot_dimension_numbers<[1], [0], [0], [1], [0, 0, 1, 1], [], []>} : vector<2x64xbf16>, vector<64x512xbf16>, vector<2x512xf32> -> vector<2x512xf32>
    %257 = arith.addf %252, %256 : vector<2x512xf32>
    %258 = vector.extract_strided_slice %231 {offsets = [10, 0], sizes = [2, 64], strides = [1, 1]} : vector<32x64xbf16> to vector<2x64xbf16>
    %c5_226 = arith.constant 5 : index
    %c0_227 = arith.constant 0 : index
    %c0_228 = arith.constant 0 : index
    %259 = vector.load %arg13[%c5_226, %c0_227, %c0_228] : memref<16x64x512xbf16, #tpu.memory_space<vmem>>, vector<1x64x512xbf16>
    %260 = vector.shape_cast %259 : vector<1x64x512xbf16> to vector<64x512xbf16>
    %cst_229 = arith.constant dense<0.000000e+00> : vector<2x512xf32>
    %261 = tpu.matmul %258, %260, %cst_229 {dimension_numbers = #tpu.dot_dimension_numbers<[1], [0], [0], [1], [0, 0, 1, 1], [], []>} : vector<2x64xbf16>, vector<64x512xbf16>, vector<2x512xf32> -> vector<2x512xf32>
    %262 = arith.addf %257, %261 : vector<2x512xf32>
    %263 = vector.extract_strided_slice %231 {offsets = [12, 0], sizes = [2, 64], strides = [1, 1]} : vector<32x64xbf16> to vector<2x64xbf16>
    %c6_230 = arith.constant 6 : index
    %c0_231 = arith.constant 0 : index
    %c0_232 = arith.constant 0 : index
    %264 = vector.load %arg13[%c6_230, %c0_231, %c0_232] : memref<16x64x512xbf16, #tpu.memory_space<vmem>>, vector<1x64x512xbf16>
    %265 = vector.shape_cast %264 : vector<1x64x512xbf16> to vector<64x512xbf16>
    %cst_233 = arith.constant dense<0.000000e+00> : vector<2x512xf32>
    %266 = tpu.matmul %263, %265, %cst_233 {dimension_numbers = #tpu.dot_dimension_numbers<[1], [0], [0], [1], [0, 0, 1, 1], [], []>} : vector<2x64xbf16>, vector<64x512xbf16>, vector<2x512xf32> -> vector<2x512xf32>
    %267 = arith.addf %262, %266 : vector<2x512xf32>
    %268 = vector.extract_strided_slice %231 {offsets = [14, 0], sizes = [2, 64], strides = [1, 1]} : vector<32x64xbf16> to vector<2x64xbf16>
    %c7_234 = arith.constant 7 : index
    %c0_235 = arith.constant 0 : index
    %c0_236 = arith.constant 0 : index
    %269 = vector.load %arg13[%c7_234, %c0_235, %c0_236] : memref<16x64x512xbf16, #tpu.memory_space<vmem>>, vector<1x64x512xbf16>
    %270 = vector.shape_cast %269 : vector<1x64x512xbf16> to vector<64x512xbf16>
    %cst_237 = arith.constant dense<0.000000e+00> : vector<2x512xf32>
    %271 = tpu.matmul %268, %270, %cst_237 {dimension_numbers = #tpu.dot_dimension_numbers<[1], [0], [0], [1], [0, 0, 1, 1], [], []>} : vector<2x64xbf16>, vector<64x512xbf16>, vector<2x512xf32> -> vector<2x512xf32>
    %272 = arith.addf %267, %271 : vector<2x512xf32>
    %273 = vector.extract_strided_slice %231 {offsets = [16, 0], sizes = [2, 64], strides = [1, 1]} : vector<32x64xbf16> to vector<2x64xbf16>
    %c8_238 = arith.constant 8 : index
    %c0_239 = arith.constant 0 : index
    %c0_240 = arith.constant 0 : index
    %274 = vector.load %arg13[%c8_238, %c0_239, %c0_240] : memref<16x64x512xbf16, #tpu.memory_space<vmem>>, vector<1x64x512xbf16>
    %275 = vector.shape_cast %274 : vector<1x64x512xbf16> to vector<64x512xbf16>
    %cst_241 = arith.constant dense<0.000000e+00> : vector<2x512xf32>
    %276 = tpu.matmul %273, %275, %cst_241 {dimension_numbers = #tpu.dot_dimension_numbers<[1], [0], [0], [1], [0, 0, 1, 1], [], []>} : vector<2x64xbf16>, vector<64x512xbf16>, vector<2x512xf32> -> vector<2x512xf32>
    %277 = arith.addf %272, %276 : vector<2x512xf32>
    %278 = vector.extract_strided_slice %231 {offsets = [18, 0], sizes = [2, 64], strides = [1, 1]} : vector<32x64xbf16> to vector<2x64xbf16>
    %c9_242 = arith.constant 9 : index
    %c0_243 = arith.constant 0 : index
    %c0_244 = arith.constant 0 : index
    %279 = vector.load %arg13[%c9_242, %c0_243, %c0_244] : memref<16x64x512xbf16, #tpu.memory_space<vmem>>, vector<1x64x512xbf16>
    %280 = vector.shape_cast %279 : vector<1x64x512xbf16> to vector<64x512xbf16>
    %cst_245 = arith.constant dense<0.000000e+00> : vector<2x512xf32>
    %281 = tpu.matmul %278, %280, %cst_245 {dimension_numbers = #tpu.dot_dimension_numbers<[1], [0], [0], [1], [0, 0, 1, 1], [], []>} : vector<2x64xbf16>, vector<64x512xbf16>, vector<2x512xf32> -> vector<2x512xf32>
    %282 = arith.addf %277, %281 : vector<2x512xf32>
    %283 = vector.extract_strided_slice %231 {offsets = [20, 0], sizes = [2, 64], strides = [1, 1]} : vector<32x64xbf16> to vector<2x64xbf16>
    %c10_246 = arith.constant 10 : index
    %c0_247 = arith.constant 0 : index
    %c0_248 = arith.constant 0 : index
    %284 = vector.load %arg13[%c10_246, %c0_247, %c0_248] : memref<16x64x512xbf16, #tpu.memory_space<vmem>>, vector<1x64x512xbf16>
    %285 = vector.shape_cast %284 : vector<1x64x512xbf16> to vector<64x512xbf16>
    %cst_249 = arith.constant dense<0.000000e+00> : vector<2x512xf32>
    %286 = tpu.matmul %283, %285, %cst_249 {dimension_numbers = #tpu.dot_dimension_numbers<[1], [0], [0], [1], [0, 0, 1, 1], [], []>} : vector<2x64xbf16>, vector<64x512xbf16>, vector<2x512xf32> -> vector<2x512xf32>
    %287 = arith.addf %282, %286 : vector<2x512xf32>
    %288 = vector.extract_strided_slice %231 {offsets = [22, 0], sizes = [2, 64], strides = [1, 1]} : vector<32x64xbf16> to vector<2x64xbf16>
    %c11_250 = arith.constant 11 : index
    %c0_251 = arith.constant 0 : index
    %c0_252 = arith.constant 0 : index
    %289 = vector.load %arg13[%c11_250, %c0_251, %c0_252] : memref<16x64x512xbf16, #tpu.memory_space<vmem>>, vector<1x64x512xbf16>
    %290 = vector.shape_cast %289 : vector<1x64x512xbf16> to vector<64x512xbf16>
    %cst_253 = arith.constant dense<0.000000e+00> : vector<2x512xf32>
    %291 = tpu.matmul %288, %290, %cst_253 {dimension_numbers = #tpu.dot_dimension_numbers<[1], [0], [0], [1], [0, 0, 1, 1], [], []>} : vector<2x64xbf16>, vector<64x512xbf16>, vector<2x512xf32> -> vector<2x512xf32>
    %292 = arith.addf %287, %291 : vector<2x512xf32>
    %293 = vector.extract_strided_slice %231 {offsets = [24, 0], sizes = [2, 64], strides = [1, 1]} : vector<32x64xbf16> to vector<2x64xbf16>
    %c12_254 = arith.constant 12 : index
    %c0_255 = arith.constant 0 : index
    %c0_256 = arith.constant 0 : index
    %294 = vector.load %arg13[%c12_254, %c0_255, %c0_256] : memref<16x64x512xbf16, #tpu.memory_space<vmem>>, vector<1x64x512xbf16>
    %295 = vector.shape_cast %294 : vector<1x64x512xbf16> to vector<64x512xbf16>
    %cst_257 = arith.constant dense<0.000000e+00> : vector<2x512xf32>
    %296 = tpu.matmul %293, %295, %cst_257 {dimension_numbers = #tpu.dot_dimension_numbers<[1], [0], [0], [1], [0, 0, 1, 1], [], []>} : vector<2x64xbf16>, vector<64x512xbf16>, vector<2x512xf32> -> vector<2x512xf32>
    %297 = arith.addf %292, %296 : vector<2x512xf32>
    %298 = vector.extract_strided_slice %231 {offsets = [26, 0], sizes = [2, 64], strides = [1, 1]} : vector<32x64xbf16> to vector<2x64xbf16>
    %c13_258 = arith.constant 13 : index
    %c0_259 = arith.constant 0 : index
    %c0_260 = arith.constant 0 : index
    %299 = vector.load %arg13[%c13_258, %c0_259, %c0_260] : memref<16x64x512xbf16, #tpu.memory_space<vmem>>, vector<1x64x512xbf16>
    %300 = vector.shape_cast %299 : vector<1x64x512xbf16> to vector<64x512xbf16>
    %cst_261 = arith.constant dense<0.000000e+00> : vector<2x512xf32>
    %301 = tpu.matmul %298, %300, %cst_261 {dimension_numbers = #tpu.dot_dimension_numbers<[1], [0], [0], [1], [0, 0, 1, 1], [], []>} : vector<2x64xbf16>, vector<64x512xbf16>, vector<2x512xf32> -> vector<2x512xf32>
    %302 = arith.addf %297, %301 : vector<2x512xf32>
    %303 = vector.extract_strided_slice %231 {offsets = [28, 0], sizes = [2, 64], strides = [1, 1]} : vector<32x64xbf16> to vector<2x64xbf16>
    %c14_262 = arith.constant 14 : index
    %c0_263 = arith.constant 0 : index
    %c0_264 = arith.constant 0 : index
    %304 = vector.load %arg13[%c14_262, %c0_263, %c0_264] : memref<16x64x512xbf16, #tpu.memory_space<vmem>>, vector<1x64x512xbf16>
    %305 = vector.shape_cast %304 : vector<1x64x512xbf16> to vector<64x512xbf16>
    %cst_265 = arith.constant dense<0.000000e+00> : vector<2x512xf32>
    %306 = tpu.matmul %303, %305, %cst_265 {dimension_numbers = #tpu.dot_dimension_numbers<[1], [0], [0], [1], [0, 0, 1, 1], [], []>} : vector<2x64xbf16>, vector<64x512xbf16>, vector<2x512xf32> -> vector<2x512xf32>
    %307 = arith.addf %302, %306 : vector<2x512xf32>
    %308 = vector.extract_strided_slice %231 {offsets = [30, 0], sizes = [2, 64], strides = [1, 1]} : vector<32x64xbf16> to vector<2x64xbf16>
    %c15_266 = arith.constant 15 : index
    %c0_267 = arith.constant 0 : index
    %c0_268 = arith.constant 0 : index
    %309 = vector.load %arg13[%c15_266, %c0_267, %c0_268] : memref<16x64x512xbf16, #tpu.memory_space<vmem>>, vector<1x64x512xbf16>
    %310 = vector.shape_cast %309 : vector<1x64x512xbf16> to vector<64x512xbf16>
    %cst_269 = arith.constant dense<0.000000e+00> : vector<2x512xf32>
    %311 = tpu.matmul %308, %310, %cst_269 {dimension_numbers = #tpu.dot_dimension_numbers<[1], [0], [0], [1], [0, 0, 1, 1], [], []>} : vector<2x64xbf16>, vector<64x512xbf16>, vector<2x512xf32> -> vector<2x512xf32>
    %312 = arith.addf %307, %311 : vector<2x512xf32>
    %c0_270 = arith.constant 0 : index
    %c0_271 = arith.constant 0 : index
    %313 = vector.load %arg14[%c0_270, %c0_271] : memref<1x512xf32, #tpu.memory_space<vmem>>, vector<1x512xf32>
    %314 = vector.broadcast %313 : vector<1x512xf32> to vector<2x512xf32>
    %315 = arith.addf %312, %314 : vector<2x512xf32>
    %cst_272 = arith.constant 0.000000e+00 : f32
    %316 = vector.broadcast %cst_272 : f32 to vector<2x512xf32>
    %317 = arith.maximumf %315, %316 : vector<2x512xf32>
    %318 = arith.truncf %317 : vector<2x512xf32> to vector<2x512xbf16>
    %c0_273 = arith.constant 0 : index
    %c0_274 = arith.constant 0 : index
    %319 = vector.load %arg15[%c0_273, %c0_274] : memref<512x6xbf16, #tpu.memory_space<vmem>>, vector<512x6xbf16>
    %cst_275 = arith.constant dense<0.000000e+00> : vector<2x6xf32>
    %320 = tpu.matmul %318, %319, %cst_275 {dimension_numbers = #tpu.dot_dimension_numbers<[1], [0], [0], [1], [0, 0, 1, 1], [], []>} : vector<2x512xbf16>, vector<512x6xbf16>, vector<2x6xf32> -> vector<2x6xf32>
    %c0_276 = arith.constant 0 : index
    %c0_277 = arith.constant 0 : index
    %321 = vector.load %arg16[%c0_276, %c0_277] : memref<1x6xf32, #tpu.memory_space<vmem>>, vector<1x6xf32>
    %322 = vector.broadcast %321 : vector<1x6xf32> to vector<2x6xf32>
    %323 = arith.addf %320, %322 : vector<2x6xf32>
    %c0_278 = arith.constant 0 : index
    %c0_279 = arith.constant 0 : index
    %c0_280 = arith.constant 0 : index
    %324 = vector.load %arg17[%c0_278, %c0_279, %c0_280] : memref<1x2x6xf32, #tpu.memory_space<vmem>>, vector<1x2x6xf32>
    %325 = vector.shape_cast %324 : vector<1x2x6xf32> to vector<2x6xf32>
    %326 = vector.shape_cast %323 : vector<2x6xf32> to vector<1x2x6xf32>
    tpu.vector_store %arg17[%c0_278, %c0_279, %c0_280], %326 {strides = array<i32>} : memref<1x2x6xf32, #tpu.memory_space<vmem>>, vector<1x2x6xf32>,
    return
  }
  func.func @transform_0(%arg0: i32) -> (i32, i32) {
    %c0_i32 = arith.constant 0 : i32
    %c0_i32_0 = arith.constant 0 : i32
    return %arg0, %c0_i32 : i32, i32
  }
  func.func @transform_1(%arg0: i32) -> (i32, i32) {
    %c0_i32 = arith.constant 0 : i32
    %c0_i32_0 = arith.constant 0 : i32
    %c0_i32_1 = arith.constant 0 : i32
    return %c0_i32, %c0_i32_0 : i32, i32
  }
  func.func @transform_2(%arg0: i32) -> (i32, i32) {
    %c0_i32 = arith.constant 0 : i32
    %c0_i32_0 = arith.constant 0 : i32
    %c0_i32_1 = arith.constant 0 : i32
    return %c0_i32, %c0_i32_0 : i32, i32
  }
  func.func @transform_3(%arg0: i32) -> (i32, i32) {
    %c0_i32 = arith.constant 0 : i32
    %c0_i32_0 = arith.constant 0 : i32
    %c0_i32_1 = arith.constant 0 : i32
    return %c0_i32, %c0_i32_0 : i32, i32
  }
  func.func @transform_4(%arg0: i32) -> (i32, i32, i32) {
    %c0_i32 = arith.constant 0 : i32
    %c0_i32_0 = arith.constant 0 : i32
    %c0_i32_1 = arith.constant 0 : i32
    %c0_i32_2 = arith.constant 0 : i32
    return %c0_i32, %c0_i32_0, %c0_i32_1 : i32, i32, i32
  }
  func.func @transform_5(%arg0: i32) -> (i32, i32, i32) {
    %c0_i32 = arith.constant 0 : i32
    %c0_i32_0 = arith.constant 0 : i32
    %c0_i32_1 = arith.constant 0 : i32
    %c0_i32_2 = arith.constant 0 : i32
    return %c0_i32, %c0_i32_0, %c0_i32_1 : i32, i32, i32
  }
  func.func @transform_6(%arg0: i32) -> (i32, i32) {
    %c0_i32 = arith.constant 0 : i32
    %c0_i32_0 = arith.constant 0 : i32
    %c0_i32_1 = arith.constant 0 : i32
    return %c0_i32, %c0_i32_0 : i32, i32
  }
  func.func @transform_7(%arg0: i32) -> (i32, i32) {
    %c0_i32 = arith.constant 0 : i32
    %c0_i32_0 = arith.constant 0 : i32
    %c0_i32_1 = arith.constant 0 : i32
    return %c0_i32, %c0_i32_0 : i32, i32
  }
  func.func @transform_8(%arg0: i32) -> (i32, i32, i32) {
    %c0_i32 = arith.constant 0 : i32
    %c0_i32_0 = arith.constant 0 : i32
    %c0_i32_1 = arith.constant 0 : i32
    %c0_i32_2 = arith.constant 0 : i32
    return %c0_i32, %c0_i32_0, %c0_i32_1 : i32, i32, i32
  }
  func.func @transform_9(%arg0: i32) -> (i32, i32, i32) {
    %c0_i32 = arith.constant 0 : i32
    %c0_i32_0 = arith.constant 0 : i32
    %c0_i32_1 = arith.constant 0 : i32
    %c0_i32_2 = arith.constant 0 : i32
    return %c0_i32, %c0_i32_0, %c0_i32_1 : i32, i32, i32
  }
  func.func @transform_10(%arg0: i32) -> (i32, i32) {
    %c0_i32 = arith.constant 0 : i32
    %c0_i32_0 = arith.constant 0 : i32
    %c0_i32_1 = arith.constant 0 : i32
    return %c0_i32, %c0_i32_0 : i32, i32
  }
  func.func @transform_11(%arg0: i32) -> (i32, i32) {
    %c0_i32 = arith.constant 0 : i32
    %c0_i32_0 = arith.constant 0 : i32
    %c0_i32_1 = arith.constant 0 : i32
    return %c0_i32, %c0_i32_0 : i32, i32
  }
  func.func @transform_12(%arg0: i32) -> (i32, i32, i32) {
    %c0_i32 = arith.constant 0 : i32
    %c0_i32_0 = arith.constant 0 : i32
    %c0_i32_1 = arith.constant 0 : i32
    %c0_i32_2 = arith.constant 0 : i32
    return %c0_i32, %c0_i32_0, %c0_i32_1 : i32, i32, i32
  }
  func.func @transform_13(%arg0: i32) -> (i32, i32) {
    %c0_i32 = arith.constant 0 : i32
    %c0_i32_0 = arith.constant 0 : i32
    %c0_i32_1 = arith.constant 0 : i32
    return %c0_i32, %c0_i32_0 : i32, i32
  }
  func.func @transform_14(%arg0: i32) -> (i32, i32) {
    %c0_i32 = arith.constant 0 : i32
    %c0_i32_0 = arith.constant 0 : i32
    %c0_i32_1 = arith.constant 0 : i32
    return %c0_i32, %c0_i32_0 : i32, i32
  }
  func.func @transform_15(%arg0: i32) -> (i32, i32) {
    %c0_i32 = arith.constant 0 : i32
    %c0_i32_0 = arith.constant 0 : i32
    %c0_i32_1 = arith.constant 0 : i32
    return %c0_i32, %c0_i32_0 : i32, i32
  }
  func.func @transform_16(%arg0: i32) -> (i32, i32, i32) {
    %c0_i32 = arith.constant 0 : i32
    %c0_i32_0 = arith.constant 0 : i32
    %c0_i32_1 = arith.constant 0 : i32
    return %arg0, %c0_i32, %c0_i32_0 : i32, i32, i32
  }
}

</mosaic_0001>

<bundles_post_ra>
// kernel: dqn_forward.1
= control target key start
LH: loop header
LB: loop body
LE: loop exit
PB: predicated region body
PF: predicated region fallthrough
CT: control target
= control target key end

     0   :  { %s21232_s0 = inlined_call_operand.vmem [shape: bf16[392,256], index: 0, kind: input, shape index: {}]   ;;  %s21233_s1 = inlined_call_operand.vmem [shape: bf16[256,32], index: 1, kind: input, shape index: {}]   ;;  %s21234_s2 = inlined_call_operand.vmem [shape: f32[1,32], index: 2, kind: input, shape index: {}]   ;;  %s21235_s3 = inlined_call_operand.vmem [shape: f32[1,32], index: 3, kind: input, shape index: {}]   ;;  %s21236_s4 = inlined_call_operand.vmem [shape: bf16[16,72,392], index: 4, kind: input, shape index: {}]   ;;  %s21237_s5 = inlined_call_operand.vmem [shape: bf16[16,32,64], index: 5, kind: input, shape index: {}]   ;;  %s21238_s6 = inlined_call_operand.vmem [shape: f32[1,64], index: 6, kind: input, shape index: {}]   ;;  %s21239_s7 = inlined_call_operand.vmem [shape: f32[1,64], index: 7, kind: input, shape index: {}]   ;;  %s21240_s8 = inlined_call_operand.vmem [shape: bf16[9,32,72], index: 8, kind: input, shape index: {}]   ;;  %s21241_s9 = inlined_call_operand.vmem [shape: bf16[9,64,64], index: 9, kind: input, shape index: {}]   ;;  %s21242_s10 = inlined_call_operand.vmem [shape: f32[1,64], index: 10, kind: input, shape index: {}]   ;;  %s21243_s11 = inlined_call_operand.vmem [shape: f32[1,64], index: 11, kind: input, shape index: {}]   ;;  %s21244_s12 = inlined_call_operand.vmem [shape: bf16[16,64,512], index: 12, kind: input, shape index: {}]   ;;  %s21245_s13 = inlined_call_operand.vmem [shape: f32[1,512], index: 13, kind: input, shape index: {}]   ;;  %s21246_s14 = inlined_call_operand.vmem [shape: bf16[512,6], index: 14, kind: input, shape index: {}]   ;;  %s21247_s15 = inlined_call_operand.vmem [shape: f32[1,6], index: 15, kind: input, shape index: {}]   ;;  %s21248_s16 = inlined_call_operand.hbm [shape: f32[1,2,6], index: 16, kind: output, shape index: {}]  }
   0x1   :  { %21257 = sst [smem:[#allocation32_spill]] %s21232_s0 }
   0x2   :  { %v15597_v0 = vld [vmem:[%s21233_s1] sm:$0xff]   ;;  %v21252_v1 = vmov 0   ;;  %v15598_v2 = vld [vmem:[%s21233_s1 + $0x8] sm:$0xff]   ;;  %v15599_v3 = vld [vmem:[%s21233_s1 + $0x10] sm:$0xff]   ;;  %s21258_s18 = sld [smem:[#allocation32_spill]] }
   0x3   :  { %479 = vmatprep.subr.bf16.mxu0 %v21252_v1  ;;  %v15600_v4 = vld [vmem:[%s21233_s1 + $0x18] sm:$0xff]   ;;  %v15601_v5 = vld [vmem:[%s21233_s1 + $0x20] sm:$0xff]   ;;  %v15602_v7 = vld [vmem:[%s21233_s1 + $0x28] sm:$0xff]  }
   0x4   :  { %480 = vmatpush1.bf16.msra.mxu0 %v15597_v0  ;;  %v15603_v8 = vld [vmem:[%s21233_s1 + $0x30] sm:$0xff]   ;;  %v15604_v9 = vld [vmem:[%s21233_s1 + $0x38] sm:$0xff]   ;;  %v15605_v10 = vld [vmem:[%s21233_s1 + $0x40] sm:$0xff]  }
   0x5   :  { %481 = vmatprep.subr.bf16.mxu0 %v21252_v1  ;;  %v15606_v11 = vld [vmem:[%s21233_s1 + $0x48] sm:$0xff]   ;;  %v15607_v12 = vld [vmem:[%s21233_s1 + $0x50] sm:$0xff]   ;;  %v15608_v13 = vld [vmem:[%s21233_s1 + $0x58] sm:$0xff]  }
   0x6   :  { %v15609_v14 = vld [vmem:[%s21233_s1 + $0x60] sm:$0xff]   ;;  %v15610_v15 = vld [vmem:[%s21233_s1 + $0x68] sm:$0xff]   ;;  %v15611_v16 = vld [vmem:[%s21233_s1 + $0x70] sm:$0xff]  }
   0x7   :  { %v15612_v17 = vld [vmem:[%s21233_s1 + $0x78] sm:$0xff]  }
   0x8   :  { %482 = vmatpush1.bf16.msra.mxu0 %v15598_v2  ;;  %v15615_v6 = vld [vmem:[%s21258_s18 + $0x4] ss:$8 sps:$4 sm:$0xff]   ;;  %v15613_v18 = vld [vmem:[%s21258_s18] ss:$8 sps:$4 sm:$0xff]   ;;  %v15616_v19 = vld [vmem:[%s21258_s18 + $0x14] ss:$8 sps:$4 sm:$0xff]  }
   0x9   :  { %483 = vmatprep.subr.bf16.mxu0 %v21252_v1  ;;  %511 = vmatprep.mubr.bf16.mxu0 %v15615_v6  ;;  %v15618_v20 = vld [vmem:[%s21258_s18 + $0x10] ss:$8 sps:$4 sm:$0xff]   ;;  %v15619_v21 = vld [vmem:[%s21258_s18 + $0x24] ss:$8 sps:$4 sm:$0xff]   ;;  %v15621_v22 = vld [vmem:[%s21258_s18 + $0x20] ss:$8 sps:$4 sm:$0xff]  }
   0xa   :  { %v15622_v23 = vld [vmem:[%s21258_s18 + $0x34] ss:$8 sps:$4 sm:$0xff]   ;;  %v15624_v24 = vld [vmem:[%s21258_s18 + $0x30] ss:$8 sps:$4 sm:$0xff]   ;;  %v15625_v25 = vld [vmem:[%s21258_s18 + $0x44] ss:$8 sps:$4 sm:$0xff]  }
   0xb   :  { %v15627_v26 = vld [vmem:[%s21258_s18 + $0x40] ss:$8 sps:$4 sm:$0xff]   ;;  %v15628_v27 = vld [vmem:[%s21258_s18 + $0x54] ss:$8 sps:$4 sm:$0xff]   ;;  %v15630_v28 = vld [vmem:[%s21258_s18 + $0x50] ss:$8 sps:$4 sm:$0xff]  }
   0xc   :  { %484 = vmatpush1.bf16.msra.mxu0 %v15599_v3  ;;  %v15631_v29 = vld [vmem:[%s21258_s18 + $0x64] ss:$8 sps:$4 sm:$0xff]   ;;  %v15633_v30 = vld [vmem:[%s21258_s18 + $0x60] ss:$8 sps:$4 sm:$0xff]   ;;  %v15634_v31 = vld [vmem:[%s21258_s18 + $0x74] ss:$8 sps:$4 sm:$0xff]  }
   0xd   :  { %485 = vmatprep.subr.bf16.mxu0 %v21252_v1  ;;  %v15636_v32 = vld [vmem:[%s21258_s18 + $0x70] ss:$8 sps:$4 sm:$0xff]   ;;  %v15637_v33 = vld [vmem:[%s21258_s18 + $0x84] ss:$8 sps:$4 sm:$0xff]   ;;  %v15639_v34 = vld [vmem:[%s21258_s18 + $0x80] ss:$8 sps:$4 sm:$0xff]  }
   0xe   :  { %v15640_v35 = vld [vmem:[%s21258_s18 + $0x94] ss:$8 sps:$4 sm:$0xff]   ;;  %v15642_v36 = vld [vmem:[%s21258_s18 + $0x90] ss:$8 sps:$4 sm:$0xff]   ;;  %v15643_v37 = vld [vmem:[%s21258_s18 + $0xa4] ss:$8 sps:$4 sm:$0xff]  }
   0xf   :  { %v15645_v38 = vld [vmem:[%s21258_s18 + $0xa0] ss:$8 sps:$4 sm:$0xff]   ;;  %v15646_v39 = vld [vmem:[%s21258_s18 + $0xb4] ss:$8 sps:$4 sm:$0xff]   ;;  %v15648_v40 = vld [vmem:[%s21258_s18 + $0xb0] ss:$8 sps:$4 sm:$0xff]  }
  0x10   :  { %486 = vmatpush1.bf16.msra.mxu0 %v15600_v4  ;;  %v15649_v41 = vld [vmem:[%s21258_s18 + $0xc4] ss:$8 sps:$4 sm:$0xff]   ;;  %v15651_v42 = vld [vmem:[%s21258_s18 + $0xc0] ss:$8 sps:$4 sm:$0xff]   ;;  %v15652_v43 = vld [vmem:[%s21258_s18 + $0xd4] ss:$8 sps:$4 sm:$0xff]  }
  0x11   :  { %487 = vmatprep.subr.bf16.mxu0 %v21252_v1  ;;  %v15654_v44 = vld [vmem:[%s21258_s18 + $0xd0] ss:$8 sps:$4 sm:$0xff]   ;;  %v15655_v45 = vld [vmem:[%s21258_s18 + $0xe4] ss:$8 sps:$4 sm:$0xff]   ;;  %v15657_v46 = vld [vmem:[%s21258_s18 + $0xe0] ss:$8 sps:$4 sm:$0xff]  }
  0x12   :  { %v15658_v47 = vld [vmem:[%s21258_s18 + $0xf4] ss:$8 sps:$4 sm:$0xff]   ;;  %v15660_v48 = vld [vmem:[%s21258_s18 + $0xf0] ss:$8 sps:$4 sm:$0xff]   ;;  %v15661_v49 = vld [vmem:[%s21258_s18 + $0x104] ss:$8 sps:$4 sm:$0xff]  }
  0x13   :  { %v15663_v50 = vld [vmem:[%s21258_s18 + $0x100] ss:$8 sps:$4 sm:$0xff]   ;;  %v15664_v51 = vld [vmem:[%s21258_s18 + $0x114] ss:$8 sps:$4 sm:$0xff]   ;;  %v15666_v52 = vld [vmem:[%s21258_s18 + $0x110] ss:$8 sps:$4 sm:$0xff]  }
  0x14   :  { %488 = vmatpush1.bf16.msra.mxu0 %v15601_v5  ;;  %v15667_v53 = vld [vmem:[%s21258_s18 + $0x124] ss:$8 sps:$4 sm:$0xff]   ;;  %v15669_v54 = vld [vmem:[%s21258_s18 + $0x120] ss:$8 sps:$4 sm:$0xff]   ;;  %v15670_v55 = vld [vmem:[%s21258_s18 + $0x134] ss:$8 sps:$4 sm:$0xff]  }
  0x15   :  { %489 = vmatprep.subr.bf16.mxu0 %v21252_v1  ;;  %v15672_v56 = vld [vmem:[%s21258_s18 + $0x130] ss:$8 sps:$4 sm:$0xff]   ;;  %v15673_v57 = vld [vmem:[%s21258_s18 + $0x144] ss:$8 sps:$4 sm:$0xff]   ;;  %v15675_v58 = vld [vmem:[%s21258_s18 + $0x140] ss:$8 sps:$4 sm:$0xff]  }
  0x16   :  { %v15676_v59 = vld [vmem:[%s21258_s18 + $0x154] ss:$8 sps:$4 sm:$0xff]   ;;  %v15678_v60 = vld [vmem:[%s21258_s18 + $0x150] ss:$8 sps:$4 sm:$0xff]   ;;  %v15679_v61 = vld [vmem:[%s21258_s18 + $0x164] ss:$8 sps:$4 sm:$0xff]  }
  0x17   :  { %v15681_v62 = vld [vmem:[%s21258_s18 + $0x160] ss:$8 sps:$4 sm:$0xff]   ;;  %v15682_v63 = vld [vmem:[%s21258_s18 + $0x174] ss:$8 sps:$4 sm:$0xff]   ;;  %v15684_v2 = vld [vmem:[%s21258_s18 + $0x170] ss:$8 sps:$4 sm:$0xff]  }
  0x18   :  { %490 = vmatpush1.bf16.msra.mxu0 %v15602_v7  ;;  %v103_v0 = vld [vmem:[%s21258_s18 + $0x180] sm:$0xff] }
  0x19   :  { %491 = vmatprep.subr.bf16.mxu0 %v21252_v1  ;;  %v12013_v3 = vcombine.high %v103_v0, %v103_v0  ;;  %v12012_v4 = vcombine.low %v103_v0, %v103_v0  ;;  %v16964_v5 = vld [vmem:[%s21234_s2] ss:$0 sm:$0xff] }
  0x1a   :  { %v16969_v6 = vld [vmem:[%s21235_s3] ss:$0 sm:$0xff] }
  0x1c   :  { %492 = vmatpush1.bf16.msra.mxu0 %v15603_v8 }
  0x1d   :  { %493 = vmatprep.subr.bf16.mxu0 %v21252_v1 }
  0x20   :  { %494 = vmatpush1.bf16.msra.mxu0 %v15604_v9 }
  0x21   :  { %495 = vmatprep.subr.bf16.mxu0 %v21252_v1 }
  0x24   :  { %496 = vmatpush1.bf16.msra.mxu0 %v15605_v10 }
  0x25   :  { %497 = vmatprep.subr.bf16.mxu0 %v21252_v1 }
  0x28   :  { %498 = vmatpush1.bf16.msra.mxu0 %v15606_v11 }
  0x29   :  { %499 = vmatprep.subr.bf16.mxu0 %v21252_v1 }
  0x2c   :  { %500 = vmatpush1.bf16.msra.mxu0 %v15607_v12 }
  0x2d   :  { %501 = vmatprep.subr.bf16.mxu0 %v21252_v1 }
  0x30   :  { %502 = vmatpush1.bf16.msra.mxu0 %v15608_v13 }
  0x31   :  { %503 = vmatprep.subr.bf16.mxu0 %v21252_v1 }
  0x34   :  { %504 = vmatpush1.bf16.msra.mxu0 %v15609_v14  ;;  %v15689_v14 = vld [vmem:[%s21236_s4 + $0x124] ss:$16 sps:$4 sm:$0xff]  }
  0x35   :  { %505 = vmatprep.subr.bf16.mxu0 %v21252_v1 }
  0x38   :  { %506 = vmatpush1.bf16.msra.mxu0 %v15610_v15 }
  0x39   :  { %507 = vmatprep.subr.bf16.mxu0 %v21252_v1 }
  0x3c   :  { %508 = vmatpush1.bf16.msra.mxu0 %v15611_v16 }
  0x3d   :  { %509 = vmatprep.subr.bf16.mxu0 %v21252_v1 }
  0x40   :  { %510 = vmatpush1.bf16.msra.mxu0 %v15612_v17 }
  0x43   :  { %512 = vmatmul.mubr.bf16.vlgmr.msra.gmra.mrb[0].mxu0 %v15613_v18 }
  0x44   :  { %519 = vmatprep.mubr.bf16.mxu0 %v15616_v19  ;;  %v15692_v19 = vld [vmem:[%s21236_s4 + $0x4] ss:$16 sps:$4 sm:$0xff]  }
  0x45   :  { %1056 = vmatprep.mubr.bf16.mxu1 %v15692_v19 }
  0x4b   :  { %520 = vmatmul.mubr.bf16.gmra.mrb[4].mxu0 %v15618_v20 }
  0x4c   :  { %527 = vmatprep.mubr.bf16.mxu0 %v15619_v21 }
  0x53   :  { %528 = vmatmul.mubr.bf16.gmra.mrb[8].mxu0 %v15621_v22 }
  0x54   :  { %535 = vmatprep.mubr.bf16.mxu0 %v15622_v23 }
  0x5b   :  { %536 = vmatmul.mubr.bf16.gmra.mrb[12].mxu0 %v15624_v24 }
  0x5c   :  { %543 = vmatprep.mubr.bf16.mxu0 %v15625_v25 }
  0x63   :  { %544 = vmatmul.mubr.bf16.gmra.mrb[16].mxu0 %v15627_v26 }
  0x64   :  { %551 = vmatprep.mubr.bf16.mxu0 %v15628_v27 }
  0x6b   :  { %552 = vmatmul.mubr.bf16.gmra.mrb[20].mxu0 %v15630_v28 }
  0x6c   :  { %559 = vmatprep.mubr.bf16.mxu0 %v15631_v29 }
  0x73   :  { %560 = vmatmul.mubr.bf16.gmra.mrb[24].mxu0 %v15633_v30 }
  0x74   :  { %567 = vmatprep.mubr.bf16.mxu0 %v15634_v31 }
  0x7b   :  { %568 = vmatmul.mubr.bf16.gmra.mrb[28].mxu0 %v15636_v32 }
  0x7c   :  { %575 = vmatprep.mubr.bf16.mxu0 %v15637_v33 }
  0x83   :  { %576 = vmatmul.mubr.bf16.gmra.mrb[32].mxu0 %v15639_v34 }
  0x84   :  { %583 = vmatprep.mubr.bf16.mxu0 %v15640_v35 }
  0x8b   :  { %584 = vmatmul.mubr.bf16.gmra.mrb[36].mxu0 %v15642_v36 }
  0x8c   :  { %591 = vmatprep.mubr.bf16.mxu0 %v15643_v37 }
  0x93   :  { %592 = vmatmul.mubr.bf16.gmra.mrb[40].mxu0 %v15645_v38 }
  0x94   :  { %599 = vmatprep.mubr.bf16.mxu0 %v15646_v39 }
  0x9b   :  { %600 = vmatmul.mubr.bf16.gmra.mrb[44].mxu0 %v15648_v40 }
  0x9c   :  { %607 = vmatprep.mubr.bf16.mxu0 %v15649_v41 }
  0xa3   :  { %608 = vmatmul.mubr.bf16.gmra.mrb[48].mxu0 %v15651_v42 }
  0xa4   :  { %615 = vmatprep.mubr.bf16.mxu0 %v15652_v43 }
  0xab   :  { %616 = vmatmul.mubr.bf16.gmra.mrb[52].mxu0 %v15654_v44 }
  0xac   :  { %623 = vmatprep.mubr.bf16.mxu0 %v15655_v45 }
  0xb3   :  { %624 = vmatmul.mubr.bf16.gmra.mrb[56].mxu0 %v15657_v46 }
  0xb4   :  { %631 = vmatprep.mubr.bf16.mxu0 %v15658_v47 }
  0xbb   :  { %632 = vmatmul.mubr.bf16.gmra.mrb[60].mxu0 %v15660_v48 }
  0xbc   :  { %639 = vmatprep.mubr.bf16.mxu0 %v15661_v49 }
  0xc3   :  { %640 = vmatmul.mubr.bf16.gmra.mrb[64].mxu0 %v15663_v50 }
  0xc4   :  { %647 = vmatprep.mubr.bf16.mxu0 %v15664_v51 }
  0xcb   :  { %648 = vmatmul.mubr.bf16.gmra.mrb[68].mxu0 %v15666_v52 }
  0xcc   :  { %655 = vmatprep.mubr.bf16.mxu0 %v15667_v53 }
  0xd3   :  { %656 = vmatmul.mubr.bf16.gmra.mrb[72].mxu0 %v15669_v54 }
  0xd4   :  { %663 = vmatprep.mubr.bf16.mxu0 %v15670_v55 }
  0xdb   :  { %664 = vmatmul.mubr.bf16.gmra.mrb[76].mxu0 %v15672_v56 }
  0xdc   :  { %671 = vmatprep.mubr.bf16.mxu0 %v15673_v57 }
  0xe3   :  { %672 = vmatmul.mubr.bf16.gmra.mrb[80].mxu0 %v15675_v58 }
  0xe4   :  { %679 = vmatprep.mubr.bf16.mxu0 %v15676_v59 }
  0xeb   :  { %680 = vmatmul.mubr.bf16.gmra.mrb[84].mxu0 %v15678_v60 }
  0xec   :  { %687 = vmatprep.mubr.bf16.mxu0 %v15679_v61 }
  0xf3   :  { %688 = vmatmul.mubr.bf16.gmra.mrb[88].mxu0 %v15681_v62 }
  0xf4   :  { %695 = vmatprep.mubr.bf16.mxu0 %v15682_v63 }
  0xfb   :  { %696 = vmatmul.mubr.bf16.gmra.mrb[92].mxu0 %v15684_v2 }
  0xfc   :  { %703 = vmatprep.mubr.bf16.mxu0 %v12013_v3 }
 0x103   :  { %704 = vmatmul.mubr.bf16.gmra.mrb[96].mxu0 %v12012_v4 }
 0x104   :  { %1808 = vmatprep.mubr.bf16.mxu0 %v15689_v14 }
 0x116   :  { %v513_v7 = vpop.f32.mrb[0].mxu0 }
 0x117   :  { %v718_v8 = vmul.f32 %v16964_v5, %v513_v7  ;;  %v515_v9 = vpop.f32.mrb[1].mxu0 }
 0x118   :  { %v516_v10 = vpop.f32.mrb[2].mxu0 }
 0x119   :  { %v774_v11 = vadd.f32 %v16969_v6, %v718_v8  ;;  %v719_v12 = vmul.f32 %v16964_v5, %v516_v10  ;;  %v518_v13 = vpop.f32.mrb[3].mxu0 }
 0x11b   :  { %v775_v15 = vadd.f32 %v16969_v6, %v719_v12  ;;  %v823_v16 = vmax.f32 %v774_v11, 0.0 }
 0x11d   :  { %v824_v17 = vmax.f32 %v775_v15, 0.0 }
 0x11e   :  { %v521_v18 = vpop.f32.mrb[4].mxu0 }
 0x11f   :  { %v16981_v20 = vpack.c.bf16 %v824_v17, %v823_v16  ;;  %v720_v21 = vmul.f32 %v16964_v5, %v521_v18  ;;  %v523_v22 = vpop.f32.mrb[5].mxu0 }
 0x120   :  { %v524_v23 = vpop.f32.mrb[6].mxu0 }
 0x121   :  { %v776_v24 = vadd.f32 %v16969_v6, %v720_v21  ;;  %v721_v25 = vmul.f32 %v16964_v5, %v524_v23  ;;  %v526_v26 = vpop.f32.mrb[7].mxu0 }
 0x123   :  { %v777_v27 = vadd.f32 %v16969_v6, %v721_v25  ;;  %v825_v28 = vmax.f32 %v776_v24, 0.0 }
 0x125   :  { %v826_v29 = vmax.f32 %v777_v27, 0.0 }
 0x126   :  { %v529_v30 = vpop.f32.mrb[8].mxu0 }
 0x127   :  { %v16987_v31 = vpack.c.bf16 %v826_v29, %v825_v28  ;;  %v722_v32 = vmul.f32 %v16964_v5, %v529_v30  ;;  %v531_v33 = vpop.f32.mrb[9].mxu0 }
 0x128   :  { %v532_v34 = vpop.f32.mrb[10].mxu0 }
 0x129   :  { %v778_v35 = vadd.f32 %v16969_v6, %v722_v32  ;;  %v723_v36 = vmul.f32 %v16964_v5, %v532_v34  ;;  %v534_v37 = vpop.f32.mrb[11].mxu0 }
 0x12b   :  { %v779_v38 = vadd.f32 %v16969_v6, %v723_v36  ;;  %v827_v39 = vmax.f32 %v778_v35, 0.0 }
 0x12d   :  { %v828_v40 = vmax.f32 %v779_v38, 0.0 }
 0x12e   :  { %v537_v41 = vpop.f32.mrb[12].mxu0 }
 0x12f   :  { %v16993_v42 = vpack.c.bf16 %v828_v40, %v827_v39  ;;  %v724_v43 = vmul.f32 %v16964_v5, %v537_v41  ;;  %v539_v44 = vpop.f32.mrb[13].mxu0 }
 0x130   :  { %v540_v45 = vpop.f32.mrb[14].mxu0 }
 0x131   :  { %v780_v46 = vadd.f32 %v16969_v6, %v724_v43  ;;  %v725_v47 = vmul.f32 %v16964_v5, %v540_v45  ;;  %v542_v48 = vpop.f32.mrb[15].mxu0 }
 0x133   :  { %v781_v49 = vadd.f32 %v16969_v6, %v725_v47  ;;  %v829_v50 = vmax.f32 %v780_v46, 0.0 }
 0x135   :  { %v830_v51 = vmax.f32 %v781_v49, 0.0 }
 0x136   :  { %v545_v52 = vpop.f32.mrb[16].mxu0 }
 0x137   :  { %v16999_v53 = vpack.c.bf16 %v830_v51, %v829_v50  ;;  %v726_v54 = vmul.f32 %v16964_v5, %v545_v52  ;;  %v547_v55 = vpop.f32.mrb[17].mxu0 }
 0x138   :  { %v548_v56 = vpop.f32.mrb[18].mxu0 }
 0x139   :  { %21 = vsyncpa [#allocation3], 0  ;;  %v782_v57 = vadd.f32 %v16969_v6, %v726_v54  ;;  %v727_v58 = vmul.f32 %v16964_v5, %v548_v56  ;;  %v550_v59 = vpop.f32.mrb[19].mxu0  ;;  %vm1004_vm0 = vcmask 64512   ;;  %vm1020_vm1 = vcmask 1043456  }
 0x13a   :  { %vm16663_vm2 = vmmov 0   ;;  %vm1466_vm3 = vcmask 261120   ;;  %vm7103_vm4 = vcmask 588800   ;;  %vm7277_vm5 = vcmask 523264  }
 0x13b   :  { %v783_v60 = vadd.f32 %v16969_v6, %v727_v58  ;;  %v831_v61 = vmax.f32 %v782_v57, 0.0  ;;  %vm11948_vm6 = vcmask 41984  }
 0x13d   :  { %v832_v62 = vmax.f32 %v783_v60, 0.0 }
 0x13e   :  { %v553_v63 = vpop.f32.mrb[20].mxu0 }
 0x13f   :  { %v17005_v0 = vpack.c.bf16 %v832_v62, %v831_v61  ;;  %v728_v2 = vmul.f32 %v16964_v5, %v553_v63  ;;  %v555_v3 = vpop.f32.mrb[21].mxu0 }
 0x140   :  { %v556_v4 = vpop.f32.mrb[22].mxu0 }
 0x141   :  { %v784_v7 = vadd.f32 %v16969_v6, %v728_v2  ;;  %v729_v8 = vmul.f32 %v16964_v5, %v556_v4  ;;  %v558_v9 = vpop.f32.mrb[23].mxu0 }
 0x143   :  { %v785_v10 = vadd.f32 %v16969_v6, %v729_v8  ;;  %v833_v11 = vmax.f32 %v784_v7, 0.0 }
 0x145   :  { %v834_v12 = vmax.f32 %v785_v10, 0.0 }
 0x146   :  { %v561_v13 = vpop.f32.mrb[24].mxu0 }
 0x147   :  { %v17011_v14 = vpack.c.bf16 %v834_v12, %v833_v11  ;;  %v730_v15 = vmul.f32 %v16964_v5, %v561_v13  ;;  %v563_v16 = vpop.f32.mrb[25].mxu0 }
 0x148   :  { %v564_v17 = vpop.f32.mrb[26].mxu0 }
 0x149   :  { %v786_v18 = vadd.f32 %v16969_v6, %v730_v15  ;;  %v731_v19 = vmul.f32 %v16964_v5, %v564_v17  ;;  %v566_v21 = vpop.f32.mrb[27].mxu0 }
 0x14b   :  { %v787_v22 = vadd.f32 %v16969_v6, %v731_v19  ;;  %v835_v23 = vmax.f32 %v786_v18, 0.0 }
 0x14d   :  { %v836_v24 = vmax.f32 %v787_v22, 0.0 }
 0x14e   :  { %v569_v25 = vpop.f32.mrb[28].mxu0 }
 0x14f   :  { %v17017_v26 = vpack.c.bf16 %v836_v24, %v835_v23  ;;  %v732_v27 = vmul.f32 %v16964_v5, %v569_v25  ;;  %v571_v28 = vpop.f32.mrb[29].mxu0 }
 0x150   :  { %v572_v29 = vpop.f32.mrb[30].mxu0 }
 0x151   :  { %v788_v30 = vadd.f32 %v16969_v6, %v732_v27  ;;  %v733_v32 = vmul.f32 %v16964_v5, %v572_v29  ;;  %v574_v33 = vpop.f32.mrb[31].mxu0 }
 0x153   :  { %v789_v34 = vadd.f32 %v16969_v6, %v733_v32  ;;  %v837_v35 = vmax.f32 %v788_v30, 0.0 }
 0x155   :  { %v838_v36 = vmax.f32 %v789_v34, 0.0 }
 0x156   :  { %v577_v37 = vpop.f32.mrb[32].mxu0 }
 0x157   :  { %v17023_v38 = vpack.c.bf16 %v838_v36, %v837_v35  ;;  %v734_v39 = vmul.f32 %v16964_v5, %v577_v37  ;;  %v579_v40 = vpop.f32.mrb[33].mxu0 }
 0x158   :  { %v580_v41 = vpop.f32.mrb[34].mxu0 }
 0x159   :  { %v790_v43 = vadd.f32 %v16969_v6, %v734_v39  ;;  %v735_v44 = vmul.f32 %v16964_v5, %v580_v41  ;;  %v582_v45 = vpop.f32.mrb[35].mxu0 }
 0x15b   :  { %v791_v46 = vadd.f32 %v16969_v6, %v735_v44  ;;  %v839_v47 = vmax.f32 %v790_v43, 0.0 }
 0x15d   :  { %v840_v48 = vmax.f32 %v791_v46, 0.0 }
 0x15e   :  { %v585_v49 = vpop.f32.mrb[36].mxu0 }
 0x15f   :  { %v17029_v50 = vpack.c.bf16 %v840_v48, %v839_v47  ;;  %v736_v51 = vmul.f32 %v16964_v5, %v585_v49  ;;  %v587_v52 = vpop.f32.mrb[37].mxu0 }
 0x160   :  { %v588_v54 = vpop.f32.mrb[38].mxu0 }
 0x161   :  { %v792_v55 = vadd.f32 %v16969_v6, %v736_v51  ;;  %v737_v56 = vmul.f32 %v16964_v5, %v588_v54  ;;  %v590_v57 = vpop.f32.mrb[39].mxu0  ;;  %13625 = vmatprep.subr.bf16.mxu1 %v17029_v50  ;;  %13731 = vmatprep.subr.bf16.mxu0 %v17029_v50 }
 0x162   :  { %13626 = vmatpush3.bf16.msra.mxu1 %v16981_v20  ;;  %13732 = vmatpush3.bf16.msra.mxu0 %v16981_v20 }
 0x163   :  { %v793_v58 = vadd.f32 %v16969_v6, %v737_v56  ;;  %v841_v59 = vmax.f32 %v792_v55, 0.0 }
 0x165   :  { %v842_v60 = vmax.f32 %v793_v58, 0.0 }
 0x166   :  { %v593_v61 = vpop.f32.mrb[40].mxu0 }
 0x167   :  { %v17039_v62 = vpack.c.bf16 %v842_v60, %v841_v59  ;;  %v738_v63 = vmul.f32 %v16964_v5, %v593_v61  ;;  %v595_v2 = vpop.f32.mrb[41].mxu0 }
 0x168   :  { %v596_v3 = vpop.f32.mrb[42].mxu0 }
 0x169   :  { %v794_v4 = vadd.f32 %v16969_v6, %v738_v63  ;;  %v739_v7 = vmul.f32 %v16964_v5, %v596_v3  ;;  %v598_v8 = vpop.f32.mrb[43].mxu0  ;;  %13627 = vmatprep.subr.bf16.mxu1 %v17039_v62  ;;  %13733 = vmatprep.subr.bf16.mxu0 %v17039_v62 }
 0x16a   :  { %13628 = vmatpush3.bf16.msra.mxu1 %v16987_v31  ;;  %13734 = vmatpush3.bf16.msra.mxu0 %v16987_v31 }
 0x16b   :  { %v795_v9 = vadd.f32 %v16969_v6, %v739_v7  ;;  %v843_v10 = vmax.f32 %v794_v4, 0.0 }
 0x16d   :  { %v844_v11 = vmax.f32 %v795_v9, 0.0 }
 0x16e   :  { %v601_v12 = vpop.f32.mrb[44].mxu0 }
 0x16f   :  { %v17049_v13 = vpack.c.bf16 %v844_v11, %v843_v10  ;;  %v740_v15 = vmul.f32 %v16964_v5, %v601_v12  ;;  %v603_v16 = vpop.f32.mrb[45].mxu0 }
 0x170   :  { %v604_v17 = vpop.f32.mrb[46].mxu0 }
 0x171   :  { %v796_v18 = vadd.f32 %v16969_v6, %v740_v15  ;;  %v741_v19 = vmul.f32 %v16964_v5, %v604_v17  ;;  %v606_v21 = vpop.f32.mrb[47].mxu0  ;;  %13629 = vmatprep.subr.bf16.mxu1 %v17049_v13  ;;  %13735 = vmatprep.subr.bf16.mxu0 %v17049_v13 }
 0x172   :  { %13630 = vmatpush3.bf16.msra.mxu1 %v16993_v42  ;;  %13736 = vmatpush3.bf16.msra.mxu0 %v16993_v42 }
 0x173   :  { %v797_v22 = vadd.f32 %v16969_v6, %v741_v19  ;;  %v845_v23 = vmax.f32 %v796_v18, 0.0 }
 0x175   :  { %v846_v24 = vmax.f32 %v797_v22, 0.0 }
 0x176   :  { %v609_v25 = vpop.f32.mrb[48].mxu0 }
 0x177   :  { %v17059_v27 = vpack.c.bf16 %v846_v24, %v845_v23  ;;  %v742_v28 = vmul.f32 %v16964_v5, %v609_v25  ;;  %v611_v29 = vpop.f32.mrb[49].mxu0 }
 0x178   :  { %v612_v30 = vpop.f32.mrb[50].mxu0  ;;  %v15687_v29 = vld [vmem:[%s21236_s4 + $0x120] ss:$16 sps:$4 sm:$0xff]  }
 0x179   :  { %v798_v32 = vadd.f32 %v16969_v6, %v742_v28  ;;  %v743_v33 = vmul.f32 %v16964_v5, %v612_v30  ;;  %v614_v34 = vpop.f32.mrb[51].mxu0  ;;  %13631 = vmatprep.subr.bf16.mxu1 %v17059_v27  ;;  %13737 = vmatprep.subr.bf16.mxu0 %v17059_v27  ;;  %v15690_v30 = vld [vmem:[%s21236_s4] ss:$16 sps:$4 sm:$0xff]  }
 0x17a   :  { %13632 = vmatpush3.bf16.msra.mxu1 %v16999_v53  ;;  %13738 = vmatpush3.bf16.msra.mxu0 %v16999_v53  ;;  %v15704_v34 = vld [vmem:[%s21236_s4 + $0x24] ss:$16 sps:$4 sm:$0xff]  }
 0x17b   :  { %v799_v35 = vadd.f32 %v16969_v6, %v743_v33  ;;  %v847_v36 = vmax.f32 %v798_v32, 0.0  ;;  %v15693_v32 = vld [vmem:[%s21236_s4 + $0x144] ss:$16 sps:$4 sm:$0xff]  }
 0x17d   :  { %v848_v37 = vmax.f32 %v799_v35, 0.0 }
 0x17e   :  { %v617_v39 = vpop.f32.mrb[52].mxu0 }
 0x17f   :  { %v17069_v40 = vpack.c.bf16 %v848_v37, %v847_v36  ;;  %v744_v41 = vmul.f32 %v16964_v5, %v617_v39  ;;  %v619_v43 = vpop.f32.mrb[53].mxu0 }
 0x180   :  { %v620_v44 = vpop.f32.mrb[54].mxu0 }
 0x181   :  { %v800_v45 = vadd.f32 %v16969_v6, %v744_v41  ;;  %v745_v46 = vmul.f32 %v16964_v5, %v620_v44  ;;  %v622_v47 = vpop.f32.mrb[55].mxu0  ;;  %13633 = vmatprep.subr.bf16.mxu1 %v17069_v40  ;;  %13739 = vmatprep.subr.bf16.mxu0 %v17069_v40 }
 0x182   :  { %13634 = vmatpush3.bf16.msra.mxu1 %v17005_v0  ;;  %13740 = vmatpush3.bf16.msra.mxu0 %v17005_v0 }
 0x183   :  { %v801_v48 = vadd.f32 %v16969_v6, %v745_v46  ;;  %v849_v49 = vmax.f32 %v800_v45, 0.0 }
 0x185   :  { %v850_v51 = vmax.f32 %v801_v48, 0.0  ;;  %v15695_v48 = vld [vmem:[%s21236_s4 + $0x140] ss:$16 sps:$4 sm:$0xff]  }
 0x186   :  { %v625_v52 = vpop.f32.mrb[56].mxu0 }
 0x187   :  { %v17079_v54 = vpack.c.bf16 %v850_v51, %v849_v49  ;;  %v746_v55 = vmul.f32 %v16964_v5, %v625_v52  ;;  %v627_v56 = vpop.f32.mrb[57].mxu0  ;;  %v15706_v49 = vld [vmem:[%s21236_s4 + $0x20] ss:$16 sps:$4 sm:$0xff]   ;;  %v15696_v51 = vld [vmem:[%s21236_s4 + $0x164] ss:$16 sps:$4 sm:$0xff]  }
 0x188   :  { %v628_v57 = vpop.f32.mrb[58].mxu0 }
 0x189   :  { %v802_v58 = vadd.f32 %v16969_v6, %v746_v55  ;;  %v747_v59 = vmul.f32 %v16964_v5, %v628_v57  ;;  %v630_v60 = vpop.f32.mrb[59].mxu0  ;;  %13635 = vmatprep.subr.bf16.mxu1 %v17079_v54  ;;  %13741 = vmatprep.subr.bf16.mxu0 %v17079_v54  ;;  %v15710_v55 = vld [vmem:[%s21236_s4 + $0x44] ss:$16 sps:$4 sm:$0xff]  }
 0x18a   :  { %13636 = vmatpush3.bf16.msra.mxu1 %v17011_v14  ;;  %13742 = vmatpush3.bf16.msra.mxu0 %v17011_v14 }
 0x18b   :  { %v803_v61 = vadd.f32 %v16969_v6, %v747_v59  ;;  %v851_v63 = vmax.f32 %v802_v58, 0.0 }
 0x18d   :  { %v852_v2 = vmax.f32 %v803_v61, 0.0 }
 0x18e   :  { %v633_v3 = vpop.f32.mrb[60].mxu0 }
 0x18f   :  { %v17089_v4 = vpack.c.bf16 %v852_v2, %v851_v63  ;;  %v748_v7 = vmul.f32 %v16964_v5, %v633_v3  ;;  %v635_v8 = vpop.f32.mrb[61].mxu0 }
 0x190   :  { %v636_v9 = vpop.f32.mrb[62].mxu0  ;;  %v15698_v8 = vld [vmem:[%s21236_s4 + $0x160] ss:$16 sps:$4 sm:$0xff]  }
 0x191   :  { %v804_v10 = vadd.f32 %v16969_v6, %v748_v7  ;;  %v749_v11 = vmul.f32 %v16964_v5, %v636_v9  ;;  %v638_v12 = vpop.f32.mrb[63].mxu0  ;;  %13637 = vmatprep.subr.bf16.mxu1 %v17089_v4  ;;  %13743 = vmatprep.subr.bf16.mxu0 %v17089_v4  ;;  %v15712_v9 = vld [vmem:[%s21236_s4 + $0x40] ss:$16 sps:$4 sm:$0xff]  }
 0x192   :  { %13638 = vmatpush3.bf16.msra.mxu1 %v17017_v26  ;;  %13744 = vmatpush3.bf16.msra.mxu0 %v17017_v26  ;;  %v15716_v12 = vld [vmem:[%s21236_s4 + $0x64] ss:$16 sps:$4 sm:$0xff]  }
 0x193   :  { %v805_v15 = vadd.f32 %v16969_v6, %v749_v11  ;;  %v853_v16 = vmax.f32 %v804_v10, 0.0  ;;  %v15699_v10 = vld [vmem:[%s21236_s4 + $0x184] ss:$16 sps:$4 sm:$0xff]  }
 0x195   :  { %v854_v17 = vmax.f32 %v805_v15, 0.0 }
 0x196   :  { %v641_v18 = vpop.f32.mrb[64].mxu0 }
 0x197   :  { %v17099_v19 = vpack.c.bf16 %v854_v17, %v853_v16  ;;  %v750_v21 = vmul.f32 %v16964_v5, %v641_v18  ;;  %v643_v22 = vpop.f32.mrb[65].mxu0 }
 0x198   :  { %v644_v23 = vpop.f32.mrb[66].mxu0 }
 0x199   :  { %v806_v24 = vadd.f32 %v16969_v6, %v750_v21  ;;  %v751_v25 = vmul.f32 %v16964_v5, %v644_v23  ;;  %v646_v28 = vpop.f32.mrb[67].mxu0  ;;  %13639 = vmatprep.subr.bf16.mxu1 %v17099_v19  ;;  %13745 = vmatprep.subr.bf16.mxu0 %v17099_v19  ;;  %v12134_v23 = vld [vmem:[%s21236_s4 + $0x1a0] sm:$0xff] }
 0x19a   :  { %13640 = vmatpush3.bf16.msra.mxu1 %v17023_v38  ;;  %13746 = vmatpush3.bf16.msra.mxu0 %v17023_v38 }
 0x19b   :  { %v807_v33 = vadd.f32 %v16969_v6, %v751_v25  ;;  %13784 = vmatprep.subr.bf16.mxu0 %v17029_v50  ;;  %1096 = vmatprep.subr.bf16.mxu1 %v21252_v1  ;;  %v855_v35 = vmax.f32 %v806_v24, 0.0  ;;  %v913_v25 = vld [vmem:[%s21236_s4 + $0x80] sm:$0xff] }
 0x19d   :  { %v856_v36 = vmax.f32 %v807_v33, 0.0  ;;  %1809 = vmatmul.mubr.bf16.vlgmr.msra.gmra.mrb[100].mxu0 %v15687_v29  ;;  %1057 = vmatmul.mubr.bf16.vlgmr.msra.gmra.mrb[0].mxu1 %v15690_v30  ;;  %v15718_v33 = vld [vmem:[%s21236_s4 + $0x60] ss:$16 sps:$4 sm:$0xff]  }
 0x19e   :  { %v649_v37 = vpop.f32.mrb[68].mxu0  ;;  %13785 = vmatpush3.bf16.msra.mxu0 %v16981_v20  ;;  %1816 = vmatprep.mubr.bf16.mxu0 %v15693_v32  ;;  %v15701_v32 = vld [vmem:[%s21236_s4 + $0x180] ss:$16 sps:$4 sm:$0xff]  }
 0x19f   :  { %v17124_v39 = vpack.c.bf16 %v856_v36, %v855_v35  ;;  %v752_v41 = vmul.f32 %v16964_v5, %v649_v37  ;;  %v651_v43 = vpop.f32.mrb[69].mxu0  ;;  %13786 = vmatprep.subr.bf16.mxu0 %v17039_v62  ;;  %1064 = vmatprep.mubr.bf16.mxu1 %v15704_v34  ;;  %v12153_v34 = vcombine.high %v12134_v23, %v12134_v23 }
 0x1a0   :  { %v652_v44 = vpop.f32.mrb[70].mxu0  ;;  %v12049_v36 = vcombine.high %v913_v25, %v913_v25 }
 0x1a1   :  { %v808_v45 = vadd.f32 %v16969_v6, %v752_v41  ;;  %v753_v46 = vmul.f32 %v16964_v5, %v652_v44  ;;  %v654_v47 = vpop.f32.mrb[71].mxu0  ;;  %1097 = vmatpush1.bf16.msra.mxu1 %v17124_v39 }
 0x1a2   :  { %13787 = vmatpush3.bf16.msra.mxu0 %v16987_v31  ;;  %1098 = vmatprep.subr.bf16.mxu1 %v21252_v1 }
 0x1a3   :  { %v809_v52 = vadd.f32 %v16969_v6, %v753_v46  ;;  %13788 = vmatprep.subr.bf16.mxu0 %v17049_v13  ;;  %v857_v56 = vmax.f32 %v808_v45, 0.0 }
 0x1a5   :  { %v858_v57 = vmax.f32 %v809_v52, 0.0  ;;  %1817 = vmatmul.mubr.bf16.gmra.mrb[104].mxu0 %v15695_v48  ;;  %1065 = vmatmul.mubr.bf16.gmra.mrb[4].mxu1 %v15706_v49  ;;  %v12152_v52 = vcombine.low %v12134_v23, %v12134_v23 }
 0x1a6   :  { %v657_v58 = vpop.f32.mrb[72].mxu0  ;;  %13789 = vmatpush3.bf16.msra.mxu0 %v16993_v42  ;;  %1824 = vmatprep.mubr.bf16.mxu0 %v15696_v51 }
 0x1a7   :  { %v17148_v59 = vpack.c.bf16 %v858_v57, %v857_v56  ;;  %v754_v60 = vmul.f32 %v16964_v5, %v657_v58  ;;  %v659_v61 = vpop.f32.mrb[73].mxu0  ;;  %13790 = vmatprep.subr.bf16.mxu0 %v17059_v27  ;;  %1072 = vmatprep.mubr.bf16.mxu1 %v15710_v55  ;;  %v12048_v55 = vcombine.low %v913_v25, %v913_v25  ;;  %v15709_v56 = vld [vmem:[%s21236_s4 + $0x1b4] ss:$16 sps:$4 sm:$0xff]   ;;  %v15729_v57 = vld [vmem:[%s21236_s4 + $0xc] ss:$16 sps:$4 sm:$0xff]  }
 0x1a8   :  { %v660_v63 = vpop.f32.mrb[74].mxu0 }
 0x1a9   :  { %v810_v2 = vadd.f32 %v16969_v6, %v754_v60  ;;  %v755_v3 = vmul.f32 %v16964_v5, %v660_v63  ;;  %v662_v7 = vpop.f32.mrb[75].mxu0  ;;  %1099 = vmatpush1.bf16.msra.mxu1 %v17148_v59 }
 0x1aa   :  { %13791 = vmatpush3.bf16.msra.mxu0 %v16999_v53  ;;  %1100 = vmatprep.subr.bf16.mxu1 %v21252_v1 }
 0x1ab   :  { %v811_v11 = vadd.f32 %v16969_v6, %v755_v3  ;;  %13792 = vmatprep.subr.bf16.mxu0 %v17069_v40  ;;  %v859_v15 = vmax.f32 %v810_v2, 0.0 }
 0x1ad   :  { %v860_v16 = vmax.f32 %v811_v11, 0.0  ;;  %1825 = vmatmul.mubr.bf16.gmra.mrb[108].mxu0 %v15698_v8  ;;  %1073 = vmatmul.mubr.bf16.gmra.mrb[8].mxu1 %v15712_v9 }
 0x1ae   :  { %v665_v17 = vpop.f32.mrb[76].mxu0  ;;  %13793 = vmatpush3.bf16.msra.mxu0 %v17005_v0  ;;  %1832 = vmatprep.mubr.bf16.mxu0 %v15699_v10 }
 0x1af   :  { %v17172_v18 = vpack.c.bf16 %v860_v16, %v859_v15  ;;  %v756_v21 = vmul.f32 %v16964_v5, %v665_v17  ;;  %v667_v22 = vpop.f32.mrb[77].mxu0  ;;  %13794 = vmatprep.subr.bf16.mxu0 %v17079_v54  ;;  %1080 = vmatprep.mubr.bf16.mxu1 %v15716_v12  ;;  %v15707_v12 = vld [vmem:[%s21236_s4 + $0x1b0] ss:$16 sps:$4 sm:$0xff]   ;;  %v15713_v15 = vld [vmem:[%s21236_s4 + $0x1d4] ss:$16 sps:$4 sm:$0xff]  }
 0x1b0   :  { %v668_v24 = vpop.f32.mrb[78].mxu0 }
 0x1b1   :  { %v812_v28 = vadd.f32 %v16969_v6, %v756_v21  ;;  %v757_v29 = vmul.f32 %v16964_v5, %v668_v24  ;;  %v670_v30 = vpop.f32.mrb[79].mxu0  ;;  %1101 = vmatpush1.bf16.msra.mxu1 %v17172_v18 }
 0x1b2   :  { %13795 = vmatpush3.bf16.msra.mxu0 %v17011_v14  ;;  %1102 = vmatprep.subr.bf16.mxu1 %v21252_v1 }
 0x1b3   :  { %v813_v35 = vadd.f32 %v16969_v6, %v757_v29  ;;  %13796 = vmatprep.subr.bf16.mxu0 %v17089_v4  ;;  %v861_v37 = vmax.f32 %v812_v28, 0.0 }
 0x1b5   :  { %v862_v41 = vmax.f32 %v813_v35, 0.0  ;;  %1833 = vmatmul.mubr.bf16.gmra.mrb[112].mxu0 %v15701_v32  ;;  %1081 = vmatmul.mubr.bf16.gmra.mrb[12].mxu1 %v15718_v33  ;;  %v15715_v33 = vld [vmem:[%s21236_s4 + $0x1d0] ss:$16 sps:$4 sm:$0xff]  }
 0x1b6   :  { %v673_v43 = vpop.f32.mrb[80].mxu0  ;;  %13797 = vmatpush3.bf16.msra.mxu0 %v17017_v26  ;;  %1840 = vmatprep.mubr.bf16.mxu0 %v12153_v34  ;;  %v15719_v34 = vld [vmem:[%s21236_s4 + $0x1f4] ss:$16 sps:$4 sm:$0xff]  }
 0x1b7   :  { %v17196_v44 = vpack.c.bf16 %v862_v41, %v861_v37  ;;  %v758_v45 = vmul.f32 %v16964_v5, %v673_v43  ;;  %v675_v46 = vpop.f32.mrb[81].mxu0  ;;  %13798 = vmatprep.subr.bf16.mxu0 %v17099_v19  ;;  %1088 = vmatprep.mubr.bf16.mxu1 %v12049_v36 }
 0x1b8   :  { %v676_v47 = vpop.f32.mrb[82].mxu0 }
 0x1b9   :  { %v814_v48 = vadd.f32 %v16969_v6, %v758_v45  ;;  %v759_v49 = vmul.f32 %v16964_v5, %v676_v47  ;;  %v678_v51 = vpop.f32.mrb[83].mxu0  ;;  %1103 = vmatpush1.bf16.msra.mxu1 %v17196_v44 }
 0x1ba   :  { %13799 = vmatpush3.bf16.msra.mxu0 %v17023_v38  ;;  %1104 = vmatprep.subr.bf16.mxu1 %v21252_v1 }
 0x1bb   :  { %v815_v58 = vadd.f32 %v16969_v6, %v759_v49  ;;  %2233 = vmatprep.subr.bf16.mxu0 %v21252_v1  ;;  %v863_v60 = vmax.f32 %v814_v48, 0.0 }
 0x1bd   :  { %v864_v61 = vmax.f32 %v815_v58, 0.0  ;;  %1841 = vmatmul.mubr.bf16.gmra.mrb[116].mxu0 %v12152_v52  ;;  %1089 = vmatmul.mubr.bf16.gmra.mrb[16].mxu1 %v12048_v55  ;;  %v15721_v52 = vld [vmem:[%s21236_s4 + $0x1f0] ss:$16 sps:$4 sm:$0xff]   ;;  %v15724_v55 = vld [vmem:[%s21236_s4 + $0x214] ss:$16 sps:$4 sm:$0xff]  }
 0x1be   :  { %v681_v63 = vpop.f32.mrb[84].mxu0  ;;  %2193 = vmatprep.mubr.bf16.mxu0 %v15709_v56  ;;  %12052 = vmatprep.mubr.msk.bf16.mxu1 %vm1004_vm0, %v15729_v57 }
 0x1bf   :  { %v17214_v2 = vpack.c.bf16 %v864_v61, %v863_v60  ;;  %v760_v3 = vmul.f32 %v16964_v5, %v681_v63  ;;  %v683_v7 = vpop.f32.mrb[85].mxu0 }
 0x1c0   :  { %v684_v8 = vpop.f32.mrb[86].mxu0  ;;  %v12188_v7 = vld [vmem:[%s21236_s4 + $0x230] sm:$0xff] }
 0x1c1   :  { %v816_v9 = vadd.f32 %v16969_v6, %v760_v3  ;;  %v761_v10 = vmul.f32 %v16964_v5, %v684_v8  ;;  %v686_v11 = vpop.f32.mrb[87].mxu0  ;;  %1105 = vmatpush1.bf16.msra.mxu1 %v17214_v2 }
 0x1c2   :  { %1106 = vmatprep.subr.bf16.mxu1 %v21252_v1  ;;  %v15726_v11 = vld [vmem:[%s21236_s4 + $0x210] ss:$16 sps:$4 sm:$0xff]  }
 0x1c3   :  { %v817_v16 = vadd.f32 %v16969_v6, %v761_v10  ;;  %v865_v17 = vmax.f32 %v816_v9, 0.0 }
 0x1c5   :  { %v866_v21 = vmax.f32 %v817_v16, 0.0  ;;  %2194 = vmatmul.mubr.bf16.vlgmr.msra.gmra.mrb[120].mxu0 %v15707_v12  ;;  %v15727_v16 = vld [vmem:[%s21236_s4 + $0x8] ss:$16 sps:$4 sm:$0xff]  }
 0x1c6   :  { %2234 = vmatpush1.bf16.msra.mxu0 %v17124_v39  ;;  %v689_v22 = vpop.f32.mrb[88].mxu0  ;;  %2201 = vmatprep.mubr.bf16.mxu0 %v15713_v15 }
 0x1c7   :  { %v17229_v23 = vpack.c.bf16 %v866_v21, %v865_v17  ;;  %v762_v24 = vmul.f32 %v16964_v5, %v689_v22  ;;  %v691_v25 = vpop.f32.mrb[89].mxu0  ;;  %2235 = vmatprep.subr.bf16.mxu0 %v21252_v1  ;;  %v15732_v17 = vld [vmem:[%s21236_s4 + $0x2c] ss:$16 sps:$4 sm:$0xff]   ;;  %v12206_v21 = vcombine.low %v12188_v7, %v12188_v7 }
 0x1c8   :  { %v692_v28 = vpop.f32.mrb[90].mxu0  ;;  %v15737_v22 = vld [vmem:[%s21236_s4 + $0x1bc] ss:$16 sps:$4 sm:$0xff]  }
 0x1c9   :  { %v818_v29 = vadd.f32 %v16969_v6, %v762_v24  ;;  %v763_v30 = vmul.f32 %v16964_v5, %v692_v28  ;;  %v694_v32 = vpop.f32.mrb[91].mxu0  ;;  %1107 = vmatpush1.bf16.msra.mxu1 %v17229_v23  ;;  %v15734_v24 = vld [vmem:[%s21236_s4 + $0x28] ss:$16 sps:$4 sm:$0xff]   ;;  %v15738_v25 = vld [vmem:[%s21236_s4 + $0x4c] ss:$16 sps:$4 sm:$0xff]  }
 0x1ca   :  { %2236 = vmatpush1.bf16.msra.mxu0 %v17148_v59  ;;  %1108 = vmatprep.subr.bf16.mxu1 %v21252_v1  ;;  %v15735_v28 = vld [vmem:[%s21236_s4 + $0x1b8] ss:$16 sps:$4 sm:$0xff]   ;;  %v15744_v32 = vld [vmem:[%s21236_s4 + $0x6c] ss:$16 sps:$4 sm:$0xff]  }
 0x1cb   :  { %v819_v35 = vadd.f32 %v16969_v6, %v763_v30  ;;  %2237 = vmatprep.subr.bf16.mxu0 %v21252_v1  ;;  %v867_v36 = vmax.f32 %v818_v29, 0.0  ;;  %v15741_v29 = vld [vmem:[%s21236_s4 + $0x1dc] ss:$16 sps:$4 sm:$0xff]   ;;  %v15740_v30 = vld [vmem:[%s21236_s4 + $0x48] ss:$16 sps:$4 sm:$0xff]  }
 0x1cd   :  { %v868_v37 = vmax.f32 %v819_v35, 0.0  ;;  %2202 = vmatmul.mubr.bf16.gmra.mrb[124].mxu0 %v15715_v33  ;;  %v15743_v33 = vld [vmem:[%s21236_s4 + $0x1d8] ss:$16 sps:$4 sm:$0xff]  }
 0x1ce   :  { %2238 = vmatpush1.bf16.msra.mxu0 %v17172_v18  ;;  %v697_v41 = vpop.f32.mrb[92].mxu0  ;;  %2209 = vmatprep.mubr.bf16.mxu0 %v15719_v34  ;;  %v15747_v34 = vld [vmem:[%s21236_s4 + $0x1fc] ss:$16 sps:$4 sm:$0xff]  }
 0x1cf   :  { %v17247_v43 = vpack.c.bf16 %v868_v37, %v867_v36  ;;  %v764_v45 = vmul.f32 %v16964_v5, %v697_v41  ;;  %v699_v46 = vpop.f32.mrb[93].mxu0  ;;  %2239 = vmatprep.subr.bf16.mxu0 %v21252_v1  ;;  %v914_v35 = vld [vmem:[%s21236_s4 + $0x88] sm:$0xff] }
 0x1d0   :  { %v700_v47 = vpop.f32.mrb[94].mxu0  ;;  %v15746_v36 = vld [vmem:[%s21236_s4 + $0x68] ss:$16 sps:$4 sm:$0xff]   ;;  %v12051_v37 = vcombine.high %v914_v35, %v914_v35  ;;  %v12050_v46 = vcombine.low %v914_v35, %v914_v35  ;;  %v15791_v35 = vld [vmem:[%s21236_s4 + $0x2d0] ss:$16 sps:$4 sm:$0xff]  }
 0x1d1   :  { %v820_v48 = vadd.f32 %v16969_v6, %v764_v45  ;;  %v765_v49 = vmul.f32 %v16964_v5, %v700_v47  ;;  %v702_v51 = vpop.f32.mrb[95].mxu0  ;;  %1109 = vmatpush1.bf16.msra.mxu1 %v17247_v43  ;;  %v15749_v41 = vld [vmem:[%s21236_s4 + $0x1f8] ss:$16 sps:$4 sm:$0xff]   ;;  %v15752_v45 = vld [vmem:[%s21236_s4 + $0x21c] ss:$16 sps:$4 sm:$0xff]  }
 0x1d2   :  { %2240 = vmatpush1.bf16.msra.mxu0 %v17196_v44  ;;  %1110 = vmatprep.subr.bf16.mxu1 %v21252_v1  ;;  %v12189_v47 = vld [vmem:[%s21236_s4 + $0x238] sm:$0xff] }
 0x1d3   :  { %v821_v56 = vadd.f32 %v16969_v6, %v765_v49  ;;  %2241 = vmatprep.subr.bf16.mxu0 %v21252_v1  ;;  %v869_v57 = vmax.f32 %v820_v48, 0.0  ;;  %v15757_v48 = vld [vmem:[%s21236_s4 + $0x94] ss:$16 sps:$4 sm:$0xff]   ;;  %v15754_v49 = vld [vmem:[%s21236_s4 + $0x218] ss:$16 sps:$4 sm:$0xff]   ;;  %v12209_v51 = vcombine.high %v12189_v47, %v12189_v47 }
 0x1d5   :  { %v870_v58 = vmax.f32 %v821_v56, 0.0  ;;  %2210 = vmatmul.mubr.bf16.gmra.mrb[128].mxu0 %v15721_v52  ;;  %v15755_v52 = vld [vmem:[%s21236_s4 + $0x90] ss:$16 sps:$4 sm:$0xff]   ;;  %v12208_v56 = vcombine.low %v12189_v47, %v12189_v47  ;;  %v12074_v47 = vld [vmem:[%s21236_s4 + $0x118] sm:$0xff] }
 0x1d6   :  { %2242 = vmatpush1.bf16.msra.mxu0 %v17214_v2  ;;  %v705_v60 = vpop.f32.mrb[96].mxu0  ;;  %2217 = vmatprep.mubr.bf16.mxu0 %v15724_v55  ;;  %v15760_v55 = vld [vmem:[%s21236_s4 + $0xb4] ss:$16 sps:$4 sm:$0xff]  }
 0x1d7   :  { %v17265_v61 = vpack.c.bf16 %v870_v58, %v869_v57  ;;  %v766_v63 = vmul.f32 %v16964_v5, %v705_v60  ;;  %v707_v3 = vpop.f32.mrb[97].mxu0  ;;  %2243 = vmatprep.subr.bf16.mxu0 %v21252_v1  ;;  %v12207_v5 = vcombine.high %v12188_v7, %v12188_v7  ;;  %v15765_v57 = vld [vmem:[%s21236_s4 + $0x244] ss:$16 sps:$4 sm:$0xff]   ;;  %v15762_v58 = vld [vmem:[%s21236_s4 + $0xb0] ss:$16 sps:$4 sm:$0xff]  }
 0x1d8   :  { %v708_v8 = vpop.f32.mrb[98].mxu0  ;;  %v15766_v60 = vld [vmem:[%s21236_s4 + $0xd4] ss:$16 sps:$4 sm:$0xff]   ;;  %v15768_v7 = vld [vmem:[%s21236_s4 + $0xd0] ss:$16 sps:$4 sm:$0xff]  }
 0x1d9   :  { %v822_v9 = vadd.f32 %v16969_v6, %v766_v63  ;;  %v709_v10 = vpop.f32.mrb[99].mxu0  ;;  %1111 = vmatpush1.bf16.msra.mxu1 %v17265_v61  ;;  %v15763_v63 = vld [vmem:[%s21236_s4 + $0x240] ss:$16 sps:$4 sm:$0xff]   ;;  %v15769_v3 = vld [vmem:[%s21236_s4 + $0x264] ss:$16 sps:$4 sm:$0xff]  }
 0x1da   :  { %2244 = vmatpush1.bf16.msra.mxu0 %v17229_v23  ;;  %1112 = vmatprep.subr.bf16.mxu1 %v21252_v1  ;;  %v15772_v8 = vld [vmem:[%s21236_s4 + $0xf4] ss:$16 sps:$4 sm:$0xff]  }
 0x1db   :  { %v871_v12 = vmax.f32 %v822_v9, 0.0  ;;  %2245 = vmatprep.subr.bf16.mxu0 %v21252_v1  ;;  %v15771_v9 = vld [vmem:[%s21236_s4 + $0x260] ss:$16 sps:$4 sm:$0xff]   ;;  %v15775_v10 = vld [vmem:[%s21236_s4 + $0x284] ss:$16 sps:$4 sm:$0xff]  }
 0x1dd   :  { %v896_v15 = vpack.c.bf16 %v871_v12, %v871_v12  ;;  %2218 = vmatmul.mubr.bf16.gmra.mrb[132].mxu0 %v15726_v11  ;;  %v12073_v11 = vld [vmem:[%s21236_s4 + $0x110] sm:$0xff] }
 0x1de   :  { %2246 = vmatpush1.bf16.msra.mxu0 %v17247_v43  ;;  %2225 = vmatprep.mubr.bf16.mxu0 %v12207_v5  ;;  %v15774_v5 = vld [vmem:[%s21236_s4 + $0xf0] ss:$16 sps:$4 sm:$0xff]   ;;  %v12092_v12 = vcombine.high %v12073_v11, %v12073_v11 }
 0x1df   :  { %v17282_v6 = vsel %vm1020_vm1, %v896_v15, 0  ;;  %2247 = vmatprep.subr.bf16.mxu0 %v21252_v1  ;;  %v15777_v15 = vld [vmem:[%s21236_s4 + $0x280] ss:$16 sps:$4 sm:$0xff]  }
 0x1e0   :  { %1113 = vmatpush1.bf16.msra.mxu1 %v17282_v6 }
 0x1e1   :  { %13671 = vmatprep.subr.bf16.mxu1 %v17029_v50 }
 0x1e2   :  { %2248 = vmatpush1.bf16.msra.mxu0 %v17265_v61 }
 0x1e3   :  { %1129 = vmatmul.mubr.bf16.vlgmr.msra.gmra.mrb[20].mxu1 %v15727_v16  ;;  %2249 = vmatprep.subr.bf16.mxu0 %v21252_v1  ;;  %v15780_v16 = vld [vmem:[%s21236_s4 + $0x2a4] ss:$16 sps:$4 sm:$0xff]  }
 0x1e4   :  { %13672 = vmatpush3.bf16.msra.mxu1 %v16981_v20  ;;  %12053 = vmatprep.mubr.msk.bf16.mxu1 %vm1004_vm0, %v15732_v17  ;;  %v12091_v17 = vcombine.low %v12073_v11, %v12073_v11  ;;  %v15861_v11 = vld [vmem:[%s21237_s5 + $0x10] sm:$0xff]  }
 0x1e5   :  { %13673 = vmatprep.subr.bf16.mxu1 %v17039_v62  ;;  %2226 = vmatmul.mubr.bf16.gmra.mrb[136].mxu0 %v12206_v21  ;;  %v12242_v21 = vld [vmem:[%s21236_s4 + $0x2c0] sm:$0xff] }
 0x1e6   :  { %2250 = vmatpush1.bf16.msra.mxu0 %v17282_v6  ;;  %12210 = vmatprep.mubr.msk.bf16.mxu0 %vm1004_vm0, %v15737_v22  ;;  %v15785_v22 = vld [vmem:[%s21236_s4 + $0x9c] ss:$16 sps:$4 sm:$0xff]  }
 0x1e7   :  { %13837 = vmatprep.subr.bf16.mxu0 %v17029_v50 }
 0x1e8   :  { %13674 = vmatpush3.bf16.msra.mxu1 %v16987_v31 }
 0x1e9   :  { %13675 = vmatprep.subr.bf16.mxu1 %v17049_v13 }
 0x1eb   :  { %1137 = vmatmul.mubr.bf16.gmra.mrb[24].mxu1 %v15734_v24  ;;  %v15782_v24 = vld [vmem:[%s21236_s4 + $0x2a0] ss:$16 sps:$4 sm:$0xff]  }
 0x1ec   :  { %13676 = vmatpush3.bf16.msra.mxu1 %v16993_v42  ;;  %12054 = vmatprep.mubr.msk.bf16.mxu1 %vm1004_vm0, %v15738_v25  ;;  %v12261_v25 = vcombine.high %v12242_v21, %v12242_v21 }
 0x1ed   :  { %13677 = vmatprep.subr.bf16.mxu1 %v17059_v27  ;;  %2266 = vmatmul.mubr.bf16.vlgmr.msra.gmra.mrb[140].mxu0 %v15735_v28  ;;  %v15783_v28 = vld [vmem:[%s21236_s4 + $0x98] ss:$16 sps:$4 sm:$0xff]  }
 0x1ee   :  { %13838 = vmatpush3.bf16.msra.mxu0 %v16981_v20  ;;  %12211 = vmatprep.mubr.msk.bf16.mxu0 %vm1004_vm0, %v15741_v29  ;;  %v15788_v29 = vld [vmem:[%s21236_s4 + $0xbc] ss:$16 sps:$4 sm:$0xff]  }
 0x1ef   :  { %13839 = vmatprep.subr.bf16.mxu0 %v17039_v62 }
 0x1f0   :  { %13678 = vmatpush3.bf16.msra.mxu1 %v16999_v53 }
 0x1f1   :  { %13679 = vmatprep.subr.bf16.mxu1 %v17069_v40 }
 0x1f2   :  { %13840 = vmatpush3.bf16.msra.mxu0 %v16987_v31 }
 0x1f3   :  { %13841 = vmatprep.subr.bf16.mxu0 %v17049_v13  ;;  %1145 = vmatmul.mubr.bf16.gmra.mrb[28].mxu1 %v15740_v30  ;;  %v12260_v30 = vcombine.low %v12242_v21, %v12242_v21 }
 0x1f4   :  { %13680 = vmatpush3.bf16.msra.mxu1 %v17005_v0  ;;  %12055 = vmatprep.mubr.msk.bf16.mxu1 %vm1004_vm0, %v15744_v32  ;;  %v15793_v32 = vld [vmem:[%s21236_s4 + $0x2d4] ss:$16 sps:$4 sm:$0xff]  }
 0x1f5   :  { %13681 = vmatprep.subr.bf16.mxu1 %v17079_v54  ;;  %2274 = vmatmul.mubr.bf16.gmra.mrb[144].mxu0 %v15743_v33  ;;  %v15790_v33 = vld [vmem:[%s21236_s4 + $0xb8] ss:$16 sps:$4 sm:$0xff]  }
 0x1f6   :  { %13842 = vmatpush3.bf16.msra.mxu0 %v16993_v42  ;;  %12212 = vmatprep.mubr.msk.bf16.mxu0 %vm1004_vm0, %v15747_v34  ;;  %v15794_v34 = vld [vmem:[%s21236_s4 + $0xdc] ss:$16 sps:$4 sm:$0xff]  }
 0x1f7   :  { %13843 = vmatprep.subr.bf16.mxu0 %v17059_v27 }
 0x1f8   :  { %13682 = vmatpush3.bf16.msra.mxu1 %v17011_v14 }
 0x1f9   :  { %13683 = vmatprep.subr.bf16.mxu1 %v17089_v4 }
 0x1fa   :  { %13844 = vmatpush3.bf16.msra.mxu0 %v16999_v53 }
 0x1fb   :  { %13845 = vmatprep.subr.bf16.mxu0 %v17069_v40  ;;  %1153 = vmatmul.mubr.bf16.gmra.mrb[32].mxu1 %v15746_v36  ;;  %v15797_v36 = vld [vmem:[%s21236_s4 + $0x2f4] ss:$16 sps:$4 sm:$0xff]  }
 0x1fc   :  { %13684 = vmatpush3.bf16.msra.mxu1 %v17017_v26  ;;  %12056 = vmatprep.mubr.msk.bf16.mxu1 %vm1004_vm0, %v12051_v37  ;;  %v15796_v37 = vld [vmem:[%s21236_s4 + $0xd8] ss:$16 sps:$4 sm:$0xff]  }
 0x1fd   :  { %13685 = vmatprep.subr.bf16.mxu1 %v17099_v19  ;;  %2282 = vmatmul.mubr.bf16.gmra.mrb[148].mxu0 %v15749_v41  ;;  %v15800_v41 = vld [vmem:[%s21236_s4 + $0xfc] ss:$16 sps:$4 sm:$0xff]  }
 0x1fe   :  { %13846 = vmatpush3.bf16.msra.mxu0 %v17005_v0  ;;  %12213 = vmatprep.mubr.msk.bf16.mxu0 %vm1004_vm0, %v15752_v45  ;;  %v15799_v45 = vld [vmem:[%s21236_s4 + $0x2f0] ss:$16 sps:$4 sm:$0xff]  }
 0x1ff   :  { %13847 = vmatprep.subr.bf16.mxu0 %v17079_v54 }
 0x200   :  { %13686 = vmatpush3.bf16.msra.mxu1 %v17023_v38 }
 0x201   :  { %1372 = vmatprep.subr.bf16.mxu1 %v21252_v1 }
 0x202   :  { %13848 = vmatpush3.bf16.msra.mxu0 %v17011_v14 }
 0x203   :  { %13849 = vmatprep.subr.bf16.mxu0 %v17089_v4  ;;  %1161 = vmatmul.mubr.bf16.gmra.mrb[36].mxu1 %v12050_v46  ;;  %v15803_v46 = vld [vmem:[%s21236_s4 + $0x314] ss:$16 sps:$4 sm:$0xff]  }
 0x204   :  { %1332 = vmatprep.mubr.bf16.mxu1 %v15757_v48  ;;  %v15802_v48 = vld [vmem:[%s21236_s4 + $0xf8] ss:$16 sps:$4 sm:$0xff]  }
 0x205   :  { %2290 = vmatmul.mubr.bf16.gmra.mrb[152].mxu0 %v15754_v49  ;;  %v12094_v49 = vcombine.high %v12074_v47, %v12074_v47 }
 0x206   :  { %13850 = vmatpush3.bf16.msra.mxu0 %v17017_v26  ;;  %12214 = vmatprep.mubr.msk.bf16.mxu0 %vm1004_vm0, %v12209_v51  ;;  %v15805_v51 = vld [vmem:[%s21236_s4 + $0x310] ss:$16 sps:$4 sm:$0xff]  }
 0x207   :  { %13851 = vmatprep.subr.bf16.mxu0 %v17099_v19 }
 0x20a   :  { %13852 = vmatpush3.bf16.msra.mxu0 %v17023_v38 }
 0x20b   :  { %13890 = vmatprep.subr.bf16.mxu0 %v17029_v50  ;;  %1333 = vmatmul.mubr.bf16.vlgmr.msra.gmra.mrb[40].mxu1 %v15755_v52  ;;  %v15808_v52 = vld [vmem:[%s21236_s4 + $0x334] ss:$16 sps:$4 sm:$0xff]  }
 0x20c   :  { %1373 = vmatpush1.bf16.msra.mxu1 %v17124_v39  ;;  %1340 = vmatprep.mubr.bf16.mxu1 %v15760_v55  ;;  %v12093_v55 = vcombine.low %v12074_v47, %v12074_v47  ;;  %v15829_v47 = vld [vmem:[%s21236_s4 + $0x364] ss:$16 sps:$4 sm:$0xff]  }
 0x20d   :  { %2298 = vmatmul.mubr.bf16.gmra.mrb[156].mxu0 %v12208_v56  ;;  %1374 = vmatprep.subr.bf16.mxu1 %v21252_v1  ;;  %v12296_v56 = vld [vmem:[%s21236_s4 + $0x350] sm:$0xff] }
 0x20e   :  { %2578 = vmatprep.mubr.bf16.mxu0 %v15765_v57  ;;  %v15810_v57 = vld [vmem:[%s21236_s4 + $0x330] ss:$16 sps:$4 sm:$0xff]  }
 0x210   :  { %1375 = vmatpush1.bf16.msra.mxu1 %v17148_v59 }
 0x211   :  { %1376 = vmatprep.subr.bf16.mxu1 %v21252_v1 }
 0x213   :  { %1341 = vmatmul.mubr.bf16.gmra.mrb[44].mxu1 %v15762_v58  ;;  %v12315_v58 = vcombine.high %v12296_v56, %v12296_v56 }
 0x214   :  { %1377 = vmatpush1.bf16.msra.mxu1 %v17172_v18  ;;  %1348 = vmatprep.mubr.bf16.mxu1 %v15766_v60  ;;  %v12314_v60 = vcombine.low %v12296_v56, %v12296_v56  ;;  %v15827_v56 = vld [vmem:[%s21236_s4 + $0x360] ss:$16 sps:$4 sm:$0xff]  }
 0x215   :  { %2579 = vmatmul.mubr.bf16.vlgmr.msra.gmra.mrb[160].mxu0 %v15763_v63  ;;  %1378 = vmatprep.subr.bf16.mxu1 %v21252_v1  ;;  %v15815_v63 = vld [vmem:[%s21236_s4 + $0x2dc] ss:$16 sps:$4 sm:$0xff]  }
 0x216   :  { %13891 = vmatpush3.bf16.msra.mxu0 %v16981_v20  ;;  %2586 = vmatprep.mubr.bf16.mxu0 %v15769_v3  ;;  %v15813_v3 = vld [vmem:[%s21236_s4 + $0x2d8] ss:$16 sps:$4 sm:$0xff]  }
 0x217   :  { %13892 = vmatprep.subr.bf16.mxu0 %v17039_v62 }
 0x218   :  { %1379 = vmatpush1.bf16.msra.mxu1 %v17196_v44 }
 0x219   :  { %1380 = vmatprep.subr.bf16.mxu1 %v21252_v1 }
 0x21a   :  { %13893 = vmatpush3.bf16.msra.mxu0 %v16987_v31 }
 0x21b   :  { %13894 = vmatprep.subr.bf16.mxu0 %v17049_v13  ;;  %1349 = vmatmul.mubr.bf16.gmra.mrb[48].mxu1 %v15768_v7  ;;  %v15816_v7 = vld [vmem:[%s21236_s4 + $0x2fc] ss:$16 sps:$4 sm:$0xff]  }
 0x21c   :  { %1381 = vmatpush1.bf16.msra.mxu1 %v17214_v2  ;;  %1356 = vmatprep.mubr.bf16.mxu1 %v15772_v8  ;;  %v15818_v8 = vld [vmem:[%s21236_s4 + $0x2f8] ss:$16 sps:$4 sm:$0xff]  }
 0x21d   :  { %2587 = vmatmul.mubr.bf16.gmra.mrb[164].mxu0 %v15771_v9  ;;  %1382 = vmatprep.subr.bf16.mxu1 %v21252_v1  ;;  %v15819_v9 = vld [vmem:[%s21236_s4 + $0x31c] ss:$16 sps:$4 sm:$0xff]  }
 0x21e   :  { %13895 = vmatpush3.bf16.msra.mxu0 %v16993_v42  ;;  %2594 = vmatprep.mubr.bf16.mxu0 %v15775_v10  ;;  %v21250_v10 = vmov 0.0  }
 0x21f   :  { %13896 = vmatprep.subr.bf16.mxu0 %v17059_v27 }
 0x220   :  { %1383 = vmatpush1.bf16.msra.mxu1 %v17229_v23 }
 0x221   :  { %1384 = vmatprep.subr.bf16.mxu1 %v21252_v1 }
 0x222   :  { %13897 = vmatpush3.bf16.msra.mxu0 %v16999_v53 }
 0x223   :  { %13898 = vmatprep.subr.bf16.mxu0 %v17069_v40  ;;  %1357 = vmatmul.mubr.bf16.gmra.mrb[52].mxu1 %v15774_v5 }
 0x224   :  { %1385 = vmatpush1.bf16.msra.mxu1 %v17247_v43  ;;  %1364 = vmatprep.mubr.bf16.mxu1 %v12092_v12  ;;  %v15821_v12 = vld [vmem:[%s21236_s4 + $0x318] ss:$16 sps:$4 sm:$0xff]  }
 0x225   :  { %2595 = vmatmul.mubr.bf16.gmra.mrb[168].mxu0 %v15777_v15  ;;  %1386 = vmatprep.subr.bf16.mxu1 %v21252_v1 }
 0x226   :  { %13899 = vmatpush3.bf16.msra.mxu0 %v17005_v0  ;;  %2602 = vmatprep.mubr.bf16.mxu0 %v15780_v16  ;;  %v15822_v16 = vld [vmem:[%s21236_s4 + $0x33c] ss:$16 sps:$4 sm:$0xff]  }
 0x227   :  { %13900 = vmatprep.subr.bf16.mxu0 %v17079_v54 }
 0x228   :  { %1387 = vmatpush1.bf16.msra.mxu1 %v17265_v61 }
 0x229   :  { %1388 = vmatprep.subr.bf16.mxu1 %v21252_v1 }
 0x22a   :  { %13901 = vmatpush3.bf16.msra.mxu0 %v17011_v14 }
 0x22b   :  { %13902 = vmatprep.subr.bf16.mxu0 %v17089_v4  ;;  %1365 = vmatmul.mubr.bf16.gmra.mrb[56].mxu1 %v12091_v17 }
 0x22c   :  { %1389 = vmatpush1.bf16.msra.mxu1 %v17282_v6  ;;  %12095 = vmatprep.mubr.msk.bf16.mxu1 %vm1004_vm0, %v15785_v22 }
 0x22d   :  { %2603 = vmatmul.mubr.bf16.gmra.mrb[172].mxu0 %v15782_v24  ;;  %14634 = vmatprep.subr.bf16.mxu1 %v21250_v10 }
 0x22e   :  { %13903 = vmatpush3.bf16.msra.mxu0 %v17017_v26  ;;  %2610 = vmatprep.mubr.bf16.mxu0 %v12261_v25  ;;  %v12297_v25 = vld [vmem:[%s21236_s4 + $0x358] sm:$0xff] }
 0x22f   :  { %13904 = vmatprep.subr.bf16.mxu0 %v17099_v19 }
 0x232   :  { %13905 = vmatpush3.bf16.msra.mxu0 %v17023_v38 }
 0x233   :  { %1405 = vmatmul.mubr.bf16.vlgmr.msra.gmra.mrb[60].mxu1 %v15783_v28  ;;  %3003 = vmatprep.subr.bf16.mxu0 %v21252_v1 }
 0x234   :  { %12096 = vmatprep.mubr.msk.bf16.mxu1 %vm1004_vm0, %v15788_v29  ;;  %14635 = vmatpush3.bf16.msra.mxu1 %v15861_v11  ;;  %v15824_v29 = vld [vmem:[%s21236_s4 + $0x338] ss:$16 sps:$4 sm:$0xff]  }
 0x235   :  { %2611 = vmatmul.mubr.bf16.gmra.mrb[176].mxu0 %v12260_v30  ;;  %14636 = vmatprep.subr.bf16.mxu1 %v21250_v10 }
 0x236   :  { %2963 = vmatprep.mubr.bf16.mxu0 %v15793_v32  ;;  %v12317_v32 = vcombine.high %v12297_v25, %v12297_v25 }
 0x23b   :  { %1413 = vmatmul.mubr.bf16.gmra.mrb[64].mxu1 %v15790_v33 }
 0x23c   :  { %12097 = vmatprep.mubr.msk.bf16.mxu1 %vm1004_vm0, %v15794_v34 }
 0x23d   :  { %2964 = vmatmul.mubr.bf16.vlgmr.msra.gmra.mrb[180].mxu0 %v15791_v35 }
 0x23e   :  { %3004 = vmatpush1.bf16.msra.mxu0 %v17124_v39  ;;  %2971 = vmatprep.mubr.bf16.mxu0 %v15797_v36 }
 0x23f   :  { %3005 = vmatprep.subr.bf16.mxu0 %v21252_v1 }
 0x242   :  { %3006 = vmatpush1.bf16.msra.mxu0 %v17148_v59 }
 0x243   :  { %1421 = vmatmul.mubr.bf16.gmra.mrb[68].mxu1 %v15796_v37  ;;  %3007 = vmatprep.subr.bf16.mxu0 %v21252_v1 }
 0x244   :  { %12098 = vmatprep.mubr.msk.bf16.mxu1 %vm1004_vm0, %v15800_v41  ;;  %v15870_v41 = vld [vmem:[%s21237_s5 + $0x18] sm:$0xff]  }
 0x245   :  { %2972 = vmatmul.mubr.bf16.gmra.mrb[184].mxu0 %v15799_v45  ;;  %v12316_v45 = vcombine.low %v12297_v25, %v12297_v25  ;;  %14637 = vmatpush3.bf16.msra.mxu1 %v15870_v41  ;;  %v12350_v25 = vld [vmem:[%s21236_s4 + $0x3e0] sm:$0xff] }
 0x246   :  { %3008 = vmatpush1.bf16.msra.mxu0 %v17172_v18  ;;  %2979 = vmatprep.mubr.bf16.mxu0 %v15803_v46 }
 0x247   :  { %3009 = vmatprep.subr.bf16.mxu0 %v21252_v1  ;;  %14658 = vmatprep.subr.bf16.mxu1 %v21250_v10 }
 0x24a   :  { %3010 = vmatpush1.bf16.msra.mxu0 %v17196_v44 }
 0x24b   :  { %1429 = vmatmul.mubr.bf16.gmra.mrb[72].mxu1 %v15802_v48  ;;  %3011 = vmatprep.subr.bf16.mxu0 %v21252_v1 }
 0x24c   :  { %12099 = vmatprep.mubr.msk.bf16.mxu1 %vm1004_vm0, %v12094_v49 }
 0x24d   :  { %2980 = vmatmul.mubr.bf16.gmra.mrb[188].mxu0 %v15805_v51 }
 0x24e   :  { %3012 = vmatpush1.bf16.msra.mxu0 %v17214_v2  ;;  %2987 = vmatprep.mubr.bf16.mxu0 %v15808_v52 }
 0x24f   :  { %3013 = vmatprep.subr.bf16.mxu0 %v21252_v1 }
 0x252   :  { %3014 = vmatpush1.bf16.msra.mxu0 %v17229_v23 }
 0x253   :  { %1437 = vmatmul.mubr.bf16.gmra.mrb[76].mxu1 %v12093_v55  ;;  %3015 = vmatprep.subr.bf16.mxu0 %v21252_v1 }
 0x254   :  { %14638 = vmatprep.mubr.msk.bf16.mxu1 %vm16663_vm2, %v21250_v10 }
 0x255   :  { %2988 = vmatmul.mubr.bf16.gmra.mrb[192].mxu0 %v15810_v57 }
 0x256   :  { %3016 = vmatpush1.bf16.msra.mxu0 %v17247_v43  ;;  %2995 = vmatprep.mubr.bf16.mxu0 %v12315_v58  ;;  %v15830_v58 = vld [vmem:[%s21236_s4 + $0x384] ss:$16 sps:$4 sm:$0xff]  }
 0x257   :  { %3017 = vmatprep.subr.bf16.mxu0 %v21252_v1 }
 0x25a   :  { %3018 = vmatpush1.bf16.msra.mxu0 %v17265_v61 }
 0x25b   :  { %3019 = vmatprep.subr.bf16.mxu0 %v21252_v1 }
 0x25d   :  { %2996 = vmatmul.mubr.bf16.gmra.mrb[196].mxu0 %v12314_v60 }
 0x25e   :  { %3020 = vmatpush1.bf16.msra.mxu0 %v17282_v6  ;;  %12318 = vmatprep.mubr.msk.bf16.mxu0 %vm1004_vm0, %v15815_v63 }
 0x25f   :  { %13943 = vmatprep.subr.bf16.mxu0 %v17029_v50 }
 0x265   :  { %3036 = vmatmul.mubr.bf16.vlgmr.msra.gmra.mrb[200].mxu0 %v15813_v3 }
 0x266   :  { %13944 = vmatpush3.bf16.msra.mxu0 %v16981_v20  ;;  %12319 = vmatprep.mubr.msk.bf16.mxu0 %vm1004_vm0, %v15816_v7 }
 0x267   :  { %13945 = vmatprep.subr.bf16.mxu0 %v17039_v62 }
 0x26a   :  { %13946 = vmatpush3.bf16.msra.mxu0 %v16987_v31 }
 0x26b   :  { %13947 = vmatprep.subr.bf16.mxu0 %v17049_v13 }
 0x26d   :  { %3044 = vmatmul.mubr.bf16.gmra.mrb[204].mxu0 %v15818_v8 }
 0x26e   :  { %13948 = vmatpush3.bf16.msra.mxu0 %v16993_v42  ;;  %12320 = vmatprep.mubr.msk.bf16.mxu0 %vm1004_vm0, %v15819_v9  ;;  %v15832_v9 = vld [vmem:[%s21236_s4 + $0x380] ss:$16 sps:$4 sm:$0xff]  }
 0x26f   :  { %13949 = vmatprep.subr.bf16.mxu0 %v17059_v27 }
 0x270   :  { %v13641_v5 = vpop.f32.mrb[0].mxu1 }
 0x271   :  { %v13642_v15 = vpop.f32.mrb[1].mxu1 }
 0x272   :  { %13950 = vmatpush3.bf16.msra.mxu0 %v16999_v53  ;;  %v17583_v17 = vadd.f32 %v13642_v15, %v13641_v5  ;;  %v13644_v21 = vpop.f32.mrb[2].mxu1  ;;  %v15833_v5 = vld [vmem:[%s21236_s4 + $0x3a4] ss:$16 sps:$4 sm:$0xff]  }
 0x273   :  { %13951 = vmatprep.subr.bf16.mxu0 %v17069_v40  ;;  %v13645_v22 = vpop.f32.mrb[3].mxu1 }
 0x274   :  { %v17586_v24 = vadd.f32 %v13645_v22, %v13644_v21  ;;  %v15835_v21 = vld [vmem:[%s21236_s4 + $0x3a0] ss:$16 sps:$4 sm:$0xff]   ;;  %v15836_v22 = vld [vmem:[%s21236_s4 + $0x3c4] ss:$16 sps:$4 sm:$0xff]  }
 0x275   :  { %3052 = vmatmul.mubr.bf16.gmra.mrb[208].mxu0 %v15821_v12 }
 0x276   :  { %13952 = vmatpush3.bf16.msra.mxu0 %v17005_v0  ;;  %12321 = vmatprep.mubr.msk.bf16.mxu0 %vm1004_vm0, %v15822_v16 }
 0x277   :  { %13953 = vmatprep.subr.bf16.mxu0 %v17079_v54 }
 0x278   :  { %v13647_v28 = vpop.f32.mrb[4].mxu1 }
 0x279   :  { %v13648_v30 = vpop.f32.mrb[5].mxu1 }
 0x27a   :  { %13954 = vmatpush3.bf16.msra.mxu0 %v17011_v14  ;;  %v17598_v33 = vadd.f32 %v13648_v30, %v13647_v28  ;;  %v13650_v34 = vpop.f32.mrb[6].mxu1  ;;  %v15838_v28 = vld [vmem:[%s21236_s4 + $0x3c0] ss:$16 sps:$4 sm:$0xff]   ;;  %v12368_v30 = vcombine.low %v12350_v25, %v12350_v25 }
 0x27b   :  { %13955 = vmatprep.subr.bf16.mxu0 %v17089_v4  ;;  %v13651_v35 = vpop.f32.mrb[7].mxu1 }
 0x27c   :  { %v17601_v36 = vadd.f32 %v13651_v35, %v13650_v34  ;;  %v15841_v34 = vld [vmem:[%s21236_s4 + $0x3f0] ss:$16 sps:$4 sm:$0xff]   ;;  %v15844_v35 = vld [vmem:[%s21236_s4 + $0x414] ss:$16 sps:$4 sm:$0xff]  }
 0x27d   :  { %3060 = vmatmul.mubr.bf16.gmra.mrb[212].mxu0 %v15824_v29  ;;  %v12369_v29 = vcombine.high %v12350_v25, %v12350_v25  ;;  %v15852_v25 = vld [vmem:[%s21236_s4 + $0x450] ss:$16 sps:$4 sm:$0xff]  }
 0x27e   :  { %13956 = vmatpush3.bf16.msra.mxu0 %v17017_v26  ;;  %12322 = vmatprep.mubr.msk.bf16.mxu0 %vm1004_vm0, %v12317_v32  ;;  %v15843_v32 = vld [vmem:[%s21236_s4 + $0x3f4] ss:$16 sps:$4 sm:$0xff]  }
 0x27f   :  { %13957 = vmatprep.subr.bf16.mxu0 %v17099_v19 }
 0x280   :  { %v13653_v37 = vpop.f32.mrb[8].mxu1 }
 0x281   :  { %v13654_v46 = vpop.f32.mrb[9].mxu1 }
 0x282   :  { %13958 = vmatpush3.bf16.msra.mxu0 %v17023_v38  ;;  %v17613_v48 = vadd.f32 %v13654_v46, %v13653_v37  ;;  %v13656_v49 = vpop.f32.mrb[10].mxu1 }
 0x283   :  { %13996 = vmatprep.subr.bf16.mxu0 %v17029_v50  ;;  %v13657_v51 = vpop.f32.mrb[11].mxu1 }
 0x284   :  { %v17617_v52 = vadd.f32 %v13657_v51, %v13656_v49  ;;  %v15846_v51 = vld [vmem:[%s21236_s4 + $0x410] ss:$16 sps:$4 sm:$0xff]  }
 0x285   :  { %3068 = vmatmul.mubr.bf16.gmra.mrb[216].mxu0 %v12316_v45 }
 0x286   :  { %3348 = vmatprep.mubr.bf16.mxu0 %v15829_v47 }
 0x288   :  { %v13659_v55 = vpop.f32.mrb[12].mxu1 }
 0x289   :  { %v13660_v57 = vpop.f32.mrb[13].mxu1 }
 0x28a   :  { %v17625_v60 = vadd.f32 %v13660_v57, %v13659_v55  ;;  %v13662_v63 = vpop.f32.mrb[14].mxu1  ;;  %v15847_v55 = vld [vmem:[%s21236_s4 + $0x434] ss:$16 sps:$4 sm:$0xff]  }
 0x28b   :  { %v13663_v3 = vpop.f32.mrb[15].mxu1 }
 0x28c   :  { %v17627_v7 = vadd.f32 %v13663_v3, %v13662_v63 }
 0x28d   :  { %3349 = vmatmul.mubr.bf16.vlgmr.msra.gmra.mrb[220].mxu0 %v15827_v56 }
 0x28e   :  { %13997 = vmatpush3.bf16.msra.mxu0 %v16981_v20  ;;  %3356 = vmatprep.mubr.bf16.mxu0 %v15830_v58 }
 0x28f   :  { %13998 = vmatprep.subr.bf16.mxu0 %v17039_v62 }
 0x290   :  { %v13665_v8 = vpop.f32.mrb[16].mxu1 }
 0x291   :  { %v13666_v11 = vpop.f32.mrb[17].mxu1 }
 0x292   :  { %13999 = vmatpush3.bf16.msra.mxu0 %v16987_v31  ;;  %v17640_v12 = vadd.f32 %v13666_v11, %v13665_v8  ;;  %v13668_v15 = vpop.f32.mrb[18].mxu1  ;;  %v15849_v8 = vld [vmem:[%s21236_s4 + $0x430] ss:$16 sps:$4 sm:$0xff]  }
 0x293   :  { %14000 = vmatprep.subr.bf16.mxu0 %v17049_v13  ;;  %v13669_v16 = vpop.f32.mrb[19].mxu1  ;;  %v12404_v15 = vld [vmem:[%s21236_s4 + $0x470] sm:$0xff] }
 0x295   :  { %3357 = vmatmul.mubr.bf16.gmra.mrb[224].mxu0 %v15832_v9  ;;  %v15850_v9 = vld [vmem:[%s21236_s4 + $0x454] ss:$16 sps:$4 sm:$0xff]  }
 0x296   :  { %14001 = vmatpush3.bf16.msra.mxu0 %v16993_v42  ;;  %3364 = vmatprep.mubr.bf16.mxu0 %v15833_v5 }
 0x297   :  { %14002 = vmatprep.subr.bf16.mxu0 %v17059_v27 }
 0x29a   :  { %14003 = vmatpush3.bf16.msra.mxu0 %v16999_v53 }
 0x29b   :  { %14004 = vmatprep.subr.bf16.mxu0 %v17069_v40 }
 0x29d   :  { %3365 = vmatmul.mubr.bf16.gmra.mrb[228].mxu0 %v15835_v21 }
 0x29e   :  { %14005 = vmatpush3.bf16.msra.mxu0 %v17005_v0  ;;  %3372 = vmatprep.mubr.bf16.mxu0 %v15836_v22 }
 0x29f   :  { %14006 = vmatprep.subr.bf16.mxu0 %v17079_v54 }
 0x2a2   :  { %14007 = vmatpush3.bf16.msra.mxu0 %v17011_v14 }
 0x2a3   :  { %14008 = vmatprep.subr.bf16.mxu0 %v17089_v4 }
 0x2a5   :  { %3373 = vmatmul.mubr.bf16.gmra.mrb[232].mxu0 %v15838_v28 }
 0x2a6   :  { %14009 = vmatpush3.bf16.msra.mxu0 %v17017_v26  ;;  %3380 = vmatprep.mubr.bf16.mxu0 %v12369_v29 }
 0x2a7   :  { %14010 = vmatprep.subr.bf16.mxu0 %v17099_v19 }
 0x2aa   :  { %14011 = vmatpush3.bf16.msra.mxu0 %v17023_v38 }
 0x2ab   :  { %3773 = vmatprep.subr.bf16.mxu0 %v21252_v1 }
 0x2ad   :  { %3381 = vmatmul.mubr.bf16.gmra.mrb[236].mxu0 %v12368_v30 }
 0x2ae   :  { %3733 = vmatprep.mubr.bf16.mxu0 %v15843_v32 }
 0x2b5   :  { %3734 = vmatmul.mubr.bf16.vlgmr.msra.gmra.mrb[240].mxu0 %v15841_v34 }
 0x2b6   :  { %3774 = vmatpush1.bf16.msra.mxu0 %v17124_v39  ;;  %v1130_v37 = vpop.f32.mrb[20].mxu1  ;;  %3741 = vmatprep.mubr.bf16.mxu0 %v15844_v35 }
 0x2b7   :  { %v17678_v41 = vadd.f32 %v17583_v17, %v1130_v37  ;;  %v1132_v45 = vpop.f32.mrb[21].mxu1  ;;  %3775 = vmatprep.subr.bf16.mxu0 %v21252_v1  ;;  %v12422_v37 = vcombine.low %v12404_v15, %v12404_v15 }
 0x2b8   :  { %v1133_v46 = vpop.f32.mrb[22].mxu1  ;;  %v15857_v45 = vld [vmem:[%s21236_s4 + $0x3fc] ss:$16 sps:$4 sm:$0xff]  }
 0x2b9   :  { %v17682_v47 = vadd.f32 %v17586_v24, %v1133_v46  ;;  %v1135_v49 = vpop.f32.mrb[23].mxu1 }
 0x2ba   :  { %3776 = vmatpush1.bf16.msra.mxu0 %v17148_v59 }
 0x2bb   :  { %v1168_v17 = vpack.c.bf16 %v17682_v47, %v17678_v41  ;;  %3777 = vmatprep.subr.bf16.mxu0 %v21252_v1  ;;  %v15893_v41 = vld [vmem:[%s21236_s4 + $0x550] ss:$16 sps:$4 sm:$0xff]  }
 0x2bd   :  { %3742 = vmatmul.mubr.bf16.gmra.mrb[244].mxu0 %v15846_v51 }
 0x2be   :  { %3778 = vmatpush1.bf16.msra.mxu0 %v17172_v18  ;;  %v1138_v24 = vpop.f32.mrb[24].mxu1  ;;  %3749 = vmatprep.mubr.bf16.mxu0 %v15847_v55 }
 0x2bf   :  { %v17696_v56 = vadd.f32 %v17598_v33, %v1138_v24  ;;  %v1140_v57 = vpop.f32.mrb[25].mxu1  ;;  %3779 = vmatprep.subr.bf16.mxu0 %v21252_v1  ;;  %v15855_v24 = vld [vmem:[%s21236_s4 + $0x3f8] ss:$16 sps:$4 sm:$0xff]  }
 0x2c0   :  { %v1141_v58 = vpop.f32.mrb[26].mxu1  ;;  %v15860_v57 = vld [vmem:[%s21236_s4 + $0x41c] ss:$16 sps:$4 sm:$0xff]  }
 0x2c1   :  { %v17700_v63 = vadd.f32 %v17601_v36, %v1141_v58  ;;  %v1143_v3 = vpop.f32.mrb[27].mxu1 }
 0x2c2   :  { %3780 = vmatpush1.bf16.msra.mxu0 %v17196_v44 }
 0x2c3   :  { %v1169_v33 = vpack.c.bf16 %v17700_v63, %v17696_v56  ;;  %3781 = vmatprep.subr.bf16.mxu0 %v21252_v1  ;;  %v15896_v56 = vld [vmem:[%s21236_s4 + $0x570] ss:$16 sps:$4 sm:$0xff]  }
 0x2c4   :  { %v12512_v63 = vld [vmem:[%s21236_s4 + $0x590] sm:$0xff] }
 0x2c5   :  { %3750 = vmatmul.mubr.bf16.gmra.mrb[248].mxu0 %v15849_v8 }
 0x2c6   :  { %3782 = vmatpush1.bf16.msra.mxu0 %v17214_v2  ;;  %v1146_v36 = vpop.f32.mrb[28].mxu1  ;;  %3757 = vmatprep.mubr.bf16.mxu0 %v15850_v9 }
 0x2c7   :  { %v17714_v11 = vadd.f32 %v17613_v48, %v1146_v36  ;;  %v1148_v5 = vpop.f32.mrb[29].mxu1  ;;  %3783 = vmatprep.subr.bf16.mxu0 %v21252_v1  ;;  %v12423_v48 = vcombine.high %v12404_v15, %v12404_v15  ;;  %v15858_v36 = vld [vmem:[%s21236_s4 + $0x418] ss:$16 sps:$4 sm:$0xff]   ;;  %v15864_v15 = vld [vmem:[%s21236_s4 + $0x43c] ss:$16 sps:$4 sm:$0xff]  }
 0x2c8   :  { %v1149_v16 = vpop.f32.mrb[30].mxu1 }
 0x2c9   :  { %v17721_v21 = vadd.f32 %v17617_v52, %v1149_v16  ;;  %v1151_v22 = vpop.f32.mrb[31].mxu1 }
 0x2ca   :  { %3784 = vmatpush1.bf16.msra.mxu0 %v17229_v23 }
 0x2cb   :  { %v1170_v28 = vpack.c.bf16 %v17721_v21, %v17714_v11  ;;  %3785 = vmatprep.subr.bf16.mxu0 %v21252_v1  ;;  %v12530_v21 = vcombine.low %v12512_v63, %v12512_v63 }
 0x2cd   :  { %3758 = vmatmul.mubr.bf16.gmra.mrb[252].mxu0 %v15852_v25 }
 0x2ce   :  { %3786 = vmatpush1.bf16.msra.mxu0 %v17247_v43  ;;  %v1154_v29 = vpop.f32.mrb[32].mxu1  ;;  %3765 = vmatprep.mubr.bf16.mxu0 %v12423_v48 }
 0x2cf   :  { %v17732_v52 = vadd.f32 %v17625_v60, %v1154_v29  ;;  %v1156_v30 = vpop.f32.mrb[33].mxu1  ;;  %3787 = vmatprep.subr.bf16.mxu0 %v21252_v1 }
 0x2d0   :  { %v1157_v32 = vpop.f32.mrb[34].mxu1  ;;  %v15862_v30 = vld [vmem:[%s21236_s4 + $0x438] ss:$16 sps:$4 sm:$0xff]  }
 0x2d1   :  { %v17736_v34 = vadd.f32 %v17627_v7, %v1157_v32  ;;  %v1159_v35 = vpop.f32.mrb[35].mxu1 }
 0x2d2   :  { %3788 = vmatpush1.bf16.msra.mxu0 %v17265_v61  ;;  %v15867_v35 = vld [vmem:[%s21236_s4 + $0x45c] ss:$16 sps:$4 sm:$0xff]  }
 0x2d3   :  { %v1171_v46 = vpack.c.bf16 %v17736_v34, %v17732_v52  ;;  %3789 = vmatprep.subr.bf16.mxu0 %v21252_v1  ;;  %v15901_v52 = vld [vmem:[%s21236_s4 + $0x518] ss:$16 sps:$4 sm:$0xff]  }
 0x2d5   :  { %3766 = vmatmul.mubr.bf16.gmra.mrb[0].mxu0 %v12422_v37 }
 0x2d6   :  { %3790 = vmatpush1.bf16.msra.mxu0 %v17282_v6  ;;  %v1162_v60 = vpop.f32.mrb[36].mxu1  ;;  %12426 = vmatprep.mubr.msk.bf16.mxu0 %vm1004_vm0, %v15857_v45 }
 0x2d7   :  { %v17748_v7 = vadd.f32 %v17640_v12, %v1162_v60  ;;  %14049 = vmatprep.subr.bf16.mxu0 %v17029_v50  ;;  %v1164_v49 = vpop.f32.mrb[37].mxu1  ;;  %v12405_v60 = vld [vmem:[%s21236_s4 + $0x478] sm:$0xff] }
 0x2d8   :  { %v1165_v51 = vpop.f32.mrb[38].mxu1 }
 0x2d9   :  { %v1166_v55 = vpop.f32.mrb[39].mxu1 }
 0x2dd   :  { %3806 = vmatmul.mubr.bf16.vlgmr.msra.gmra.mrb[4].mxu0 %v15855_v24  ;;  %v15865_v24 = vld [vmem:[%s21236_s4 + $0x458] ss:$16 sps:$4 sm:$0xff]  }
 0x2de   :  { %14050 = vmatpush3.bf16.msra.mxu0 %v16981_v20  ;;  %v13687_v58 = vpop.f32.mrb[40].mxu1  ;;  %12427 = vmatprep.mubr.msk.bf16.mxu0 %vm1004_vm0, %v15860_v57 }
 0x2df   :  { %14051 = vmatprep.subr.bf16.mxu0 %v17039_v62  ;;  %v13688_v12 = vpop.f32.mrb[41].mxu1 }
 0x2e0   :  { %v17760_v3 = vadd.f32 %v13688_v12, %v13687_v58  ;;  %v13690_v8 = vpop.f32.mrb[42].mxu1  ;;  %v12425_v58 = vcombine.high %v12405_v60, %v12405_v60 }
 0x2e1   :  { %v13691_v9 = vpop.f32.mrb[43].mxu1 }
 0x2e2   :  { %v17765_v5 = vadd.f32 %v13691_v9, %v13690_v8  ;;  %14052 = vmatpush3.bf16.msra.mxu0 %v16987_v31 }
 0x2e3   :  { %14053 = vmatprep.subr.bf16.mxu0 %v17049_v13 }
 0x2e5   :  { %3814 = vmatmul.mubr.bf16.gmra.mrb[8].mxu0 %v15858_v36 }
 0x2e6   :  { %14054 = vmatpush3.bf16.msra.mxu0 %v16993_v42  ;;  %v13693_v16 = vpop.f32.mrb[44].mxu1  ;;  %12428 = vmatprep.mubr.msk.bf16.mxu0 %vm1004_vm0, %v15864_v15 }
 0x2e7   :  { %14055 = vmatprep.subr.bf16.mxu0 %v17059_v27  ;;  %v13694_v22 = vpop.f32.mrb[45].mxu1 }
 0x2e8   :  { %v17775_v25 = vadd.f32 %v13694_v22, %v13693_v16  ;;  %v13696_v48 = vpop.f32.mrb[46].mxu1  ;;  %v12424_v16 = vcombine.low %v12405_v60, %v12405_v60  ;;  %v15871_v60 = vld [vmem:[%s21236_s4 + $0x480] ss:$16 sps:$4 sm:$0xff]  }
 0x2e9   :  { %v13697_v29 = vpop.f32.mrb[47].mxu1 }
 0x2ea   :  { %v17780_v32 = vadd.f32 %v13697_v29, %v13696_v48  ;;  %14056 = vmatpush3.bf16.msra.mxu0 %v16999_v53  ;;  %v15873_v48 = vld [vmem:[%s21236_s4 + $0x484] ss:$16 sps:$4 sm:$0xff]  }
 0x2eb   :  { %14057 = vmatprep.subr.bf16.mxu0 %v17069_v40 }
 0x2ed   :  { %3822 = vmatmul.mubr.bf16.gmra.mrb[12].mxu0 %v15862_v30 }
 0x2ee   :  { %14058 = vmatpush3.bf16.msra.mxu0 %v17005_v0  ;;  %v13699_v37 = vpop.f32.mrb[48].mxu1  ;;  %12429 = vmatprep.mubr.msk.bf16.mxu0 %vm1004_vm0, %v15867_v35 }
 0x2ef   :  { %14059 = vmatprep.subr.bf16.mxu0 %v17079_v54  ;;  %v13700_v45 = vpop.f32.mrb[49].mxu1 }
 0x2f0   :  { %v17793_v49 = vadd.f32 %v13700_v45, %v13699_v37  ;;  %v13702_v51 = vpop.f32.mrb[50].mxu1 }
 0x2f1   :  { %v13703_v55 = vpop.f32.mrb[51].mxu1 }
 0x2f2   :  { %v17798_v57 = vadd.f32 %v13703_v55, %v13702_v51  ;;  %14060 = vmatpush3.bf16.msra.mxu0 %v17011_v14  ;;  %v15876_v51 = vld [vmem:[%s21236_s4 + $0x4a4] ss:$16 sps:$4 sm:$0xff]  }
 0x2f3   :  { %14061 = vmatprep.subr.bf16.mxu0 %v17089_v4 }
 0x2f5   :  { %3830 = vmatmul.mubr.bf16.gmra.mrb[16].mxu0 %v15865_v24 }
 0x2f6   :  { %14062 = vmatpush3.bf16.msra.mxu0 %v17017_v26  ;;  %v13705_v12 = vpop.f32.mrb[52].mxu1  ;;  %12430 = vmatprep.mubr.msk.bf16.mxu0 %vm1004_vm0, %v12425_v58 }
 0x2f7   :  { %14063 = vmatprep.subr.bf16.mxu0 %v17099_v19  ;;  %v13706_v8 = vpop.f32.mrb[53].mxu1 }
 0x2f8   :  { %v17805_v9 = vadd.f32 %v13706_v8, %v13705_v12  ;;  %v13708_v36 = vpop.f32.mrb[54].mxu1 }
 0x2f9   :  { %v13709_v15 = vpop.f32.mrb[55].mxu1 }
 0x2fa   :  { %v17807_v22 = vadd.f32 %v13709_v15, %v13708_v36  ;;  %14064 = vmatpush3.bf16.msra.mxu0 %v17023_v38  ;;  %v15874_v15 = vld [vmem:[%s21236_s4 + $0x4a0] ss:$16 sps:$4 sm:$0xff]  }
 0x2fb   :  { %14102 = vmatprep.subr.bf16.mxu0 %v17029_v50 }
 0x2fd   :  { %3838 = vmatmul.mubr.bf16.gmra.mrb[20].mxu0 %v12424_v16  ;;  %v15877_v16 = vld [vmem:[%s21237_s5] sm:$0xff]  }
 0x2fe   :  { %v13711_v29 = vpop.f32.mrb[56].mxu1  ;;  %4118 = vmatprep.mubr.bf16.mxu0 %v15873_v48 }
 0x2ff   :  { %v13712_v30 = vpop.f32.mrb[57].mxu1 }
 0x300   :  { %v17814_v35 = vadd.f32 %v13712_v30, %v13711_v29  ;;  %v13714_v37 = vpop.f32.mrb[58].mxu1  ;;  %v15886_v29 = vld [vmem:[%s21237_s5 + $0x8] sm:$0xff]  }
 0x301   :  { %v13715_v45 = vpop.f32.mrb[59].mxu1 }
 0x305   :  { %4119 = vmatmul.mubr.bf16.vlgmr.msra.gmra.mrb[24].mxu0 %v15871_v60 }
 0x306   :  { %14103 = vmatpush3.bf16.msra.mxu0 %v16981_v20  ;;  %v1406_v55 = vpop.f32.mrb[60].mxu1  ;;  %4126 = vmatprep.mubr.bf16.mxu0 %v15876_v51 }
 0x307   :  { %v1407_v24 = vadd.f32 %v17760_v3, %v1406_v55  ;;  %14104 = vmatprep.subr.bf16.mxu0 %v17039_v62  ;;  %v1408_v58 = vpop.f32.mrb[61].mxu1  ;;  %v15880_v3 = vld [vmem:[%s21236_s4 + $0x4c4] ss:$16 sps:$4 sm:$0xff]   ;;  %v15878_v55 = vld [vmem:[%s21236_s4 + $0x4c0] ss:$16 sps:$4 sm:$0xff]  }
 0x308   :  { %v1409_v12 = vpop.f32.mrb[62].mxu1 }
 0x309   :  { %v1410_v8 = vadd.f32 %v17765_v5, %v1409_v12  ;;  %v1411_v36 = vpop.f32.mrb[63].mxu1 }
 0x30a   :  { %14105 = vmatpush3.bf16.msra.mxu0 %v16987_v31  ;;  %v12458_v36 = vld [vmem:[%s21236_s4 + $0x500] sm:$0xff] }
 0x30b   :  { %v1444_v48 = vpack.c.bf16 %v1410_v8, %v1407_v24  ;;  %14106 = vmatprep.subr.bf16.mxu0 %v17049_v13  ;;  %v15883_v24 = vld [vmem:[%s21236_s4 + $0x4e4] ss:$16 sps:$4 sm:$0xff]  }
 0x30d   :  { %14639 = vmatmul.mubr.msk.bf16.vlgmr.msra.gmra.mrb[80].mxu1 %vm1466_vm3, %v1444_v48  ;;  %4127 = vmatmul.mubr.bf16.gmra.mrb[28].mxu0 %v15874_v15  ;;  %v15881_v48 = vld [vmem:[%s21236_s4 + $0x4e0] ss:$16 sps:$4 sm:$0xff]  }
 0x30e   :  { %14107 = vmatpush3.bf16.msra.mxu0 %v16993_v42  ;;  %v1414_v5 = vpop.f32.mrb[64].mxu1  ;;  %14659 = vmatpush3.bf16.msra.mxu1 %v15877_v16 }
 0x30f   :  { %v1415_v30 = vadd.f32 %v17775_v25, %v1414_v5  ;;  %14108 = vmatprep.subr.bf16.mxu0 %v17059_v27  ;;  %v1416_v37 = vpop.f32.mrb[65].mxu1  ;;  %14642 = vmatprep.mubr.msk.bf16.mxu1 %vm16663_vm2, %v21250_v10  ;;  %v12477_v5 = vcombine.high %v12458_v36, %v12458_v36 }
 0x310   :  { %v1417_v45 = vpop.f32.mrb[66].mxu1  ;;  %4134 = vmatprep.mubr.bf16.mxu0 %v15880_v3  ;;  %14660 = vmatprep.subr.bf16.mxu1 %v21250_v10  ;;  %v13747_v3 = vpop.f32.mrb[100].mxu0 }
 0x311   :  { %v1418_v60 = vadd.f32 %v17780_v32, %v1417_v45  ;;  %v1419_v51 = vpop.f32.mrb[67].mxu1 }
 0x312   :  { %14109 = vmatpush3.bf16.msra.mxu0 %v16999_v53  ;;  %14661 = vmatpush3.bf16.msra.mxu1 %v15886_v29  ;;  %v13748_v29 = vpop.f32.mrb[101].mxu0 }
 0x313   :  { %v1445_v25 = vpack.c.bf16 %v1418_v60, %v1415_v30  ;;  %14110 = vmatprep.subr.bf16.mxu0 %v17069_v40  ;;  %1848 = vmatprep.subr.bf16.mxu1 %v21252_v1  ;;  %v17872_v30 = vadd.f32 %v13748_v29, %v13747_v3  ;;  %v13750_v37 = vpop.f32.mrb[102].mxu0  ;;  %v15887_v29 = vld [vmem:[%s21236_s4 + $0x510] ss:$16 sps:$4 sm:$0xff]  }
 0x315   :  { %14643 = vmatmul.mubr.msk.bf16.gmra.mrb[84].mxu1 %vm1466_vm3, %v1445_v25  ;;  %4135 = vmatmul.mubr.bf16.gmra.mrb[32].mxu0 %v15878_v55 }
 0x316   :  { %14111 = vmatpush3.bf16.msra.mxu0 %v17005_v0  ;;  %v1422_v32 = vpop.f32.mrb[68].mxu1  ;;  %14646 = vmatprep.mubr.msk.bf16.mxu1 %vm16663_vm2, %v21250_v10 }
 0x317   :  { %v1423_v58 = vadd.f32 %v17793_v49, %v1422_v32  ;;  %14112 = vmatprep.subr.bf16.mxu0 %v17079_v54  ;;  %v1424_v12 = vpop.f32.mrb[69].mxu1  ;;  %4142 = vmatprep.mubr.bf16.mxu0 %v15883_v24 }
 0x318   :  { %v1425_v8 = vpop.f32.mrb[70].mxu1 }
 0x319   :  { %v1426_v15 = vadd.f32 %v17798_v57, %v1425_v8  ;;  %v1427_v16 = vpop.f32.mrb[71].mxu1  ;;  %v13751_v57 = vpop.f32.mrb[103].mxu0 }
 0x31a   :  { %14113 = vmatpush3.bf16.msra.mxu0 %v17011_v14  ;;  %v17878_v60 = vadd.f32 %v13751_v57, %v13750_v37  ;;  %v17880_v51 = vpop.f32.mrb[104].mxu0 }
 0x31b   :  { %v1446_v49 = vpack.c.bf16 %v1426_v15, %v1423_v58  ;;  %14114 = vmatprep.subr.bf16.mxu0 %v17089_v4  ;;  %v17884_v24 = vpop.f32.mrb[105].mxu0  ;;  %v12476_v15 = vcombine.low %v12458_v36, %v12458_v36 }
 0x31c   :  { %v17886_v58 = vpop.f32.mrb[106].mxu0 }
 0x31d   :  { %14647 = vmatmul.mubr.msk.bf16.gmra.mrb[88].mxu1 %vm1466_vm3, %v1446_v49  ;;  %4143 = vmatmul.mubr.bf16.gmra.mrb[36].mxu0 %v15881_v48  ;;  %v17889_v16 = vpop.f32.mrb[107].mxu0 }
 0x31e   :  { %14115 = vmatpush3.bf16.msra.mxu0 %v17017_v26  ;;  %v1430_v45 = vpop.f32.mrb[72].mxu1  ;;  %14650 = vmatprep.mubr.msk.bf16.mxu1 %vm16663_vm2, %v21250_v10  ;;  %v17903_v37 = vpop.f32.mrb[108].mxu0 }
 0x31f   :  { %v1431_v55 = vadd.f32 %v17805_v9, %v1430_v45  ;;  %14116 = vmatprep.subr.bf16.mxu0 %v17099_v19  ;;  %v1432_v25 = vpop.f32.mrb[73].mxu1  ;;  %4150 = vmatprep.mubr.bf16.mxu0 %v12477_v5  ;;  %v15889_v9 = vld [vmem:[%s21236_s4 + $0x514] ss:$16 sps:$4 sm:$0xff]  }
 0x320   :  { %v1433_v32 = vpop.f32.mrb[74].mxu1  ;;  %v15892_v45 = vld [vmem:[%s21236_s4 + $0x534] ss:$16 sps:$4 sm:$0xff]  }
 0x321   :  { %v1434_v12 = vadd.f32 %v17807_v22, %v1433_v32  ;;  %v1435_v8 = vpop.f32.mrb[75].mxu1  ;;  %v15890_v32 = vld [vmem:[%s21236_s4 + $0x530] ss:$16 sps:$4 sm:$0xff]  }
 0x322   :  { %14117 = vmatpush3.bf16.msra.mxu0 %v17023_v38 }
 0x323   :  { %v1447_v48 = vpack.c.bf16 %v1434_v12, %v1431_v55  ;;  %4543 = vmatprep.subr.bf16.mxu0 %v21252_v1  ;;  %v17908_v55 = vpop.f32.mrb[109].mxu0 }
 0x324   :  { %v17910_v25 = vpop.f32.mrb[110].mxu0 }
 0x325   :  { %14651 = vmatmul.mubr.msk.bf16.gmra.mrb[92].mxu1 %vm1466_vm3, %v1447_v48  ;;  %4151 = vmatmul.mubr.bf16.gmra.mrb[40].mxu0 %v12476_v15  ;;  %v15895_v15 = vld [vmem:[%s21236_s4 + $0x554] ss:$16 sps:$4 sm:$0xff]  }
 0x326   :  { %v1438_v3 = vpop.f32.mrb[76].mxu1  ;;  %14654 = vmatprep.mubr.msk.bf16.mxu1 %vm16663_vm2, %v21250_v10  ;;  %4503 = vmatprep.mubr.bf16.mxu0 %v15889_v9 }
 0x327   :  { %v1439_v22 = vadd.f32 %v17814_v35, %v1438_v3  ;;  %v1440_v36 = vpop.f32.mrb[77].mxu1  ;;  %v17913_v35 = vpop.f32.mrb[111].mxu0  ;;  %v15898_v3 = vld [vmem:[%s21236_s4 + $0x574] ss:$16 sps:$4 sm:$0xff]  }
 0x328   :  { %v1441_v49 = vpop.f32.mrb[78].mxu1  ;;  %v17923_v12 = vpop.f32.mrb[112].mxu0 }
 0x329   :  { %v1442_v5 = vpop.f32.mrb[79].mxu1  ;;  %v1448_v57 = vpack.c.bf16 %v1439_v22, %v1439_v22  ;;  %v17926_v8 = vpop.f32.mrb[113].mxu0 }
 0x32a   :  { %v17931_v9 = vpop.f32.mrb[114].mxu0  ;;  %v12531_v5 = vcombine.high %v12512_v63, %v12512_v63 }
 0x32b   :  { %v17937_v48 = vpop.f32.mrb[115].mxu0 }
 0x32c   :  { %v17950_v47 = vpop.f32.mrb[116].mxu0 }
 0x32d   :  { %14655 = vmatmul.mubr.msk.bf16.gmra.mrb[96].mxu1 %vm1466_vm3, %v1448_v57  ;;  %4504 = vmatmul.mubr.bf16.vlgmr.msra.gmra.mrb[44].mxu0 %v15887_v29 }
 0x32e   :  { %4544 = vmatpush1.bf16.msra.mxu0 %v17124_v39  ;;  %14662 = vmatprep.mubr.msk.bf16.mxu1 %vm16663_vm2, %v21250_v10 }
 0x32f   :  { %4545 = vmatprep.subr.bf16.mxu0 %v21252_v1  ;;  %4511 = vmatprep.mubr.bf16.mxu0 %v15892_v45 }
 0x332   :  { %4546 = vmatpush1.bf16.msra.mxu0 %v17148_v59 }
 0x333   :  { %4547 = vmatprep.subr.bf16.mxu0 %v21252_v1 }
 0x335   :  { %14663 = vmatmul.mubr.msk.bf16.vlgmr.msra.gmra.mrb[80].mxu1 %vm1466_vm3, %v1168_v17  ;;  %4512 = vmatmul.mubr.bf16.gmra.mrb[48].mxu0 %v15890_v32  ;;  %v17954_v17 = vpop.f32.mrb[117].mxu0 }
 0x336   :  { %1849 = vmatpush1.bf16.msra.mxu1 %v17124_v39  ;;  %4548 = vmatpush1.bf16.msra.mxu0 %v17172_v18  ;;  %v13774_v22 = vpop.f32.mrb[118].mxu0 }
 0x337   :  { %1850 = vmatprep.subr.bf16.mxu1 %v21252_v1  ;;  %4549 = vmatprep.subr.bf16.mxu0 %v21252_v1  ;;  %v13775_v36 = vpop.f32.mrb[119].mxu0 }
 0x338   :  { %14666 = vmatprep.mubr.msk.bf16.mxu1 %vm16663_vm2, %v21250_v10  ;;  %4519 = vmatprep.mubr.bf16.mxu0 %v15895_v15  ;;  %v15903_v36 = vld [vmem:[%s21236_s4 + $0x51c] ss:$16 sps:$4 sm:$0xff]  }
 0x33a   :  { %1851 = vmatpush1.bf16.msra.mxu1 %v17148_v59  ;;  %4550 = vmatpush1.bf16.msra.mxu0 %v17196_v44 }
 0x33b   :  { %1852 = vmatprep.subr.bf16.mxu1 %v21252_v1  ;;  %4551 = vmatprep.subr.bf16.mxu0 %v21252_v1 }
 0x33d   :  { %14667 = vmatmul.mubr.msk.bf16.gmra.mrb[84].mxu1 %vm1466_vm3, %v1169_v33  ;;  %4520 = vmatmul.mubr.bf16.gmra.mrb[52].mxu0 %v15893_v41  ;;  %v13800_v33 = vpop.f32.mrb[120].mxu0 }
 0x33e   :  { %1853 = vmatpush1.bf16.msra.mxu1 %v17172_v18  ;;  %4552 = vmatpush1.bf16.msra.mxu0 %v17214_v2  ;;  %v13801_v49 = vpop.f32.mrb[121].mxu0 }
 0x33f   :  { %1854 = vmatprep.subr.bf16.mxu1 %v21252_v1  ;;  %4553 = vmatprep.subr.bf16.mxu0 %v21252_v1  ;;  %v17979_v29 = vadd.f32 %v13801_v49, %v13800_v33  ;;  %v13803_v57 = vpop.f32.mrb[122].mxu0  ;;  %v15909_v33 = vld [vmem:[%s21236_s4 + $0x53c] ss:$16 sps:$4 sm:$0xff]  }
 0x340   :  { %14670 = vmatprep.mubr.msk.bf16.mxu1 %vm16663_vm2, %v21250_v10  ;;  %4527 = vmatprep.mubr.bf16.mxu0 %v15898_v3  ;;  %v13804_v45 = vpop.f32.mrb[123].mxu0 }
 0x341   :  { %v17987_v32 = vadd.f32 %v13804_v45, %v13803_v57  ;;  %v13806_v15 = vpop.f32.mrb[124].mxu0  ;;  %v15904_v45 = vld [vmem:[%s21236_s4 + $0x128] ss:$16 sps:$4 sm:$0xff]  }
 0x342   :  { %1855 = vmatpush1.bf16.msra.mxu1 %v17196_v44  ;;  %4554 = vmatpush1.bf16.msra.mxu0 %v17229_v23  ;;  %v13807_v11 = vpop.f32.mrb[125].mxu0 }
 0x343   :  { %1856 = vmatprep.subr.bf16.mxu1 %v21252_v1  ;;  %4555 = vmatprep.subr.bf16.mxu0 %v21252_v1  ;;  %v13809_v41 = vpop.f32.mrb[126].mxu0 }
 0x344   :  { %v13810_v3 = vpop.f32.mrb[127].mxu0 }
 0x345   :  { %14671 = vmatmul.mubr.msk.bf16.gmra.mrb[88].mxu1 %vm1466_vm3, %v1170_v28  ;;  %4528 = vmatmul.mubr.bf16.gmra.mrb[56].mxu0 %v15896_v56  ;;  %v17993_v28 = vadd.f32 %v13807_v11, %v13806_v15  ;;  %v17999_v22 = vadd.f32 %v13810_v3, %v13809_v41  ;;  %v13812_v34 = vpop.f32.mrb[128].mxu0  ;;  %v15906_v56 = vld [vmem:[%s21236_s4 + $0x12c] ss:$16 sps:$4 sm:$0xff]   ;;  %v15907_v15 = vld [vmem:[%s21236_s4 + $0x538] ss:$16 sps:$4 sm:$0xff]  }
 0x346   :  { %1857 = vmatpush1.bf16.msra.mxu1 %v17214_v2  ;;  %4556 = vmatpush1.bf16.msra.mxu0 %v17247_v43  ;;  %v13813_v63 = vpop.f32.mrb[129].mxu0  ;;  %v15910_v11 = vld [vmem:[%s21236_s4 + $0x14c] ss:$16 sps:$4 sm:$0xff]  }
 0x347   :  { %1858 = vmatprep.subr.bf16.mxu1 %v21252_v1  ;;  %4557 = vmatprep.subr.bf16.mxu0 %v21252_v1  ;;  %v18028_v49 = vadd.f32 %v13813_v63, %v13812_v34  ;;  %v15914_v41 = vld [vmem:[%s21236_s4 + $0x55c] ss:$16 sps:$4 sm:$0xff]   ;;  %v15915_v63 = vld [vmem:[%s21236_s4 + $0x148] ss:$16 sps:$4 sm:$0xff]  }
 0x348   :  { %14674 = vmatprep.mubr.msk.bf16.mxu1 %vm16663_vm2, %v21250_v10  ;;  %4535 = vmatprep.mubr.bf16.mxu0 %v12531_v5  ;;  %v13815_v5 = vpop.f32.mrb[130].mxu0 }
 0x349   :  { %v13816_v57 = vpop.f32.mrb[131].mxu0 }
 0x34a   :  { %1859 = vmatpush1.bf16.msra.mxu1 %v17229_v23  ;;  %4558 = vmatpush1.bf16.msra.mxu0 %v17265_v61 }
 0x34b   :  { %1860 = vmatprep.subr.bf16.mxu1 %v21252_v1  ;;  %4559 = vmatprep.subr.bf16.mxu0 %v21252_v1 }
 0x34d   :  { %14675 = vmatmul.mubr.msk.bf16.gmra.mrb[92].mxu1 %vm1466_vm3, %v1171_v46  ;;  %4536 = vmatmul.mubr.bf16.gmra.mrb[60].mxu0 %v12530_v21  ;;  %v1172_v46 = vpack.c.bf16 %v17748_v7, %v17748_v7  ;;  %v18033_v7 = vadd.f32 %v13816_v57, %v13815_v5  ;;  %v13818_v21 = vpop.f32.mrb[132].mxu0  ;;  %v15920_v57 = vld [vmem:[%s21236_s4 + $0x57c] ss:$16 sps:$4 sm:$0xff]  }
 0x34e   :  { %1861 = vmatpush1.bf16.msra.mxu1 %v17247_v43  ;;  %4560 = vmatpush1.bf16.msra.mxu0 %v17282_v6  ;;  %v13819_v3 = vpop.f32.mrb[133].mxu0 }
 0x34f   :  { %14155 = vmatprep.subr.bf16.mxu0 %v17029_v50  ;;  %1862 = vmatprep.subr.bf16.mxu1 %v21252_v1 }
 0x350   :  { %14678 = vmatprep.mubr.msk.bf16.mxu1 %vm16663_vm2, %v21250_v10  ;;  %12534 = vmatprep.mubr.msk.bf16.mxu0 %vm1004_vm0, %v15903_v36  ;;  %v18053_v36 = vadd.f32 %v13819_v3, %v13818_v21  ;;  %v15918_v3 = vld [vmem:[%s21236_s4 + $0x578] ss:$16 sps:$4 sm:$0xff]  }
 0x352   :  { %1863 = vmatpush1.bf16.msra.mxu1 %v17265_v61 }
 0x353   :  { %1864 = vmatprep.subr.bf16.mxu1 %v21252_v1 }
 0x355   :  { %14679 = vmatmul.mubr.msk.bf16.gmra.mrb[96].mxu1 %vm1466_vm3, %v1172_v46  ;;  %4576 = vmatmul.mubr.bf16.vlgmr.msra.gmra.mrb[64].mxu0 %v15901_v52  ;;  %v13821_v52 = vpop.f32.mrb[134].mxu0 }
 0x356   :  { %1865 = vmatpush1.bf16.msra.mxu1 %v17282_v6  ;;  %14156 = vmatpush3.bf16.msra.mxu0 %v16981_v20  ;;  %v13822_v34 = vpop.f32.mrb[135].mxu0 }
 0x357   :  { %14157 = vmatprep.subr.bf16.mxu0 %v17039_v62  ;;  %12156 = vmatprep.mubr.msk.bf16.mxu1 %vm1004_vm0, %v15906_v56  ;;  %v18057_v46 = vadd.f32 %v13822_v34, %v13821_v52  ;;  %v15912_v56 = vld [vmem:[%s21236_s4 + $0x558] ss:$16 sps:$4 sm:$0xff]   ;;  %v13824_v5 = vpop.f32.mrb[136].mxu0  ;;  %v15922_v34 = vld [vmem:[%s21236_s4 + $0x18c] ss:$16 sps:$4 sm:$0xff]  }
 0x358   :  { %12535 = vmatprep.mubr.msk.bf16.mxu0 %vm1004_vm0, %v15909_v33  ;;  %14682 = vmatprep.subr.bf16.mxu1 %v21250_v10  ;;  %v15916_v33 = vld [vmem:[%s21236_s4 + $0x16c] ss:$16 sps:$4 sm:$0xff]   ;;  %v15921_v52 = vld [vmem:[%s21236_s4 + $0x168] ss:$16 sps:$4 sm:$0xff]  }
 0x35a   :  { %14158 = vmatpush3.bf16.msra.mxu0 %v16987_v31 }
 0x35b   :  { %14159 = vmatprep.subr.bf16.mxu0 %v17049_v13 }
 0x35d   :  { %1881 = vmatmul.mubr.bf16.vlgmr.msra.gmra.mrb[100].mxu1 %v15904_v45  ;;  %4584 = vmatmul.mubr.bf16.gmra.mrb[68].mxu0 %v15907_v15  ;;  %v13825_v45 = vpop.f32.mrb[137].mxu0 }
 0x35e   :  { %14160 = vmatpush3.bf16.msra.mxu0 %v16993_v42  ;;  %12157 = vmatprep.mubr.msk.bf16.mxu1 %vm1004_vm0, %v15910_v11  ;;  %v18075_v15 = vadd.f32 %v13825_v45, %v13824_v5  ;;  %v13827_v11 = vpop.f32.mrb[138].mxu0 }
 0x35f   :  { %14161 = vmatprep.subr.bf16.mxu0 %v17059_v27  ;;  %12536 = vmatprep.mubr.msk.bf16.mxu0 %vm1004_vm0, %v15914_v41  ;;  %v13828_v21 = vpop.f32.mrb[139].mxu0  ;;  %v12513_v41 = vld [vmem:[%s21236_s4 + $0x598] sm:$0xff] }
 0x362   :  { %14162 = vmatpush3.bf16.msra.mxu0 %v16999_v53 }
 0x363   :  { %14163 = vmatprep.subr.bf16.mxu0 %v17069_v40 }
 0x365   :  { %1889 = vmatmul.mubr.bf16.gmra.mrb[104].mxu1 %v15915_v63  ;;  %4592 = vmatmul.mubr.bf16.gmra.mrb[72].mxu0 %v15912_v56  ;;  %v2267_v56 = vpop.f32.mrb[140].mxu0  ;;  %v12533_v63 = vcombine.high %v12513_v41, %v12513_v41 }
 0x366   :  { %14164 = vmatpush3.bf16.msra.mxu0 %v17005_v0  ;;  %12158 = vmatprep.mubr.msk.bf16.mxu1 %vm1004_vm0, %v15916_v33  ;;  %v18096_v33 = vadd.f32 %v17979_v29, %v2267_v56  ;;  %v2269_v5 = vpop.f32.mrb[141].mxu0  ;;  %v12135_v29 = vld [vmem:[%s21236_s4 + $0x1a8] sm:$0xff] }
 0x367   :  { %14165 = vmatprep.subr.bf16.mxu0 %v17079_v54  ;;  %12537 = vmatprep.mubr.msk.bf16.mxu0 %vm1004_vm0, %v15920_v57  ;;  %v2270_v57 = vpop.f32.mrb[142].mxu0  ;;  %v12532_v5 = vcombine.low %v12513_v41, %v12513_v41  ;;  %v12154_v41 = vcombine.low %v12135_v29, %v12135_v29 }
 0x368   :  { %v18099_v45 = vadd.f32 %v17987_v32, %v2270_v57  ;;  %v2272_v11 = vpop.f32.mrb[143].mxu0 }
 0x369   :  { %v2275_v21 = vpop.f32.mrb[144].mxu0  ;;  %v12155_v11 = vcombine.high %v12135_v29, %v12135_v29  ;;  %v15948_v29 = vld [vmem:[%s21236_s4 + $0x654] ss:$16 sps:$4 sm:$0xff]  }
 0x36a   :  { %14166 = vmatpush3.bf16.msra.mxu0 %v17011_v14  ;;  %v18111_v32 = vadd.f32 %v17993_v28, %v2275_v21  ;;  %v15934_v21 = vld [vmem:[%s21236_s4 + $0x5c4] ss:$16 sps:$4 sm:$0xff]  }
 0x36b   :  { %14167 = vmatprep.subr.bf16.mxu0 %v17089_v4 }
 0x36d   :  { %1897 = vmatmul.mubr.bf16.gmra.mrb[108].mxu1 %v15921_v52  ;;  %4600 = vmatmul.mubr.bf16.gmra.mrb[76].mxu0 %v15918_v3  ;;  %v2277_v52 = vpop.f32.mrb[145].mxu0  ;;  %v15930_v3 = vld [vmem:[%s21236_s4 + $0x5a4] ss:$16 sps:$4 sm:$0xff]  }
 0x36e   :  { %14168 = vmatpush3.bf16.msra.mxu0 %v17017_v26  ;;  %12159 = vmatprep.mubr.msk.bf16.mxu1 %vm1004_vm0, %v15922_v34  ;;  %v2278_v56 = vpop.f32.mrb[146].mxu0  ;;  %v15926_v34 = vld [vmem:[%s21236_s4 + $0x188] ss:$16 sps:$4 sm:$0xff]  }
 0x36f   :  { %14169 = vmatprep.subr.bf16.mxu0 %v17099_v19  ;;  %12538 = vmatprep.mubr.msk.bf16.mxu0 %vm1004_vm0, %v12533_v63  ;;  %v18117_v57 = vadd.f32 %v17999_v22, %v2278_v56  ;;  %v2280_v63 = vpop.f32.mrb[147].mxu0  ;;  %v15928_v22 = vld [vmem:[%s21236_s4 + $0x5a0] ss:$16 sps:$4 sm:$0xff]  }
 0x370   :  { %v2283_v52 = vpop.f32.mrb[148].mxu0 }
 0x371   :  { %v18134_v56 = vadd.f32 %v18028_v49, %v2283_v52  ;;  %v2285_v63 = vpop.f32.mrb[149].mxu0  ;;  %v15932_v49 = vld [vmem:[%s21236_s4 + $0x5c0] ss:$16 sps:$4 sm:$0xff]  }
 0x372   :  { %14170 = vmatpush3.bf16.msra.mxu0 %v17023_v38  ;;  %v2286_v28 = vpop.f32.mrb[150].mxu0 }
 0x373   :  { %14208 = vmatprep.subr.bf16.mxu0 %v17029_v50 }
 0x375   :  { %1905 = vmatmul.mubr.bf16.gmra.mrb[112].mxu1 %v15926_v34  ;;  %4608 = vmatmul.mubr.bf16.gmra.mrb[80].mxu0 %v12532_v5  ;;  %v18137_v5 = vadd.f32 %v18033_v7, %v2286_v28  ;;  %v15937_v7 = vld [vmem:[%s21236_s4 + $0x5e4] ss:$16 sps:$4 sm:$0xff]  }
 0x376   :  { %12160 = vmatprep.mubr.msk.bf16.mxu1 %vm1004_vm0, %v12155_v11  ;;  %4888 = vmatprep.mubr.bf16.mxu0 %v15930_v3  ;;  %v2288_v3 = vpop.f32.mrb[151].mxu0 }
 0x377   :  { %v2291_v34 = vpop.f32.mrb[152].mxu0 }
 0x378   :  { %v18154_v11 = vadd.f32 %v18053_v36, %v2291_v34  ;;  %v2293_v28 = vpop.f32.mrb[153].mxu0  ;;  %v15935_v36 = vld [vmem:[%s21236_s4 + $0x5e0] ss:$16 sps:$4 sm:$0xff]  }
 0x379   :  { %v12566_v28 = vld [vmem:[%s21236_s4 + $0x620] sm:$0xff] }
 0x37a   :  { %21259 = vst [vmem:[#allocation5_spill] sm:$0xff] %v18154_v11 }
 0x37d   :  { %1913 = vmatmul.mubr.bf16.gmra.mrb[116].mxu1 %v12154_v41  ;;  %4889 = vmatmul.mubr.bf16.vlgmr.msra.gmra.mrb[84].mxu0 %v15928_v22  ;;  %v2294_v22 = vpop.f32.mrb[154].mxu0 }
 0x37e   :  { %14209 = vmatpush3.bf16.msra.mxu0 %v16981_v20  ;;  %4896 = vmatprep.mubr.bf16.mxu0 %v15934_v21  ;;  %v18157_v41 = vadd.f32 %v18057_v46, %v2294_v22  ;;  %v2296_v21 = vpop.f32.mrb[155].mxu0  ;;  %v15940_v46 = vld [vmem:[%s21236_s4 + $0x604] ss:$16 sps:$4 sm:$0xff]   ;;  %v15938_v22 = vld [vmem:[%s21236_s4 + $0x600] ss:$16 sps:$4 sm:$0xff]  }
 0x37f   :  { %14210 = vmatprep.subr.bf16.mxu0 %v17039_v62  ;;  %14686 = vmatprep.mubr.msk.bf16.mxu1 %vm16663_vm2, %v21250_v10  ;;  %v2299_v63 = vpop.f32.mrb[156].mxu0 }
 0x380   :  { %21260 = vst [vmem:[#allocation6_spill] sm:$0xff] %v18157_v41  ;;  %v18172_v3 = vadd.f32 %v18075_v15, %v2299_v63  ;;  %v12585_v15 = vcombine.high %v12566_v28, %v12566_v28  ;;  %v18194_v63 = vadd.f32 %v17889_v16, %v17886_v58  ;;  %v12584_v16 = vcombine.low %v12566_v28, %v12566_v28  ;;  %v15943_v28 = vld [vmem:[%s21236_s4 + $0x630] ss:$16 sps:$4 sm:$0xff]  }
 0x382   :  { %14211 = vmatpush3.bf16.msra.mxu0 %v16987_v31  ;;  %21261 = vst [vmem:[#allocation7_spill] sm:$0xff] %v18172_v3 }
 0x383   :  { %14212 = vmatprep.subr.bf16.mxu0 %v17049_v13 }
 0x385   :  { %4897 = vmatmul.mubr.bf16.gmra.mrb[88].mxu0 %v15932_v49  ;;  %v2301_v49 = vpop.f32.mrb[157].mxu0 }
 0x386   :  { %14213 = vmatpush3.bf16.msra.mxu0 %v16993_v42  ;;  %4904 = vmatprep.mubr.bf16.mxu0 %v15937_v7  ;;  %v2302_v7 = vpop.f32.mrb[158].mxu0 }
 0x387   :  { %14214 = vmatprep.subr.bf16.mxu0 %v17059_v27  ;;  %v2303_v34 = vpop.f32.mrb[159].mxu0 }
 0x388   :  { %v18183_v21 = vpop.f32.mrb[160].mxu0 }
 0x389   :  { %v18197_v49 = vpop.f32.mrb[161].mxu0 }
 0x38a   :  { %14215 = vmatpush3.bf16.msra.mxu0 %v16999_v53  ;;  %v18199_v7 = vpop.f32.mrb[162].mxu0 }
 0x38b   :  { %14216 = vmatprep.subr.bf16.mxu0 %v17069_v40  ;;  %21262 = vst [vmem:[#allocation8_spill] sm:$0xff] %v18199_v7  ;;  %v18201_v34 = vpop.f32.mrb[163].mxu0 }
 0x38c   :  { %21263 = vst [vmem:[#allocation9_spill] sm:$0xff] %v18201_v34  ;;  %v15966_v34 = vld [vmem:[%s21236_s4 + $0x698] ss:$16 sps:$4 sm:$0xff]  }
 0x38d   :  { %4905 = vmatmul.mubr.bf16.gmra.mrb[92].mxu0 %v15935_v36  ;;  %v15985_v36 = vld [vmem:[%s21237_s5 + $0x20] sm:$0xff]  }
 0x38e   :  { %14217 = vmatpush3.bf16.msra.mxu0 %v17005_v0  ;;  %4912 = vmatprep.mubr.bf16.mxu0 %v15940_v46  ;;  %v18190_v46 = vadd.f32 %v17884_v24, %v17880_v51  ;;  %v18205_v51 = vpop.f32.mrb[164].mxu0 }
 0x38f   :  { %14218 = vmatprep.subr.bf16.mxu0 %v17079_v54  ;;  %14683 = vmatpush3.bf16.msra.mxu1 %v15985_v36  ;;  %21264 = vst [vmem:[#allocation10_spill] sm:$0xff] %v18205_v51  ;;  %v18208_v24 = vpop.f32.mrb[165].mxu0  ;;  %v18224_v36 = vadd.f32 %v17913_v35, %v17910_v25 }
 0x390   :  { %14684 = vmatprep.subr.bf16.mxu1 %v21250_v10  ;;  %21265 = vst [vmem:[#allocation11_spill] sm:$0xff] %v18208_v24  ;;  %v18210_v58 = vpop.f32.mrb[166].mxu0  ;;  %v15963_v24 = vld [vmem:[%s21236_s4 + $0x678] ss:$16 sps:$4 sm:$0xff]  }
 0x391   :  { %21266 = vst [vmem:[#allocation12_spill] sm:$0xff] %v18210_v58  ;;  %v18212_v52 = vpop.f32.mrb[167].mxu0 }
 0x392   :  { %14219 = vmatpush3.bf16.msra.mxu0 %v17011_v14  ;;  %21267 = vst [vmem:[#allocation13_spill] sm:$0xff] %v18212_v52  ;;  %v18233_v10 = vpop.f32.mrb[168].mxu0 }
 0x393   :  { %14220 = vmatprep.subr.bf16.mxu0 %v17089_v4  ;;  %21268 = vst [vmem:[#allocation14_spill] sm:$0xff] %v18233_v10  ;;  %v18243_v25 = vpop.f32.mrb[169].mxu0  ;;  %v15959_v10 = vld [vmem:[%s21236_s4 + $0x63c] ss:$16 sps:$4 sm:$0xff]  }
 0x394   :  { %21269 = vst [vmem:[#allocation15_spill] sm:$0xff] %v18243_v25  ;;  %v18245_v35 = vpop.f32.mrb[170].mxu0 }
 0x395   :  { %4913 = vmatmul.mubr.bf16.gmra.mrb[96].mxu0 %v15938_v22  ;;  %v15945_v22 = vld [vmem:[%s21236_s4 + $0x634] ss:$16 sps:$4 sm:$0xff]   ;;  %21270 = vst [vmem:[#allocation16_spill] sm:$0xff] %v18245_v35 }
 0x396   :  { %14221 = vmatpush3.bf16.msra.mxu0 %v17017_v26  ;;  %4920 = vmatprep.mubr.bf16.mxu0 %v12585_v15  ;;  %v18220_v15 = vadd.f32 %v17908_v55, %v17903_v37  ;;  %v18237_v37 = vadd.f32 %v17926_v8, %v17923_v12  ;;  %v18241_v55 = vadd.f32 %v17937_v48, %v17931_v9  ;;  %v15992_v12 = vld [vmem:[%s21237_s5 + $0x28] sm:$0xff]   ;;  %v15946_v8 = vld [vmem:[%s21236_s4 + $0x650] ss:$16 sps:$4 sm:$0xff]   ;;  %v15951_v9 = vld [vmem:[%s21236_s4 + $0x674] ss:$16 sps:$4 sm:$0xff]  }
 0x397   :  { %14222 = vmatprep.subr.bf16.mxu0 %v17099_v19  ;;  %14685 = vmatpush3.bf16.msra.mxu1 %v15992_v12 }
 0x39a   :  { %14223 = vmatpush3.bf16.msra.mxu0 %v17023_v38 }
 0x39b   :  { %5313 = vmatprep.subr.bf16.mxu0 %v21252_v1 }
 0x39d   :  { %4921 = vmatmul.mubr.bf16.gmra.mrb[100].mxu0 %v12584_v16  ;;  %v18247_v16 = vpop.f32.mrb[171].mxu0 }
 0x39e   :  { %5273 = vmatprep.mubr.bf16.mxu0 %v15945_v22  ;;  %21271 = vst [vmem:[#allocation17_spill] sm:$0xff] %v18247_v16  ;;  %v18261_v48 = vpop.f32.mrb[172].mxu0  ;;  %v18266_v22 = vadd.f32 %v17954_v17, %v17950_v47  ;;  %v15954_v47 = vld [vmem:[%s21236_s4 + $0x694] ss:$16 sps:$4 sm:$0xff]  }
 0x39f   :  { %21272 = vst [vmem:[#allocation18_spill] sm:$0xff] %v18261_v48  ;;  %v15949_v48 = vld [vmem:[%s21236_s4 + $0x670] ss:$16 sps:$4 sm:$0xff]  }
 0x3a5   :  { %5274 = vmatmul.mubr.bf16.vlgmr.msra.gmra.mrb[104].mxu0 %v15943_v28  ;;  %v18269_v28 = vpop.f32.mrb[173].mxu0 }
 0x3a6   :  { %5314 = vmatpush1.bf16.msra.mxu0 %v17124_v39  ;;  %5281 = vmatprep.mubr.bf16.mxu0 %v15948_v29  ;;  %v21273_v29 = vmov 0.0   ;;  %21274 = vst [vmem:[#allocation19_spill] sm:$0xff] %v18269_v28  ;;  %v18271_v16 = vpop.f32.mrb[174].mxu0  ;;  %v15952_v28 = vld [vmem:[%s21236_s4 + $0x690] ss:$16 sps:$4 sm:$0xff]  }
 0x3a7   :  { %5315 = vmatprep.subr.bf16.mxu0 %v21252_v1  ;;  %14706 = vmatprep.subr.bf16.mxu1 %v21273_v29  ;;  %21275 = vst [vmem:[#allocation20_spill] sm:$0xff] %v18271_v16  ;;  %v18273_v12 = vpop.f32.mrb[175].mxu0  ;;  %v12620_v16 = vld [vmem:[%s21236_s4 + $0x6b0] sm:$0xff] }
 0x3a8   :  { %21276 = vst [vmem:[#allocation21_spill] sm:$0xff] %v18273_v12  ;;  %v18285_v17 = vpop.f32.mrb[176].mxu0  ;;  %v12638_v25 = vcombine.low %v12620_v16, %v12620_v16 }
 0x3a9   :  { %21277 = vst [vmem:[#allocation22_spill] sm:$0xff] %v18285_v17  ;;  %v12639_v17 = vcombine.high %v12620_v16, %v12620_v16 }
 0x3aa   :  { %5316 = vmatpush1.bf16.msra.mxu0 %v17148_v59 }
 0x3ab   :  { %5317 = vmatprep.subr.bf16.mxu0 %v21252_v1 }
 0x3ad   :  { %5282 = vmatmul.mubr.bf16.gmra.mrb[108].mxu0 %v15946_v8  ;;  %v18287_v8 = vpop.f32.mrb[177].mxu0 }
 0x3ae   :  { %5318 = vmatpush1.bf16.msra.mxu0 %v17172_v18  ;;  %5289 = vmatprep.mubr.bf16.mxu0 %v15951_v9  ;;  %21278 = vst [vmem:[#allocation23_spill] sm:$0xff] %v18287_v8  ;;  %v13880_v9 = vpop.f32.mrb[178].mxu0 }
 0x3af   :  { %5319 = vmatprep.subr.bf16.mxu0 %v21252_v1  ;;  %v13881_v12 = vpop.f32.mrb[179].mxu0 }
 0x3b2   :  { %5320 = vmatpush1.bf16.msra.mxu0 %v17196_v44 }
 0x3b3   :  { %5321 = vmatprep.subr.bf16.mxu0 %v21252_v1 }
 0x3b5   :  { %5290 = vmatmul.mubr.bf16.gmra.mrb[112].mxu0 %v15949_v48  ;;  %v13906_v48 = vpop.f32.mrb[180].mxu0 }
 0x3b6   :  { %5322 = vmatpush1.bf16.msra.mxu0 %v17214_v2  ;;  %5297 = vmatprep.mubr.bf16.mxu0 %v15954_v47  ;;  %v13907_v9 = vpop.f32.mrb[181].mxu0 }
 0x3b7   :  { %5323 = vmatprep.subr.bf16.mxu0 %v21252_v1  ;;  %v18299_v47 = vadd.f32 %v13907_v9, %v13906_v48  ;;  %v13909_v12 = vpop.f32.mrb[182].mxu0 }
 0x3b8   :  { %v13910_v8 = vpop.f32.mrb[183].mxu0 }
 0x3b9   :  { %v18303_v35 = vadd.f32 %v13910_v8, %v13909_v12  ;;  %v15957_v12 = vld [vmem:[%s21236_s4 + $0x638] ss:$16 sps:$4 sm:$0xff]  }
 0x3ba   :  { %5324 = vmatpush1.bf16.msra.mxu0 %v17229_v23 }
 0x3bb   :  { %5325 = vmatprep.subr.bf16.mxu0 %v21252_v1 }
 0x3bd   :  { %5298 = vmatmul.mubr.bf16.gmra.mrb[116].mxu0 %v15952_v28  ;;  %v13912_v28 = vpop.f32.mrb[184].mxu0 }
 0x3be   :  { %5326 = vmatpush1.bf16.msra.mxu0 %v17247_v43  ;;  %5305 = vmatprep.mubr.bf16.mxu0 %v12639_v17  ;;  %v13913_v48 = vpop.f32.mrb[185].mxu0 }
 0x3bf   :  { %5327 = vmatprep.subr.bf16.mxu0 %v21252_v1  ;;  %v18310_v9 = vadd.f32 %v13913_v48, %v13912_v28  ;;  %v13915_v17 = vpop.f32.mrb[186].mxu0 }
 0x3c0   :  { %v13916_v8 = vpop.f32.mrb[187].mxu0 }
 0x3c1   :  { %v18315_v16 = vadd.f32 %v13916_v8, %v13915_v17  ;;  %v13918_v28 = vpop.f32.mrb[188].mxu0  ;;  %v15960_v8 = vld [vmem:[%s21236_s4 + $0x658] ss:$16 sps:$4 sm:$0xff]  }
 0x3c2   :  { %5328 = vmatpush1.bf16.msra.mxu0 %v17265_v61  ;;  %v13919_v48 = vpop.f32.mrb[189].mxu0 }
 0x3c3   :  { %5329 = vmatprep.subr.bf16.mxu0 %v21252_v1  ;;  %v18323_v1 = vadd.f32 %v13919_v48, %v13918_v28  ;;  %v13921_v52 = vpop.f32.mrb[190].mxu0 }
 0x3c5   :  { %5306 = vmatmul.mubr.bf16.gmra.mrb[120].mxu0 %v12638_v25  ;;  %v15962_v25 = vld [vmem:[%s21236_s4 + $0x65c] ss:$16 sps:$4 sm:$0xff]  }
 0x3c6   :  { %5330 = vmatpush1.bf16.msra.mxu0 %v17282_v6  ;;  %12642 = vmatprep.mubr.msk.bf16.mxu0 %vm1004_vm0, %v15959_v10  ;;  %v13922_v10 = vpop.f32.mrb[191].mxu0 }
 0x3c7   :  { %14261 = vmatprep.subr.bf16.mxu0 %v17029_v50  ;;  %v18328_v17 = vadd.f32 %v13922_v10, %v13921_v52  ;;  %v13924_v28 = vpop.f32.mrb[192].mxu0 }
 0x3c8   :  { %v13925_v48 = vpop.f32.mrb[193].mxu0 }
 0x3c9   :  { %v13927_v58 = vpop.f32.mrb[194].mxu0 }
 0x3ca   :  { %v13928_v52 = vpop.f32.mrb[195].mxu0 }
 0x3cb   :  { %v18343_v10 = vadd.f32 %v13928_v52, %v13927_v58  ;;  %v12621_v52 = vld [vmem:[%s21236_s4 + $0x6b8] sm:$0xff] }
 0x3cc   :  { %v12640_v11 = vcombine.low %v12621_v52, %v12621_v52 }
 0x3cd   :  { %5346 = vmatmul.mubr.bf16.vlgmr.msra.gmra.mrb[124].mxu0 %v15957_v12  ;;  %v15965_v12 = vld [vmem:[%s21236_s4 + $0x67c] ss:$16 sps:$4 sm:$0xff]  }
 0x3ce   :  { %14262 = vmatpush3.bf16.msra.mxu0 %v16981_v20  ;;  %12643 = vmatprep.mubr.msk.bf16.mxu0 %vm1004_vm0, %v15962_v25  ;;  %v18338_v25 = vadd.f32 %v13925_v48, %v13924_v28  ;;  %v13930_v28 = vpop.f32.mrb[196].mxu0 }
 0x3cf   :  { %14263 = vmatprep.subr.bf16.mxu0 %v17039_v62  ;;  %v13931_v48 = vpop.f32.mrb[197].mxu0 }
 0x3d0   :  { %v13933_v51 = vpop.f32.mrb[198].mxu0 }
 0x3d1   :  { %v13934_v58 = vpop.f32.mrb[199].mxu0 }
 0x3d2   :  { %14264 = vmatpush3.bf16.msra.mxu0 %v16987_v31  ;;  %v3037_v51 = vpop.f32.mrb[200].mxu0 }
 0x3d3   :  { %14265 = vmatprep.subr.bf16.mxu0 %v17049_v13 }
 0x3d5   :  { %5354 = vmatmul.mubr.bf16.gmra.mrb[128].mxu0 %v15960_v8  ;;  %v15968_v8 = vld [vmem:[%s21236_s4 + $0x69c] ss:$16 sps:$4 sm:$0xff]  }
 0x3d6   :  { %14266 = vmatpush3.bf16.msra.mxu0 %v16993_v42  ;;  %12644 = vmatprep.mubr.msk.bf16.mxu0 %vm1004_vm0, %v15965_v12  ;;  %v18353_v12 = vadd.f32 %v13931_v48, %v13930_v28  ;;  %v12641_v28 = vcombine.high %v12621_v52, %v12621_v52 }
 0x3d7   :  { %14267 = vmatprep.subr.bf16.mxu0 %v17059_v27 }
 0x3da   :  { %14268 = vmatpush3.bf16.msra.mxu0 %v16999_v53 }
 0x3db   :  { %14269 = vmatprep.subr.bf16.mxu0 %v17069_v40 }
 0x3dd   :  { %5362 = vmatmul.mubr.bf16.gmra.mrb[132].mxu0 %v15963_v24  ;;  %v18367_v24 = vadd.f32 %v18299_v47, %v3037_v51 }
 0x3de   :  { %14270 = vmatpush3.bf16.msra.mxu0 %v17005_v0  ;;  %12645 = vmatprep.mubr.msk.bf16.mxu0 %vm1004_vm0, %v15968_v8  ;;  %v3039_v8 = vpop.f32.mrb[201].mxu0 }
 0x3df   :  { %14271 = vmatprep.subr.bf16.mxu0 %v17079_v54  ;;  %v3040_v48 = vpop.f32.mrb[202].mxu0  ;;  %v15971_v8 = vld [vmem:[%s21236_s4 + $0x6c0] ss:$16 sps:$4 sm:$0xff]  }
 0x3e0   :  { %v18370_v58 = vadd.f32 %v18303_v35, %v3040_v48  ;;  %v3042_v7 = vpop.f32.mrb[203].mxu0 }
 0x3e1   :  { %v3045_v41 = vpop.f32.mrb[204].mxu0 }
 0x3e2   :  { %14272 = vmatpush3.bf16.msra.mxu0 %v17011_v14  ;;  %v18382_v35 = vadd.f32 %v18310_v9, %v3045_v41  ;;  %v3047_v7 = vpop.f32.mrb[205].mxu0  ;;  %v15976_v41 = vld [vmem:[%s21236_s4 + $0x6e4] ss:$16 sps:$4 sm:$0xff]  }
 0x3e3   :  { %14273 = vmatprep.subr.bf16.mxu0 %v17089_v4  ;;  %v3048_v47 = vpop.f32.mrb[206].mxu0 }
 0x3e4   :  { %v3050_v51 = vpop.f32.mrb[207].mxu0 }
 0x3e5   :  { %5370 = vmatmul.mubr.bf16.gmra.mrb[136].mxu0 %v15966_v34  ;;  %v15973_v34 = vld [vmem:[%s21236_s4 + $0x6c4] ss:$16 sps:$4 sm:$0xff]   ;;  %v3053_v9 = vpop.f32.mrb[208].mxu0 }
 0x3e6   :  { %14274 = vmatpush3.bf16.msra.mxu0 %v17017_v26  ;;  %12646 = vmatprep.mubr.msk.bf16.mxu0 %vm1004_vm0, %v12641_v28  ;;  %v18386_v28 = vadd.f32 %v18315_v16, %v3048_v47  ;;  %v18397_v48 = vadd.f32 %v18323_v1, %v3053_v9  ;;  %v15974_v1 = vld [vmem:[%s21236_s4 + $0x6e0] ss:$16 sps:$4 sm:$0xff]  }
 0x3e7   :  { %14275 = vmatprep.subr.bf16.mxu0 %v17099_v19 }
 0x3ea   :  { %14276 = vmatpush3.bf16.msra.mxu0 %v17023_v38 }
 0x3eb   :  { %14314 = vmatprep.subr.bf16.mxu0 %v17029_v50 }
 0x3ed   :  { %5378 = vmatmul.mubr.bf16.gmra.mrb[140].mxu0 %v12640_v11  ;;  %v3055_v11 = vpop.f32.mrb[209].mxu0 }
 0x3ee   :  { %5658 = vmatprep.mubr.bf16.mxu0 %v15973_v34  ;;  %v3056_v16 = vpop.f32.mrb[210].mxu0 }
 0x3ef   :  { %v18400_v34 = vadd.f32 %v18328_v17, %v3056_v16  ;;  %v3058_v7 = vpop.f32.mrb[211].mxu0  ;;  %v15979_v17 = vld [vmem:[%s21236_s4 + $0x704] ss:$16 sps:$4 sm:$0xff]  }
 0x3f0   :  { %v3061_v51 = vpop.f32.mrb[212].mxu0  ;;  %v15980_v7 = vld [vmem:[%s21236_s4 + $0x720] ss:$16 sps:$4 sm:$0xff]  }
 0x3f5   :  { %5659 = vmatmul.mubr.bf16.vlgmr.msra.gmra.mrb[144].mxu0 %v15971_v8  ;;  %v18415_v8 = vadd.f32 %v18338_v25, %v3061_v51  ;;  %v15977_v25 = vld [vmem:[%s21236_s4 + $0x700] ss:$16 sps:$4 sm:$0xff]  }
 0x3f6   :  { %14315 = vmatpush3.bf16.msra.mxu0 %v16981_v20  ;;  %5666 = vmatprep.mubr.bf16.mxu0 %v15976_v41  ;;  %v3063_v41 = vpop.f32.mrb[213].mxu0 }
 0x3f7   :  { %14316 = vmatprep.subr.bf16.mxu0 %v17039_v62  ;;  %21279 = vst [vmem:[#allocation24_spill] sm:$0xff] %v18415_v8  ;;  %v3064_v9 = vpop.f32.mrb[214].mxu0 }
 0x3f8   :  { %v18418_v11 = vadd.f32 %v18343_v10, %v3064_v9  ;;  %v3066_v16 = vpop.f32.mrb[215].mxu0  ;;  %v15982_v10 = vld [vmem:[%s21236_s4 + $0x724] ss:$16 sps:$4 sm:$0xff]  }
 0x3f9   :  { %v12674_v16 = vld [vmem:[%s21236_s4 + $0x740] sm:$0xff] }
 0x3fa   :  { %14317 = vmatpush3.bf16.msra.mxu0 %v16987_v31  ;;  %v12692_v47 = vcombine.low %v12674_v16, %v12674_v16 }
 0x3fb   :  { %14318 = vmatprep.subr.bf16.mxu0 %v17049_v13 }
 0x3fd   :  { %5667 = vmatmul.mubr.bf16.gmra.mrb[148].mxu0 %v15974_v1  ;;  %v3069_v1 = vpop.f32.mrb[216].mxu0 }
 0x3fe   :  { %14319 = vmatpush3.bf16.msra.mxu0 %v16993_v42  ;;  %5674 = vmatprep.mubr.bf16.mxu0 %v15979_v17  ;;  %v18433_v17 = vadd.f32 %v18353_v12, %v3069_v1  ;;  %v3071_v51 = vpop.f32.mrb[217].mxu0  ;;  %v12693_v12 = vcombine.high %v12674_v16, %v12674_v16  ;;  %v15991_v16 = vld [vmem:[%s21236_s4 + $0x774] ss:$16 sps:$4 sm:$0xff]  }
 0x3ff   :  { %14320 = vmatprep.subr.bf16.mxu0 %v17059_v27  ;;  %v3072_v41 = vpop.f32.mrb[218].mxu0 }
 0x400   :  { %21280 = vst [vmem:[#allocation25_spill] sm:$0xff] %v18433_v17  ;;  %v3073_v9 = vpop.f32.mrb[219].mxu0  ;;  %v16001_v17 = vld [vmem:[%s21237_s5 + $0x30] sm:$0xff]  }
 0x401   :  { %v18444_v1 = vpop.f32.mrb[220].mxu0 }
 0x402   :  { %14321 = vmatpush3.bf16.msra.mxu0 %v16999_v53 }
 0x403   :  { %14322 = vmatprep.subr.bf16.mxu0 %v17069_v40 }
 0x405   :  { %5675 = vmatmul.mubr.bf16.gmra.mrb[152].mxu0 %v15977_v25  ;;  %v18447_v25 = vpop.f32.mrb[221].mxu0 }
 0x406   :  { %14323 = vmatpush3.bf16.msra.mxu0 %v17005_v0  ;;  %5682 = vmatprep.mubr.bf16.mxu0 %v15982_v10  ;;  %v18449_v10 = vpop.f32.mrb[222].mxu0 }
 0x407   :  { %14324 = vmatprep.subr.bf16.mxu0 %v17079_v54  ;;  %21281 = vst [vmem:[#allocation26_spill] sm:$0xff] %v18449_v10  ;;  %v18451_v51 = vpop.f32.mrb[223].mxu0 }
 0x408   :  { %21282 = vst [vmem:[#allocation27_spill] sm:$0xff] %v18451_v51  ;;  %v18455_v41 = vpop.f32.mrb[224].mxu0  ;;  %v21287_v51 = vmov 0  }
 0x409   :  { %21283 = vst [vmem:[#allocation28_spill] sm:$0xff] %v18455_v41  ;;  %v18457_v9 = vpop.f32.mrb[225].mxu0 }
 0x40a   :  { %14325 = vmatpush3.bf16.msra.mxu0 %v17011_v14  ;;  %21284 = vst [vmem:[#allocation29_spill] sm:$0xff] %v18457_v9  ;;  %v18459_v52 = vpop.f32.mrb[226].mxu0  ;;  %v15996_v9 = vld [vmem:[%s21236_s4 + $0x7b0] ss:$16 sps:$4 sm:$0xff]  }
 0x40b   :  { %14326 = vmatprep.subr.bf16.mxu0 %v17089_v4  ;;  %21285 = vst [vmem:[#allocation30_spill] sm:$0xff] %v18459_v52  ;;  %v18465_v3 = vpop.f32.mrb[227].mxu0 }
 0x40c   :  { %21286 = vst [vmem:[#allocation31_spill] sm:$0xff] %v18465_v3  ;;  %v15989_v3 = vld [vmem:[%s21236_s4 + $0x770] ss:$16 sps:$4 sm:$0xff]  }
 0x40d   :  { %5683 = vmatmul.mubr.bf16.gmra.mrb[156].mxu0 %v15980_v7  ;;  %v15988_v7 = vld [vmem:[%s21236_s4 + $0x754] ss:$16 sps:$4 sm:$0xff]  }
 0x40e   :  { %14327 = vmatpush3.bf16.msra.mxu0 %v17017_v26  ;;  %5690 = vmatprep.mubr.bf16.mxu0 %v12693_v12  ;;  %v15986_v12 = vld [vmem:[%s21236_s4 + $0x750] ss:$16 sps:$4 sm:$0xff]  }
 0x40f   :  { %14328 = vmatprep.subr.bf16.mxu0 %v17099_v19 }
 0x412   :  { %14329 = vmatpush3.bf16.msra.mxu0 %v17023_v38 }
 0x413   :  { %6083 = vmatprep.subr.bf16.mxu0 %v21287_v51 }
 0x415   :  { %5691 = vmatmul.mubr.bf16.gmra.mrb[160].mxu0 %v12692_v47  ;;  %v15995_v47 = vld [vmem:[%s21236_s4 + $0x794] ss:$16 sps:$4 sm:$0xff]  }
 0x416   :  { %6043 = vmatprep.mubr.bf16.mxu0 %v15988_v7  ;;  %v15993_v7 = vld [vmem:[%s21236_s4 + $0x790] ss:$16 sps:$4 sm:$0xff]  }
 0x41d   :  { %6044 = vmatmul.mubr.bf16.vlgmr.msra.gmra.mrb[164].mxu0 %v15986_v12  ;;  %v15998_v12 = vld [vmem:[%s21236_s4 + $0x7b4] ss:$16 sps:$4 sm:$0xff]  }
 0x41e   :  { %6084 = vmatpush1.bf16.msra.mxu0 %v17124_v39  ;;  %6051 = vmatprep.mubr.bf16.mxu0 %v15991_v16 }
 0x41f   :  { %6085 = vmatprep.subr.bf16.mxu0 %v21287_v51 }
 0x422   :  { %6086 = vmatpush1.bf16.msra.mxu0 %v17148_v59 }
 0x423   :  { %6087 = vmatprep.subr.bf16.mxu0 %v21287_v51 }
 0x425   :  { %6052 = vmatmul.mubr.bf16.gmra.mrb[168].mxu0 %v15989_v3  ;;  %v12728_v3 = vld [vmem:[%s21236_s4 + $0x7d0] sm:$0xff] }
 0x426   :  { %6088 = vmatpush1.bf16.msra.mxu0 %v17172_v18  ;;  %6059 = vmatprep.mubr.bf16.mxu0 %v15995_v47  ;;  %v12747_v41 = vcombine.high %v12728_v3, %v12728_v3 }
 0x427   :  { %6089 = vmatprep.subr.bf16.mxu0 %v21287_v51 }
 0x42a   :  { %6090 = vmatpush1.bf16.msra.mxu0 %v17196_v44 }
 0x42b   :  { %6091 = vmatprep.subr.bf16.mxu0 %v21287_v51 }
 0x42d   :  { %6060 = vmatmul.mubr.bf16.gmra.mrb[172].mxu0 %v15993_v7 }
 0x42e   :  { %6092 = vmatpush1.bf16.msra.mxu0 %v17214_v2  ;;  %6067 = vmatprep.mubr.bf16.mxu0 %v15998_v12 }
 0x42f   :  { %6093 = vmatprep.subr.bf16.mxu0 %v21287_v51 }
 0x430   :  { %v1882_v16 = vpop.f32.mrb[100].mxu1 }
 0x431   :  { %v1883_v47 = vadd.f32 %v17872_v30, %v1882_v16  ;;  %v1884_v52 = vpop.f32.mrb[101].mxu1  ;;  %v18512_v30 = vadd.f32 %v18197_v49, %v18183_v21  ;;  %v16004_v49 = vld [vmem:[%s21236_s4 + $0x75c] ss:$16 sps:$4 sm:$0xff]  }
 0x432   :  { %6094 = vmatpush1.bf16.msra.mxu0 %v17229_v23  ;;  %v1885_v7 = vpop.f32.mrb[102].mxu1  ;;  %v16008_v52 = vld [vmem:[%s21237_s5 + $0x38] sm:$0xff]  }
 0x433   :  { %v1886_v12 = vadd.f32 %v17878_v60, %v1885_v7  ;;  %v1887_v10 = vpop.f32.mrb[103].mxu1  ;;  %6095 = vmatprep.subr.bf16.mxu0 %v21287_v51 }
 0x435   :  { %v1920_v8 = vpack.c.bf16 %v1886_v12, %v1883_v47  ;;  %6068 = vmatmul.mubr.bf16.gmra.mrb[176].mxu0 %v15996_v9  ;;  %v12746_v9 = vcombine.low %v12728_v3, %v12728_v3  ;;  %v16002_v47 = vld [vmem:[%s21236_s4 + $0x758] ss:$16 sps:$4 sm:$0xff]   ;;  %v16007_v12 = vld [vmem:[%s21236_s4 + $0x77c] ss:$16 sps:$4 sm:$0xff]  }
 0x436   :  { %6096 = vmatpush1.bf16.msra.mxu0 %v17247_v43  ;;  %6075 = vmatprep.mubr.bf16.mxu0 %v12747_v41 }
 0x437   :  { %14687 = vmatmul.mubr.msk.bf16.vlgmr.msra.gmra.mrb[80].mxu1 %vm1466_vm3, %v1920_v8  ;;  %6097 = vmatprep.subr.bf16.mxu0 %v21287_v51 }
 0x438   :  { %v1890_v60 = vpop.f32.mrb[104].mxu1  ;;  %14707 = vmatpush3.bf16.msra.mxu1 %v16001_v17  ;;  %14690 = vmatprep.mubr.msk.bf16.mxu1 %vm16663_vm2, %v21273_v29 }
 0x439   :  { %v1891_v10 = vadd.f32 %v18190_v46, %v1890_v60  ;;  %v1892_v41 = vpop.f32.mrb[105].mxu1  ;;  %14708 = vmatprep.subr.bf16.mxu1 %v21273_v29 }
 0x43a   :  { %6098 = vmatpush1.bf16.msra.mxu0 %v17265_v61  ;;  %v1893_v21 = vpop.f32.mrb[106].mxu1 }
 0x43b   :  { %v1894_v8 = vadd.f32 %v18194_v63, %v1893_v21  ;;  %v1895_v17 = vpop.f32.mrb[107].mxu1  ;;  %6099 = vmatprep.subr.bf16.mxu0 %v21287_v51 }
 0x43c   :  { %14709 = vmatpush3.bf16.msra.mxu1 %v16008_v52 }
 0x43d   :  { %v1921_v16 = vpack.c.bf16 %v1894_v8, %v1891_v10  ;;  %6076 = vmatmul.mubr.bf16.gmra.mrb[180].mxu0 %v12746_v9  ;;  %2618 = vmatprep.subr.bf16.mxu1 %v21287_v51 }
 0x43e   :  { %6100 = vmatpush1.bf16.msra.mxu0 %v17282_v6  ;;  %12750 = vmatprep.mubr.msk.bf16.mxu0 %vm1004_vm0, %v16004_v49  ;;  %v16011_v49 = vld [vmem:[%s21236_s4 + $0x79c] ss:$16 sps:$4 sm:$0xff]  }
 0x43f   :  { %14367 = vmatprep.subr.bf16.mxu0 %v17029_v50  ;;  %14691 = vmatmul.mubr.msk.bf16.gmra.mrb[84].mxu1 %vm1466_vm3, %v1921_v16 }
 0x440   :  { %v1898_v46 = vpop.f32.mrb[108].mxu1  ;;  %14694 = vmatprep.mubr.msk.bf16.mxu1 %vm16663_vm2, %v21273_v29 }
 0x441   :  { %v1899_v63 = vadd.f32 %v18220_v15, %v1898_v46  ;;  %v1900_v3 = vpop.f32.mrb[109].mxu1 }
 0x442   :  { %v1901_v7 = vpop.f32.mrb[110].mxu1 }
 0x443   :  { %v1902_v60 = vadd.f32 %v18224_v36, %v1901_v7  ;;  %v1903_v52 = vpop.f32.mrb[111].mxu1  ;;  %v16005_v36 = vld [vmem:[%s21236_s4 + $0x778] ss:$16 sps:$4 sm:$0xff]  }
 0x445   :  { %v1922_v10 = vpack.c.bf16 %v1902_v60, %v1899_v63  ;;  %6116 = vmatmul.mubr.bf16.vlgmr.msra.gmra.mrb[184].mxu0 %v16002_v47  ;;  %v16009_v63 = vld [vmem:[%s21236_s4 + $0x798] ss:$16 sps:$4 sm:$0xff]   ;;  %v16014_v47 = vld [vmem:[%s21236_s4 + $0x7bc] ss:$16 sps:$4 sm:$0xff]  }
 0x446   :  { %14368 = vmatpush3.bf16.msra.mxu0 %v16981_v20  ;;  %12751 = vmatprep.mubr.msk.bf16.mxu0 %vm1004_vm0, %v16007_v12  ;;  %v16012_v60 = vld [vmem:[%s21236_s4 + $0x7b8] ss:$16 sps:$4 sm:$0xff]  }
 0x447   :  { %14369 = vmatprep.subr.bf16.mxu0 %v17039_v62  ;;  %14695 = vmatmul.mubr.msk.bf16.gmra.mrb[88].mxu1 %vm1466_vm3, %v1922_v10  ;;  %v21288_v10 = vpack.c.bf16 %v18099_v45, %v18096_v33  ;;  %v21289_v33 = vpack.c.bf16 %v18117_v57, %v18111_v32  ;;  %v16022_v45 = vld [vmem:[%s21236_s4 + $0x804] ss:$16 sps:$4 sm:$0xff]   ;;  %v21290_v32 = vpack.c.bf16 %v18137_v5, %v18134_v56  ;;  %v16020_v57 = vld [vmem:[%s21236_s4 + $0x800] ss:$16 sps:$4 sm:$0xff]  }
 0x448   :  { %v1906_v15 = vpop.f32.mrb[112].mxu1  ;;  %14698 = vmatprep.mubr.msk.bf16.mxu1 %vm16663_vm2, %v21273_v29  ;;  %v21292_v56 = vld [vmem:[#allocation5_spill] sm:$0xff] }
 0x449   :  { %v1907_v41 = vadd.f32 %v18237_v37, %v1906_v15  ;;  %v1908_v9 = vpop.f32.mrb[113].mxu1 }
 0x44a   :  { %14370 = vmatpush3.bf16.msra.mxu0 %v16987_v31  ;;  %v1909_v21 = vpop.f32.mrb[114].mxu1 }
 0x44b   :  { %v1910_v8 = vadd.f32 %v18241_v55, %v1909_v21  ;;  %14371 = vmatprep.subr.bf16.mxu0 %v17049_v13  ;;  %v1911_v17 = vpop.f32.mrb[115].mxu1  ;;  %v16048_v21 = vld [vmem:[%s21237_s5 + $0x40] sm:$0xff]  }
 0x44c   :  { %v16043_v17 = vld [vmem:[%s21236_s4 + $0x2ac] ss:$16 sps:$4 sm:$0xff]  }
 0x44d   :  { %v1923_v16 = vpack.c.bf16 %v1910_v8, %v1907_v41  ;;  %6124 = vmatmul.mubr.bf16.gmra.mrb[188].mxu0 %v16005_v36  ;;  %v16019_v41 = vld [vmem:[%s21236_s4 + $0x7e4] ss:$16 sps:$4 sm:$0xff]   ;;  %v16034_v36 = vld [vmem:[%s21236_s4 + $0x26c] ss:$16 sps:$4 sm:$0xff]   ;;  %v16042_v8 = vld [vmem:[%s21236_s4 + $0x288] ss:$16 sps:$4 sm:$0xff]  }
 0x44e   :  { %14372 = vmatpush3.bf16.msra.mxu0 %v16993_v42  ;;  %12752 = vmatprep.mubr.msk.bf16.mxu0 %vm1004_vm0, %v16011_v49  ;;  %v16040_v49 = vld [vmem:[%s21236_s4 + $0x28c] ss:$16 sps:$4 sm:$0xff]  }
 0x44f   :  { %14373 = vmatprep.subr.bf16.mxu0 %v17059_v27  ;;  %14699 = vmatmul.mubr.msk.bf16.gmra.mrb[92].mxu1 %vm1466_vm3, %v1923_v16  ;;  %v12243_v16 = vld [vmem:[%s21236_s4 + $0x2c8] sm:$0xff] }
 0x450   :  { %v1914_v37 = vpop.f32.mrb[116].mxu1  ;;  %14702 = vmatprep.mubr.msk.bf16.mxu1 %vm16663_vm2, %v21273_v29 }
 0x451   :  { %v1915_v46 = vadd.f32 %v18266_v22, %v1914_v37  ;;  %v1916_v55 = vpop.f32.mrb[117].mxu1  ;;  %v12729_v22 = vld [vmem:[%s21236_s4 + $0x7d8] sm:$0xff] }
 0x452   :  { %14374 = vmatpush3.bf16.msra.mxu0 %v16999_v53  ;;  %v1917_v3 = vpop.f32.mrb[118].mxu1  ;;  %v12749_v52 = vcombine.high %v12729_v22, %v12729_v22  ;;  %v12748_v15 = vcombine.low %v12729_v22, %v12729_v22  ;;  %v16045_v37 = vld [vmem:[%s21236_s4 + $0x2a8] ss:$16 sps:$4 sm:$0xff]   ;;  %v12262_v55 = vcombine.low %v12243_v16, %v12243_v16 }
 0x453   :  { %14375 = vmatprep.subr.bf16.mxu0 %v17069_v40  ;;  %v1918_v7 = vpop.f32.mrb[119].mxu1  ;;  %v1924_v12 = vpack.c.bf16 %v1915_v46, %v1915_v46  ;;  %v12263_v46 = vcombine.high %v12243_v16, %v12243_v16  ;;  %v21296_v3 = vld [vmem:[#allocation9_spill] sm:$0xff] }
 0x454   :  { %v21297_v7 = vld [vmem:[#allocation10_spill] sm:$0xff] }
 0x455   :  { %6132 = vmatmul.mubr.bf16.gmra.mrb[192].mxu0 %v16009_v63  ;;  %v21295_v63 = vld [vmem:[#allocation8_spill] sm:$0xff] }
 0x456   :  { %14376 = vmatpush3.bf16.msra.mxu0 %v17005_v0  ;;  %12753 = vmatprep.mubr.msk.bf16.mxu0 %vm1004_vm0, %v16014_v47  ;;  %v13858_v47 = vadd.f32 %v21296_v3, %v21295_v63 }
 0x457   :  { %14377 = vmatprep.subr.bf16.mxu0 %v17079_v54  ;;  %14703 = vmatmul.mubr.msk.bf16.gmra.mrb[96].mxu1 %vm1466_vm3, %v1924_v12  ;;  %v21298_v12 = vld [vmem:[#allocation11_spill] sm:$0xff] }
 0x458   :  { %14710 = vmatprep.mubr.msk.bf16.mxu1 %vm16663_vm2, %v21273_v29  ;;  %v13861_v22 = vadd.f32 %v21298_v12, %v21297_v7 }
 0x45a   :  { %14378 = vmatpush3.bf16.msra.mxu0 %v17011_v14 }
 0x45b   :  { %14379 = vmatprep.subr.bf16.mxu0 %v17089_v4 }
 0x45d   :  { %6140 = vmatmul.mubr.bf16.gmra.mrb[196].mxu0 %v16012_v60  ;;  %v21299_v60 = vld [vmem:[#allocation12_spill] sm:$0xff] }
 0x45e   :  { %14380 = vmatpush3.bf16.msra.mxu0 %v17017_v26  ;;  %12754 = vmatprep.mubr.msk.bf16.mxu0 %vm1004_vm0, %v12749_v52  ;;  %v21300_v52 = vld [vmem:[#allocation13_spill] sm:$0xff] }
 0x45f   :  { %14381 = vmatprep.subr.bf16.mxu0 %v17099_v19  ;;  %14711 = vmatmul.mubr.msk.bf16.vlgmr.msra.gmra.mrb[80].mxu1 %vm1466_vm3, %v21288_v10  ;;  %v13864_v10 = vadd.f32 %v21300_v52, %v21299_v60 }
 0x460   :  { %2619 = vmatpush1.bf16.msra.mxu1 %v17124_v39  ;;  %14714 = vmatprep.mubr.msk.bf16.mxu1 %vm16663_vm2, %v21273_v29 }
 0x461   :  { %2620 = vmatprep.subr.bf16.mxu1 %v21287_v51 }
 0x462   :  { %14382 = vmatpush3.bf16.msra.mxu0 %v17023_v38 }
 0x463   :  { %14420 = vmatprep.subr.bf16.mxu0 %v17029_v50  ;;  %v16017_v50 = vld [vmem:[%s21236_s4 + $0x7e0] ss:$16 sps:$4 sm:$0xff]  }
 0x464   :  { %2621 = vmatpush1.bf16.msra.mxu1 %v17148_v59 }
 0x465   :  { %6148 = vmatmul.mubr.bf16.gmra.mrb[200].mxu0 %v12748_v15  ;;  %2622 = vmatprep.subr.bf16.mxu1 %v21287_v51  ;;  %v21301_v15 = vld [vmem:[#allocation14_spill] sm:$0xff] }
 0x466   :  { %6428 = vmatprep.mubr.bf16.mxu0 %v16019_v41  ;;  %v21302_v41 = vld [vmem:[#allocation15_spill] sm:$0xff] }
 0x467   :  { %14715 = vmatmul.mubr.msk.bf16.gmra.mrb[84].mxu1 %vm1466_vm3, %v21289_v33  ;;  %v18755_v33 = vadd.f32 %v21302_v41, %v21301_v15 }
 0x468   :  { %2623 = vmatpush1.bf16.msra.mxu1 %v17172_v18  ;;  %14718 = vmatprep.mubr.msk.bf16.mxu1 %vm16663_vm2, %v21273_v29 }
 0x469   :  { %2624 = vmatprep.subr.bf16.mxu1 %v21287_v51 }
 0x46c   :  { %2625 = vmatpush1.bf16.msra.mxu1 %v17196_v44 }
 0x46d   :  { %6429 = vmatmul.mubr.bf16.vlgmr.msra.gmra.mrb[204].mxu0 %v16017_v50  ;;  %2626 = vmatprep.subr.bf16.mxu1 %v21287_v51  ;;  %v21303_v50 = vld [vmem:[#allocation16_spill] sm:$0xff] }
 0x46e   :  { %14421 = vmatpush3.bf16.msra.mxu0 %v16981_v20  ;;  %6436 = vmatprep.mubr.bf16.mxu0 %v16022_v45  ;;  %v16025_v20 = vld [vmem:[%s21236_s4 + $0x824] ss:$16 sps:$4 sm:$0xff]  }
 0x46f   :  { %14422 = vmatprep.subr.bf16.mxu0 %v17039_v62  ;;  %14719 = vmatmul.mubr.msk.bf16.gmra.mrb[88].mxu1 %vm1466_vm3, %v21290_v32  ;;  %v21291_v62 = vld [vmem:[#allocation6_spill] sm:$0xff]  ;;  %v21304_v45 = vld [vmem:[#allocation17_spill] sm:$0xff] }
 0x470   :  { %2627 = vmatpush1.bf16.msra.mxu1 %v17214_v2  ;;  %14722 = vmatprep.mubr.msk.bf16.mxu1 %vm16663_vm2, %v21273_v29  ;;  %v21293_v5 = vpack.c.bf16 %v21291_v62, %v21292_v56  ;;  %v18759_v32 = vadd.f32 %v21304_v45, %v21303_v50  ;;  %v21307_v56 = vld [vmem:[#allocation20_spill] sm:$0xff] }
 0x471   :  { %2628 = vmatprep.subr.bf16.mxu1 %v21287_v51 }
 0x472   :  { %14423 = vmatpush3.bf16.msra.mxu0 %v16987_v31  ;;  %v16023_v31 = vld [vmem:[%s21236_s4 + $0x820] ss:$16 sps:$4 sm:$0xff]  }
 0x473   :  { %14424 = vmatprep.subr.bf16.mxu0 %v17049_v13  ;;  %v16031_v13 = vld [vmem:[%s21236_s4 + $0x24c] ss:$16 sps:$4 sm:$0xff]  }
 0x474   :  { %2629 = vmatpush1.bf16.msra.mxu1 %v17229_v23 }
 0x475   :  { %6437 = vmatmul.mubr.bf16.gmra.mrb[208].mxu0 %v16020_v57  ;;  %2630 = vmatprep.subr.bf16.mxu1 %v21287_v51  ;;  %v21305_v57 = vld [vmem:[#allocation18_spill] sm:$0xff] }
 0x476   :  { %14425 = vmatpush3.bf16.msra.mxu0 %v16993_v42  ;;  %6444 = vmatprep.mubr.bf16.mxu0 %v16025_v20  ;;  %v16028_v42 = vld [vmem:[%s21236_s4 + $0x844] ss:$16 sps:$4 sm:$0xff]  }
 0x477   :  { %14426 = vmatprep.subr.bf16.mxu0 %v17059_v27  ;;  %14723 = vmatmul.mubr.msk.bf16.gmra.mrb[92].mxu1 %vm1466_vm3, %v21293_v5  ;;  %v21294_v27 = vld [vmem:[#allocation7_spill] sm:$0xff]  ;;  %v21308_v5 = vld [vmem:[#allocation21_spill] sm:$0xff] }
 0x478   :  { %2631 = vmatpush1.bf16.msra.mxu1 %v17247_v43  ;;  %14726 = vmatprep.mubr.msk.bf16.mxu1 %vm16663_vm2, %v21273_v29  ;;  %v2309_v9 = vpack.c.bf16 %v21294_v27, %v21294_v27  ;;  %v21306_v20 = vld [vmem:[#allocation19_spill] sm:$0xff] }
 0x479   :  { %2632 = vmatprep.subr.bf16.mxu1 %v21287_v51  ;;  %v18763_v62 = vadd.f32 %v21306_v20, %v21305_v57 }
 0x47a   :  { %14427 = vmatpush3.bf16.msra.mxu0 %v16999_v53  ;;  %v12782_v53 = vld [vmem:[%s21236_s4 + $0x860] sm:$0xff] }
 0x47b   :  { %14428 = vmatprep.subr.bf16.mxu0 %v17069_v40  ;;  %v16026_v40 = vld [vmem:[%s21236_s4 + $0x840] ss:$16 sps:$4 sm:$0xff]  }
 0x47c   :  { %2633 = vmatpush1.bf16.msra.mxu1 %v17265_v61 }
 0x47d   :  { %6445 = vmatmul.mubr.bf16.gmra.mrb[212].mxu0 %v16023_v31  ;;  %2634 = vmatprep.subr.bf16.mxu1 %v21287_v51  ;;  %v18767_v31 = vadd.f32 %v21308_v5, %v21307_v56 }
 0x47e   :  { %14429 = vmatpush3.bf16.msra.mxu0 %v17005_v0  ;;  %6452 = vmatprep.mubr.bf16.mxu0 %v16028_v42  ;;  %v12801_v0 = vcombine.high %v12782_v53, %v12782_v53  ;;  %v21309_v42 = vld [vmem:[#allocation22_spill] sm:$0xff] }
 0x47f   :  { %14430 = vmatprep.subr.bf16.mxu0 %v17079_v54  ;;  %14727 = vmatmul.mubr.msk.bf16.gmra.mrb[96].mxu1 %vm1466_vm3, %v2309_v9  ;;  %v16029_v54 = vld [vmem:[%s21236_s4 + $0x248] ss:$16 sps:$4 sm:$0xff]   ;;  %v18773_v9 = vpop.f32.mrb[228].mxu0 }
 0x480   :  { %2635 = vmatpush1.bf16.msra.mxu1 %v17282_v6  ;;  %12264 = vmatprep.mubr.msk.bf16.mxu1 %vm1004_vm0, %v16031_v13  ;;  %v21310_v13 = vld [vmem:[#allocation23_spill] sm:$0xff] }
 0x481   :  { %14730 = vmatprep.subr.bf16.mxu1 %v21273_v29  ;;  %v18771_v27 = vadd.f32 %v21310_v13, %v21309_v42 }
 0x482   :  { %14431 = vmatpush3.bf16.msra.mxu0 %v17011_v14  ;;  %v16049_v14 = vld [vmem:[%s21237_s5 + $0x48] sm:$0xff]  }
 0x483   :  { %14432 = vmatprep.subr.bf16.mxu0 %v17089_v4  ;;  %v12800_v4 = vcombine.low %v12782_v53, %v12782_v53  ;;  %v18777_v53 = vadd.f32 %v18447_v25, %v18444_v1 }
 0x485   :  { %6453 = vmatmul.mubr.bf16.gmra.mrb[216].mxu0 %v16026_v40  ;;  %v18779_v40 = vpop.f32.mrb[229].mxu0 }
 0x486   :  { %14433 = vmatpush3.bf16.msra.mxu0 %v17017_v26  ;;  %6460 = vmatprep.mubr.bf16.mxu0 %v12801_v0  ;;  %v16039_v26 = vld [vmem:[%s21236_s4 + $0x874] ss:$16 sps:$4 sm:$0xff]   ;;  %v18781_v0 = vpop.f32.mrb[230].mxu0 }
 0x487   :  { %14434 = vmatprep.subr.bf16.mxu0 %v17099_v19  ;;  %2651 = vmatmul.mubr.bf16.vlgmr.msra.gmra.mrb[120].mxu1 %v16029_v54  ;;  %v16036_v19 = vld [vmem:[%s21236_s4 + $0x268] ss:$16 sps:$4 sm:$0xff]   ;;  %v18783_v54 = vpop.f32.mrb[231].mxu0 }
 0x488   :  { %12265 = vmatprep.mubr.msk.bf16.mxu1 %vm1004_vm0, %v16034_v36  ;;  %14731 = vmatpush3.bf16.msra.mxu1 %v16048_v21  ;;  %v18785_v36 = vpop.f32.mrb[232].mxu0 }
 0x489   :  { %14732 = vmatprep.subr.bf16.mxu1 %v21273_v29  ;;  %v18787_v21 = vpop.f32.mrb[233].mxu0 }
 0x48a   :  { %14435 = vmatpush3.bf16.msra.mxu0 %v17023_v38  ;;  %v16037_v38 = vld [vmem:[%s21236_s4 + $0x870] ss:$16 sps:$4 sm:$0xff]  }
 0x48b   :  { %6853 = vmatprep.subr.bf16.mxu0 %v21287_v51 }
 0x48c   :  { %14733 = vmatpush3.bf16.msra.mxu1 %v16049_v14  ;;  %v18789_v14 = vpop.f32.mrb[234].mxu0 }
 0x48d   :  { %6461 = vmatmul.mubr.bf16.gmra.mrb[220].mxu0 %v12800_v4  ;;  %14754 = vmatprep.subr.bf16.mxu1 %v21273_v29  ;;  %v18791_v4 = vpop.f32.mrb[235].mxu0 }
 0x48e   :  { %6813 = vmatprep.mubr.bf16.mxu0 %v16039_v26  ;;  %v18793_v26 = vpop.f32.mrb[236].mxu0 }
 0x48f   :  { %2659 = vmatmul.mubr.bf16.gmra.mrb[124].mxu1 %v16036_v19 }
 0x490   :  { %12266 = vmatprep.mubr.msk.bf16.mxu1 %vm1004_vm0, %v16040_v49  ;;  %v18795_v49 = vpop.f32.mrb[237].mxu0 }
 0x495   :  { %6814 = vmatmul.mubr.bf16.vlgmr.msra.gmra.mrb[224].mxu0 %v16037_v38  ;;  %v13986_v38 = vpop.f32.mrb[238].mxu0 }
 0x496   :  { %6854 = vmatpush1.bf16.msra.mxu0 %v17124_v39 }
 0x497   :  { %2667 = vmatmul.mubr.bf16.gmra.mrb[128].mxu1 %v16042_v8  ;;  %6855 = vmatprep.subr.bf16.mxu0 %v21287_v51 }
 0x498   :  { %12267 = vmatprep.mubr.msk.bf16.mxu1 %vm1004_vm0, %v16043_v17  ;;  %v13987_v17 = vpop.f32.mrb[239].mxu0 }
 0x49a   :  { %6856 = vmatpush1.bf16.msra.mxu0 %v17148_v59 }
 0x49b   :  { %6857 = vmatprep.subr.bf16.mxu0 %v21287_v51 }
 0x49e   :  { %6858 = vmatpush1.bf16.msra.mxu0 %v17172_v18 }
 0x49f   :  { %2675 = vmatmul.mubr.bf16.gmra.mrb[132].mxu1 %v16045_v37  ;;  %6859 = vmatprep.subr.bf16.mxu0 %v21287_v51 }
 0x4a0   :  { %12268 = vmatprep.mubr.msk.bf16.mxu1 %vm1004_vm0, %v12263_v46  ;;  %v14012_v46 = vpop.f32.mrb[240].mxu0 }
 0x4a1   :  { %v14013_v63 = vpop.f32.mrb[241].mxu0 }
 0x4a2   :  { %6860 = vmatpush1.bf16.msra.mxu0 %v17196_v44  ;;  %v18801_v7 = vadd.f32 %v14013_v63, %v14012_v46  ;;  %v14015_v12 = vpop.f32.mrb[242].mxu0 }
 0x4a3   :  { %6861 = vmatprep.subr.bf16.mxu0 %v21287_v51  ;;  %v14016_v60 = vpop.f32.mrb[243].mxu0 }
 0x4a4   :  { %v14018_v52 = vpop.f32.mrb[244].mxu0 }
 0x4a5   :  { %v14019_v41 = vpop.f32.mrb[245].mxu0 }
 0x4a6   :  { %6862 = vmatpush1.bf16.msra.mxu0 %v17214_v2  ;;  %v18812_v57 = vadd.f32 %v14019_v41, %v14018_v52  ;;  %v14021_v20 = vpop.f32.mrb[246].mxu0 }
 0x4a7   :  { %2683 = vmatmul.mubr.bf16.gmra.mrb[136].mxu1 %v12262_v55  ;;  %6863 = vmatprep.subr.bf16.mxu0 %v21287_v51  ;;  %v16050_v55 = vld [vmem:[%s21237_s5 + $0x50] sm:$0xff]   ;;  %v14022_v5 = vpop.f32.mrb[247].mxu0 }
 0x4a8   :  { %14734 = vmatprep.mubr.msk.bf16.mxu1 %vm16663_vm2, %v21273_v29 }
 0x4aa   :  { %6864 = vmatpush1.bf16.msra.mxu0 %v17229_v23 }
 0x4ab   :  { %6865 = vmatprep.subr.bf16.mxu0 %v21287_v51 }
 0x4ae   :  { %6866 = vmatpush1.bf16.msra.mxu0 %v17247_v43 }
 0x4af   :  { %6867 = vmatprep.subr.bf16.mxu0 %v21287_v51 }
 0x4b2   :  { %6868 = vmatpush1.bf16.msra.mxu0 %v17265_v61 }
 0x4b3   :  { %6869 = vmatprep.subr.bf16.mxu0 %v21287_v51 }
 0x4b6   :  { %6870 = vmatpush1.bf16.msra.mxu0 %v17282_v6 }
 0x55a   :  { %v2652_v19 = vpop.f32.mrb[120].mxu1 }
 0x55b   :  { %v2653_v1 = vadd.f32 %v18512_v30, %v2652_v19  ;;  %v2654_v25 = vpop.f32.mrb[121].mxu1  ;;  %v18804_v30 = vadd.f32 %v14016_v60, %v14015_v12  ;;  %v18814_v19 = vadd.f32 %v14022_v5, %v14021_v20 }
 0x55c   :  { %v2655_v8 = vpop.f32.mrb[122].mxu1 }
 0x55d   :  { %v2656_v16 = vadd.f32 %v13858_v47, %v2655_v8  ;;  %v2657_v37 = vpop.f32.mrb[123].mxu1  ;;  %v16051_v47 = vld [vmem:[%s21237_s5 + $0x58] sm:$0xff]  }
 0x55f   :  { %v2690_v3 = vpack.c.bf16 %v2656_v16, %v2653_v1  ;;  %v14024_v1 = vpop.f32.mrb[248].mxu0 }
 0x560   :  { %v14025_v25 = vpop.f32.mrb[249].mxu0 }
 0x561   :  { %14735 = vmatmul.mubr.msk.bf16.vlgmr.msra.gmra.mrb[80].mxu1 %vm1466_vm3, %v2690_v3  ;;  %v18817_v8 = vadd.f32 %v14025_v25, %v14024_v1 }
 0x562   :  { %v2660_v15 = vpop.f32.mrb[124].mxu1  ;;  %14755 = vmatpush3.bf16.msra.mxu1 %v16050_v55  ;;  %14738 = vmatprep.mubr.msk.bf16.mxu1 %vm16663_vm2, %v21273_v29 }
 0x563   :  { %v2661_v50 = vadd.f32 %v13861_v22, %v2660_v15  ;;  %v2662_v45 = vpop.f32.mrb[125].mxu1  ;;  %14756 = vmatprep.subr.bf16.mxu1 %v21273_v29  ;;  %v14027_v22 = vpop.f32.mrb[250].mxu0 }
 0x564   :  { %v2663_v56 = vpop.f32.mrb[126].mxu1  ;;  %v14028_v17 = vpop.f32.mrb[251].mxu0 }
 0x565   :  { %v2664_v42 = vadd.f32 %v13864_v10, %v2663_v56  ;;  %v2665_v13 = vpop.f32.mrb[127].mxu1  ;;  %v18820_v16 = vadd.f32 %v14028_v17, %v14027_v22  ;;  %v14030_v37 = vpop.f32.mrb[252].mxu0 }
 0x566   :  { %14757 = vmatpush3.bf16.msra.mxu1 %v16051_v47  ;;  %v14031_v10 = vpop.f32.mrb[253].mxu0 }
 0x567   :  { %v2691_v38 = vpack.c.bf16 %v2664_v42, %v2661_v50  ;;  %3388 = vmatprep.subr.bf16.mxu1 %v21287_v51  ;;  %v18825_v3 = vadd.f32 %v14031_v10, %v14030_v37  ;;  %v14033_v12 = vpop.f32.mrb[254].mxu0 }
 0x568   :  { %v14034_v52 = vpop.f32.mrb[255].mxu0 }
 0x569   :  { %14739 = vmatmul.mubr.msk.bf16.gmra.mrb[84].mxu1 %vm1466_vm3, %v2691_v38  ;;  %v18828_v41 = vadd.f32 %v14034_v52, %v14033_v12  ;;  %v14036_v50 = vpop.f32.mrb[0].mxu0  ;;  %v16066_v12 = vld [vmem:[%s21237_s5 + $0x60] sm:$0xff]   ;;  %v16057_v52 = vld [vmem:[%s21236_s4 + $0x388] ss:$16 sps:$4 sm:$0xff]  }
 0x56a   :  { %v2668_v46 = vpop.f32.mrb[128].mxu1  ;;  %14742 = vmatprep.mubr.msk.bf16.mxu1 %vm16663_vm2, %v21273_v29  ;;  %v14037_v45 = vpop.f32.mrb[1].mxu0 }
 0x56b   :  { %v2669_v55 = vadd.f32 %v18755_v33, %v2668_v46  ;;  %v2670_v63 = vpop.f32.mrb[129].mxu1  ;;  %v18830_v56 = vadd.f32 %v14037_v45, %v14036_v50  ;;  %v14039_v5 = vpop.f32.mrb[2].mxu0  ;;  %v16061_v50 = vld [vmem:[%s21236_s4 + $0x3cc] ss:$16 sps:$4 sm:$0xff]  }
 0x56c   :  { %v2671_v60 = vpop.f32.mrb[130].mxu1  ;;  %v14040_v42 = vpop.f32.mrb[3].mxu0  ;;  %v12351_v45 = vld [vmem:[%s21236_s4 + $0x3e8] sm:$0xff] }
 0x56d   :  { %v2672_v15 = vadd.f32 %v18759_v32, %v2671_v60  ;;  %v2673_v47 = vpop.f32.mrb[131].mxu1  ;;  %v16067_v60 = vld [vmem:[%s21237_s5 + $0x68] sm:$0xff]   ;;  %v12371_v5 = vcombine.high %v12351_v45, %v12351_v45  ;;  %v12370_v42 = vcombine.low %v12351_v45, %v12351_v45 }
 0x56e   :  { %v16060_v47 = vld [vmem:[%s21236_s4 + $0x3a8] ss:$16 sps:$4 sm:$0xff]  }
 0x56f   :  { %v2692_v20 = vpack.c.bf16 %v2672_v15, %v2669_v55  ;;  %v16058_v15 = vld [vmem:[%s21236_s4 + $0x3ac] ss:$16 sps:$4 sm:$0xff]  }
 0x571   :  { %14743 = vmatmul.mubr.msk.bf16.gmra.mrb[88].mxu1 %vm1466_vm3, %v2692_v20  ;;  %v16063_v20 = vld [vmem:[%s21236_s4 + $0x3c8] ss:$16 sps:$4 sm:$0xff]  }
 0x572   :  { %v2676_v33 = vpop.f32.mrb[132].mxu1  ;;  %14746 = vmatprep.mubr.msk.bf16.mxu1 %vm16663_vm2, %v21273_v29 }
 0x573   :  { %v2677_v13 = vadd.f32 %v18763_v62, %v2676_v33  ;;  %v2678_v1 = vpop.f32.mrb[133].mxu1  ;;  %v21311_v62 = vpack.c.bf16 %v18370_v58, %v18367_v24  ;;  %v21313_v24 = vpack.c.bf16 %v18400_v34, %v18397_v48  ;;  %v21314_v58 = vld [vmem:[#allocation24_spill] sm:$0xff]  ;;  %v21316_v48 = vld [vmem:[#allocation25_spill] sm:$0xff]  ;;  %v21317_v33 = vld [vmem:[#allocation26_spill] sm:$0xff] }
 0x574   :  { %v2679_v32 = vpop.f32.mrb[134].mxu1  ;;  %v3079_v34 = vpack.c.bf16 %v21316_v48, %v21316_v48 }
 0x575   :  { %v2680_v25 = vadd.f32 %v18767_v31, %v2679_v32  ;;  %v2681_v38 = vpop.f32.mrb[135].mxu1  ;;  %v21312_v31 = vpack.c.bf16 %v18386_v28, %v18382_v35  ;;  %v21315_v35 = vpack.c.bf16 %v18418_v11, %v21314_v58  ;;  %v16054_v28 = vld [vmem:[%s21236_s4 + $0x36c] ss:$16 sps:$4 sm:$0xff]   ;;  %v16052_v11 = vld [vmem:[%s21236_s4 + $0x368] ss:$16 sps:$4 sm:$0xff]  }
 0x576   :  { %v21319_v32 = vld [vmem:[#allocation28_spill] sm:$0xff] }
 0x577   :  { %v2693_v22 = vpack.c.bf16 %v2680_v25, %v2677_v13  ;;  %v21318_v13 = vld [vmem:[#allocation27_spill] sm:$0xff]  ;;  %v21320_v25 = vld [vmem:[#allocation29_spill] sm:$0xff] }
 0x578   :  { %v13964_v1 = vadd.f32 %v21318_v13, %v21317_v33  ;;  %v18935_v38 = vadd.f32 %v21320_v25, %v21319_v32 }
 0x579   :  { %14747 = vmatmul.mubr.msk.bf16.gmra.mrb[92].mxu1 %vm1466_vm3, %v2693_v22  ;;  %v21321_v22 = vld [vmem:[#allocation30_spill] sm:$0xff] }
 0x57a   :  { %v2684_v17 = vpop.f32.mrb[136].mxu1  ;;  %14750 = vmatprep.mubr.msk.bf16.mxu1 %vm16663_vm2, %v21273_v29 }
 0x57b   :  { %v2685_v37 = vadd.f32 %v18771_v27, %v2684_v17  ;;  %v2686_v46 = vpop.f32.mrb[137].mxu1  ;;  %v16055_v27 = vld [vmem:[%s21236_s4 + $0x38c] ss:$16 sps:$4 sm:$0xff]   ;;  %v21322_v17 = vld [vmem:[#allocation31_spill] sm:$0xff] }
 0x57c   :  { %v2687_v10 = vpop.f32.mrb[138].mxu1  ;;  %v18943_v46 = vadd.f32 %v18779_v40, %v18773_v9 }
 0x57d   :  { %v2688_v55 = vpop.f32.mrb[139].mxu1  ;;  %v2694_v63 = vpack.c.bf16 %v2685_v37, %v2685_v37  ;;  %v18939_v37 = vadd.f32 %v21322_v17, %v21321_v22  ;;  %v18947_v10 = vadd.f32 %v18783_v54, %v18781_v0 }
 0x57e   :  { %v18951_v55 = vadd.f32 %v18787_v21, %v18785_v36 }
 0x581   :  { %14751 = vmatmul.mubr.msk.bf16.gmra.mrb[96].mxu1 %vm1466_vm3, %v2694_v63  ;;  %v18955_v63 = vadd.f32 %v18791_v4, %v18789_v14 }
 0x582   :  { %14758 = vmatprep.mubr.msk.bf16.mxu1 %vm16663_vm2, %v21273_v29 }
 0x589   :  { %14759 = vmatmul.mubr.msk.bf16.vlgmr.msra.gmra.mrb[80].mxu1 %vm1466_vm3, %v21311_v62  ;;  %v18959_v62 = vadd.f32 %v18795_v49, %v18793_v26 }
 0x58a   :  { %3389 = vmatpush1.bf16.msra.mxu1 %v17124_v39  ;;  %14762 = vmatprep.mubr.msk.bf16.mxu1 %vm16663_vm2, %v21273_v29 }
 0x58b   :  { %3390 = vmatprep.subr.bf16.mxu1 %v21287_v51 }
 0x58e   :  { %3391 = vmatpush1.bf16.msra.mxu1 %v17148_v59 }
 0x58f   :  { %3392 = vmatprep.subr.bf16.mxu1 %v21287_v51 }
 0x591   :  { %14763 = vmatmul.mubr.msk.bf16.gmra.mrb[84].mxu1 %vm1466_vm3, %v21312_v31  ;;  %v3807_v31 = vpop.f32.mrb[4].mxu0 }
 0x592   :  { %3393 = vmatpush1.bf16.msra.mxu1 %v17172_v18  ;;  %14766 = vmatprep.mubr.msk.bf16.mxu1 %vm16663_vm2, %v21273_v29  ;;  %v18962_v9 = vadd.f32 %v18801_v7, %v3807_v31  ;;  %v3809_v40 = vpop.f32.mrb[5].mxu0 }
 0x593   :  { %3394 = vmatprep.subr.bf16.mxu1 %v21287_v51 }
 0x596   :  { %3395 = vmatpush1.bf16.msra.mxu1 %v17196_v44 }
 0x597   :  { %3396 = vmatprep.subr.bf16.mxu1 %v21287_v51 }
 0x599   :  { %14767 = vmatmul.mubr.msk.bf16.gmra.mrb[88].mxu1 %vm1466_vm3, %v21313_v24  ;;  %v3810_v24 = vpop.f32.mrb[6].mxu0 }
 0x59a   :  { %3397 = vmatpush1.bf16.msra.mxu1 %v17214_v2  ;;  %14770 = vmatprep.mubr.msk.bf16.mxu1 %vm16663_vm2, %v21273_v29  ;;  %v18965_v0 = vadd.f32 %v18804_v30, %v3810_v24  ;;  %v3812_v54 = vpop.f32.mrb[7].mxu0 }
 0x59b   :  { %3398 = vmatprep.subr.bf16.mxu1 %v21287_v51  ;;  %v3815_v21 = vpop.f32.mrb[8].mxu0 }
 0x59c   :  { %v18970_v14 = vadd.f32 %v18812_v57, %v3815_v21  ;;  %v3817_v4 = vpop.f32.mrb[9].mxu0 }
 0x59d   :  { %v3818_v26 = vpop.f32.mrb[10].mxu0 }
 0x59e   :  { %3399 = vmatpush1.bf16.msra.mxu1 %v17229_v23  ;;  %v18973_v49 = vadd.f32 %v18814_v19, %v3818_v26  ;;  %v3820_v7 = vpop.f32.mrb[11].mxu0 }
 0x59f   :  { %3400 = vmatprep.subr.bf16.mxu1 %v21287_v51 }
 0x5a1   :  { %14771 = vmatmul.mubr.msk.bf16.gmra.mrb[92].mxu1 %vm1466_vm3, %v21315_v35  ;;  %v3823_v35 = vpop.f32.mrb[12].mxu0 }
 0x5a2   :  { %3401 = vmatpush1.bf16.msra.mxu1 %v17247_v43  ;;  %14774 = vmatprep.mubr.msk.bf16.mxu1 %vm16663_vm2, %v21273_v29  ;;  %v3825_v30 = vpop.f32.mrb[13].mxu0 }
 0x5a3   :  { %3402 = vmatprep.subr.bf16.mxu1 %v21287_v51  ;;  %v16068_v30 = vld [vmem:[%s21237_s5 + $0x70] sm:$0xff]  }
 0x5a6   :  { %3403 = vmatpush1.bf16.msra.mxu1 %v17265_v61 }
 0x5a7   :  { %3404 = vmatprep.subr.bf16.mxu1 %v21287_v51 }
 0x5a9   :  { %14775 = vmatmul.mubr.msk.bf16.gmra.mrb[96].mxu1 %vm1466_vm3, %v3079_v34  ;;  %v18978_v34 = vadd.f32 %v18817_v8, %v3823_v35 }
 0x5aa   :  { %3405 = vmatpush1.bf16.msra.mxu1 %v17282_v6  ;;  %12372 = vmatprep.mubr.msk.bf16.mxu1 %vm1004_vm0, %v16054_v28  ;;  %v3826_v28 = vpop.f32.mrb[14].mxu0 }
 0x5ab   :  { %14778 = vmatprep.subr.bf16.mxu1 %v21273_v29  ;;  %v3828_v48 = vpop.f32.mrb[15].mxu0 }
 0x5b1   :  { %3421 = vmatmul.mubr.bf16.vlgmr.msra.gmra.mrb[140].mxu1 %v16052_v11  ;;  %v18981_v11 = vadd.f32 %v18820_v16, %v3826_v28 }
 0x5b2   :  { %12373 = vmatprep.mubr.msk.bf16.mxu1 %vm1004_vm0, %v16055_v27  ;;  %14779 = vmatpush3.bf16.msra.mxu1 %v16066_v12  ;;  %v3831_v27 = vpop.f32.mrb[16].mxu0 }
 0x5b3   :  { %14780 = vmatprep.subr.bf16.mxu1 %v21273_v29  ;;  %v18986_v19 = vadd.f32 %v18825_v3, %v3831_v27  ;;  %v3833_v12 = vpop.f32.mrb[17].mxu0 }
 0x5b6   :  { %14781 = vmatpush3.bf16.msra.mxu1 %v16067_v60  ;;  %v3834_v60 = vpop.f32.mrb[18].mxu0 }
 0x5b7   :  { %14802 = vmatprep.subr.bf16.mxu1 %v21273_v29 }
 0x5b9   :  { %3429 = vmatmul.mubr.bf16.gmra.mrb[144].mxu1 %v16057_v52  ;;  %v18989_v52 = vadd.f32 %v18828_v41, %v3834_v60 }
 0x5ba   :  { %12374 = vmatprep.mubr.msk.bf16.mxu1 %vm1004_vm0, %v16058_v15  ;;  %v3836_v15 = vpop.f32.mrb[19].mxu0 }
 0x5c1   :  { %3437 = vmatmul.mubr.bf16.gmra.mrb[148].mxu1 %v16060_v47  ;;  %v3839_v47 = vpop.f32.mrb[20].mxu0 }
 0x5c2   :  { %12375 = vmatprep.mubr.msk.bf16.mxu1 %vm1004_vm0, %v16061_v50  ;;  %v18994_v16 = vadd.f32 %v18830_v56, %v3839_v47  ;;  %v3841_v50 = vpop.f32.mrb[21].mxu0 }
 0x5c3   :  { %v3842_v45 = vpop.f32.mrb[22].mxu0 }
 0x5c9   :  { %3445 = vmatmul.mubr.bf16.gmra.mrb[152].mxu1 %v16063_v20  ;;  %v3843_v20 = vpop.f32.mrb[23].mxu0 }
 0x5ca   :  { %12376 = vmatprep.mubr.msk.bf16.mxu1 %vm1004_vm0, %v12371_v5  ;;  %v14065_v5 = vpop.f32.mrb[24].mxu0 }
 0x5d1   :  { %3453 = vmatmul.mubr.bf16.gmra.mrb[156].mxu1 %v12370_v42  ;;  %v14066_v42 = vpop.f32.mrb[25].mxu0 }
 0x5d2   :  { %14782 = vmatprep.mubr.msk.bf16.mxu1 %vm16663_vm2, %v21273_v29  ;;  %v18996_v3 = vpop.f32.mrb[26].mxu0  ;;  %v18998_v33 = vadd.f32 %v14066_v42, %v14065_v5 }
 0x5d3   :  { %v19000_v13 = vpop.f32.mrb[27].mxu0 }
 0x5d4   :  { %v19002_v41 = vpop.f32.mrb[28].mxu0 }
 0x5d5   :  { %v19004_v32 = vpop.f32.mrb[29].mxu0 }
 0x5d6   :  { %v19006_v25 = vpop.f32.mrb[30].mxu0 }
 0x5d7   :  { %v19008_v22 = vpop.f32.mrb[31].mxu0 }
 0x5d8   :  { %v19010_v56 = vpop.f32.mrb[32].mxu0 }
 0x5d9   :  { %v19012_v31 = vpop.f32.mrb[33].mxu0 }
 0x5da   :  { %v19015_v54 = vpop.f32.mrb[34].mxu0 }
 0x5db   :  { %v19017_v4 = vpop.f32.mrb[35].mxu0 }
 0x5dc   :  { %v19019_v35 = vpop.f32.mrb[36].mxu0 }
 0x5dd   :  { %v19024_v28 = vpop.f32.mrb[37].mxu0 }
 0x5de   :  { %v19026_v27 = vpop.f32.mrb[38].mxu0 }
 0x684   :  { %v3422_v17 = vpop.f32.mrb[140].mxu1 }
 0x685   :  { %v3423_v40 = vadd.f32 %v18777_v53, %v3422_v17  ;;  %v3424_v24 = vpop.f32.mrb[141].mxu1  ;;  %v19028_v53 = vpop.f32.mrb[39].mxu0 }
 0x686   :  { %v3425_v21 = vpop.f32.mrb[142].mxu1  ;;  %v19031_v12 = vpop.f32.mrb[40].mxu0 }
 0x687   :  { %v3426_v26 = vadd.f32 %v13964_v1, %v3425_v21  ;;  %v3427_v7 = vpop.f32.mrb[143].mxu1  ;;  %v16069_v1 = vld [vmem:[%s21237_s5 + $0x78] sm:$0xff]   ;;  %v19038_v15 = vpop.f32.mrb[41].mxu0 }
 0x688   :  { %v14092_v45 = vpop.f32.mrb[42].mxu0 }
 0x689   :  { %v3460_v48 = vpack.c.bf16 %v3426_v26, %v3423_v40  ;;  %v14093_v5 = vpop.f32.mrb[43].mxu0 }
 0x68a   :  { %v14118_v40 = vpop.f32.mrb[44].mxu0 }
 0x68b   :  { %14783 = vmatmul.mubr.msk.bf16.vlgmr.msra.gmra.mrb[80].mxu1 %vm1466_vm3, %v3460_v48  ;;  %v14119_v24 = vpop.f32.mrb[45].mxu0 }
 0x68c   :  { %v3430_v60 = vpop.f32.mrb[144].mxu1  ;;  %14803 = vmatpush3.bf16.msra.mxu1 %v16068_v30  ;;  %14786 = vmatprep.mubr.msk.bf16.mxu1 %vm16663_vm2, %v21273_v29  ;;  %v19044_v26 = vadd.f32 %v14119_v24, %v14118_v40  ;;  %v14121_v7 = vpop.f32.mrb[46].mxu0 }
 0x68d   :  { %v3431_v47 = vadd.f32 %v18935_v38, %v3430_v60  ;;  %v3432_v50 = vpop.f32.mrb[145].mxu1  ;;  %14804 = vmatprep.subr.bf16.mxu1 %v21273_v29  ;;  %v14122_v30 = vpop.f32.mrb[47].mxu0 }
 0x68e   :  { %v3433_v20 = vpop.f32.mrb[146].mxu1  ;;  %v19047_v38 = vadd.f32 %v14122_v30, %v14121_v7  ;;  %v14124_v48 = vpop.f32.mrb[48].mxu0 }
 0x68f   :  { %v3434_v42 = vadd.f32 %v18939_v37, %v3433_v20  ;;  %v3435_v17 = vpop.f32.mrb[147].mxu1  ;;  %v14125_v37 = vpop.f32.mrb[49].mxu0 }
 0x690   :  { %14805 = vmatpush3.bf16.msra.mxu1 %v16069_v1  ;;  %v14127_v45 = vpop.f32.mrb[50].mxu0 }
 0x691   :  { %v3461_v21 = vpack.c.bf16 %v3434_v42, %v3431_v47  ;;  %4158 = vmatprep.subr.bf16.mxu1 %v21287_v51  ;;  %v19052_v47 = vadd.f32 %v14125_v37, %v14124_v48  ;;  %v14128_v5 = vpop.f32.mrb[51].mxu0 }
 0x692   :  { %v19055_v40 = vadd.f32 %v14128_v5, %v14127_v45  ;;  %v14130_v24 = vpop.f32.mrb[52].mxu0 }
 0x693   :  { %14787 = vmatmul.mubr.msk.bf16.gmra.mrb[84].mxu1 %vm1466_vm3, %v3461_v21  ;;  %v14131_v21 = vpop.f32.mrb[53].mxu0 }
 0x694   :  { %v3438_v60 = vpop.f32.mrb[148].mxu1  ;;  %14790 = vmatprep.mubr.msk.bf16.mxu1 %vm16663_vm2, %v21273_v29  ;;  %v19057_v30 = vadd.f32 %v14131_v21, %v14130_v24  ;;  %v14133_v8 = vpop.f32.mrb[54].mxu0 }
 0x695   :  { %v3439_v1 = vadd.f32 %v18943_v46, %v3438_v60  ;;  %v3440_v50 = vpop.f32.mrb[149].mxu1  ;;  %v14134_v57 = vpop.f32.mrb[55].mxu0 }
 0x696   :  { %v3441_v20 = vpop.f32.mrb[150].mxu1  ;;  %v19060_v46 = vadd.f32 %v14134_v57, %v14133_v8  ;;  %v14136_v48 = vpop.f32.mrb[56].mxu0 }
 0x697   :  { %v3442_v42 = vadd.f32 %v18947_v10, %v3441_v20  ;;  %v3443_v17 = vpop.f32.mrb[151].mxu1  ;;  %v14137_v10 = vpop.f32.mrb[57].mxu0 }
 0x698   :  { %v19065_v45 = vadd.f32 %v14137_v10, %v14136_v48 }
 0x699   :  { %v3462_v7 = vpack.c.bf16 %v3442_v42, %v3439_v1  ;;  %v14139_v1 = vpop.f32.mrb[58].mxu0 }
 0x69a   :  { %v14140_v5 = vpop.f32.mrb[59].mxu0 }
 0x69b   :  { %14791 = vmatmul.mubr.msk.bf16.gmra.mrb[88].mxu1 %vm1466_vm3, %v3462_v7  ;;  %v19068_v24 = vadd.f32 %v14140_v5, %v14139_v1  ;;  %v14142_v57 = vpop.f32.mrb[60].mxu0  ;;  %v16079_v1 = vld [vmem:[%s21236_s4 + $0x4ec] ss:$16 sps:$4 sm:$0xff]   ;;  %v16081_v5 = vld [vmem:[%s21236_s4 + $0x4e8] ss:$16 sps:$4 sm:$0xff]  }
 0x69c   :  { %v3446_v60 = vpop.f32.mrb[152].mxu1  ;;  %14794 = vmatprep.mubr.msk.bf16.mxu1 %vm16663_vm2, %v21273_v29  ;;  %v14143_v8 = vpop.f32.mrb[61].mxu0 }
 0x69d   :  { %v3447_v37 = vadd.f32 %v18951_v55, %v3446_v60  ;;  %v3448_v50 = vpop.f32.mrb[153].mxu1  ;;  %v19070_v7 = vadd.f32 %v14143_v8, %v14142_v57  ;;  %v14145_v58 = vpop.f32.mrb[62].mxu0  ;;  %v14070_v57 = vadd.f32 %v19000_v13, %v18996_v3  ;;  %v19170_v8 = vadd.f32 %v19004_v32, %v19002_v41 }
 0x69e   :  { %v3449_v20 = vpop.f32.mrb[154].mxu1  ;;  %v14146_v36 = vpop.f32.mrb[63].mxu0  ;;  %v16070_v58 = vld [vmem:[%s21236_s4 + $0x488] ss:$16 sps:$4 sm:$0xff]   ;;  %v19190_v3 = vadd.f32 %v19028_v53, %v19026_v27  ;;  %v19194_v13 = vadd.f32 %v19038_v15, %v19031_v12 }
 0x69f   :  { %v3450_v42 = vadd.f32 %v18955_v63, %v3449_v20  ;;  %v3451_v17 = vpop.f32.mrb[155].mxu1  ;;  %v21323_v36 = vpack.c.bf16 %v18965_v0, %v18962_v9  ;;  %v21325_v9 = vpack.c.bf16 %v18981_v11, %v18978_v34  ;;  %v21326_v0 = vpack.c.bf16 %v18989_v52, %v18986_v19  ;;  %v16073_v34 = vld [vmem:[%s21236_s4 + $0x4ac] ss:$16 sps:$4 sm:$0xff]   ;;  %v16084_v11 = vld [vmem:[%s21237_s5 + $0x80] sm:$0xff]   ;;  %v16075_v52 = vld [vmem:[%s21236_s4 + $0x4a8] ss:$16 sps:$4 sm:$0xff]  }
 0x6a0   :  { %v16085_v19 = vld [vmem:[%s21237_s5 + $0x88] sm:$0xff]   ;;  %v4577_v41 = vpop.f32.mrb[64].mxu0 }
 0x6a1   :  { %v3463_v21 = vpack.c.bf16 %v3450_v42, %v3447_v37  ;;  %v16078_v37 = vld [vmem:[%s21236_s4 + $0x4c8] ss:$16 sps:$4 sm:$0xff]   ;;  %v19197_v32 = vadd.f32 %v19044_v26, %v4577_v41 }
 0x6a2   :  { %v12459_v20 = vld [vmem:[%s21236_s4 + $0x508] sm:$0xff] }
 0x6a3   :  { %14795 = vmatmul.mubr.msk.bf16.gmra.mrb[92].mxu1 %vm1466_vm3, %v3463_v21  ;;  %v12479_v42 = vcombine.high %v12459_v20, %v12459_v20  ;;  %v12478_v17 = vcombine.low %v12459_v20, %v12459_v20  ;;  %v19174_v21 = vadd.f32 %v19008_v22, %v19006_v25  ;;  %v4579_v25 = vpop.f32.mrb[65].mxu0 }
 0x6a4   :  { %v3454_v55 = vpop.f32.mrb[156].mxu1  ;;  %14798 = vmatprep.mubr.msk.bf16.mxu1 %vm16663_vm2, %v21273_v29  ;;  %v4580_v22 = vpop.f32.mrb[66].mxu0 }
 0x6a5   :  { %v3455_v48 = vadd.f32 %v18959_v62, %v3454_v55  ;;  %v3456_v60 = vpop.f32.mrb[157].mxu1  ;;  %v21324_v62 = vpack.c.bf16 %v18973_v49, %v18970_v14  ;;  %v16072_v14 = vld [vmem:[%s21236_s4 + $0x48c] ss:$16 sps:$4 sm:$0xff]   ;;  %v3849_v49 = vpack.c.bf16 %v18994_v16, %v18994_v16  ;;  %v19178_v55 = vadd.f32 %v19012_v31, %v19010_v56  ;;  %v4582_v31 = vpop.f32.mrb[67].mxu0 }
 0x6a6   :  { %v3457_v63 = vpop.f32.mrb[158].mxu1  ;;  %v16076_v16 = vld [vmem:[%s21236_s4 + $0x4cc] ss:$16 sps:$4 sm:$0xff]   ;;  %v19186_v60 = vadd.f32 %v19024_v28, %v19019_v35  ;;  %v19200_v56 = vadd.f32 %v19047_v38, %v4580_v22 }
 0x6a7   :  { %v3458_v10 = vpop.f32.mrb[159].mxu1  ;;  %v3464_v50 = vpack.c.bf16 %v3455_v48, %v3455_v48  ;;  %v19182_v48 = vadd.f32 %v19017_v4, %v19015_v54  ;;  %v4585_v4 = vpop.f32.mrb[68].mxu0 }
 0x6a8   :  { %v4615_v54 = vpack.c.bf16 %v19200_v56, %v19197_v32  ;;  %v19205_v35 = vadd.f32 %v19052_v47, %v4585_v4  ;;  %v4587_v28 = vpop.f32.mrb[69].mxu0  ;;  %v16088_v56 = vld [vmem:[%s21236_s4 + $0x5a8] ss:$16 sps:$4 sm:$0xff]  }
 0x6a9   :  { %v4588_v27 = vpop.f32.mrb[70].mxu0 }
 0x6aa   :  { %v19208_v53 = vadd.f32 %v19055_v40, %v4588_v27  ;;  %v4590_v12 = vpop.f32.mrb[71].mxu0 }
 0x6ab   :  { %14799 = vmatmul.mubr.msk.bf16.gmra.mrb[96].mxu1 %vm1466_vm3, %v3464_v50  ;;  %v4593_v26 = vpop.f32.mrb[72].mxu0 }
 0x6ac   :  { %14806 = vmatprep.mubr.msk.bf16.mxu1 %vm16663_vm2, %v21273_v29  ;;  %v4616_v15 = vpack.c.bf16 %v19208_v53, %v19205_v35  ;;  %v19213_v38 = vadd.f32 %v19057_v30, %v4593_v26  ;;  %v4595_v63 = vpop.f32.mrb[73].mxu0  ;;  %v16102_v35 = vld [vmem:[%s21237_s5 + $0xa0] sm:$0xff]   ;;  %v16103_v53 = vld [vmem:[%s21237_s5 + $0xa8] sm:$0xff]  }
 0x6ad   :  { %v4596_v10 = vpop.f32.mrb[74].mxu0 }
 0x6ae   :  { %v19216_v50 = vadd.f32 %v19060_v46, %v4596_v10  ;;  %v4598_v47 = vpop.f32.mrb[75].mxu0 }
 0x6b3   :  { %14807 = vmatmul.mubr.msk.bf16.vlgmr.msra.gmra.mrb[80].mxu1 %vm1466_vm3, %v21323_v36  ;;  %v4617_v36 = vpack.c.bf16 %v19216_v50, %v19213_v38  ;;  %v16094_v38 = vld [vmem:[%s21236_s4 + $0x5ec] ss:$16 sps:$4 sm:$0xff]   ;;  %v16096_v50 = vld [vmem:[%s21236_s4 + $0x5e8] ss:$16 sps:$4 sm:$0xff]  }
 0x6b4   :  { %4159 = vmatpush1.bf16.msra.mxu1 %v17124_v39  ;;  %14810 = vmatprep.mubr.msk.bf16.mxu1 %vm16663_vm2, %v21273_v29 }
 0x6b5   :  { %4160 = vmatprep.subr.bf16.mxu1 %v21287_v51 }
 0x6b8   :  { %4161 = vmatpush1.bf16.msra.mxu1 %v17148_v59 }
 0x6b9   :  { %4162 = vmatprep.subr.bf16.mxu1 %v21287_v51 }
 0x6bb   :  { %14811 = vmatmul.mubr.msk.bf16.gmra.mrb[84].mxu1 %vm1466_vm3, %v21324_v62  ;;  %v4601_v62 = vpop.f32.mrb[76].mxu0 }
 0x6bc   :  { %4163 = vmatpush1.bf16.msra.mxu1 %v17172_v18  ;;  %14814 = vmatprep.mubr.msk.bf16.mxu1 %vm16663_vm2, %v21273_v29  ;;  %v19221_v40 = vadd.f32 %v19065_v45, %v4601_v62 }
 0x6bd   :  { %4164 = vmatprep.subr.bf16.mxu1 %v21287_v51 }
 0x6c0   :  { %4165 = vmatpush1.bf16.msra.mxu1 %v17196_v44 }
 0x6c1   :  { %4166 = vmatprep.subr.bf16.mxu1 %v21287_v51 }
 0x6c3   :  { %14815 = vmatmul.mubr.msk.bf16.gmra.mrb[88].mxu1 %vm1466_vm3, %v21325_v9  ;;  %v4603_v9 = vpop.f32.mrb[77].mxu0 }
 0x6c4   :  { %4167 = vmatpush1.bf16.msra.mxu1 %v17214_v2  ;;  %14818 = vmatprep.mubr.msk.bf16.mxu1 %vm16663_vm2, %v21273_v29 }
 0x6c5   :  { %4168 = vmatprep.subr.bf16.mxu1 %v21287_v51 }
 0x6c8   :  { %4169 = vmatpush1.bf16.msra.mxu1 %v17229_v23 }
 0x6c9   :  { %4170 = vmatprep.subr.bf16.mxu1 %v21287_v51 }
 0x6cb   :  { %14819 = vmatmul.mubr.msk.bf16.gmra.mrb[92].mxu1 %vm1466_vm3, %v21326_v0  ;;  %v4604_v0 = vpop.f32.mrb[78].mxu0 }
 0x6cc   :  { %4171 = vmatpush1.bf16.msra.mxu1 %v17247_v43  ;;  %14822 = vmatprep.mubr.msk.bf16.mxu1 %vm16663_vm2, %v21273_v29  ;;  %v4606_v30 = vpop.f32.mrb[79].mxu0 }
 0x6cd   :  { %4172 = vmatprep.subr.bf16.mxu1 %v21287_v51 }
 0x6d0   :  { %4173 = vmatpush1.bf16.msra.mxu1 %v17265_v61 }
 0x6d1   :  { %4174 = vmatprep.subr.bf16.mxu1 %v21287_v51 }
 0x6d3   :  { %14823 = vmatmul.mubr.msk.bf16.gmra.mrb[96].mxu1 %vm1466_vm3, %v3849_v49 }
 0x6d4   :  { %4175 = vmatpush1.bf16.msra.mxu1 %v17282_v6  ;;  %12480 = vmatprep.mubr.msk.bf16.mxu1 %vm1004_vm0, %v16072_v14  ;;  %v19224_v14 = vadd.f32 %v19068_v24, %v4604_v0  ;;  %v16086_v0 = vld [vmem:[%s21237_s5 + $0x90] sm:$0xff]  }
 0x6d5   :  { %14826 = vmatprep.subr.bf16.mxu1 %v21273_v29 }
 0x6d6   :  { %v4618_v49 = vpack.c.bf16 %v19224_v14, %v19221_v40  ;;  %v12567_v40 = vld [vmem:[%s21236_s4 + $0x628] sm:$0xff] }
 0x6d7   :  { %v16099_v14 = vld [vmem:[%s21236_s4 + $0x608] ss:$16 sps:$4 sm:$0xff]  }
 0x6db   :  { %4191 = vmatmul.mubr.bf16.vlgmr.msra.gmra.mrb[160].mxu1 %v16070_v58  ;;  %v4609_v58 = vpop.f32.mrb[80].mxu0 }
 0x6dc   :  { %12481 = vmatprep.mubr.msk.bf16.mxu1 %vm1004_vm0, %v16073_v34  ;;  %14827 = vmatpush3.bf16.msra.mxu1 %v16084_v11  ;;  %v19229_v46 = vadd.f32 %v19070_v7, %v4609_v58  ;;  %v4611_v34 = vpop.f32.mrb[81].mxu0 }
 0x6dd   :  { %14828 = vmatprep.subr.bf16.mxu1 %v21273_v29  ;;  %v4612_v11 = vpop.f32.mrb[82].mxu0 }
 0x6de   :  { %v4619_v32 = vpack.c.bf16 %v19229_v46, %v19229_v46  ;;  %v12586_v46 = vcombine.low %v12567_v40, %v12567_v40 }
 0x6e0   :  { %14829 = vmatpush3.bf16.msra.mxu1 %v16085_v19  ;;  %v4613_v19 = vpop.f32.mrb[83].mxu0 }
 0x6e1   :  { %14850 = vmatprep.subr.bf16.mxu1 %v21273_v29 }
 0x6e3   :  { %4199 = vmatmul.mubr.bf16.gmra.mrb[164].mxu1 %v16075_v52  ;;  %v14171_v52 = vpop.f32.mrb[84].mxu0 }
 0x6e4   :  { %12482 = vmatprep.mubr.msk.bf16.mxu1 %vm1004_vm0, %v16076_v16  ;;  %v14172_v16 = vpop.f32.mrb[85].mxu0 }
 0x6e5   :  { %v19231_v45 = vadd.f32 %v14172_v16, %v14171_v52  ;;  %v16087_v16 = vld [vmem:[%s21237_s5 + $0x98] sm:$0xff]  }
 0x6eb   :  { %4207 = vmatmul.mubr.bf16.gmra.mrb[168].mxu1 %v16078_v37  ;;  %v14174_v37 = vpop.f32.mrb[86].mxu0 }
 0x6ec   :  { %12483 = vmatprep.mubr.msk.bf16.mxu1 %vm1004_vm0, %v16079_v1  ;;  %v14175_v1 = vpop.f32.mrb[87].mxu0 }
 0x6ed   :  { %v19233_v20 = vadd.f32 %v14175_v1, %v14174_v37  ;;  %v14177_v24 = vpop.f32.mrb[88].mxu0 }
 0x6f3   :  { %4215 = vmatmul.mubr.bf16.gmra.mrb[172].mxu1 %v16081_v5  ;;  %v14178_v5 = vpop.f32.mrb[89].mxu0 }
 0x6f4   :  { %12484 = vmatprep.mubr.msk.bf16.mxu1 %vm1004_vm0, %v12479_v42  ;;  %v19235_v42 = vadd.f32 %v14178_v5, %v14177_v24 }
 0x6fb   :  { %4223 = vmatmul.mubr.bf16.gmra.mrb[176].mxu1 %v12478_v17  ;;  %v14180_v17 = vpop.f32.mrb[90].mxu0 }
 0x6fc   :  { %14830 = vmatprep.mubr.msk.bf16.mxu1 %vm16663_vm2, %v21273_v29  ;;  %v14181_v41 = vpop.f32.mrb[91].mxu0 }
 0x6fd   :  { %v19237_v25 = vadd.f32 %v14181_v41, %v14180_v17  ;;  %v14183_v7 = vpop.f32.mrb[92].mxu0 }
 0x6fe   :  { %v14184_v31 = vpop.f32.mrb[93].mxu0 }
 0x6ff   :  { %v19240_v27 = vadd.f32 %v14184_v31, %v14183_v7  ;;  %v14186_v12 = vpop.f32.mrb[94].mxu0 }
 0x700   :  { %v14187_v63 = vpop.f32.mrb[95].mxu0 }
 0x701   :  { %v19242_v62 = vadd.f32 %v14187_v63, %v14186_v12  ;;  %v14189_v9 = vpop.f32.mrb[96].mxu0 }
 0x702   :  { %v14190_v30 = vpop.f32.mrb[97].mxu0 }
 0x703   :  { %v19247_v34 = vadd.f32 %v14190_v30, %v14189_v9 }
 0x7ae   :  { %v4192_v22 = vpop.f32.mrb[160].mxu1 }
 0x7af   :  { %v4193_v4 = vadd.f32 %v18998_v33, %v4192_v22  ;;  %v4194_v28 = vpop.f32.mrb[161].mxu1  ;;  %v14192_v33 = vpop.f32.mrb[98].mxu0 }
 0x7b0   :  { %v4195_v26 = vpop.f32.mrb[162].mxu1  ;;  %v14193_v11 = vpop.f32.mrb[99].mxu0 }
 0x7b1   :  { %v4196_v10 = vadd.f32 %v14070_v57, %v4195_v26  ;;  %v4197_v47 = vpop.f32.mrb[163].mxu1  ;;  %v19250_v19 = vadd.f32 %v14193_v11, %v14192_v33  ;;  %v14195_v52 = vpop.f32.mrb[100].mxu0 }
 0x7b2   :  { %v14196_v37 = vpop.f32.mrb[101].mxu0 }
 0x7b3   :  { %v4230_v58 = vpack.c.bf16 %v4196_v10, %v4193_v4  ;;  %v19259_v5 = vadd.f32 %v14196_v37, %v14195_v52  ;;  %v14198_v17 = vpop.f32.mrb[102].mxu0 }
 0x7b4   :  { %v14199_v7 = vpop.f32.mrb[103].mxu0 }
 0x7b5   :  { %14831 = vmatmul.mubr.msk.bf16.vlgmr.msra.gmra.mrb[80].mxu1 %vm1466_vm3, %v4230_v58  ;;  %v14224_v4 = vpop.f32.mrb[104].mxu0 }
 0x7b6   :  { %v4200_v57 = vpop.f32.mrb[164].mxu1  ;;  %14851 = vmatpush3.bf16.msra.mxu1 %v16086_v0  ;;  %14834 = vmatprep.mubr.msk.bf16.mxu1 %vm16663_vm2, %v21273_v29  ;;  %v14225_v28 = vpop.f32.mrb[105].mxu0 }
 0x7b7   :  { %v4201_v1 = vadd.f32 %v19170_v8, %v4200_v57  ;;  %v4202_v24 = vpop.f32.mrb[165].mxu1  ;;  %14852 = vmatprep.subr.bf16.mxu1 %v21273_v29  ;;  %v19263_v26 = vadd.f32 %v14225_v28, %v14224_v4  ;;  %v14227_v8 = vpop.f32.mrb[106].mxu0 }
 0x7b8   :  { %v4203_v41 = vpop.f32.mrb[166].mxu1  ;;  %v14228_v63 = vpop.f32.mrb[107].mxu0 }
 0x7b9   :  { %v4204_v22 = vadd.f32 %v19174_v21, %v4203_v41  ;;  %v4205_v31 = vpop.f32.mrb[167].mxu1  ;;  %v19266_v10 = vadd.f32 %v14228_v63, %v14227_v8  ;;  %v14230_v47 = vpop.f32.mrb[108].mxu0 }
 0x7ba   :  { %14853 = vmatpush3.bf16.msra.mxu1 %v16087_v16  ;;  %v14231_v21 = vpop.f32.mrb[109].mxu0 }
 0x7bb   :  { %v4231_v12 = vpack.c.bf16 %v4204_v22, %v4201_v1  ;;  %4928 = vmatprep.subr.bf16.mxu1 %v21287_v51  ;;  %v19271_v58 = vadd.f32 %v14231_v21, %v14230_v47  ;;  %v14233_v33 = vpop.f32.mrb[110].mxu0 }
 0x7bc   :  { %v14234_v52 = vpop.f32.mrb[111].mxu0 }
 0x7bd   :  { %14835 = vmatmul.mubr.msk.bf16.gmra.mrb[84].mxu1 %vm1466_vm3, %v4231_v12  ;;  %v19274_v37 = vadd.f32 %v14234_v52, %v14233_v33  ;;  %v14236_v1 = vpop.f32.mrb[112].mxu0 }
 0x7be   :  { %v4208_v9 = vpop.f32.mrb[168].mxu1  ;;  %14838 = vmatprep.mubr.msk.bf16.mxu1 %vm16663_vm2, %v21273_v29  ;;  %v14237_v24 = vpop.f32.mrb[113].mxu0 }
 0x7bf   :  { %v4209_v0 = vadd.f32 %v19178_v55, %v4208_v9  ;;  %v4210_v30 = vpop.f32.mrb[169].mxu1  ;;  %v19276_v41 = vadd.f32 %v14237_v24, %v14236_v1  ;;  %v14239_v7 = vpop.f32.mrb[114].mxu0 }
 0x7c0   :  { %v4211_v11 = vpop.f32.mrb[170].mxu1  ;;  %v14240_v22 = vpop.f32.mrb[115].mxu0 }
 0x7c1   :  { %v4212_v57 = vadd.f32 %v19182_v48, %v4211_v11  ;;  %v4213_v16 = vpop.f32.mrb[171].mxu1  ;;  %v19279_v55 = vadd.f32 %v14240_v22, %v14239_v7  ;;  %v14242_v31 = vpop.f32.mrb[116].mxu0 }
 0x7c2   :  { %v14243_v48 = vpop.f32.mrb[117].mxu0 }
 0x7c3   :  { %v4232_v17 = vpack.c.bf16 %v4212_v57, %v4209_v0  ;;  %v19284_v8 = vadd.f32 %v14243_v48, %v14242_v31  ;;  %v14245_v63 = vpop.f32.mrb[118].mxu0 }
 0x7c4   :  { %v14246_v9 = vpop.f32.mrb[119].mxu0 }
 0x7c5   :  { %14839 = vmatmul.mubr.msk.bf16.gmra.mrb[88].mxu1 %vm1466_vm3, %v4232_v17  ;;  %v19287_v30 = vadd.f32 %v14246_v9, %v14245_v63  ;;  %v14248_v33 = vpop.f32.mrb[120].mxu0 }
 0x7c6   :  { %v4216_v4 = vpop.f32.mrb[172].mxu1  ;;  %14842 = vmatprep.mubr.msk.bf16.mxu1 %vm16663_vm2, %v21273_v29  ;;  %v14249_v11 = vpop.f32.mrb[121].mxu0 }
 0x7c7   :  { %v4217_v28 = vadd.f32 %v19186_v60, %v4216_v4  ;;  %v4218_v12 = vpop.f32.mrb[173].mxu1  ;;  %v19289_v57 = vadd.f32 %v14249_v11, %v14248_v33  ;;  %v14251_v16 = vpop.f32.mrb[122].mxu0 }
 0x7c8   :  { %v4219_v47 = vpop.f32.mrb[174].mxu1  ;;  %v14252_v1 = vpop.f32.mrb[123].mxu0 }
 0x7c9   :  { %v4220_v21 = vadd.f32 %v19190_v3, %v4219_v47  ;;  %v4221_v0 = vpop.f32.mrb[175].mxu1  ;;  %v5347_v31 = vpop.f32.mrb[124].mxu0 }
 0x7ca   :  { %v19386_v4 = vadd.f32 %v19263_v26, %v5347_v31  ;;  %v5349_v48 = vpop.f32.mrb[125].mxu0 }
 0x7cb   :  { %v4233_v52 = vpack.c.bf16 %v4220_v21, %v4217_v28  ;;  %v5350_v28 = vpop.f32.mrb[126].mxu0 }
 0x7cc   :  { %v19389_v12 = vadd.f32 %v19266_v10, %v5350_v28  ;;  %v5352_v63 = vpop.f32.mrb[127].mxu0 }
 0x7cd   :  { %14843 = vmatmul.mubr.msk.bf16.gmra.mrb[92].mxu1 %vm1466_vm3, %v4233_v52  ;;  %v5355_v9 = vpop.f32.mrb[128].mxu0 }
 0x7ce   :  { %v4224_v60 = vpop.f32.mrb[176].mxu1  ;;  %14846 = vmatprep.mubr.msk.bf16.mxu1 %vm16663_vm2, %v21273_v29  ;;  %v5385_v47 = vpack.c.bf16 %v19389_v12, %v19386_v4  ;;  %v19394_v21 = vadd.f32 %v19271_v58, %v5355_v9  ;;  %v5357_v0 = vpop.f32.mrb[129].mxu0  ;;  %v16106_v12 = vld [vmem:[%s21236_s4 + $0x6c8] ss:$16 sps:$4 sm:$0xff]  }
 0x7cf   :  { %v4225_v24 = vadd.f32 %v19194_v13, %v4224_v60  ;;  %v4226_v17 = vpop.f32.mrb[177].mxu1  ;;  %v16090_v13 = vld [vmem:[%s21236_s4 + $0x5ac] ss:$16 sps:$4 sm:$0xff]   ;;  %v5358_v33 = vpop.f32.mrb[130].mxu0 }
 0x7d0   :  { %v4227_v3 = vpop.f32.mrb[178].mxu1  ;;  %v19397_v11 = vadd.f32 %v19274_v37, %v5358_v33  ;;  %v5360_v26 = vpop.f32.mrb[131].mxu0 }
 0x7d1   :  { %v4228_v7 = vpop.f32.mrb[179].mxu1  ;;  %v4234_v22 = vpack.c.bf16 %v4225_v24, %v4225_v24  ;;  %v5363_v16 = vpop.f32.mrb[132].mxu0 }
 0x7d2   :  { %v5386_v52 = vpack.c.bf16 %v19397_v11, %v19394_v21  ;;  %v19402_v10 = vadd.f32 %v19276_v41, %v5363_v16  ;;  %v5365_v1 = vpop.f32.mrb[133].mxu0  ;;  %v16120_v21 = vld [vmem:[%s21237_s5 + $0xc0] sm:$0xff]   ;;  %v16121_v11 = vld [vmem:[%s21237_s5 + $0xc8] sm:$0xff]  }
 0x7d3   :  { %v5366_v60 = vpop.f32.mrb[134].mxu0 }
 0x7d4   :  { %v19405_v24 = vadd.f32 %v19279_v55, %v5366_v60  ;;  %v5368_v58 = vpop.f32.mrb[135].mxu0 }
 0x7d5   :  { %14847 = vmatmul.mubr.msk.bf16.gmra.mrb[96].mxu1 %vm1466_vm3, %v4234_v22  ;;  %v5371_v3 = vpop.f32.mrb[136].mxu0 }
 0x7d6   :  { %14854 = vmatprep.mubr.msk.bf16.mxu1 %vm16663_vm2, %v21273_v29  ;;  %v5387_v17 = vpack.c.bf16 %v19405_v24, %v19402_v10  ;;  %v19410_v37 = vadd.f32 %v19284_v8, %v5371_v3  ;;  %v5373_v7 = vpop.f32.mrb[137].mxu0  ;;  %v16112_v10 = vld [vmem:[%s21236_s4 + $0x70c] ss:$16 sps:$4 sm:$0xff]   ;;  %v16114_v24 = vld [vmem:[%s21236_s4 + $0x708] ss:$16 sps:$4 sm:$0xff]  }
 0x7d7   :  { %v5374_v22 = vpop.f32.mrb[138].mxu0 }
 0x7d8   :  { %v5376_v41 = vpop.f32.mrb[139].mxu0 }
 0x7dd   :  { %14855 = vmatmul.mubr.msk.bf16.vlgmr.msra.gmra.mrb[80].mxu1 %vm1466_vm3, %v4615_v54  ;;  %v16091_v54 = vld [vmem:[%s21236_s4 + $0x5cc] ss:$16 sps:$4 sm:$0xff]  }
 0x7de   :  { %4929 = vmatpush1.bf16.msra.mxu1 %v17124_v39  ;;  %14858 = vmatprep.mubr.msk.bf16.mxu1 %vm16663_vm2, %v21273_v29 }
 0x7df   :  { %4930 = vmatprep.subr.bf16.mxu1 %v21287_v51 }
 0x7e2   :  { %4931 = vmatpush1.bf16.msra.mxu1 %v17148_v59 }
 0x7e3   :  { %4932 = vmatprep.subr.bf16.mxu1 %v21287_v51 }
 0x7e5   :  { %14859 = vmatmul.mubr.msk.bf16.gmra.mrb[84].mxu1 %vm1466_vm3, %v4616_v15  ;;  %v16093_v15 = vld [vmem:[%s21236_s4 + $0x5c8] ss:$16 sps:$4 sm:$0xff]  }
 0x7e6   :  { %4933 = vmatpush1.bf16.msra.mxu1 %v17172_v18  ;;  %14862 = vmatprep.mubr.msk.bf16.mxu1 %vm16663_vm2, %v21273_v29 }
 0x7e7   :  { %4934 = vmatprep.subr.bf16.mxu1 %v21287_v51 }
 0x7ea   :  { %4935 = vmatpush1.bf16.msra.mxu1 %v17196_v44 }
 0x7eb   :  { %4936 = vmatprep.subr.bf16.mxu1 %v21287_v51 }
 0x7ed   :  { %14863 = vmatmul.mubr.msk.bf16.gmra.mrb[88].mxu1 %vm1466_vm3, %v4617_v36  ;;  %v16097_v36 = vld [vmem:[%s21236_s4 + $0x60c] ss:$16 sps:$4 sm:$0xff]  }
 0x7ee   :  { %4937 = vmatpush1.bf16.msra.mxu1 %v17214_v2  ;;  %14866 = vmatprep.mubr.msk.bf16.mxu1 %vm16663_vm2, %v21273_v29 }
 0x7ef   :  { %4938 = vmatprep.subr.bf16.mxu1 %v21287_v51 }
 0x7f2   :  { %4939 = vmatpush1.bf16.msra.mxu1 %v17229_v23 }
 0x7f3   :  { %4940 = vmatprep.subr.bf16.mxu1 %v21287_v51 }
 0x7f5   :  { %14867 = vmatmul.mubr.msk.bf16.gmra.mrb[92].mxu1 %vm1466_vm3, %v4618_v49  ;;  %v12587_v49 = vcombine.high %v12567_v40, %v12567_v40 }
 0x7f6   :  { %4941 = vmatpush1.bf16.msra.mxu1 %v17247_v43  ;;  %14870 = vmatprep.mubr.msk.bf16.mxu1 %vm16663_vm2, %v21273_v29 }
 0x7f7   :  { %4942 = vmatprep.subr.bf16.mxu1 %v21287_v51 }
 0x7fa   :  { %4943 = vmatpush1.bf16.msra.mxu1 %v17265_v61 }
 0x7fb   :  { %4944 = vmatprep.subr.bf16.mxu1 %v21287_v51 }
 0x7fd   :  { %14871 = vmatmul.mubr.msk.bf16.gmra.mrb[96].mxu1 %vm1466_vm3, %v4619_v32 }
 0x7fe   :  { %4945 = vmatpush1.bf16.msra.mxu1 %v17282_v6  ;;  %12588 = vmatprep.mubr.msk.bf16.mxu1 %vm1004_vm0, %v16090_v13  ;;  %v19413_v13 = vadd.f32 %v19287_v30, %v5374_v22  ;;  %v16104_v22 = vld [vmem:[%s21237_s5 + $0xb0] sm:$0xff]  }
 0x7ff   :  { %14874 = vmatprep.subr.bf16.mxu1 %v21273_v29 }
 0x800   :  { %v5388_v32 = vpack.c.bf16 %v19413_v13, %v19410_v37  ;;  %v12675_v37 = vld [vmem:[%s21236_s4 + $0x748] sm:$0xff] }
 0x801   :  { %v16117_v13 = vld [vmem:[%s21236_s4 + $0x728] ss:$16 sps:$4 sm:$0xff]  }
 0x805   :  { %4961 = vmatmul.mubr.bf16.vlgmr.msra.gmra.mrb[180].mxu1 %v16088_v56  ;;  %v5379_v56 = vpop.f32.mrb[140].mxu0 }
 0x806   :  { %12589 = vmatprep.mubr.msk.bf16.mxu1 %vm1004_vm0, %v16091_v54  ;;  %14875 = vmatpush3.bf16.msra.mxu1 %v16102_v35  ;;  %v19418_v55 = vadd.f32 %v19289_v57, %v5379_v56  ;;  %v5381_v54 = vpop.f32.mrb[141].mxu0 }
 0x807   :  { %14876 = vmatprep.subr.bf16.mxu1 %v21273_v29  ;;  %v5382_v35 = vpop.f32.mrb[142].mxu0 }
 0x808   :  { %v5389_v4 = vpack.c.bf16 %v19418_v55, %v19418_v55  ;;  %v12694_v55 = vcombine.low %v12675_v37, %v12675_v37 }
 0x80a   :  { %14877 = vmatpush3.bf16.msra.mxu1 %v16103_v53  ;;  %v5383_v53 = vpop.f32.mrb[143].mxu0 }
 0x80b   :  { %14898 = vmatprep.subr.bf16.mxu1 %v21273_v29 }
 0x80d   :  { %4969 = vmatmul.mubr.bf16.gmra.mrb[184].mxu1 %v16093_v15  ;;  %v14277_v15 = vpop.f32.mrb[144].mxu0 }
 0x80e   :  { %12590 = vmatprep.mubr.msk.bf16.mxu1 %vm1004_vm0, %v16094_v38  ;;  %v14278_v38 = vpop.f32.mrb[145].mxu0 }
 0x80f   :  { %v19420_v8 = vadd.f32 %v14278_v38, %v14277_v15  ;;  %v16105_v38 = vld [vmem:[%s21237_s5 + $0xb8] sm:$0xff]  }
 0x815   :  { %4977 = vmatmul.mubr.bf16.gmra.mrb[188].mxu1 %v16096_v50  ;;  %v14280_v50 = vpop.f32.mrb[146].mxu0 }
 0x816   :  { %12591 = vmatprep.mubr.msk.bf16.mxu1 %vm1004_vm0, %v16097_v36  ;;  %v14281_v36 = vpop.f32.mrb[147].mxu0 }
 0x817   :  { %v19422_v40 = vadd.f32 %v14281_v36, %v14280_v50  ;;  %v14283_v30 = vpop.f32.mrb[148].mxu0 }
 0x81d   :  { %4985 = vmatmul.mubr.bf16.gmra.mrb[192].mxu1 %v16099_v14  ;;  %v14284_v14 = vpop.f32.mrb[149].mxu0 }
 0x81e   :  { %12592 = vmatprep.mubr.msk.bf16.mxu1 %vm1004_vm0, %v12587_v49  ;;  %v19424_v49 = vadd.f32 %v14284_v14, %v14283_v30 }
 0x825   :  { %4993 = vmatmul.mubr.bf16.gmra.mrb[196].mxu1 %v12586_v46  ;;  %v14286_v46 = vpop.f32.mrb[150].mxu0 }
 0x826   :  { %14878 = vmatprep.mubr.msk.bf16.mxu1 %vm16663_vm2, %v21273_v29  ;;  %v14287_v31 = vpop.f32.mrb[151].mxu0 }
 0x827   :  { %v19426_v48 = vadd.f32 %v14287_v31, %v14286_v46  ;;  %v14289_v57 = vpop.f32.mrb[152].mxu0 }
 0x828   :  { %v14290_v63 = vpop.f32.mrb[153].mxu0 }
 0x829   :  { %v19429_v33 = vadd.f32 %v14290_v63, %v14289_v57  ;;  %v14292_v26 = vpop.f32.mrb[154].mxu0 }
 0x82a   :  { %v14293_v1 = vpop.f32.mrb[155].mxu0 }
 0x82b   :  { %v19432_v3 = vadd.f32 %v14293_v1, %v14292_v26  ;;  %v14295_v7 = vpop.f32.mrb[156].mxu0 }
 0x82c   :  { %v14296_v41 = vpop.f32.mrb[157].mxu0 }
 0x82d   :  { %v19437_v54 = vadd.f32 %v14296_v41, %v14295_v7 }
 0x8d8   :  { %v4962_v28 = vpop.f32.mrb[180].mxu1 }
 0x8d9   :  { %v4963_v9 = vadd.f32 %v19231_v45, %v4962_v28  ;;  %v4964_v0 = vpop.f32.mrb[181].mxu1  ;;  %v14298_v45 = vpop.f32.mrb[158].mxu0 }
 0x8da   :  { %v4965_v16 = vpop.f32.mrb[182].mxu1  ;;  %v14299_v35 = vpop.f32.mrb[159].mxu0 }
 0x8db   :  { %v4966_v60 = vadd.f32 %v19233_v20, %v4965_v16  ;;  %v4967_v58 = vpop.f32.mrb[183].mxu1  ;;  %v19440_v53 = vadd.f32 %v14299_v35, %v14298_v45  ;;  %v14301_v15 = vpop.f32.mrb[160].mxu0 }
 0x8dc   :  { %v14302_v50 = vpop.f32.mrb[161].mxu0 }
 0x8dd   :  { %v5000_v56 = vpack.c.bf16 %v4966_v60, %v4963_v9  ;;  %v19449_v14 = vadd.f32 %v14302_v50, %v14301_v15  ;;  %v14304_v46 = vpop.f32.mrb[162].mxu0 }
 0x8de   :  { %v14305_v57 = vpop.f32.mrb[163].mxu0 }
 0x8df   :  { %14879 = vmatmul.mubr.msk.bf16.vlgmr.msra.gmra.mrb[80].mxu1 %vm1466_vm3, %v5000_v56  ;;  %v14330_v9 = vpop.f32.mrb[164].mxu0 }
 0x8e0   :  { %v4970_v20 = vpop.f32.mrb[184].mxu1  ;;  %14899 = vmatpush3.bf16.msra.mxu1 %v16104_v22  ;;  %14882 = vmatprep.mubr.msk.bf16.mxu1 %vm16663_vm2, %v21273_v29  ;;  %v14331_v0 = vpop.f32.mrb[165].mxu0 }
 0x8e1   :  { %v4971_v36 = vadd.f32 %v19235_v42, %v4970_v20  ;;  %v4972_v30 = vpop.f32.mrb[185].mxu1  ;;  %14900 = vmatprep.subr.bf16.mxu1 %v21273_v29  ;;  %v19453_v16 = vadd.f32 %v14331_v0, %v14330_v9  ;;  %v14333_v42 = vpop.f32.mrb[166].mxu0 }
 0x8e2   :  { %v4973_v31 = vpop.f32.mrb[186].mxu1  ;;  %v14334_v1 = vpop.f32.mrb[167].mxu0 }
 0x8e3   :  { %v4974_v28 = vadd.f32 %v19237_v25, %v4973_v31  ;;  %v4975_v63 = vpop.f32.mrb[187].mxu1  ;;  %v19456_v60 = vadd.f32 %v14334_v1, %v14333_v42  ;;  %v14336_v58 = vpop.f32.mrb[168].mxu0 }
 0x8e4   :  { %14901 = vmatpush3.bf16.msra.mxu1 %v16105_v38  ;;  %v14337_v25 = vpop.f32.mrb[169].mxu0 }
 0x8e5   :  { %v5001_v26 = vpack.c.bf16 %v4974_v28, %v4971_v36  ;;  %5698 = vmatprep.subr.bf16.mxu1 %v21287_v51  ;;  %v19461_v56 = vadd.f32 %v14337_v25, %v14336_v58  ;;  %v14339_v45 = vpop.f32.mrb[170].mxu0 }
 0x8e6   :  { %v14340_v15 = vpop.f32.mrb[171].mxu0 }
 0x8e7   :  { %14883 = vmatmul.mubr.msk.bf16.gmra.mrb[84].mxu1 %vm1466_vm3, %v5001_v26  ;;  %v19464_v50 = vadd.f32 %v14340_v15, %v14339_v45  ;;  %v14342_v36 = vpop.f32.mrb[172].mxu0 }
 0x8e8   :  { %v4978_v7 = vpop.f32.mrb[188].mxu1  ;;  %14886 = vmatprep.mubr.msk.bf16.mxu1 %vm16663_vm2, %v21273_v29  ;;  %v14343_v30 = vpop.f32.mrb[173].mxu0 }
 0x8e9   :  { %v4979_v22 = vadd.f32 %v19240_v27, %v4978_v7  ;;  %v4980_v41 = vpop.f32.mrb[189].mxu1  ;;  %v19466_v31 = vadd.f32 %v14343_v30, %v14342_v36  ;;  %v14345_v57 = vpop.f32.mrb[174].mxu0 }
 0x8ea   :  { %v4981_v35 = vpop.f32.mrb[190].mxu1  ;;  %v14346_v28 = vpop.f32.mrb[175].mxu0 }
 0x8eb   :  { %v4982_v20 = vadd.f32 %v19242_v62, %v4981_v35  ;;  %v4983_v38 = vpop.f32.mrb[191].mxu1  ;;  %v19469_v27 = vadd.f32 %v14346_v28, %v14345_v57  ;;  %v14348_v63 = vpop.f32.mrb[176].mxu0 }
 0x8ec   :  { %v14349_v62 = vpop.f32.mrb[177].mxu0 }
 0x8ed   :  { %v5002_v46 = vpack.c.bf16 %v4982_v20, %v4979_v22  ;;  %v19474_v42 = vadd.f32 %v14349_v62, %v14348_v63  ;;  %v14351_v1 = vpop.f32.mrb[178].mxu0 }
 0x8ee   :  { %v14352_v7 = vpop.f32.mrb[179].mxu0 }
 0x8ef   :  { %14887 = vmatmul.mubr.msk.bf16.gmra.mrb[88].mxu1 %vm1466_vm3, %v5002_v46  ;;  %v19477_v41 = vadd.f32 %v14352_v7, %v14351_v1  ;;  %v14354_v45 = vpop.f32.mrb[180].mxu0 }
 0x8f0   :  { %v4986_v9 = vpop.f32.mrb[192].mxu1  ;;  %14890 = vmatprep.mubr.msk.bf16.mxu1 %vm16663_vm2, %v21273_v29  ;;  %v14355_v35 = vpop.f32.mrb[181].mxu0 }
 0x8f1   :  { %v4987_v0 = vadd.f32 %v19247_v34, %v4986_v9  ;;  %v4988_v26 = vpop.f32.mrb[193].mxu1  ;;  %v19479_v20 = vadd.f32 %v14355_v35, %v14354_v45  ;;  %v14357_v38 = vpop.f32.mrb[182].mxu0 }
 0x8f2   :  { %v4989_v58 = vpop.f32.mrb[194].mxu1  ;;  %v14358_v36 = vpop.f32.mrb[183].mxu0 }
 0x8f3   :  { %v4990_v25 = vadd.f32 %v19250_v19, %v4989_v58  ;;  %v4991_v22 = vpop.f32.mrb[195].mxu1  ;;  %v6117_v63 = vpop.f32.mrb[184].mxu0 }
 0x8f4   :  { %v19576_v9 = vadd.f32 %v19453_v16, %v6117_v63  ;;  %v6119_v62 = vpop.f32.mrb[185].mxu0  ;;  %v16145_v63 = vld [vmem:[%s21236_s4 + $0x89c] ss:$16 sps:$4 sm:$0xff]  }
 0x8f5   :  { %v5003_v15 = vpack.c.bf16 %v4990_v25, %v4987_v0  ;;  %v6120_v0 = vpop.f32.mrb[186].mxu0  ;;  %v16143_v62 = vld [vmem:[%s21236_s4 + $0x898] ss:$16 sps:$4 sm:$0xff]  }
 0x8f6   :  { %v19579_v26 = vadd.f32 %v19456_v60, %v6120_v0  ;;  %v6122_v1 = vpop.f32.mrb[187].mxu0  ;;  %v16151_v0 = vld [vmem:[%s21236_s4 + $0x8bc] ss:$16 sps:$4 sm:$0xff]  }
 0x8f7   :  { %14891 = vmatmul.mubr.msk.bf16.gmra.mrb[92].mxu1 %vm1466_vm3, %v5003_v15  ;;  %v6125_v7 = vpop.f32.mrb[188].mxu0  ;;  %v16149_v1 = vld [vmem:[%s21236_s4 + $0x8b8] ss:$16 sps:$4 sm:$0xff]  }
 0x8f8   :  { %v4994_v34 = vpop.f32.mrb[196].mxu1  ;;  %14894 = vmatprep.mubr.msk.bf16.mxu1 %vm16663_vm2, %v21273_v29  ;;  %v6155_v58 = vpack.c.bf16 %v19579_v26, %v19576_v9  ;;  %v19584_v25 = vadd.f32 %v19461_v56, %v6125_v7  ;;  %v6127_v22 = vpop.f32.mrb[189].mxu0  ;;  %v16157_v7 = vld [vmem:[%s21236_s4 + $0x8dc] ss:$16 sps:$4 sm:$0xff]  }
 0x8f9   :  { %v4995_v30 = vadd.f32 %v19259_v5, %v4994_v34  ;;  %v4996_v46 = vpop.f32.mrb[197].mxu1  ;;  %v16108_v5 = vld [vmem:[%s21236_s4 + $0x6cc] ss:$16 sps:$4 sm:$0xff]   ;;  %v6128_v45 = vpop.f32.mrb[190].mxu0  ;;  %v16155_v22 = vld [vmem:[%s21236_s4 + $0x8d8] ss:$16 sps:$4 sm:$0xff]  }
 0x8fa   :  { %v4997_v19 = vpop.f32.mrb[198].mxu1  ;;  %v19587_v35 = vadd.f32 %v19464_v50, %v6128_v45  ;;  %v6130_v16 = vpop.f32.mrb[191].mxu0  ;;  %v12837_v45 = vld [vmem:[%s21236_s4 + $0x8f8] sm:$0xff] }
 0x8fb   :  { %v4998_v57 = vpop.f32.mrb[199].mxu1  ;;  %v5004_v28 = vpack.c.bf16 %v4995_v30, %v4995_v30  ;;  %v6133_v38 = vpop.f32.mrb[192].mxu0  ;;  %v12856_v16 = vcombine.low %v12837_v45, %v12837_v45 }
 0x8fc   :  { %v6156_v15 = vpack.c.bf16 %v19587_v35, %v19584_v25  ;;  %v19592_v60 = vadd.f32 %v19466_v31, %v6133_v38  ;;  %v6135_v36 = vpop.f32.mrb[193].mxu0  ;;  %v12857_v38 = vcombine.high %v12837_v45, %v12837_v45 }
 0x8fd   :  { %v6136_v34 = vpop.f32.mrb[194].mxu0 }
 0x8fe   :  { %v19595_v30 = vadd.f32 %v19469_v27, %v6136_v34  ;;  %v6138_v56 = vpop.f32.mrb[195].mxu0 }
 0x8ff   :  { %14895 = vmatmul.mubr.msk.bf16.gmra.mrb[96].mxu1 %vm1466_vm3, %v5004_v28  ;;  %v6141_v19 = vpop.f32.mrb[196].mxu0 }
 0x900   :  { %14902 = vmatprep.mubr.msk.bf16.mxu1 %vm16663_vm2, %v21273_v29  ;;  %v6157_v46 = vpack.c.bf16 %v19595_v30, %v19592_v60  ;;  %v19600_v50 = vadd.f32 %v19474_v42, %v6141_v19  ;;  %v6143_v57 = vpop.f32.mrb[197].mxu0  ;;  %v16124_v42 = vld [vmem:[%s21236_s4 + $0x890] ss:$16 sps:$4 sm:$0xff]  }
 0x901   :  { %v6144_v28 = vpop.f32.mrb[198].mxu0 }
 0x902   :  { %v6146_v31 = vpop.f32.mrb[199].mxu0 }
 0x907   :  { %14903 = vmatmul.mubr.msk.bf16.vlgmr.msra.gmra.mrb[80].mxu1 %vm1466_vm3, %v5385_v47  ;;  %v16109_v47 = vld [vmem:[%s21236_s4 + $0x6ec] ss:$16 sps:$4 sm:$0xff]  }
 0x908   :  { %5699 = vmatpush1.bf16.msra.mxu1 %v17124_v39  ;;  %14906 = vmatprep.mubr.msk.bf16.mxu1 %vm16663_vm2, %v21273_v29 }
 0x909   :  { %5700 = vmatprep.subr.bf16.mxu1 %v21287_v51 }
 0x90c   :  { %5701 = vmatpush1.bf16.msra.mxu1 %v17148_v59 }
 0x90d   :  { %5702 = vmatprep.subr.bf16.mxu1 %v21287_v51 }
 0x90f   :  { %14907 = vmatmul.mubr.msk.bf16.gmra.mrb[84].mxu1 %vm1466_vm3, %v5386_v52  ;;  %v16111_v52 = vld [vmem:[%s21236_s4 + $0x6e8] ss:$16 sps:$4 sm:$0xff]  }
 0x910   :  { %5703 = vmatpush1.bf16.msra.mxu1 %v17172_v18  ;;  %14910 = vmatprep.mubr.msk.bf16.mxu1 %vm16663_vm2, %v21273_v29 }
 0x911   :  { %5704 = vmatprep.subr.bf16.mxu1 %v21287_v51 }
 0x914   :  { %5705 = vmatpush1.bf16.msra.mxu1 %v17196_v44 }
 0x915   :  { %5706 = vmatprep.subr.bf16.mxu1 %v21287_v51 }
 0x917   :  { %14911 = vmatmul.mubr.msk.bf16.gmra.mrb[88].mxu1 %vm1466_vm3, %v5387_v17  ;;  %v16115_v17 = vld [vmem:[%s21236_s4 + $0x72c] ss:$16 sps:$4 sm:$0xff]  }
 0x918   :  { %5707 = vmatpush1.bf16.msra.mxu1 %v17214_v2  ;;  %14914 = vmatprep.mubr.msk.bf16.mxu1 %vm16663_vm2, %v21273_v29 }
 0x919   :  { %5708 = vmatprep.subr.bf16.mxu1 %v21287_v51 }
 0x91c   :  { %5709 = vmatpush1.bf16.msra.mxu1 %v17229_v23 }
 0x91d   :  { %5710 = vmatprep.subr.bf16.mxu1 %v21287_v51 }
 0x91f   :  { %14915 = vmatmul.mubr.msk.bf16.gmra.mrb[92].mxu1 %vm1466_vm3, %v5388_v32  ;;  %v12695_v32 = vcombine.high %v12675_v37, %v12675_v37 }
 0x920   :  { %5711 = vmatpush1.bf16.msra.mxu1 %v17247_v43  ;;  %14918 = vmatprep.mubr.msk.bf16.mxu1 %vm16663_vm2, %v21273_v29 }
 0x921   :  { %5712 = vmatprep.subr.bf16.mxu1 %v21287_v51 }
 0x924   :  { %5713 = vmatpush1.bf16.msra.mxu1 %v17265_v61 }
 0x925   :  { %5714 = vmatprep.subr.bf16.mxu1 %v21287_v51 }
 0x927   :  { %14919 = vmatmul.mubr.msk.bf16.gmra.mrb[96].mxu1 %vm1466_vm3, %v5389_v4 }
 0x928   :  { %5715 = vmatpush1.bf16.msra.mxu1 %v17282_v6  ;;  %12696 = vmatprep.mubr.msk.bf16.mxu1 %vm1004_vm0, %v16108_v5  ;;  %v19603_v5 = vadd.f32 %v19477_v41, %v6144_v28  ;;  %v16126_v41 = vld [vmem:[%s21236_s4 + $0x894] ss:$16 sps:$4 sm:$0xff]  }
 0x929   :  { %14922 = vmatprep.subr.bf16.mxu1 %v21273_v29  ;;  %6821 = vmatprep.mubr.bf16.mxu0 %v16126_v41 }
 0x92a   :  { %v6158_v4 = vpack.c.bf16 %v19603_v5, %v19600_v50  ;;  %6822 = vmatmul.mubr.bf16.gmra.mrb[228].mxu0 %v16124_v42 }
 0x92f   :  { %5731 = vmatmul.mubr.bf16.vlgmr.msra.gmra.mrb[200].mxu1 %v16106_v12  ;;  %v6149_v12 = vpop.f32.mrb[200].mxu0 }
 0x930   :  { %12697 = vmatprep.mubr.msk.bf16.mxu1 %vm1004_vm0, %v16109_v47  ;;  %14923 = vmatpush3.bf16.msra.mxu1 %v16120_v21  ;;  %v19608_v27 = vadd.f32 %v19479_v20, %v6149_v12  ;;  %v6151_v47 = vpop.f32.mrb[201].mxu0  ;;  %v16129_v20 = vld [vmem:[%s21236_s4 + $0x8b4] ss:$16 sps:$4 sm:$0xff]  }
 0x931   :  { %14924 = vmatprep.subr.bf16.mxu1 %v21273_v29  ;;  %v6152_v21 = vpop.f32.mrb[202].mxu0  ;;  %6829 = vmatprep.mubr.bf16.mxu0 %v16129_v20 }
 0x934   :  { %14925 = vmatpush3.bf16.msra.mxu1 %v16121_v11  ;;  %v6153_v11 = vpop.f32.mrb[203].mxu0 }
 0x935   :  { %14946 = vmatprep.subr.bf16.mxu1 %v21273_v29  ;;  %v14383_v36 = vpop.f32.mrb[204].mxu0 }
 0x936   :  { %v14384_v34 = vpop.f32.mrb[205].mxu0 }
 0x937   :  { %5739 = vmatmul.mubr.bf16.gmra.mrb[204].mxu1 %v16111_v52  ;;  %v16127_v52 = vld [vmem:[%s21236_s4 + $0x8b0] ss:$16 sps:$4 sm:$0xff]   ;;  %v19663_v56 = vadd.f32 %v14384_v34, %v14383_v36  ;;  %v14386_v19 = vpop.f32.mrb[206].mxu0  ;;  %v16123_v34 = vld [vmem:[%s21237_s5 + $0xd8] sm:$0xff]  }
 0x938   :  { %12698 = vmatprep.mubr.msk.bf16.mxu1 %vm1004_vm0, %v16112_v10  ;;  %6830 = vmatmul.mubr.bf16.gmra.mrb[232].mxu0 %v16127_v52  ;;  %v16130_v10 = vld [vmem:[%s21236_s4 + $0x8d0] ss:$16 sps:$4 sm:$0xff]   ;;  %v14387_v57 = vpop.f32.mrb[207].mxu0 }
 0x939   :  { %v19665_v28 = vadd.f32 %v14387_v57, %v14386_v19  ;;  %v14389_v31 = vpop.f32.mrb[208].mxu0 }
 0x93a   :  { %v14390_v12 = vpop.f32.mrb[209].mxu0 }
 0x93b   :  { %v19667_v47 = vadd.f32 %v14390_v12, %v14389_v31  ;;  %v14392_v21 = vpop.f32.mrb[210].mxu0 }
 0x93c   :  { %v14393_v11 = vpop.f32.mrb[211].mxu0 }
 0x93d   :  { %v19669_v42 = vadd.f32 %v14393_v11, %v14392_v21  ;;  %v14395_v41 = vpop.f32.mrb[212].mxu0 }
 0x93e   :  { %v14396_v20 = vpop.f32.mrb[213].mxu0 }
 0x93f   :  { %5747 = vmatmul.mubr.bf16.gmra.mrb[208].mxu1 %v16114_v24  ;;  %v16132_v24 = vld [vmem:[%s21236_s4 + $0x8d4] ss:$16 sps:$4 sm:$0xff]  }
 0x940   :  { %12699 = vmatprep.mubr.msk.bf16.mxu1 %vm1004_vm0, %v16115_v17  ;;  %6837 = vmatprep.mubr.bf16.mxu0 %v16132_v24  ;;  %v12836_v17 = vld [vmem:[%s21236_s4 + $0x8f0] sm:$0xff] }
 0x941   :  { %6838 = vmatmul.mubr.bf16.gmra.mrb[236].mxu0 %v16130_v10  ;;  %v12854_v37 = vcombine.low %v12836_v17, %v12836_v17 }
 0x947   :  { %5755 = vmatmul.mubr.bf16.gmra.mrb[212].mxu1 %v16117_v13  ;;  %v12855_v13 = vcombine.high %v12836_v17, %v12836_v17  ;;  %v19672_v17 = vadd.f32 %v14396_v20, %v14395_v41 }
 0x948   :  { %12700 = vmatprep.mubr.msk.bf16.mxu1 %vm1004_vm0, %v12695_v32  ;;  %v16140_v32 = vld [vmem:[%s21236_s4 + $0x87c] ss:$16 sps:$4 sm:$0xff]  }
 0x949   :  { %6845 = vmatprep.mubr.bf16.mxu0 %v12855_v13 }
 0x94a   :  { %6846 = vmatmul.mubr.bf16.gmra.mrb[240].mxu0 %v12854_v37  ;;  %v14398_v37 = vpop.f32.mrb[214].mxu0 }
 0x94b   :  { %12858 = vmatprep.mubr.msk.bf16.mxu0 %vm1004_vm0, %v16140_v32  ;;  %v14399_v32 = vpop.f32.mrb[215].mxu0 }
 0x94f   :  { %5763 = vmatmul.mubr.bf16.gmra.mrb[216].mxu1 %v12694_v55  ;;  %v16138_v55 = vld [vmem:[%s21236_s4 + $0x878] ss:$16 sps:$4 sm:$0xff]  }
 0x950   :  { %14926 = vmatprep.mubr.msk.bf16.mxu1 %vm16663_vm2, %v21273_v29 }
 0x952   :  { %6886 = vmatmul.mubr.bf16.vlgmr.msra.gmra.mrb[244].mxu0 %v16138_v55 }
 0x953   :  { %12859 = vmatprep.mubr.msk.bf16.mxu0 %vm1004_vm0, %v16145_v63 }
 0x95a   :  { %6894 = vmatmul.mubr.bf16.gmra.mrb[248].mxu0 %v16143_v62  ;;  %v19675_v62 = vadd.f32 %v14399_v32, %v14398_v37 }
 0x95b   :  { %12860 = vmatprep.mubr.msk.bf16.mxu0 %vm1004_vm0, %v16151_v0  ;;  %v14401_v0 = vpop.f32.mrb[216].mxu0 }
 0x962   :  { %6902 = vmatmul.mubr.bf16.gmra.mrb[252].mxu0 %v16149_v1  ;;  %v16122_v1 = vld [vmem:[%s21237_s5 + $0xd0] sm:$0xff]  }
 0x963   :  { %12861 = vmatprep.mubr.msk.bf16.mxu0 %vm1004_vm0, %v16157_v7  ;;  %v14402_v7 = vpop.f32.mrb[217].mxu0 }
 0x964   :  { %v19680_v45 = vadd.f32 %v14402_v7, %v14401_v0 }
 0x96a   :  { %6910 = vmatmul.mubr.bf16.gmra.mrb[0].mxu0 %v16155_v22 }
 0x96b   :  { %12862 = vmatprep.mubr.msk.bf16.mxu0 %vm1004_vm0, %v12857_v38 }
 0x972   :  { %6918 = vmatmul.mubr.bf16.gmra.mrb[4].mxu0 %v12856_v16 }
 0xa02   :  { %v5732_v52 = vpop.f32.mrb[200].mxu1 }
 0xa03   :  { %v5733_v10 = vadd.f32 %v19420_v8, %v5732_v52  ;;  %v5734_v24 = vpop.f32.mrb[201].mxu1  ;;  %v14404_v8 = vpop.f32.mrb[218].mxu0 }
 0xa04   :  { %v5735_v13 = vpop.f32.mrb[202].mxu1  ;;  %v14405_v16 = vpop.f32.mrb[219].mxu0 }
 0xa05   :  { %v5736_v55 = vadd.f32 %v19422_v40, %v5735_v13  ;;  %v5737_v63 = vpop.f32.mrb[203].mxu1  ;;  %v19683_v38 = vadd.f32 %v14405_v16, %v14404_v8  ;;  %v14407_v36 = vpop.f32.mrb[220].mxu0 }
 0xa06   :  { %v14408_v19 = vpop.f32.mrb[221].mxu0 }
 0xa07   :  { %v5770_v22 = vpack.c.bf16 %v5736_v55, %v5733_v10  ;;  %v19692_v12 = vadd.f32 %v14408_v19, %v14407_v36  ;;  %v14410_v21 = vpop.f32.mrb[222].mxu0 }
 0xa08   :  { %v14411_v41 = vpop.f32.mrb[223].mxu0 }
 0xa09   :  { %14927 = vmatmul.mubr.msk.bf16.vlgmr.msra.gmra.mrb[80].mxu1 %vm1466_vm3, %v5770_v22  ;;  %v14436_v10 = vpop.f32.mrb[224].mxu0 }
 0xa0a   :  { %v5740_v40 = vpop.f32.mrb[204].mxu1  ;;  %14947 = vmatpush3.bf16.msra.mxu1 %v16122_v1  ;;  %14930 = vmatprep.mubr.msk.bf16.mxu1 %vm16663_vm2, %v21273_v29  ;;  %v14437_v24 = vpop.f32.mrb[225].mxu0 }
 0xa0b   :  { %v5741_v57 = vadd.f32 %v19424_v49, %v5740_v40  ;;  %v5742_v31 = vpop.f32.mrb[205].mxu1  ;;  %14948 = vmatprep.subr.bf16.mxu1 %v21273_v29  ;;  %v19696_v13 = vadd.f32 %v14437_v24, %v14436_v10  ;;  %v14439_v49 = vpop.f32.mrb[226].mxu0 }
 0xa0c   :  { %v5743_v11 = vpop.f32.mrb[206].mxu1  ;;  %v14440_v32 = vpop.f32.mrb[227].mxu0 }
 0xa0d   :  { %v5744_v52 = vadd.f32 %v19426_v48, %v5743_v11  ;;  %v5745_v20 = vpop.f32.mrb[207].mxu1  ;;  %v19699_v55 = vadd.f32 %v14440_v32, %v14439_v49 }
 0xa0e   :  { %14949 = vmatpush3.bf16.msra.mxu1 %v16123_v34 }
 0xa0f   :  { %v5771_v37 = vpack.c.bf16 %v5744_v52, %v5741_v57  ;;  %6468 = vmatprep.subr.bf16.mxu1 %v21287_v51 }
 0xa11   :  { %14931 = vmatmul.mubr.msk.bf16.gmra.mrb[84].mxu1 %vm1466_vm3, %v5771_v37 }
 0xa12   :  { %v5748_v63 = vpop.f32.mrb[208].mxu1  ;;  %14934 = vmatprep.mubr.msk.bf16.mxu1 %vm16663_vm2, %v21273_v29 }
 0xa13   :  { %v5749_v48 = vadd.f32 %v19429_v33, %v5748_v63  ;;  %v5750_v0 = vpop.f32.mrb[209].mxu1 }
 0xa14   :  { %v5751_v1 = vpop.f32.mrb[210].mxu1 }
 0xa15   :  { %v5752_v7 = vadd.f32 %v19432_v3, %v5751_v1  ;;  %v5753_v22 = vpop.f32.mrb[211].mxu1 }
 0xa17   :  { %v5772_v8 = vpack.c.bf16 %v5752_v7, %v5749_v48 }
 0xa19   :  { %14935 = vmatmul.mubr.msk.bf16.gmra.mrb[88].mxu1 %vm1466_vm3, %v5772_v8 }
 0xa1a   :  { %v5756_v16 = vpop.f32.mrb[212].mxu1  ;;  %14938 = vmatprep.mubr.msk.bf16.mxu1 %vm16663_vm2, %v21273_v29 }
 0xa1b   :  { %v5757_v36 = vadd.f32 %v19437_v54, %v5756_v16  ;;  %v5758_v40 = vpop.f32.mrb[213].mxu1  ;;  %v16153_v54 = vld [vmem:[%s21236_s4 + $0x84c] ss:$16 sps:$4 sm:$0xff]  }
 0xa1c   :  { %v5759_v34 = vpop.f32.mrb[214].mxu1 }
 0xa1d   :  { %v5760_v19 = vadd.f32 %v19440_v53, %v5759_v34  ;;  %v5761_v57 = vpop.f32.mrb[215].mxu1  ;;  %v12783_v53 = vld [vmem:[%s21236_s4 + $0x868] sm:$0xff] }
 0xa1e   :  { %v12803_v9 = vcombine.high %v12783_v53, %v12783_v53  ;;  %v12802_v26 = vcombine.low %v12783_v53, %v12783_v53 }
 0xa1f   :  { %v5773_v33 = vpack.c.bf16 %v5760_v19, %v5757_v36 }
 0xa21   :  { %14939 = vmatmul.mubr.msk.bf16.gmra.mrb[92].mxu1 %vm1466_vm3, %v5773_v33 }
 0xa22   :  { %v5764_v31 = vpop.f32.mrb[216].mxu1  ;;  %14942 = vmatprep.mubr.msk.bf16.mxu1 %vm16663_vm2, %v21273_v29 }
 0xa23   :  { %v5765_v3 = vadd.f32 %v19449_v14, %v5764_v31  ;;  %v5766_v21 = vpop.f32.mrb[217].mxu1  ;;  %v16158_v14 = vld [vmem:[%s21236_s4 + $0x848] ss:$16 sps:$4 sm:$0xff]  }
 0xa24   :  { %v5767_v11 = vpop.f32.mrb[218].mxu1 }
 0xa25   :  { %v5768_v41 = vpop.f32.mrb[219].mxu1  ;;  %v5774_v52 = vpack.c.bf16 %v5765_v3, %v5765_v3 }
 0xa29   :  { %14943 = vmatmul.mubr.msk.bf16.gmra.mrb[96].mxu1 %vm1466_vm3, %v5774_v52 }
 0xa2a   :  { %14950 = vmatprep.mubr.msk.bf16.mxu1 %vm16663_vm2, %v21273_v29 }
 0xa31   :  { %14951 = vmatmul.mubr.msk.bf16.vlgmr.msra.gmra.mrb[80].mxu1 %vm1466_vm3, %v6155_v58  ;;  %v14442_v58 = vpop.f32.mrb[228].mxu0 }
 0xa32   :  { %6469 = vmatpush1.bf16.msra.mxu1 %v17124_v39  ;;  %14954 = vmatprep.mubr.msk.bf16.mxu1 %vm16663_vm2, %v21273_v29  ;;  %v16137_v39 = vld [vmem:[%s21236_s4 + $0x7ec] ss:$16 sps:$4 sm:$0xff]   ;;  %v14443_v25 = vpop.f32.mrb[229].mxu0 }
 0xa33   :  { %6470 = vmatprep.subr.bf16.mxu1 %v21287_v51  ;;  %v14444_v35 = vadd.f32 %v14443_v25, %v14442_v58 }
 0xa36   :  { %6471 = vmatpush1.bf16.msra.mxu1 %v17148_v59  ;;  %v6159_v59 = vpack.c.bf16 %v19608_v27, %v19608_v27 }
 0xa37   :  { %6472 = vmatprep.subr.bf16.mxu1 %v21287_v51 }
 0xa39   :  { %14955 = vmatmul.mubr.msk.bf16.gmra.mrb[84].mxu1 %vm1466_vm3, %v6156_v15  ;;  %v14445_v15 = vpop.f32.mrb[230].mxu0 }
 0xa3a   :  { %6473 = vmatpush1.bf16.msra.mxu1 %v17172_v18  ;;  %14958 = vmatprep.mubr.msk.bf16.mxu1 %vm16663_vm2, %v21273_v29  ;;  %v16135_v18 = vld [vmem:[%s21236_s4 + $0x7e8] ss:$16 sps:$4 sm:$0xff]   ;;  %v14446_v60 = vpop.f32.mrb[231].mxu0 }
 0xa3b   :  { %6474 = vmatprep.subr.bf16.mxu1 %v21287_v51  ;;  %v14447_v30 = vadd.f32 %v14446_v60, %v14445_v15 }
 0xa3e   :  { %6475 = vmatpush1.bf16.msra.mxu1 %v17196_v44  ;;  %v16141_v44 = vld [vmem:[%s21236_s4 + $0x80c] ss:$16 sps:$4 sm:$0xff]  }
 0xa3f   :  { %6476 = vmatprep.subr.bf16.mxu1 %v21287_v51 }
 0xa41   :  { %14959 = vmatmul.mubr.msk.bf16.gmra.mrb[88].mxu1 %vm1466_vm3, %v6157_v46  ;;  %v14448_v46 = vpop.f32.mrb[232].mxu0 }
 0xa42   :  { %6477 = vmatpush1.bf16.msra.mxu1 %v17214_v2  ;;  %14962 = vmatprep.mubr.msk.bf16.mxu1 %vm16663_vm2, %v21273_v29  ;;  %v16163_v2 = vld [vmem:[%s21237_s5 + $0xe0] sm:$0xff]   ;;  %v14449_v50 = vpop.f32.mrb[233].mxu0 }
 0xa43   :  { %6478 = vmatprep.subr.bf16.mxu1 %v21287_v51  ;;  %v14450_v5 = vadd.f32 %v14449_v50, %v14448_v46 }
 0xa46   :  { %6479 = vmatpush1.bf16.msra.mxu1 %v17229_v23  ;;  %v16164_v23 = vld [vmem:[%s21237_s5 + $0xe8] sm:$0xff]  }
 0xa47   :  { %6480 = vmatprep.subr.bf16.mxu1 %v21287_v51 }
 0xa49   :  { %14963 = vmatmul.mubr.msk.bf16.gmra.mrb[92].mxu1 %vm1466_vm3, %v6158_v4  ;;  %v14451_v4 = vpop.f32.mrb[234].mxu0 }
 0xa4a   :  { %6481 = vmatpush1.bf16.msra.mxu1 %v17247_v43  ;;  %14966 = vmatprep.mubr.msk.bf16.mxu1 %vm16663_vm2, %v21273_v29  ;;  %v16146_v43 = vld [vmem:[%s21236_s4 + $0x808] ss:$16 sps:$4 sm:$0xff]   ;;  %v14452_v27 = vpop.f32.mrb[235].mxu0 }
 0xa4b   :  { %6482 = vmatprep.subr.bf16.mxu1 %v21287_v51  ;;  %v14453_v20 = vadd.f32 %v14452_v27, %v14451_v4  ;;  %v14454_v10 = vpop.f32.mrb[236].mxu0  ;;  %v16165_v4 = vld [vmem:[%s21237_s5 + $0xf0] sm:$0xff]  }
 0xa4c   :  { %v14455_v24 = vpop.f32.mrb[237].mxu0 }
 0xa4d   :  { %v14456_v37 = vadd.f32 %v14455_v24, %v14454_v10  ;;  %v14457_v49 = vpop.f32.mrb[238].mxu0 }
 0xa4e   :  { %6483 = vmatpush1.bf16.msra.mxu1 %v17265_v61  ;;  %v16147_v61 = vld [vmem:[%s21236_s4 + $0x82c] ss:$16 sps:$4 sm:$0xff]   ;;  %v14458_v32 = vpop.f32.mrb[239].mxu0 }
 0xa4f   :  { %6484 = vmatprep.subr.bf16.mxu1 %v21287_v51  ;;  %v14459_v63 = vadd.f32 %v14458_v32, %v14457_v49  ;;  %v14460_v48 = vpop.f32.mrb[240].mxu0 }
 0xa50   :  { %v14461_v0 = vpop.f32.mrb[241].mxu0 }
 0xa51   :  { %14967 = vmatmul.mubr.msk.bf16.gmra.mrb[96].mxu1 %vm1466_vm3, %v6159_v59  ;;  %v14462_v1 = vadd.f32 %v14461_v0, %v14460_v48  ;;  %v14463_v7 = vpop.f32.mrb[242].mxu0 }
 0xa52   :  { %6485 = vmatpush1.bf16.msra.mxu1 %v17282_v6  ;;  %12804 = vmatprep.mubr.msk.bf16.mxu1 %vm1004_vm0, %v16137_v39  ;;  %v16152_v6 = vld [vmem:[%s21236_s4 + $0x828] ss:$16 sps:$4 sm:$0xff]   ;;  %v14464_v22 = vpop.f32.mrb[243].mxu0 }
 0xa53   :  { %14970 = vmatprep.subr.bf16.mxu1 %v21273_v29  ;;  %v6887_v8 = vpop.f32.mrb[244].mxu0 }
 0xa54   :  { %v19805_v16 = vadd.f32 %v19696_v13, %v6887_v8  ;;  %v6889_v36 = vpop.f32.mrb[245].mxu0 }
 0xa55   :  { %v6890_v40 = vpop.f32.mrb[246].mxu0 }
 0xa56   :  { %v19808_v34 = vadd.f32 %v19699_v55, %v6890_v40  ;;  %v6892_v19 = vpop.f32.mrb[247].mxu0 }
 0xa57   :  { %v6895_v33 = vpop.f32.mrb[248].mxu0 }
 0xa58   :  { %v6925_v57 = vpack.c.bf16 %v19808_v34, %v19805_v16  ;;  %v19812_v31 = vadd.f32 %v14444_v35, %v6895_v33  ;;  %v6897_v3 = vpop.f32.mrb[249].mxu0  ;;  %v12875_v34 = vld [vmem:[%s21239_s7] ss:$0 sm:$0xff]  ;;  %s16664_s7 = smov [#allocation2]  }
 0xa59   :  { %6501 = vmatmul.mubr.bf16.vlgmr.msra.gmra.mrb[220].mxu1 %v16135_v18  ;;  %v6898_v21 = vpop.f32.mrb[250].mxu0  ;;  %s11956_s1 = sshll.u32 %s16664_s7, 4  ;;  %s11957_s1 = int_to_ptr.vmem [resolvable:$true] %s11956_s1 }
 0xa5a   :  { %12805 = vmatprep.mubr.msk.bf16.mxu1 %vm1004_vm0, %v16141_v44  ;;  %14971 = vmatpush3.bf16.msra.mxu1 %v16163_v2  ;;  %v19814_v11 = vadd.f32 %v14447_v30, %v6898_v21  ;;  %v6900_v41 = vpop.f32.mrb[251].mxu0  ;;  %s16637_s21 = scalar_lea.vmem %s11957_s1, 32  ;;  %p16642_p1 = scmp.lt.s32.totalorder %s11957_s1, %s11957_s1 }
 0xa5b   :  { %14972 = vmatprep.subr.bf16.mxu1 %v21273_v29  ;;  %v6903_v52 = vpop.f32.mrb[252].mxu0  ;;  %p16638_p0 = scmp.ne.s32.totalorder %s11957_s1, %s16637_s21  ;;  %p16643_p2 = scmp.lt.s32.totalorder %s16637_s21, %s16637_s21 }
 0xa5c   :  { %v6926_v13 = vpack.c.bf16 %v19814_v11, %v19812_v31  ;;  %v19818_v39 = vadd.f32 %v14450_v5, %v6903_v52  ;;  %v6905_v55 = vpop.f32.mrb[253].mxu0 }
 0xa5d   :  { %v6906_v59 = vpop.f32.mrb[254].mxu0  ;;  %p16644_p3 = por %p16643_p2, %p16642_p1 }
 0xa5e   :  { %14973 = vmatpush3.bf16.msra.mxu1 %v16164_v23  ;;  %v19820_v18 = vadd.f32 %v14453_v20, %v6906_v59  ;;  %v6908_v44 = vpop.f32.mrb[255].mxu0 }
 0xa5f   :  { %14994 = vmatprep.subr.bf16.mxu1 %v21273_v29  ;;  %v6911_v23 = vpop.f32.mrb[0].mxu0  ;;  %p16645_p4 = pnand %p16644_p3, %p16638_p0 }
 0xa60   :  { %v6927_v2 = vpack.c.bf16 %v19820_v18, %v19818_v39 }
 0xa61   :  { %6509 = vmatmul.mubr.bf16.gmra.mrb[224].mxu1 %v16146_v43  ;;  %v19824_v43 = vadd.f32 %v14456_v37, %v6911_v23 }
 0xa62   :  { %12806 = vmatprep.mubr.msk.bf16.mxu1 %vm1004_vm0, %v16147_v61  ;;  %v6913_v61 = vpop.f32.mrb[1].mxu0 }
 0xa69   :  { %6517 = vmatmul.mubr.bf16.gmra.mrb[228].mxu1 %v16152_v6  ;;  %v6914_v6 = vpop.f32.mrb[2].mxu0 }
 0xa6a   :  { %12807 = vmatprep.mubr.msk.bf16.mxu1 %vm1004_vm0, %v16153_v54  ;;  %v19826_v54 = vadd.f32 %v14459_v63, %v6914_v6  ;;  %v6916_v53 = vpop.f32.mrb[3].mxu0 }
 0xa71   :  { %6525 = vmatmul.mubr.bf16.gmra.mrb[232].mxu1 %v16158_v14  ;;  %v6928_v14 = vpack.c.bf16 %v19826_v54, %v19824_v43 }
 0xa72   :  { %12808 = vmatprep.mubr.msk.bf16.mxu1 %vm1004_vm0, %v12803_v9  ;;  %v6919_v9 = vpop.f32.mrb[4].mxu0 }
 0xa73   :  { %v6921_v58 = vpop.f32.mrb[5].mxu0 }
 0xa74   :  { %v6922_v25 = vpop.f32.mrb[6].mxu0 }
 0xa75   :  { %v6923_v35 = vpop.f32.mrb[7].mxu0 }
 0xa79   :  { %6533 = vmatmul.mubr.bf16.gmra.mrb[236].mxu1 %v12802_v26  ;;  %v19830_v26 = vadd.f32 %v14462_v1, %v6919_v9 }
 0xa7a   :  { %14974 = vmatprep.mubr.msk.bf16.mxu1 %vm16663_vm2, %v21273_v29 }
 0xb2c   :  { %v6502_v15 = vpop.f32.mrb[220].mxu1 }
 0xb2d   :  { %v6503_v60 = vadd.f32 %v19663_v56, %v6502_v15  ;;  %v6504_v30 = vpop.f32.mrb[221].mxu1  ;;  %v16166_v56 = vld [vmem:[%s21237_s5 + $0xf8] sm:$0xff]  }
 0xb2e   :  { %v6505_v46 = vpop.f32.mrb[222].mxu1 }
 0xb2f   :  { %v6506_v50 = vadd.f32 %v19665_v28, %v6505_v46  ;;  %v6507_v5 = vpop.f32.mrb[223].mxu1 }
 0xb31   :  { %v6540_v27 = vpack.c.bf16 %v6506_v50, %v6503_v60 }
 0xb33   :  { %14975 = vmatmul.mubr.msk.bf16.vlgmr.msra.gmra.mrb[80].mxu1 %vm1466_vm3, %v6540_v27 }
 0xb34   :  { %v6510_v20 = vpop.f32.mrb[224].mxu1  ;;  %14995 = vmatpush3.bf16.msra.mxu1 %v16165_v4  ;;  %14978 = vmatprep.mubr.msk.bf16.mxu1 %vm16663_vm2, %v21273_v29 }
 0xb35   :  { %v6511_v10 = vadd.f32 %v19667_v47, %v6510_v20  ;;  %v6512_v28 = vpop.f32.mrb[225].mxu1  ;;  %14996 = vmatprep.subr.bf16.mxu1 %v21273_v29 }
 0xb36   :  { %v6513_v24 = vpop.f32.mrb[226].mxu1 }
 0xb37   :  { %v6514_v37 = vadd.f32 %v19669_v42, %v6513_v24  ;;  %v6515_v49 = vpop.f32.mrb[227].mxu1 }
 0xb38   :  { %14997 = vmatpush3.bf16.msra.mxu1 %v16166_v56 }
 0xb39   :  { %v6541_v32 = vpack.c.bf16 %v6514_v37, %v6511_v10 }
 0xb3b   :  { %14979 = vmatmul.mubr.msk.bf16.gmra.mrb[84].mxu1 %vm1466_vm3, %v6541_v32 }
 0xb3c   :  { %v6518_v63 = vpop.f32.mrb[228].mxu1  ;;  %14982 = vmatprep.mubr.msk.bf16.mxu1 %vm16663_vm2, %v21273_v29 }
 0xb3d   :  { %v6519_v48 = vadd.f32 %v19672_v17, %v6518_v63  ;;  %v6520_v0 = vpop.f32.mrb[229].mxu1 }
 0xb3e   :  { %v6521_v1 = vpop.f32.mrb[230].mxu1 }
 0xb3f   :  { %v6522_v47 = vadd.f32 %v19675_v62, %v6521_v1  ;;  %v6523_v7 = vpop.f32.mrb[231].mxu1 }
 0xb41   :  { %v6542_v22 = vpack.c.bf16 %v6522_v47, %v6519_v48 }
 0xb43   :  { %14983 = vmatmul.mubr.msk.bf16.gmra.mrb[88].mxu1 %vm1466_vm3, %v6542_v22 }
 0xb44   :  { %v6526_v42 = vpop.f32.mrb[232].mxu1  ;;  %14986 = vmatprep.mubr.msk.bf16.mxu1 %vm16663_vm2, %v21273_v29 }
 0xb45   :  { %v6527_v8 = vadd.f32 %v19680_v45, %v6526_v42  ;;  %v6528_v36 = vpop.f32.mrb[233].mxu1  ;;  %v6929_v45 = vpack.c.bf16 %v19830_v26, %v19830_v26 }
 0xb46   :  { %v6529_v40 = vpop.f32.mrb[234].mxu1 }
 0xb47   :  { %v6530_v19 = vadd.f32 %v19683_v38, %v6529_v40  ;;  %v6531_v33 = vpop.f32.mrb[235].mxu1  ;;  %v16167_v38 = vld [vmem:[%s21240_s8 + $0x10] sm:$0xff]  }
 0xb49   :  { %v6543_v17 = vpack.c.bf16 %v6530_v19, %v6527_v8 }
 0xb4b   :  { %14987 = vmatmul.mubr.msk.bf16.gmra.mrb[92].mxu1 %vm1466_vm3, %v6543_v17 }
 0xb4c   :  { %v6534_v3 = vpop.f32.mrb[236].mxu1  ;;  %14990 = vmatprep.mubr.msk.bf16.mxu1 %vm16663_vm2, %v21273_v29 }
 0xb4d   :  { %v6535_v62 = vadd.f32 %v19692_v12, %v6534_v3  ;;  %v6536_v21 = vpop.f32.mrb[237].mxu1  ;;  %v16169_v12 = vld [vmem:[%s21240_s8] sm:$0xff]  }
 0xb4e   :  { %v6537_v41 = vpop.f32.mrb[238].mxu1  ;;  %15028 = vmatprep.mubr.msk.bf16.mxu0 %vm7103_vm4, %v16169_v12  ;;  %v16183_v3 = vld [vmem:[%s21241_s9 + $0x20] sm:$0xff]   ;;  %v16168_v21 = vld [vmem:[%s21240_s8 + $0x18] sm:$0xff]   ;;  %v16173_v12 = vld [vmem:[%s21240_s8 + $0x30] sm:$0xff]  }
 0xb4f   :  { %v6538_v52 = vpop.f32.mrb[239].mxu1  ;;  %v6544_v55 = vpack.c.bf16 %v6535_v62, %v6535_v62  ;;  %v16170_v41 = vld [vmem:[%s21240_s8 + $0x8] sm:$0xff]  }
 0xb50   :  { %v16171_v52 = vld [vmem:[%s21240_s8 + $0x20] sm:$0xff]  }
 0xb53   :  { %14991 = vmatmul.mubr.msk.bf16.gmra.mrb[96].mxu1 %vm1466_vm3, %v6544_v55  ;;  %v16184_v55 = vld [vmem:[%s21241_s9 + $0x28] sm:$0xff]  }
 0xb54   :  { %14998 = vmatprep.mubr.msk.bf16.mxu1 %vm16663_vm2, %v21273_v29 }
 0xb5b   :  { %14999 = vmatmul.mubr.msk.bf16.vlgmr.msra.gmra.mrb[80].mxu1 %vm1466_vm3, %v6925_v57 }
 0xb5c   :  { %15002 = vmatprep.mubr.msk.bf16.mxu1 %vm16663_vm2, %v21273_v29 }
 0xb63   :  { %15003 = vmatmul.mubr.msk.bf16.gmra.mrb[84].mxu1 %vm1466_vm3, %v6926_v13 }
 0xb64   :  { %15006 = vmatprep.mubr.msk.bf16.mxu1 %vm16663_vm2, %v21273_v29 }
 0xb6b   :  { %15007 = vmatmul.mubr.msk.bf16.gmra.mrb[88].mxu1 %vm1466_vm3, %v6927_v2 }
 0xb6c   :  { %15010 = vmatprep.mubr.msk.bf16.mxu1 %vm16663_vm2, %v21273_v29 }
 0xb73   :  { %15011 = vmatmul.mubr.msk.bf16.gmra.mrb[92].mxu1 %vm1466_vm3, %v6928_v14 }
 0xb74   :  { %15014 = vmatprep.mubr.msk.bf16.mxu1 %vm16663_vm2, %v21273_v29  ;;  %v12874_v29 = vld [vmem:[%s21238_s6] ss:$0 sm:$0xff] }
 0xb7b   :  { %15015 = vmatmul.mubr.msk.bf16.gmra.mrb[96].mxu1 %vm1466_vm3, %v6929_v45  ;;  %v16185_v45 = vld [vmem:[%s21241_s9 + $0x30] sm:$0xff]  }
 0xb7c   :  { %15042 = vmatprep.mubr.msk.bf16.mxu1 %vm7103_vm4, %v16167_v38  ;;  %v16172_v38 = vld [vmem:[%s21240_s8 + $0x28] sm:$0xff]  }
 0xc2e   :  { %v6996_v16 = vpop.f32.mrb[80].mxu1 }
 0xc2f   :  { %v7050_v57 = vmul.f32 %v12874_v29, %v6996_v16  ;;  %v15000_v31 = vpop.f32.mrb[81].mxu1  ;;  %v16175_v16 = vld [vmem:[%s21240_s8 + $0x40] sm:$0xff]  }
 0xc30   :  { %v6999_v11 = vpop.f32.mrb[82].mxu1  ;;  %v16178_v31 = vld [vmem:[%s21240_s8 + $0x58] sm:$0xff]  }
 0xc31   :  { %v7066_v13 = vadd.f32 %v12875_v34, %v7050_v57  ;;  %v7051_v39 = vmul.f32 %v12874_v29, %v6999_v11  ;;  %v15001_v59 = vpop.f32.mrb[83].mxu1  ;;  %v16177_v57 = vld [vmem:[%s21240_s8 + $0x50] sm:$0xff]   ;;  %v16179_v11 = vld [vmem:[%s21240_s8 + $0x60] sm:$0xff]  }
 0xc32   :  { %v16180_v59 = vld [vmem:[%s21240_s8 + $0x68] sm:$0xff]  }
 0xc33   :  { %v7067_v18 = vadd.f32 %v12875_v34, %v7051_v39  ;;  %v7075_v44 = vmax.f32 %v7066_v13, 0.0  ;;  %v16186_v13 = vld [vmem:[%s21241_s9 + $0x38] sm:$0xff]   ;;  %v16187_v39 = vld [vmem:[%s21241_s9] sm:$0xff]  }
 0xc35   :  { %v7076_v2 = vmax.f32 %v7067_v18, 0.0  ;;  %v16181_v18 = vld [vmem:[%s21240_s8 + $0x70] sm:$0xff]  }
 0xc36   :  { %v7004_v23 = vpop.f32.mrb[84].mxu1 }
 0xc37   :  { %v19901_v43 = vpack.c.bf16 %v7076_v2, %v7075_v44  ;;  %v7052_v61 = vmul.f32 %v12874_v29, %v7004_v23  ;;  %v15004_v6 = vpop.f32.mrb[85].mxu1  ;;  %v16182_v44 = vld [vmem:[%s21240_s8 + $0x78] sm:$0xff]  }
 0xc38   :  { %v7007_v54 = vpop.f32.mrb[86].mxu1 }
 0xc39   :  { %v7068_v53 = vadd.f32 %v12875_v34, %v7052_v61  ;;  %v7053_v14 = vmul.f32 %v12874_v29, %v7007_v54  ;;  %v15005_v9 = vpop.f32.mrb[87].mxu1  ;;  %15018 = vmatprep.subr.bf16.mxu0 %v19901_v43  ;;  %15032 = vmatprep.subr.bf16.mxu1 %v19901_v43 }
 0xc3a   :  { %15019 = vmatpush3.bf16.msra.mxu0 %v19901_v43  ;;  %15033 = vmatpush3.bf16.msra.mxu1 %v19901_v43 }
 0xc3b   :  { %v7069_v26 = vadd.f32 %v12875_v34, %v7053_v14  ;;  %v7077_v58 = vmax.f32 %v7068_v53, 0.0 }
 0xc3d   :  { %v7078_v25 = vmax.f32 %v7069_v26, 0.0 }
 0xc3e   :  { %v7012_v35 = vpop.f32.mrb[88].mxu1 }
 0xc3f   :  { %v19907_v15 = vpack.c.bf16 %v7078_v25, %v7077_v58  ;;  %v7054_v60 = vmul.f32 %v12874_v29, %v7012_v35  ;;  %v15008_v30 = vpop.f32.mrb[89].mxu1 }
 0xc40   :  { %v7015_v46 = vpop.f32.mrb[90].mxu1  ;;  %v16189_v30 = vld [vmem:[%s21241_s9 + $0x10] sm:$0xff]  }
 0xc41   :  { %v7070_v50 = vadd.f32 %v12875_v34, %v7054_v60  ;;  %v7055_v5 = vmul.f32 %v12874_v29, %v7015_v46  ;;  %v15009_v4 = vpop.f32.mrb[91].mxu1  ;;  %15020 = vmatprep.subr.bf16.mxu0 %v19907_v15  ;;  %15034 = vmatprep.subr.bf16.mxu1 %v19907_v15  ;;  %v16188_v60 = vld [vmem:[%s21241_s9 + $0x8] sm:$0xff]   ;;  %v16190_v46 = vld [vmem:[%s21241_s9 + $0x18] sm:$0xff]  }
 0xc42   :  { %15021 = vmatpush3.bf16.msra.mxu0 %v19907_v15  ;;  %15035 = vmatpush3.bf16.msra.mxu1 %v19907_v15 }
 0xc43   :  { %v7071_v27 = vadd.f32 %v12875_v34, %v7055_v5  ;;  %v7079_v20 = vmax.f32 %v7070_v50, 0.0  ;;  %v16191_v50 = vld [vmem:[%s21241_s9 + $0x40] sm:$0xff]  }
 0xc45   :  { %v7080_v56 = vmax.f32 %v7071_v27, 0.0  ;;  %v16192_v27 = vld [vmem:[%s21241_s9 + $0x48] sm:$0xff]  }
 0xc46   :  { %v7020_v10 = vpop.f32.mrb[92].mxu1 }
 0xc47   :  { %v19913_v28 = vpack.c.bf16 %v7080_v56, %v7079_v20  ;;  %v7056_v24 = vmul.f32 %v12874_v29, %v7020_v10  ;;  %v15012_v37 = vpop.f32.mrb[93].mxu1 }
 0xc48   :  { %v7023_v49 = vpop.f32.mrb[94].mxu1  ;;  %v16193_v37 = vld [vmem:[%s21241_s9 + $0x50] sm:$0xff]  }
 0xc49   :  { %v7072_v32 = vadd.f32 %v12875_v34, %v7056_v24  ;;  %v7057_v63 = vmul.f32 %v12874_v29, %v7023_v49  ;;  %v15013_v48 = vpop.f32.mrb[95].mxu1  ;;  %15022 = vmatprep.subr.bf16.mxu0 %v19913_v28  ;;  %15036 = vmatprep.subr.bf16.mxu1 %v19913_v28  ;;  %v16194_v49 = vld [vmem:[%s21241_s9 + $0x58] sm:$0xff]  }
 0xc4a   :  { %15023 = vmatpush3.bf16.msra.mxu0 %v19913_v28  ;;  %15037 = vmatpush3.bf16.msra.mxu1 %v19913_v28 }
 0xc4b   :  { %v7073_v0 = vadd.f32 %v12875_v34, %v7057_v63  ;;  %v7081_v1 = vmax.f32 %v7072_v32, 0.0  ;;  %v16195_v32 = vld [vmem:[%s21241_s9 + $0x60] sm:$0xff]   ;;  %v16196_v63 = vld [vmem:[%s21241_s9 + $0x68] sm:$0xff]  }
 0xc4d   :  { %v7082_v47 = vmax.f32 %v7073_v0, 0.0 }
 0xc4e   :  { %v7028_v7 = vpop.f32.mrb[96].mxu1 }
 0xc4f   :  { %v19919_v22 = vpack.c.bf16 %v7082_v47, %v7081_v1  ;;  %v7058_v42 = vmul.f32 %v12874_v29, %v7028_v7  ;;  %v15016_v8 = vpop.f32.mrb[97].mxu1  ;;  %v16174_v29 = vld [vmem:[%s21240_s8 + $0x38] sm:$0xff]   ;;  %v16197_v1 = vld [vmem:[%s21241_s9 + $0x70] sm:$0xff]  }
 0xc50   :  { %v7031_v36 = vpop.f32.mrb[98].mxu1 }
 0xc51   :  { %v7074_v40 = vadd.f32 %v12875_v34, %v7058_v42  ;;  %v15017_v19 = vpop.f32.mrb[99].mxu1  ;;  %15024 = vmatprep.subr.bf16.mxu0 %v19919_v22  ;;  %15038 = vmatprep.subr.bf16.mxu1 %v19919_v22  ;;  %v16176_v34 = vld [vmem:[%s21240_s8 + $0x48] sm:$0xff]   ;;  %v16198_v36 = vld [vmem:[%s21241_s9 + $0x78] sm:$0xff]  }
 0xc52   :  { %15025 = vmatpush3.bf16.msra.mxu0 %v19919_v22  ;;  %15039 = vmatpush3.bf16.msra.mxu1 %v19919_v22  ;;  %v16200_v19 = vld [vmem:[%s21241_s9 + $0x88] sm:$0xff]  }
 0xc53   :  { %v7083_v33 = vmax.f32 %v7074_v40, 0.0  ;;  %v16199_v40 = vld [vmem:[%s21241_s9 + $0x80] sm:$0xff]  }
 0xc55   :  { %v19925_v17 = vpack.c.bf16 %v7083_v33, %v7083_v33  ;;  %v16201_v33 = vld [vmem:[%s21241_s9 + $0x90] sm:$0xff]  }
 0xc57   :  { %15584 = vmatprep.subr.msk.bf16.mxu0 %vm1020_vm1, %v19925_v17  ;;  %15585 = vmatprep.subr.msk.bf16.mxu1 %vm1020_vm1, %v19925_v17  ;;  %v19936_v62 = vsel %vm1020_vm1, %v19925_v17, 0 }
 0xc58   :  { %15027 = vmatpush3.bf16.msra.mxu0 %v19936_v62  ;;  %15041 = vmatpush3.bf16.msra.mxu1 %v19936_v62 }
 0xc59   :  { %15070 = vmatprep.subr.bf16.mxu1 %v19901_v43  ;;  %15046 = vmatprep.subr.bf16.mxu0 %v16183_v3 }
 0xc5b   :  { %15043 = vmatmul.mubr.msk.bf16.vlgmr.msra.gmra.mrb[240].mxu1 %vm7103_vm4, %v16168_v21  ;;  %15029 = vmatmul.mubr.msk.bf16.vlgmr.msra.gmra.mrb[8].mxu0 %vm7103_vm4, %v16170_v41  ;;  %v16202_v41 = vld [vmem:[%s21241_s9 + $0x98] sm:$0xff]  }
 0xc5c   :  { %15071 = vmatpush3.bf16.msra.mxu1 %v19901_v43  ;;  %15080 = vmatprep.mubr.msk.bf16.mxu1 %vm7103_vm4, %v16171_v52 }
 0xc5d   :  { %15072 = vmatprep.subr.bf16.mxu1 %v19907_v15  ;;  %15047 = vmatpush3.bf16.msra.mxu0 %v16183_v3 }
 0xc5e   :  { %15048 = vmatprep.subr.bf16.mxu0 %v16184_v55 }
 0xc60   :  { %15073 = vmatpush3.bf16.msra.mxu1 %v19907_v15 }
 0xc61   :  { %15074 = vmatprep.subr.bf16.mxu1 %v19913_v28  ;;  %15049 = vmatpush3.bf16.msra.mxu0 %v16184_v55 }
 0xc62   :  { %15050 = vmatprep.subr.bf16.mxu0 %v16185_v45 }
 0xc64   :  { %15075 = vmatpush3.bf16.msra.mxu1 %v19913_v28 }
 0xc65   :  { %15076 = vmatprep.subr.bf16.mxu1 %v19919_v22  ;;  %15051 = vmatpush3.bf16.msra.mxu0 %v16185_v45 }
 0xc66   :  { %15052 = vmatprep.subr.bf16.mxu0 %v16186_v13 }
 0xc68   :  { %15077 = vmatpush3.bf16.msra.mxu1 %v19919_v22 }
 0xc69   :  { %15586 = vmatprep.subr.msk.bf16.mxu1 %vm1020_vm1, %v19925_v17  ;;  %15053 = vmatpush3.bf16.msra.mxu0 %v16186_v13 }
 0xc6a   :  { %15058 = vmatprep.subr.bf16.mxu0 %v16187_v39 }
 0xc6c   :  { %15079 = vmatpush3.bf16.msra.mxu1 %v19936_v62 }
 0xc6d   :  { %15096 = vmatprep.subr.bf16.mxu1 %v19901_v43 }
 0xc6f   :  { %15081 = vmatmul.mubr.msk.bf16.vlgmr.msra.gmra.mrb[244].mxu1 %vm7103_vm4, %v16172_v38 }
 0xc70   :  { %15097 = vmatpush3.bf16.msra.mxu1 %v19901_v43  ;;  %15106 = vmatprep.mubr.msk.bf16.mxu1 %vm7103_vm4, %v16173_v12  ;;  %v16203_v12 = vld [vmem:[%s21241_s9 + $0xa0] sm:$0xff]  }
 0xc71   :  { %15098 = vmatprep.subr.bf16.mxu1 %v19907_v15 }
 0xc74   :  { %15099 = vmatpush3.bf16.msra.mxu1 %v19907_v15 }
 0xc75   :  { %15100 = vmatprep.subr.bf16.mxu1 %v19913_v28 }
 0xc78   :  { %15101 = vmatpush3.bf16.msra.mxu1 %v19913_v28 }
 0xc79   :  { %15102 = vmatprep.subr.bf16.mxu1 %v19919_v22 }
 0xc7c   :  { %15103 = vmatpush3.bf16.msra.mxu1 %v19919_v22 }
 0xc7d   :  { %15587 = vmatprep.subr.msk.bf16.mxu1 %vm1020_vm1, %v19925_v17 }
 0xc80   :  { %15105 = vmatpush3.bf16.msra.mxu1 %v19936_v62 }
 0xc81   :  { %15122 = vmatprep.subr.bf16.mxu1 %v19901_v43 }
 0xc83   :  { %15107 = vmatmul.mubr.msk.bf16.vlgmr.msra.gmra.mrb[248].mxu1 %vm7103_vm4, %v16174_v29  ;;  %v16204_v29 = vld [vmem:[%s21241_s9 + $0xa8] sm:$0xff]  }
 0xc84   :  { %15123 = vmatpush3.bf16.msra.mxu1 %v19901_v43  ;;  %15132 = vmatprep.mubr.msk.bf16.mxu1 %vm7103_vm4, %v16175_v16  ;;  %v16205_v16 = vld [vmem:[%s21241_s9 + $0xb0] sm:$0xff]  }
 0xc85   :  { %15124 = vmatprep.subr.bf16.mxu1 %v19907_v15 }
 0xc88   :  { %15125 = vmatpush3.bf16.msra.mxu1 %v19907_v15 }
 0xc89   :  { %15126 = vmatprep.subr.bf16.mxu1 %v19913_v28 }
 0xc8c   :  { %15127 = vmatpush3.bf16.msra.mxu1 %v19913_v28 }
 0xc8d   :  { %15128 = vmatprep.subr.bf16.mxu1 %v19919_v22 }
 0xc90   :  { %15129 = vmatpush3.bf16.msra.mxu1 %v19919_v22 }
 0xc91   :  { %15588 = vmatprep.subr.msk.bf16.mxu1 %vm1020_vm1, %v19925_v17 }
 0xc94   :  { %15131 = vmatpush3.bf16.msra.mxu1 %v19936_v62 }
 0xc95   :  { %15148 = vmatprep.subr.bf16.mxu1 %v19901_v43 }
 0xc97   :  { %15133 = vmatmul.mubr.msk.bf16.vlgmr.msra.gmra.mrb[252].mxu1 %vm7103_vm4, %v16176_v34  ;;  %v16206_v34 = vld [vmem:[%s21241_s9 + $0xb8] sm:$0xff]  }
 0xc98   :  { %15149 = vmatpush3.bf16.msra.mxu1 %v19901_v43  ;;  %15158 = vmatprep.mubr.msk.bf16.mxu1 %vm7103_vm4, %v16177_v57 }
 0xc99   :  { %15150 = vmatprep.subr.bf16.mxu1 %v19907_v15 }
 0xc9c   :  { %15151 = vmatpush3.bf16.msra.mxu1 %v19907_v15 }
 0xc9d   :  { %15152 = vmatprep.subr.bf16.mxu1 %v19913_v28 }
 0xca0   :  { %15153 = vmatpush3.bf16.msra.mxu1 %v19913_v28 }
 0xca1   :  { %15154 = vmatprep.subr.bf16.mxu1 %v19919_v22 }
 0xca4   :  { %15155 = vmatpush3.bf16.msra.mxu1 %v19919_v22 }
 0xca5   :  { %15589 = vmatprep.subr.msk.bf16.mxu1 %vm1020_vm1, %v19925_v17 }
 0xca8   :  { %15157 = vmatpush3.bf16.msra.mxu1 %v19936_v62 }
 0xca9   :  { %15174 = vmatprep.subr.bf16.mxu1 %v19901_v43 }
 0xcab   :  { %15159 = vmatmul.mubr.msk.bf16.vlgmr.msra.gmra.mrb[0].mxu1 %vm7103_vm4, %v16178_v31 }
 0xcac   :  { %15175 = vmatpush3.bf16.msra.mxu1 %v19901_v43  ;;  %15184 = vmatprep.mubr.msk.bf16.mxu1 %vm7103_vm4, %v16179_v11  ;;  %v16207_v11 = vld [vmem:[%s21241_s9 + $0xc0] sm:$0xff]  }
 0xcad   :  { %15176 = vmatprep.subr.bf16.mxu1 %v19907_v15 }
 0xcb0   :  { %15177 = vmatpush3.bf16.msra.mxu1 %v19907_v15 }
 0xcb1   :  { %15178 = vmatprep.subr.bf16.mxu1 %v19913_v28 }
 0xcb4   :  { %15179 = vmatpush3.bf16.msra.mxu1 %v19913_v28 }
 0xcb5   :  { %15180 = vmatprep.subr.bf16.mxu1 %v19919_v22 }
 0xcb8   :  { %15181 = vmatpush3.bf16.msra.mxu1 %v19919_v22 }
 0xcb9   :  { %15590 = vmatprep.subr.msk.bf16.mxu1 %vm1020_vm1, %v19925_v17 }
 0xcbc   :  { %15183 = vmatpush3.bf16.msra.mxu1 %v19936_v62 }
 0xcbd   :  { %15200 = vmatprep.subr.bf16.mxu1 %v19901_v43 }
 0xcbf   :  { %15185 = vmatmul.mubr.msk.bf16.vlgmr.msra.gmra.mrb[4].mxu1 %vm7103_vm4, %v16180_v59 }
 0xcc0   :  { %15201 = vmatpush3.bf16.msra.mxu1 %v19901_v43  ;;  %15210 = vmatprep.mubr.msk.bf16.mxu1 %vm7103_vm4, %v16181_v18 }
 0xcc1   :  { %15202 = vmatprep.subr.bf16.mxu1 %v19907_v15 }
 0xcc4   :  { %15203 = vmatpush3.bf16.msra.mxu1 %v19907_v15 }
 0xcc5   :  { %15204 = vmatprep.subr.bf16.mxu1 %v19913_v28 }
 0xcc8   :  { %15205 = vmatpush3.bf16.msra.mxu1 %v19913_v28 }
 0xcc9   :  { %15206 = vmatprep.subr.bf16.mxu1 %v19919_v22 }
 0xccc   :  { %15207 = vmatpush3.bf16.msra.mxu1 %v19919_v22 }
 0xccd   :  { %15591 = vmatprep.subr.msk.bf16.mxu1 %vm1020_vm1, %v19925_v17 }
 0xcd0   :  { %15209 = vmatpush3.bf16.msra.mxu1 %v19936_v62 }
 0xcd3   :  { %15211 = vmatmul.mubr.msk.bf16.vlgmr.msra.gmra.mrb[8].mxu1 %vm7103_vm4, %v16182_v44  ;;  %v16208_v44 = vld [vmem:[%s21241_s9 + $0xc8] sm:$0xff]  }
 0xcd4   :  { %8738 = vmatprep.mubr.bf16.mxu1 %v21287_v51 }
 0xd2e   :  { %v15044_v2 = vpop.f32.mrb[240].mxu1  ;;  %v15030_v23 = vpop.f32.mrb[8].mxu0 }
 0xd2f   :  { %v7227_v61 = vpop.f32.mrb[241].mxu1  ;;  %v7147_v6 = vpop.f32.mrb[9].mxu0 }
 0xd30   :  { %v15045_v54 = vpop.f32.mrb[242].mxu1  ;;  %v15031_v53 = vpop.f32.mrb[10].mxu0 }
 0xd31   :  { %v7243_v14 = vpack.c.bf16 %v15045_v54, %v15044_v2  ;;  %v7230_v9 = vpop.f32.mrb[243].mxu1  ;;  %v7163_v26 = vpack.c.bf16 %v15031_v53, %v15030_v23  ;;  %v7150_v58 = vpop.f32.mrb[11].mxu0  ;;  %v16209_v2 = vld [vmem:[%s21241_s9 + $0xd0] sm:$0xff]   ;;  %v16210_v23 = vld [vmem:[%s21241_s9 + $0xd8] sm:$0xff]  }
 0xd32   :  { %v7242_v25 = vpack.c.bf16 %v7230_v9, %v7227_v61  ;;  %v7162_v35 = vpack.c.bf16 %v7150_v58, %v7147_v6  ;;  %v16211_v61 = vld [vmem:[%s21241_s9 + $0xe0] sm:$0xff]   ;;  %v16212_v58 = vld [vmem:[%s21241_s9 + $0xe8] sm:$0xff]  }
 0xd34   :  { %15054 = vmatprep.mubr.msk.bf16.mxu0 %vm7277_vm5, %v7242_v25  ;;  %v16213_v25 = vld [vmem:[%s21241_s9 + $0xf0] sm:$0xff]  }
 0xd35   :  { %15055 = vmatmul.mubr.msk.bf16.vlgmr.msra.gmra.mrb[12].mxu0 %vm7277_vm5, %v7243_v14 }
 0xd36   :  { %15059 = vmatpush3.bf16.msra.mxu0 %v16187_v39  ;;  %15066 = vmatprep.mubr.msk.bf16.mxu0 %vm7277_vm5, %v7162_v35  ;;  %v16214_v35 = vld [vmem:[%s21241_s9 + $0xf8] sm:$0xff]  }
 0xd37   :  { %15060 = vmatprep.subr.bf16.mxu0 %v16188_v60 }
 0xd3a   :  { %15061 = vmatpush3.bf16.msra.mxu0 %v16188_v60 }
 0xd3b   :  { %15062 = vmatprep.subr.bf16.mxu0 %v16189_v30 }
 0xd3e   :  { %15063 = vmatpush3.bf16.msra.mxu0 %v16189_v30 }
 0xd3f   :  { %15064 = vmatprep.subr.bf16.mxu0 %v16190_v46 }
 0xd42   :  { %15065 = vmatpush3.bf16.msra.mxu0 %v16190_v46  ;;  %v15082_v5 = vpop.f32.mrb[244].mxu1 }
 0xd43   :  { %15084 = vmatprep.subr.bf16.mxu0 %v16191_v50  ;;  %v7467_v4 = vpop.f32.mrb[245].mxu1 }
 0xd44   :  { %v15083_v20 = vpop.f32.mrb[246].mxu1 }
 0xd45   :  { %15067 = vmatmul.mubr.msk.bf16.vlgmr.msra.gmra.mrb[12].mxu0 %vm7277_vm5, %v7163_v26  ;;  %v7483_v56 = vpack.c.bf16 %v15083_v20, %v15082_v5  ;;  %v7470_v10 = vpop.f32.mrb[247].mxu1  ;;  %v16216_v20 = vld [vmem:[%s21240_s8 + $0x88] sm:$0xff]  }
 0xd46   :  { %15085 = vmatpush3.bf16.msra.mxu0 %v16191_v50  ;;  %v7482_v24 = vpack.c.bf16 %v7470_v10, %v7467_v4 }
 0xd47   :  { %15086 = vmatprep.subr.bf16.mxu0 %v16192_v27 }
 0xd48   :  { %15092 = vmatprep.mubr.msk.bf16.mxu0 %vm7277_vm5, %v7482_v24 }
 0xd4a   :  { %15087 = vmatpush3.bf16.msra.mxu0 %v16192_v27  ;;  %v16215_v27 = vld [vmem:[%s21240_s8 + $0x80] sm:$0xff]  }
 0xd4b   :  { %15088 = vmatprep.subr.bf16.mxu0 %v16193_v37 }
 0xd4e   :  { %15089 = vmatpush3.bf16.msra.mxu0 %v16193_v37 }
 0xd4f   :  { %15090 = vmatprep.subr.bf16.mxu0 %v16194_v49 }
 0xd52   :  { %15091 = vmatpush3.bf16.msra.mxu0 %v16194_v49 }
 0xd53   :  { %15110 = vmatprep.subr.bf16.mxu0 %v16195_v32 }
 0xd55   :  { %15093 = vmatmul.mubr.msk.bf16.vlgmr.msra.gmra.mrb[12].mxu0 %vm7277_vm5, %v7483_v56  ;;  %v16226_v56 = vld [vmem:[%s21244_s12 + $0x84] ss:$16 sps:$4 sm:$0xff]  }
 0xd56   :  { %15111 = vmatpush3.bf16.msra.mxu0 %v16195_v32  ;;  %v15108_v48 = vpop.f32.mrb[248].mxu1  ;;  %8706 = vmatprep.subr.bf16.mxu1 %v16226_v56  ;;  %v16280_v56 = vld [vmem:[%s21244_s12 + $0x24] ss:$16 sps:$4 sm:$0xff]  }
 0xd57   :  { %15112 = vmatprep.subr.bf16.mxu0 %v16196_v63  ;;  %v7631_v0 = vpop.f32.mrb[249].mxu1 }
 0xd58   :  { %v15109_v47 = vpop.f32.mrb[250].mxu1 }
 0xd59   :  { %v7647_v7 = vpack.c.bf16 %v15109_v47, %v15108_v48  ;;  %v7634_v42 = vpop.f32.mrb[251].mxu1  ;;  %v16221_v48 = vld [vmem:[%s21244_s12 + $0x8] ss:$16 sps:$4 sm:$0xff]   ;;  %v16232_v47 = vld [vmem:[%s21244_s12 + $0xa4] ss:$16 sps:$4 sm:$0xff]  }
 0xd5a   :  { %15113 = vmatpush3.bf16.msra.mxu0 %v16196_v63  ;;  %v7646_v8 = vpack.c.bf16 %v7634_v42, %v7631_v0  ;;  %v16229_v0 = vld [vmem:[%s21244_s12 + $0x2c] ss:$16 sps:$4 sm:$0xff]  }
 0xd5b   :  { %15114 = vmatprep.subr.bf16.mxu0 %v16197_v1  ;;  %v16235_v42 = vld [vmem:[%s21244_s12 + $0x4c] ss:$16 sps:$4 sm:$0xff]  }
 0xd5c   :  { %15118 = vmatprep.mubr.msk.bf16.mxu0 %vm7277_vm5, %v7646_v8  ;;  %v16233_v8 = vld [vmem:[%s21244_s12 + $0x48] ss:$16 sps:$4 sm:$0xff]  }
 0xd5e   :  { %15115 = vmatpush3.bf16.msra.mxu0 %v16197_v1  ;;  %v16227_v1 = vld [vmem:[%s21244_s12 + $0x28] ss:$16 sps:$4 sm:$0xff]  }
 0xd5f   :  { %15116 = vmatprep.subr.bf16.mxu0 %v16198_v36 }
 0xd62   :  { %15117 = vmatpush3.bf16.msra.mxu0 %v16198_v36  ;;  %v16238_v36 = vld [vmem:[%s21244_s12 + $0xc4] ss:$16 sps:$4 sm:$0xff]  }
 0xd63   :  { %15136 = vmatprep.subr.bf16.mxu0 %v16199_v40 }
 0xd65   :  { %15119 = vmatmul.mubr.msk.bf16.vlgmr.msra.gmra.mrb[12].mxu0 %vm7277_vm5, %v7647_v7  ;;  %v16230_v7 = vld [vmem:[%s21244_s12 + $0xa0] ss:$16 sps:$4 sm:$0xff]  }
 0xd66   :  { %15137 = vmatpush3.bf16.msra.mxu0 %v16199_v40  ;;  %v16236_v40 = vld [vmem:[%s21244_s12 + $0xc0] ss:$16 sps:$4 sm:$0xff]  }
 0xd67   :  { %15138 = vmatprep.subr.bf16.mxu0 %v16200_v19 }
 0xd6a   :  { %15139 = vmatpush3.bf16.msra.mxu0 %v16200_v19  ;;  %v15134_v3 = vpop.f32.mrb[252].mxu1  ;;  %v16241_v19 = vld [vmem:[%s21244_s12 + $0x6c] ss:$16 sps:$4 sm:$0xff]  }
 0xd6b   :  { %15140 = vmatprep.subr.bf16.mxu0 %v16201_v33  ;;  %v7795_v21 = vpop.f32.mrb[253].mxu1 }
 0xd6c   :  { %v15135_v52 = vpop.f32.mrb[254].mxu1 }
 0xd6d   :  { %v7811_v55 = vpack.c.bf16 %v15135_v52, %v15134_v3  ;;  %v7798_v45 = vpop.f32.mrb[255].mxu1  ;;  %v16244_v3 = vld [vmem:[%s21244_s12 + $0xe4] ss:$16 sps:$4 sm:$0xff]   ;;  %v16250_v52 = vld [vmem:[%s21244_s12 + $0x8c] ss:$16 sps:$4 sm:$0xff]  }
 0xd6e   :  { %15141 = vmatpush3.bf16.msra.mxu0 %v16201_v33  ;;  %v7810_v38 = vpack.c.bf16 %v7798_v45, %v7795_v21  ;;  %v16239_v33 = vld [vmem:[%s21244_s12 + $0x68] ss:$16 sps:$4 sm:$0xff]   ;;  %v16242_v21 = vld [vmem:[%s21244_s12 + $0xe0] ss:$16 sps:$4 sm:$0xff]  }
 0xd6f   :  { %15142 = vmatprep.subr.bf16.mxu0 %v16202_v41 }
 0xd70   :  { %15144 = vmatprep.mubr.msk.bf16.mxu0 %vm7277_vm5, %v7810_v38  ;;  %v13063_v38 = vld [vmem:[%s21243_s11] ss:$0 sm:$0xff] }
 0xd72   :  { %15143 = vmatpush3.bf16.msra.mxu0 %v16202_v41  ;;  %v16247_v41 = vld [vmem:[%s21244_s12 + $0x10c] ss:$16 sps:$4 sm:$0xff]  }
 0xd73   :  { %15162 = vmatprep.subr.bf16.mxu0 %v16203_v12 }
 0xd75   :  { %15145 = vmatmul.mubr.msk.bf16.vlgmr.msra.gmra.mrb[12].mxu0 %vm7277_vm5, %v7811_v55  ;;  %v13062_v55 = vld [vmem:[%s21242_s10] ss:$0 sm:$0xff] }
 0xd76   :  { %15163 = vmatpush3.bf16.msra.mxu0 %v16203_v12 }
 0xd77   :  { %15164 = vmatprep.subr.bf16.mxu0 %v16204_v29 }
 0xd7a   :  { %15165 = vmatpush3.bf16.msra.mxu0 %v16204_v29 }
 0xd7b   :  { %15166 = vmatprep.subr.bf16.mxu0 %v16205_v16 }
 0xd7e   :  { %v15160_v57 = vpop.f32.mrb[0].mxu1  ;;  %15167 = vmatpush3.bf16.msra.mxu0 %v16205_v16 }
 0xd7f   :  { %v7959_v31 = vpop.f32.mrb[1].mxu1  ;;  %15168 = vmatprep.subr.bf16.mxu0 %v16206_v34 }
 0xd80   :  { %v15161_v13 = vpop.f32.mrb[2].mxu1 }
 0xd81   :  { %v7975_v39 = vpack.c.bf16 %v15161_v13, %v15160_v57  ;;  %v7962_v59 = vpop.f32.mrb[3].mxu1 }
 0xd82   :  { %v7974_v18 = vpack.c.bf16 %v7962_v59, %v7959_v31  ;;  %15169 = vmatpush3.bf16.msra.mxu0 %v16206_v34 }
 0xd83   :  { %15188 = vmatprep.subr.bf16.mxu0 %v16207_v11 }
 0xd84   :  { %15170 = vmatprep.mubr.msk.bf16.mxu0 %vm7277_vm5, %v7974_v18 }
 0xd85   :  { %15171 = vmatmul.mubr.msk.bf16.vlgmr.msra.gmra.mrb[12].mxu0 %vm7277_vm5, %v7975_v39 }
 0xd86   :  { %15189 = vmatpush3.bf16.msra.mxu0 %v16207_v11 }
 0xd87   :  { %15190 = vmatprep.subr.bf16.mxu0 %v16208_v44 }
 0xd8a   :  { %15191 = vmatpush3.bf16.msra.mxu0 %v16208_v44 }
 0xd8b   :  { %15192 = vmatprep.subr.bf16.mxu0 %v16209_v2 }
 0xd8e   :  { %15193 = vmatpush3.bf16.msra.mxu0 %v16209_v2 }
 0xd8f   :  { %15194 = vmatprep.subr.bf16.mxu0 %v16210_v23 }
 0xd92   :  { %v15186_v6 = vpop.f32.mrb[4].mxu1  ;;  %15195 = vmatpush3.bf16.msra.mxu0 %v16210_v23 }
 0xd93   :  { %v8123_v54 = vpop.f32.mrb[5].mxu1  ;;  %15214 = vmatprep.subr.bf16.mxu0 %v16211_v61 }
 0xd94   :  { %v15187_v53 = vpop.f32.mrb[6].mxu1 }
 0xd95   :  { %v8139_v14 = vpack.c.bf16 %v15187_v53, %v15186_v6  ;;  %v8126_v9 = vpop.f32.mrb[7].mxu1 }
 0xd96   :  { %v8138_v26 = vpack.c.bf16 %v8126_v9, %v8123_v54  ;;  %v16245_v54 = vld [vmem:[%s21244_s12 + $0x108] ss:$16 sps:$4 sm:$0xff]  }
 0xd97   :  { %v16248_v9 = vld [vmem:[%s21244_s12 + $0x88] ss:$16 sps:$4 sm:$0xff]  }
 0xd98   :  { %15196 = vmatprep.mubr.msk.bf16.mxu0 %vm7277_vm5, %v8138_v26 }
 0xd99   :  { %15197 = vmatmul.mubr.msk.bf16.vlgmr.msra.gmra.mrb[12].mxu0 %vm7277_vm5, %v8139_v14  ;;  %v16253_v14 = vld [vmem:[%s21244_s12 + $0x12c] ss:$16 sps:$4 sm:$0xff]  }
 0xd9a   :  { %15215 = vmatpush3.bf16.msra.mxu0 %v16211_v61 }
 0xd9b   :  { %15216 = vmatprep.subr.bf16.mxu0 %v16212_v58 }
 0xd9e   :  { %15217 = vmatpush3.bf16.msra.mxu0 %v16212_v58  ;;  %v16256_v58 = vld [vmem:[%s21244_s12 + $0xac] ss:$16 sps:$4 sm:$0xff]  }
 0xd9f   :  { %15218 = vmatprep.subr.bf16.mxu0 %v16213_v25 }
 0xda2   :  { %15219 = vmatpush3.bf16.msra.mxu0 %v16213_v25  ;;  %v16251_v25 = vld [vmem:[%s21244_s12 + $0x128] ss:$16 sps:$4 sm:$0xff]  }
 0xda3   :  { %15220 = vmatprep.subr.bf16.mxu0 %v16214_v35 }
 0xda6   :  { %15221 = vmatpush3.bf16.msra.mxu0 %v16214_v35  ;;  %v15212_v60 = vpop.f32.mrb[8].mxu1  ;;  %v16259_v35 = vld [vmem:[%s21244_s12 + $0x14c] ss:$16 sps:$4 sm:$0xff]  }
 0xda7   :  { %15226 = vmatprep.subr.bf16.mxu0 %v19901_v43  ;;  %v8287_v30 = vpop.f32.mrb[9].mxu1 }
 0xda8   :  { %v15213_v46 = vpop.f32.mrb[10].mxu1 }
 0xda9   :  { %v8303_v50 = vpack.c.bf16 %v15213_v46, %v15212_v60  ;;  %v8290_v5 = vpop.f32.mrb[11].mxu1  ;;  %v16254_v60 = vld [vmem:[%s21244_s12 + $0xa8] ss:$16 sps:$4 sm:$0xff]  }
 0xdaa   :  { %v8302_v4 = vpack.c.bf16 %v8290_v5, %v8287_v30  ;;  %v16262_v30 = vld [vmem:[%s21244_s12 + $0xcc] ss:$16 sps:$4 sm:$0xff]   ;;  %v16257_v46 = vld [vmem:[%s21244_s12 + $0x148] ss:$16 sps:$4 sm:$0xff]  }
 0xdab   :  { %v16260_v5 = vld [vmem:[%s21244_s12 + $0xc8] ss:$16 sps:$4 sm:$0xff]  }
 0xdac   :  { %15222 = vmatprep.mubr.msk.bf16.mxu0 %vm7277_vm5, %v8302_v4  ;;  %v16268_v4 = vld [vmem:[%s21244_s12 + $0xec] ss:$16 sps:$4 sm:$0xff]  }
 0xdad   :  { %15223 = vmatmul.mubr.msk.bf16.vlgmr.msra.gmra.mrb[12].mxu0 %vm7277_vm5, %v8303_v50  ;;  %v16265_v50 = vld [vmem:[%s21244_s12 + $0x16c] ss:$16 sps:$4 sm:$0xff]  }
 0xdae   :  { %15227 = vmatpush3.bf16.msra.mxu0 %v19901_v43  ;;  %15236 = vmatprep.mubr.msk.bf16.mxu0 %vm7103_vm4, %v16215_v27  ;;  %v16217_v43 = vld [vmem:[%s21241_s9 + $0x100] sm:$0xff]   ;;  %v16263_v27 = vld [vmem:[%s21244_s12 + $0x168] ss:$16 sps:$4 sm:$0xff]  }
 0xdaf   :  { %15228 = vmatprep.subr.bf16.mxu0 %v19907_v15 }
 0xdb2   :  { %15229 = vmatpush3.bf16.msra.mxu0 %v19907_v15  ;;  %v16218_v15 = vld [vmem:[%s21241_s9 + $0x108] sm:$0xff]  }
 0xdb3   :  { %15230 = vmatprep.subr.bf16.mxu0 %v19913_v28 }
 0xdb6   :  { %15231 = vmatpush3.bf16.msra.mxu0 %v19913_v28  ;;  %v16219_v28 = vld [vmem:[%s21241_s9 + $0x110] sm:$0xff]  }
 0xdb7   :  { %15232 = vmatprep.subr.bf16.mxu0 %v19919_v22 }
 0xdba   :  { %15233 = vmatpush3.bf16.msra.mxu0 %v19919_v22  ;;  %v16220_v22 = vld [vmem:[%s21241_s9 + $0x118] sm:$0xff]  }
 0xdbb   :  { %15592 = vmatprep.subr.msk.bf16.mxu0 %vm1020_vm1, %v19925_v17  ;;  %v16223_v17 = vld [vmem:[%s21244_s12 + $0xc] ss:$16 sps:$4 sm:$0xff]  }
 0xdbe   :  { %15235 = vmatpush3.bf16.msra.mxu0 %v19936_v62  ;;  %v16224_v62 = vld [vmem:[%s21244_s12 + $0x80] ss:$16 sps:$4 sm:$0xff]  }
 0xdbf   :  { %15240 = vmatprep.subr.bf16.mxu0 %v16217_v43  ;;  %8707 = vmatpush1.bf16.msra.mxu1 %v16224_v62  ;;  %v16272_v62 = vld [vmem:[%s21244_s12] ss:$16 sps:$4 sm:$0xff]  }
 0xdc0   :  { %8708 = vmatprep.subr.bf16.mxu1 %v16232_v47  ;;  %v16295_v47 = vld [vmem:[%s21244_s12 + $0x20c] ss:$16 sps:$4 sm:$0xff]  }
 0xdc1   :  { %15237 = vmatmul.mubr.msk.bf16.vlgmr.msra.gmra.mrb[16].mxu0 %vm7103_vm4, %v16216_v20  ;;  %v16266_v20 = vld [vmem:[%s21244_s12 + $0xe8] ss:$16 sps:$4 sm:$0xff]  }
 0xdc2   :  { %15241 = vmatpush3.bf16.msra.mxu0 %v16217_v43  ;;  %v16271_v43 = vld [vmem:[%s21244_s12 + $0x18c] ss:$16 sps:$4 sm:$0xff]  }
 0xdc3   :  { %15242 = vmatprep.subr.bf16.mxu0 %v16218_v15  ;;  %8709 = vmatpush1.bf16.msra.mxu1 %v16230_v7  ;;  %v16290_v7 = vld [vmem:[%s21244_s12 + $0x60] ss:$16 sps:$4 sm:$0xff]  }
 0xdc4   :  { %8710 = vmatprep.subr.bf16.mxu1 %v16238_v36 }
 0xdc6   :  { %15243 = vmatpush3.bf16.msra.mxu0 %v16218_v15  ;;  %v16274_v15 = vld [vmem:[%s21244_s12 + $0x4] ss:$16 sps:$4 sm:$0xff]  }
 0xdc7   :  { %15244 = vmatprep.subr.bf16.mxu0 %v16219_v28  ;;  %8711 = vmatpush1.bf16.msra.mxu1 %v16236_v40  ;;  %v16301_v40 = vld [vmem:[%s21244_s12 + $0x22c] ss:$16 sps:$4 sm:$0xff]  }
 0xdc8   :  { %8712 = vmatprep.subr.bf16.mxu1 %v16244_v3  ;;  %v16299_v3 = vld [vmem:[%s21244_s12 + $0x228] ss:$16 sps:$4 sm:$0xff]  }
 0xdca   :  { %15245 = vmatpush3.bf16.msra.mxu0 %v16219_v28  ;;  %v16269_v28 = vld [vmem:[%s21244_s12 + $0x188] ss:$16 sps:$4 sm:$0xff]  }
 0xdcb   :  { %15246 = vmatprep.subr.bf16.mxu0 %v16220_v22  ;;  %8713 = vmatpush1.bf16.msra.mxu1 %v16242_v21  ;;  %v16307_v21 = vld [vmem:[%s21244_s12 + $0x24c] ss:$16 sps:$4 sm:$0xff]  }
 0xdcc   :  { %8747 = vmatprep.subr.bf16.mxu1 %v16250_v52  ;;  %v16310_v52 = vld [vmem:[%s21244_s12 + $0x144] ss:$16 sps:$4 sm:$0xff]  }
 0xdce   :  { %15247 = vmatpush3.bf16.msra.mxu0 %v16220_v22 }
 0xdcf   :  { %8912 = vmatprep.subr.bf16.mxu0 %v16223_v17  ;;  %v16277_v17 = vld [vmem:[%s21244_s12 + $0x1ac] ss:$16 sps:$4 sm:$0xff]  }
 0xe94   :  { %v15238_v10 = vpop.f32.mrb[16].mxu0 }
 0xe95   :  { %v8451_v24 = vpop.f32.mrb[17].mxu0 }
 0xe96   :  { %v15239_v37 = vpop.f32.mrb[18].mxu0 }
 0xe97   :  { %v8467_v49 = vpack.c.bf16 %v15239_v37, %v15238_v10  ;;  %v8454_v32 = vpop.f32.mrb[19].mxu0  ;;  %v16275_v10 = vld [vmem:[%s21244_s12 + $0x1a8] ss:$16 sps:$4 sm:$0xff]   ;;  %v16278_v37 = vld [vmem:[%s21244_s12 + $0x20] ss:$16 sps:$4 sm:$0xff]  }
 0xe98   :  { %v8466_v63 = vpack.c.bf16 %v8454_v32, %v8451_v24  ;;  %v16283_v24 = vld [vmem:[%s21244_s12 + $0x1cc] ss:$16 sps:$4 sm:$0xff]   ;;  %v16281_v32 = vld [vmem:[%s21244_s12 + $0x1c8] ss:$16 sps:$4 sm:$0xff]  }
 0xe9a   :  { %15248 = vmatprep.mubr.msk.bf16.mxu0 %vm7277_vm5, %v8466_v63  ;;  %v16289_v63 = vld [vmem:[%s21244_s12 + $0x1ec] ss:$16 sps:$4 sm:$0xff]  }
 0xe9b   :  { %15249 = vmatmul.mubr.msk.bf16.vlgmr.msra.gmra.mrb[12].mxu0 %vm7277_vm5, %v8467_v49  ;;  %v16286_v49 = vld [vmem:[%s21244_s12 + $0x44] ss:$16 sps:$4 sm:$0xff]  }
 0xe9c   :  { %8913 = vmatpush1.bf16.msra.mxu0 %v16221_v48  ;;  %8944 = vmatprep.mubr.bf16.mxu0 %v21287_v51  ;;  %v16284_v48 = vld [vmem:[%s21244_s12 + $0x40] ss:$16 sps:$4 sm:$0xff]  }
 0xe9d   :  { %8914 = vmatprep.subr.bf16.mxu0 %v16229_v0  ;;  %v16292_v0 = vld [vmem:[%s21244_s12 + $0x64] ss:$16 sps:$4 sm:$0xff]  }
 0xea0   :  { %8915 = vmatpush1.bf16.msra.mxu0 %v16227_v1  ;;  %v16287_v1 = vld [vmem:[%s21244_s12 + $0x1e8] ss:$16 sps:$4 sm:$0xff]  }
 0xea1   :  { %8916 = vmatprep.subr.bf16.mxu0 %v16235_v42  ;;  %v16298_v42 = vld [vmem:[%s21244_s12 + $0x104] ss:$16 sps:$4 sm:$0xff]  }
 0xea4   :  { %8917 = vmatpush1.bf16.msra.mxu0 %v16233_v8  ;;  %v16293_v8 = vld [vmem:[%s21244_s12 + $0x208] ss:$16 sps:$4 sm:$0xff]  }
 0xea5   :  { %8918 = vmatprep.subr.bf16.mxu0 %v16241_v19  ;;  %v16296_v19 = vld [vmem:[%s21244_s12 + $0x100] ss:$16 sps:$4 sm:$0xff]  }
 0xea8   :  { %8919 = vmatpush1.bf16.msra.mxu0 %v16239_v33  ;;  %v16304_v33 = vld [vmem:[%s21244_s12 + $0x124] ss:$16 sps:$4 sm:$0xff]  }
 0xea9   :  { %9095 = vmatprep.subr.bf16.mxu0 %v16247_v41  ;;  %v16302_v41 = vld [vmem:[%s21244_s12 + $0x120] ss:$16 sps:$4 sm:$0xff]  }
 0xf6e   :  { %v15250_v45 = vpop.f32.mrb[12].mxu0 }
 0xf6f   :  { %v8569_v12 = vmul.f32 %v15250_v45, %v13062_v55  ;;  %v8541_v29 = vpop.f32.mrb[13].mxu0  ;;  %v16313_v45 = vld [vmem:[%s21244_s12 + $0x26c] ss:$16 sps:$4 sm:$0xff]  }
 0xf70   :  { %v8567_v16 = vmul.f32 %v13062_v55, %v8541_v29  ;;  %v15251_v34 = vpop.f32.mrb[14].mxu0  ;;  %v16311_v29 = vld [vmem:[%s21244_s12 + $0x268] ss:$16 sps:$4 sm:$0xff]  }
 0xf71   :  { %v8580_v57 = vadd.f32 %v13063_v38, %v8569_v12  ;;  %v8570_v31 = vmul.f32 %v15251_v34, %v13062_v55  ;;  %v8544_v11 = vpop.f32.mrb[15].mxu0  ;;  %v16316_v12 = vld [vmem:[%s21244_s12 + $0x164] ss:$16 sps:$4 sm:$0xff]   ;;  %v16314_v34 = vld [vmem:[%s21244_s12 + $0x160] ss:$16 sps:$4 sm:$0xff]  }
 0xf72   :  { %v8578_v13 = vadd.f32 %v13063_v38, %v8567_v16  ;;  %v8568_v39 = vmul.f32 %v13062_v55, %v8544_v11  ;;  %v16305_v55 = vld [vmem:[%s21244_s12 + $0x248] ss:$16 sps:$4 sm:$0xff]   ;;  %v16319_v16 = vld [vmem:[%s21244_s12 + $0x28c] ss:$16 sps:$4 sm:$0xff]  }
 0xf73   :  { %v8581_v59 = vadd.f32 %v13063_v38, %v8570_v31  ;;  %v8584_v44 = vmax.f32 %v8580_v57, 0.0  ;;  %v16322_v57 = vld [vmem:[%s21244_s12 + $0x184] ss:$16 sps:$4 sm:$0xff]   ;;  %v16317_v31 = vld [vmem:[%s21244_s12 + $0x288] ss:$16 sps:$4 sm:$0xff]  }
 0xf74   :  { %v8579_v18 = vadd.f32 %v13063_v38, %v8568_v39  ;;  %v8582_v23 = vmax.f32 %v8578_v13, 0.0  ;;  %v16308_v38 = vld [vmem:[%s21244_s12 + $0x140] ss:$16 sps:$4 sm:$0xff]   ;;  %v16325_v13 = vld [vmem:[%s21244_s12 + $0x2ac] ss:$16 sps:$4 sm:$0xff]  }
 0xf75   :  { %v8585_v2 = vmax.f32 %v8581_v59, 0.0  ;;  %v16320_v39 = vld [vmem:[%s21244_s12 + $0x180] ss:$16 sps:$4 sm:$0xff]   ;;  %v16328_v59 = vld [vmem:[%s21244_s12 + $0x1a4] ss:$16 sps:$4 sm:$0xff]  }
 0xf76   :  { %v8583_v61 = vmax.f32 %v8579_v18, 0.0  ;;  %v16323_v18 = vld [vmem:[%s21244_s12 + $0x2a8] ss:$16 sps:$4 sm:$0xff]  }
 0xf77   :  { %v20266_v6 = vpack.c.bf16 %v8585_v2, %v8584_v44  ;;  %v16331_v44 = vld [vmem:[%s21244_s12 + $0x2cc] ss:$16 sps:$4 sm:$0xff]   ;;  %v16326_v2 = vld [vmem:[%s21244_s12 + $0x1a0] ss:$16 sps:$4 sm:$0xff]  }
 0xf78   :  { %v20271_v53 = vpack.c.bf16 %v8583_v61, %v8582_v23  ;;  %v16334_v23 = vld [vmem:[%s21244_s12 + $0x1c4] ss:$16 sps:$4 sm:$0xff]   ;;  %v16329_v61 = vld [vmem:[%s21244_s12 + $0x2c8] ss:$16 sps:$4 sm:$0xff]  }
 0xf7a   :  { %13115 = vmatmul.mubr.msk.bf16.vlgmr.msra.gmra.mrb[20].mxu0 %vm7277_vm5, %v20271_v53  ;;  %v8622_v26 = vrot.slane %v20271_v53, 1  ;;  %v8970_v22 = vrot.slane %v20271_v53, 2  ;;  %v9157_v36 = vrot.slane %v20271_v53, 3  ;;  %v9344_v11 = vrot.slane %v20271_v53, 4 }
 0xf7b   :  { %9096 = vmatpush1.bf16.msra.mxu0 %v16245_v54  ;;  %9127 = vmatprep.mubr.bf16.mxu0 %v21287_v51  ;;  %v16337_v54 = vld [vmem:[%s21244_s12 + $0x2ec] ss:$16 sps:$4 sm:$0xff]  }
 0xf7c   :  { %13096 = vmatmul.mubr.msk.bf16.vlgmr.msra.gmra.mrb[12].mxu1 %vm7277_vm5, %v8622_v26  ;;  %9097 = vmatprep.subr.bf16.mxu0 %v16253_v14  ;;  %v16332_v14 = vld [vmem:[%s21244_s12 + $0x1c0] ss:$16 sps:$4 sm:$0xff]  }
 0xf7d   :  { %8748 = vmatpush1.bf16.msra.mxu1 %v16248_v9  ;;  %8779 = vmatprep.mubr.bf16.mxu1 %v21287_v51  ;;  %v16340_v9 = vld [vmem:[%s21244_s12 + $0x1e4] ss:$16 sps:$4 sm:$0xff]  }
 0xf7e   :  { %8749 = vmatprep.subr.bf16.mxu1 %v16256_v58  ;;  %v16343_v58 = vld [vmem:[%s21244_s12 + $0x30c] ss:$16 sps:$4 sm:$0xff]  }
 0xf7f   :  { %9098 = vmatpush1.bf16.msra.mxu0 %v16251_v25  ;;  %v16338_v25 = vld [vmem:[%s21244_s12 + $0x1e0] ss:$16 sps:$4 sm:$0xff]  }
 0xf80   :  { %9099 = vmatprep.subr.bf16.mxu0 %v16259_v35  ;;  %v16346_v35 = vld [vmem:[%s21244_s12 + $0x204] ss:$16 sps:$4 sm:$0xff]  }
 0xf81   :  { %8750 = vmatpush1.bf16.msra.mxu1 %v16254_v60  ;;  %v16341_v60 = vld [vmem:[%s21244_s12 + $0x308] ss:$16 sps:$4 sm:$0xff]  }
 0xf82   :  { %8751 = vmatprep.subr.bf16.mxu1 %v16262_v30  ;;  %v9531_v30 = vrot.slane %v20271_v53, 5 }
 0xf83   :  { %9100 = vmatpush1.bf16.msra.mxu0 %v16257_v46  ;;  %v16349_v46 = vld [vmem:[%s21244_s12 + $0x32c] ss:$16 sps:$4 sm:$0xff]  }
 0xf84   :  { %9101 = vmatprep.subr.bf16.mxu0 %v16265_v50  ;;  %v16344_v50 = vld [vmem:[%s21244_s12 + $0x200] ss:$16 sps:$4 sm:$0xff]  }
 0xf85   :  { %8752 = vmatpush1.bf16.msra.mxu1 %v16260_v5  ;;  %v16352_v5 = vld [vmem:[%s21244_s12 + $0x224] ss:$16 sps:$4 sm:$0xff]  }
 0xf86   :  { %8753 = vmatprep.subr.bf16.mxu1 %v16268_v4  ;;  %v16347_v4 = vld [vmem:[%s21244_s12 + $0x328] ss:$16 sps:$4 sm:$0xff]  }
 0xf87   :  { %9102 = vmatpush1.bf16.msra.mxu0 %v16263_v27  ;;  %v16355_v27 = vld [vmem:[%s21244_s12 + $0x34c] ss:$16 sps:$4 sm:$0xff]  }
 0xf88   :  { %9282 = vmatprep.subr.bf16.mxu0 %v16271_v43  ;;  %v16350_v43 = vld [vmem:[%s21244_s12 + $0x220] ss:$16 sps:$4 sm:$0xff]  }
 0xf89   :  { %8754 = vmatpush1.bf16.msra.mxu1 %v16266_v20  ;;  %v16358_v20 = vld [vmem:[%s21244_s12 + $0x244] ss:$16 sps:$4 sm:$0xff]  }
 0xf8a   :  { %13149 = vmatmul.mubr.msk.bf16.vlgmr.msra.gmra.mrb[24].mxu0 %vm7277_vm5, %v8970_v22  ;;  %8871 = vmatprep.subr.bf16.mxu1 %v16274_v15  ;;  %v16353_v15 = vld [vmem:[%s21244_s12 + $0x348] ss:$16 sps:$4 sm:$0xff]  }
 0xf8b   :  { %9283 = vmatpush1.bf16.msra.mxu0 %v16269_v28  ;;  %9314 = vmatprep.mubr.bf16.mxu0 %v21287_v51  ;;  %v16361_v28 = vld [vmem:[%s21244_s12 + $0x36c] ss:$16 sps:$4 sm:$0xff]  }
 0xf8c   :  { %13097 = vmatmul.mubr.msk.bf16.vlgmr.msra.gmra.mrb[16].mxu1 %vm7277_vm5, %v8622_v26  ;;  %9284 = vmatprep.subr.bf16.mxu0 %v16277_v17  ;;  %v16335_v26 = vld [vmem:[%s21244_s12 + $0x2e8] ss:$16 sps:$4 sm:$0xff]   ;;  %v16364_v17 = vld [vmem:[%s21244_s12 + $0x264] ss:$16 sps:$4 sm:$0xff]  }
 0xf8d   :  { %8872 = vmatpush1.bf16.msra.mxu1 %v16272_v62  ;;  %8903 = vmatprep.mubr.bf16.mxu1 %v21287_v51  ;;  %v16359_v62 = vld [vmem:[%s21244_s12 + $0x368] ss:$16 sps:$4 sm:$0xff]  }
 0xf8e   :  { %8873 = vmatprep.subr.bf16.mxu1 %v16280_v56  ;;  %v16367_v56 = vld [vmem:[%s21244_s12 + $0x38c] ss:$16 sps:$4 sm:$0xff]  }
 0xf8f   :  { %9285 = vmatpush1.bf16.msra.mxu0 %v16275_v10  ;;  %v16362_v10 = vld [vmem:[%s21244_s12 + $0x260] ss:$16 sps:$4 sm:$0xff]  }
 0xf90   :  { %9286 = vmatprep.subr.bf16.mxu0 %v16283_v24  ;;  %v16370_v24 = vld [vmem:[%s21244_s12 + $0x284] ss:$16 sps:$4 sm:$0xff]  }
 0xf91   :  { %8874 = vmatpush1.bf16.msra.mxu1 %v16278_v37  ;;  %v16365_v37 = vld [vmem:[%s21244_s12 + $0x388] ss:$16 sps:$4 sm:$0xff]  }
 0xf92   :  { %8875 = vmatprep.subr.bf16.mxu1 %v16286_v49  ;;  %v9718_v49 = vrot.slane %v20271_v53, 6 }
 0xf93   :  { %9287 = vmatpush1.bf16.msra.mxu0 %v16281_v32  ;;  %v16373_v32 = vld [vmem:[%s21244_s12 + $0x3ac] ss:$16 sps:$4 sm:$0xff]  }
 0xf94   :  { %9288 = vmatprep.subr.bf16.mxu0 %v16289_v63  ;;  %v16368_v63 = vld [vmem:[%s21244_s12 + $0x280] ss:$16 sps:$4 sm:$0xff]  }
 0xf95   :  { %8876 = vmatpush1.bf16.msra.mxu1 %v16284_v48  ;;  %v16376_v48 = vld [vmem:[%s21244_s12 + $0x2a4] ss:$16 sps:$4 sm:$0xff]  }
 0xf96   :  { %8877 = vmatprep.subr.bf16.mxu1 %v16292_v0  ;;  %v16371_v0 = vld [vmem:[%s21244_s12 + $0x3a8] ss:$16 sps:$4 sm:$0xff]  }
 0xf97   :  { %9289 = vmatpush1.bf16.msra.mxu0 %v16287_v1  ;;  %v16379_v1 = vld [vmem:[%s21244_s12 + $0x3cc] ss:$16 sps:$4 sm:$0xff]  }
 0xf98   :  { %9469 = vmatprep.subr.bf16.mxu0 %v16295_v47  ;;  %v16374_v47 = vld [vmem:[%s21244_s12 + $0x2a0] ss:$16 sps:$4 sm:$0xff]  }
 0xf99   :  { %8878 = vmatpush1.bf16.msra.mxu1 %v16290_v7  ;;  %v16382_v7 = vld [vmem:[%s21244_s12 + $0x2c4] ss:$16 sps:$4 sm:$0xff]  }
 0xf9a   :  { %13183 = vmatmul.mubr.msk.bf16.vlgmr.msra.gmra.mrb[28].mxu0 %vm7277_vm5, %v9157_v36  ;;  %9054 = vmatprep.subr.bf16.mxu1 %v16298_v42  ;;  %v16377_v42 = vld [vmem:[%s21244_s12 + $0x3c8] ss:$16 sps:$4 sm:$0xff]  }
 0xf9b   :  { %9470 = vmatpush1.bf16.msra.mxu0 %v16293_v8  ;;  %9501 = vmatprep.mubr.bf16.mxu0 %v21287_v51  ;;  %v16385_v8 = vld [vmem:[%s21244_s12 + $0x3ec] ss:$16 sps:$4 sm:$0xff]  }
 0xf9c   :  { %13114 = vmatmul.mubr.msk.bf16.vlgmr.msra.gmra.mrb[20].mxu1 %vm7277_vm5, %v20271_v53  ;;  %9471 = vmatprep.subr.bf16.mxu0 %v16301_v40  ;;  %v16388_v40 = vld [vmem:[%s21244_s12 + $0x2e4] ss:$16 sps:$4 sm:$0xff]  }
 0xf9d   :  { %9055 = vmatpush1.bf16.msra.mxu1 %v16296_v19  ;;  %9086 = vmatprep.mubr.bf16.mxu1 %v21287_v51  ;;  %v16383_v19 = vld [vmem:[%s21244_s12 + $0x3e8] ss:$16 sps:$4 sm:$0xff]  }
 0xf9e   :  { %9056 = vmatprep.subr.bf16.mxu1 %v16304_v33  ;;  %v16391_v33 = vld [vmem:[%s21244_s12 + $0x40c] ss:$16 sps:$4 sm:$0xff]  }
 0xf9f   :  { %9472 = vmatpush1.bf16.msra.mxu0 %v16299_v3  ;;  %v16386_v3 = vld [vmem:[%s21244_s12 + $0x2e0] ss:$16 sps:$4 sm:$0xff]  }
 0xfa0   :  { %9473 = vmatprep.subr.bf16.mxu0 %v16307_v21  ;;  %v16394_v21 = vld [vmem:[%s21244_s12 + $0x304] ss:$16 sps:$4 sm:$0xff]  }
 0xfa1   :  { %9057 = vmatpush1.bf16.msra.mxu1 %v16302_v41  ;;  %v16389_v41 = vld [vmem:[%s21244_s12 + $0x408] ss:$16 sps:$4 sm:$0xff]  }
 0xfa2   :  { %9058 = vmatprep.subr.bf16.mxu1 %v16310_v52  ;;  %v9905_v52 = vrot.slane %v20271_v53, 7  ;;  %v16449_v53 = vld [vmem:[%s21244_s12 + $0x548] ss:$16 sps:$4 sm:$0xff]  }
 0xfa3   :  { %9474 = vmatpush1.bf16.msra.mxu0 %v16305_v55  ;;  %v16397_v55 = vld [vmem:[%s21244_s12 + $0x42c] ss:$16 sps:$4 sm:$0xff]  }
 0xfa4   :  { %9475 = vmatprep.subr.bf16.mxu0 %v16313_v45  ;;  %v16392_v45 = vld [vmem:[%s21244_s12 + $0x300] ss:$16 sps:$4 sm:$0xff]  }
 0xfa5   :  { %9059 = vmatpush1.bf16.msra.mxu1 %v16308_v38  ;;  %v16400_v38 = vld [vmem:[%s21244_s12 + $0x324] ss:$16 sps:$4 sm:$0xff]  }
 0xfa6   :  { %9060 = vmatprep.subr.bf16.mxu1 %v16316_v12  ;;  %v16395_v12 = vld [vmem:[%s21244_s12 + $0x428] ss:$16 sps:$4 sm:$0xff]  }
 0xfa7   :  { %9476 = vmatpush1.bf16.msra.mxu0 %v16311_v29  ;;  %v16403_v29 = vld [vmem:[%s21244_s12 + $0x44c] ss:$16 sps:$4 sm:$0xff]  }
 0xfa8   :  { %9656 = vmatprep.subr.bf16.mxu0 %v16319_v16  ;;  %v16398_v16 = vld [vmem:[%s21244_s12 + $0x320] ss:$16 sps:$4 sm:$0xff]  }
 0xfa9   :  { %9061 = vmatpush1.bf16.msra.mxu1 %v16314_v34  ;;  %v16406_v34 = vld [vmem:[%s21244_s12 + $0x344] ss:$16 sps:$4 sm:$0xff]  }
 0xfaa   :  { %13217 = vmatmul.mubr.msk.bf16.vlgmr.msra.gmra.mrb[32].mxu0 %vm7277_vm5, %v9344_v11  ;;  %9241 = vmatprep.subr.bf16.mxu1 %v16322_v57  ;;  %v16401_v57 = vld [vmem:[%s21244_s12 + $0x448] ss:$16 sps:$4 sm:$0xff]  }
 0xfab   :  { %9657 = vmatpush1.bf16.msra.mxu0 %v16317_v31  ;;  %9688 = vmatprep.mubr.bf16.mxu0 %v21287_v51  ;;  %v16409_v31 = vld [vmem:[%s21244_s12 + $0x46c] ss:$16 sps:$4 sm:$0xff]  }
 0xfac   :  { %13148 = vmatmul.mubr.msk.bf16.vlgmr.msra.gmra.mrb[24].mxu1 %vm7277_vm5, %v8970_v22  ;;  %9658 = vmatprep.subr.bf16.mxu0 %v16325_v13  ;;  %v16356_v22 = vld [vmem:[%s21244_s12 + $0x240] ss:$16 sps:$4 sm:$0xff]   ;;  %v16412_v13 = vld [vmem:[%s21244_s12 + $0x364] ss:$16 sps:$4 sm:$0xff]  }
 0xfad   :  { %9242 = vmatpush1.bf16.msra.mxu1 %v16320_v39  ;;  %9273 = vmatprep.mubr.bf16.mxu1 %v21287_v51  ;;  %v16407_v39 = vld [vmem:[%s21244_s12 + $0x468] ss:$16 sps:$4 sm:$0xff]  }
 0xfae   :  { %9243 = vmatprep.subr.bf16.mxu1 %v16328_v59  ;;  %v16415_v59 = vld [vmem:[%s21244_s12 + $0x48c] ss:$16 sps:$4 sm:$0xff]  }
 0xfaf   :  { %9659 = vmatpush1.bf16.msra.mxu0 %v16323_v18  ;;  %v16410_v18 = vld [vmem:[%s21244_s12 + $0x360] ss:$16 sps:$4 sm:$0xff]  }
 0xfb0   :  { %9660 = vmatprep.subr.bf16.mxu0 %v16331_v44  ;;  %v16418_v44 = vld [vmem:[%s21244_s12 + $0x384] ss:$16 sps:$4 sm:$0xff]  }
 0xfb1   :  { %9244 = vmatpush1.bf16.msra.mxu1 %v16326_v2  ;;  %v16413_v2 = vld [vmem:[%s21244_s12 + $0x488] ss:$16 sps:$4 sm:$0xff]  }
 0xfb2   :  { %9245 = vmatprep.subr.bf16.mxu1 %v16334_v23  ;;  %v16421_v23 = vld [vmem:[%s21244_s12 + $0x4ac] ss:$16 sps:$4 sm:$0xff]  }
 0xfb3   :  { %9661 = vmatpush1.bf16.msra.mxu0 %v16329_v61  ;;  %v16416_v61 = vld [vmem:[%s21244_s12 + $0x380] ss:$16 sps:$4 sm:$0xff]  }
 0xfb4   :  { %9662 = vmatprep.subr.bf16.mxu0 %v16337_v54  ;;  %v16424_v54 = vld [vmem:[%s21244_s12 + $0x3a4] ss:$16 sps:$4 sm:$0xff]  }
 0xfb5   :  { %9246 = vmatpush1.bf16.msra.mxu1 %v16332_v14  ;;  %v16419_v14 = vld [vmem:[%s21244_s12 + $0x4a8] ss:$16 sps:$4 sm:$0xff]  }
 0xfb6   :  { %9247 = vmatprep.subr.bf16.mxu1 %v16340_v9  ;;  %v16427_v9 = vld [vmem:[%s21244_s12 + $0x4cc] ss:$16 sps:$4 sm:$0xff]  }
 0xfb7   :  { %9663 = vmatpush1.bf16.msra.mxu0 %v16335_v26  ;;  %v16422_v26 = vld [vmem:[%s21244_s12 + $0x3a0] ss:$16 sps:$4 sm:$0xff]  }
 0xfb8   :  { %9843 = vmatprep.subr.bf16.mxu0 %v16343_v58  ;;  %v16430_v58 = vld [vmem:[%s21244_s12 + $0x3c4] ss:$16 sps:$4 sm:$0xff]  }
 0xfb9   :  { %9248 = vmatpush1.bf16.msra.mxu1 %v16338_v25  ;;  %v16425_v25 = vld [vmem:[%s21244_s12 + $0x4c8] ss:$16 sps:$4 sm:$0xff]  }
 0xfba   :  { %13251 = vmatmul.mubr.msk.bf16.vlgmr.msra.gmra.mrb[36].mxu0 %vm7277_vm5, %v9531_v30  ;;  %9428 = vmatprep.subr.bf16.mxu1 %v16346_v35  ;;  %v16433_v35 = vld [vmem:[%s21244_s12 + $0x4ec] ss:$16 sps:$4 sm:$0xff]  }
 0xfbb   :  { %9844 = vmatpush1.bf16.msra.mxu0 %v16341_v60  ;;  %9875 = vmatprep.mubr.bf16.mxu0 %v21287_v51  ;;  %v16428_v60 = vld [vmem:[%s21244_s12 + $0x3c0] ss:$16 sps:$4 sm:$0xff]  }
 0xfbc   :  { %13182 = vmatmul.mubr.msk.bf16.vlgmr.msra.gmra.mrb[28].mxu1 %vm7277_vm5, %v9157_v36  ;;  %9845 = vmatprep.subr.bf16.mxu0 %v16349_v46  ;;  %v16380_v36 = vld [vmem:[%s21244_s12 + $0x2c0] ss:$16 sps:$4 sm:$0xff]   ;;  %v16431_v46 = vld [vmem:[%s21244_s12 + $0x4e8] ss:$16 sps:$4 sm:$0xff]  }
 0xfbd   :  { %9429 = vmatpush1.bf16.msra.mxu1 %v16344_v50  ;;  %9460 = vmatprep.mubr.bf16.mxu1 %v21287_v51  ;;  %v16439_v50 = vld [vmem:[%s21244_s12 + $0x50c] ss:$16 sps:$4 sm:$0xff]  }
 0xfbe   :  { %9430 = vmatprep.subr.bf16.mxu1 %v16352_v5  ;;  %v16434_v5 = vld [vmem:[%s21244_s12 + $0x3e0] ss:$16 sps:$4 sm:$0xff]  }
 0xfbf   :  { %9846 = vmatpush1.bf16.msra.mxu0 %v16347_v4  ;;  %v16442_v4 = vld [vmem:[%s21244_s12 + $0x404] ss:$16 sps:$4 sm:$0xff]  }
 0xfc0   :  { %9847 = vmatprep.subr.bf16.mxu0 %v16355_v27  ;;  %v16437_v27 = vld [vmem:[%s21244_s12 + $0x508] ss:$16 sps:$4 sm:$0xff]  }
 0xfc1   :  { %9431 = vmatpush1.bf16.msra.mxu1 %v16350_v43  ;;  %v10279_v43 = vrot.slane %v20266_v6, 1 }
 0xfc2   :  { %9432 = vmatprep.subr.bf16.mxu1 %v16358_v20  ;;  %v16445_v20 = vld [vmem:[%s21244_s12 + $0x52c] ss:$16 sps:$4 sm:$0xff]  }
 0xfc3   :  { %9848 = vmatpush1.bf16.msra.mxu0 %v16353_v15  ;;  %v16440_v15 = vld [vmem:[%s21244_s12 + $0x400] ss:$16 sps:$4 sm:$0xff]  }
 0xfc4   :  { %9849 = vmatprep.subr.bf16.mxu0 %v16361_v28  ;;  %v16448_v28 = vld [vmem:[%s21244_s12 + $0x424] ss:$16 sps:$4 sm:$0xff]  }
 0xfc5   :  { %9433 = vmatpush1.bf16.msra.mxu1 %v16356_v22  ;;  %v16443_v22 = vld [vmem:[%s21244_s12 + $0x528] ss:$16 sps:$4 sm:$0xff]  }
 0xfc6   :  { %9434 = vmatprep.subr.bf16.mxu1 %v16364_v17  ;;  %v16451_v17 = vld [vmem:[%s21244_s12 + $0x54c] ss:$16 sps:$4 sm:$0xff]  }
 0xfc7   :  { %9850 = vmatpush1.bf16.msra.mxu0 %v16359_v62  ;;  %v16446_v62 = vld [vmem:[%s21244_s12 + $0x420] ss:$16 sps:$4 sm:$0xff]  }
 0xfc8   :  { %10030 = vmatprep.subr.bf16.mxu0 %v16367_v56  ;;  %v16454_v56 = vld [vmem:[%s21244_s12 + $0x444] ss:$16 sps:$4 sm:$0xff]  }
 0xfc9   :  { %9435 = vmatpush1.bf16.msra.mxu1 %v16362_v10  ;;  %v16457_v10 = vld [vmem:[%s21244_s12 + $0x56c] ss:$16 sps:$4 sm:$0xff]  }
 0xfca   :  { %13285 = vmatmul.mubr.msk.bf16.vlgmr.msra.gmra.mrb[40].mxu0 %vm7277_vm5, %v9718_v49  ;;  %9615 = vmatprep.subr.bf16.mxu1 %v16370_v24  ;;  %v16452_v24 = vld [vmem:[%s21244_s12 + $0x440] ss:$16 sps:$4 sm:$0xff]  }
 0xfcb   :  { %10031 = vmatpush1.bf16.msra.mxu0 %v16365_v37  ;;  %10062 = vmatprep.mubr.bf16.mxu0 %v21287_v51  ;;  %v16460_v37 = vld [vmem:[%s21244_s12 + $0x464] ss:$16 sps:$4 sm:$0xff]  }
 0xfcc   :  { %13216 = vmatmul.mubr.msk.bf16.vlgmr.msra.gmra.mrb[32].mxu1 %vm7277_vm5, %v9344_v11  ;;  %10032 = vmatprep.subr.bf16.mxu0 %v16373_v32  ;;  %v16404_v11 = vld [vmem:[%s21244_s12 + $0x340] ss:$16 sps:$4 sm:$0xff]   ;;  %v16463_v32 = vld [vmem:[%s21244_s12 + $0x58c] ss:$16 sps:$4 sm:$0xff]  }
 0xfcd   :  { %9616 = vmatpush1.bf16.msra.mxu1 %v16368_v63  ;;  %9647 = vmatprep.mubr.bf16.mxu1 %v21287_v51  ;;  %v16458_v63 = vld [vmem:[%s21244_s12 + $0x460] ss:$16 sps:$4 sm:$0xff]  }
 0xfce   :  { %9617 = vmatprep.subr.bf16.mxu1 %v16376_v48  ;;  %v16466_v48 = vld [vmem:[%s21244_s12 + $0x484] ss:$16 sps:$4 sm:$0xff]  }
 0xfcf   :  { %10033 = vmatpush1.bf16.msra.mxu0 %v16371_v0  ;;  %v16461_v0 = vld [vmem:[%s21244_s12 + $0x588] ss:$16 sps:$4 sm:$0xff]  }
 0xfd0   :  { %10034 = vmatprep.subr.bf16.mxu0 %v16379_v1  ;;  %v10466_v1 = vrot.slane %v20266_v6, 2 }
 0xfd1   :  { %9618 = vmatpush1.bf16.msra.mxu1 %v16374_v47  ;;  %v16469_v47 = vld [vmem:[%s21244_s12 + $0x5ac] ss:$16 sps:$4 sm:$0xff]  }
 0xfd2   :  { %9619 = vmatprep.subr.bf16.mxu1 %v16382_v7  ;;  %v16464_v7 = vld [vmem:[%s21244_s12 + $0x480] ss:$16 sps:$4 sm:$0xff]  }
 0xfd3   :  { %10035 = vmatpush1.bf16.msra.mxu0 %v16377_v42  ;;  %v16472_v42 = vld [vmem:[%s21244_s12 + $0x4a4] ss:$16 sps:$4 sm:$0xff]  }
 0xfd4   :  { %10036 = vmatprep.subr.bf16.mxu0 %v16385_v8  ;;  %v16467_v8 = vld [vmem:[%s21244_s12 + $0x5a8] ss:$16 sps:$4 sm:$0xff]  }
 0xfd5   :  { %9620 = vmatpush1.bf16.msra.mxu1 %v16380_v36  ;;  %v16475_v36 = vld [vmem:[%s21244_s12 + $0x5cc] ss:$16 sps:$4 sm:$0xff]  }
 0xfd6   :  { %9621 = vmatprep.subr.bf16.mxu1 %v16388_v40  ;;  %v16470_v40 = vld [vmem:[%s21244_s12 + $0x4a0] ss:$16 sps:$4 sm:$0xff]  }
 0xfd7   :  { %10037 = vmatpush1.bf16.msra.mxu0 %v16383_v19  ;;  %v16478_v19 = vld [vmem:[%s21244_s12 + $0x4c4] ss:$16 sps:$4 sm:$0xff]  }
 0xfd8   :  { %10216 = vmatprep.subr.bf16.mxu0 %v16391_v33  ;;  %v16473_v33 = vld [vmem:[%s21244_s12 + $0x5c8] ss:$16 sps:$4 sm:$0xff]  }
 0xfd9   :  { %9622 = vmatpush1.bf16.msra.mxu1 %v16386_v3  ;;  %v16481_v3 = vld [vmem:[%s21244_s12 + $0x5ec] ss:$16 sps:$4 sm:$0xff]  }
 0xfda   :  { %13319 = vmatmul.mubr.msk.bf16.vlgmr.msra.gmra.mrb[44].mxu0 %vm7277_vm5, %v9905_v52  ;;  %9802 = vmatprep.subr.bf16.mxu1 %v16394_v21  ;;  %v16476_v21 = vld [vmem:[%s21244_s12 + $0x4c0] ss:$16 sps:$4 sm:$0xff]  }
 0xfdb   :  { %10217 = vmatpush1.bf16.msra.mxu0 %v16389_v41  ;;  %10248 = vmatprep.mubr.bf16.mxu0 %v21287_v51  ;;  %v16484_v41 = vld [vmem:[%s21244_s12 + $0x4e4] ss:$16 sps:$4 sm:$0xff]  }
 0xfdc   :  { %13250 = vmatmul.mubr.msk.bf16.vlgmr.msra.gmra.mrb[36].mxu1 %vm7277_vm5, %v9531_v30  ;;  %10218 = vmatprep.subr.bf16.mxu0 %v16397_v55  ;;  %v16436_v30 = vld [vmem:[%s21244_s12 + $0x3e4] ss:$16 sps:$4 sm:$0xff]   ;;  %v16487_v55 = vld [vmem:[%s21244_s12 + $0x60c] ss:$16 sps:$4 sm:$0xff]  }
 0xfdd   :  { %9803 = vmatpush1.bf16.msra.mxu1 %v16392_v45  ;;  %9834 = vmatprep.mubr.bf16.mxu1 %v21287_v51  ;;  %v16482_v45 = vld [vmem:[%s21244_s12 + $0x4e0] ss:$16 sps:$4 sm:$0xff]  }
 0xfde   :  { %9804 = vmatprep.subr.bf16.mxu1 %v16400_v38  ;;  %v16490_v38 = vld [vmem:[%s21244_s12 + $0x504] ss:$16 sps:$4 sm:$0xff]  }
 0xfdf   :  { %10219 = vmatpush1.bf16.msra.mxu0 %v16395_v12  ;;  %v16485_v12 = vld [vmem:[%s21244_s12 + $0x608] ss:$16 sps:$4 sm:$0xff]  }
 0xfe0   :  { %10220 = vmatprep.subr.bf16.mxu0 %v16403_v29  ;;  %v10653_v29 = vrot.slane %v20266_v6, 3 }
 0xfe1   :  { %9805 = vmatpush1.bf16.msra.mxu1 %v16398_v16  ;;  %v16493_v16 = vld [vmem:[%s21244_s12 + $0x62c] ss:$16 sps:$4 sm:$0xff]  }
 0xfe2   :  { %9806 = vmatprep.subr.bf16.mxu1 %v16406_v34  ;;  %v16488_v34 = vld [vmem:[%s21244_s12 + $0x500] ss:$16 sps:$4 sm:$0xff]  }
 0xfe3   :  { %10221 = vmatpush1.bf16.msra.mxu0 %v16401_v57  ;;  %v16496_v57 = vld [vmem:[%s21244_s12 + $0x524] ss:$16 sps:$4 sm:$0xff]  }
 0xfe4   :  { %10222 = vmatprep.subr.bf16.mxu0 %v16409_v31  ;;  %v16491_v31 = vld [vmem:[%s21244_s12 + $0x628] ss:$16 sps:$4 sm:$0xff]  }
 0xfe5   :  { %9807 = vmatpush1.bf16.msra.mxu1 %v16404_v11  ;;  %v16499_v11 = vld [vmem:[%s21244_s12 + $0x64c] ss:$16 sps:$4 sm:$0xff]  }
 0xfe6   :  { %9808 = vmatprep.subr.bf16.mxu1 %v16412_v13  ;;  %v16494_v13 = vld [vmem:[%s21244_s12 + $0x520] ss:$16 sps:$4 sm:$0xff]  }
 0xfe7   :  { %10223 = vmatpush1.bf16.msra.mxu0 %v16407_v39  ;;  %v16502_v39 = vld [vmem:[%s21244_s12 + $0x544] ss:$16 sps:$4 sm:$0xff]  }
 0xfe8   :  { %10404 = vmatprep.subr.bf16.mxu0 %v16415_v59  ;;  %v16497_v59 = vld [vmem:[%s21244_s12 + $0x648] ss:$16 sps:$4 sm:$0xff]  }
 0xfe9   :  { %9809 = vmatpush1.bf16.msra.mxu1 %v16410_v18  ;;  %v16505_v18 = vld [vmem:[%s21244_s12 + $0x66c] ss:$16 sps:$4 sm:$0xff]  }
 0xfea   :  { %13353 = vmatmul.mubr.msk.bf16.vlgmr.msra.gmra.mrb[48].mxu0 %vm7277_vm5, %v20266_v6  ;;  %9989 = vmatprep.subr.bf16.mxu1 %v16418_v44  ;;  %v16500_v44 = vld [vmem:[%s21244_s12 + $0x540] ss:$16 sps:$4 sm:$0xff]  }
 0xfeb   :  { %10405 = vmatpush1.bf16.msra.mxu0 %v16413_v2  ;;  %10436 = vmatprep.mubr.bf16.mxu0 %v21287_v51  ;;  %v16508_v2 = vld [vmem:[%s21244_s12 + $0x564] ss:$16 sps:$4 sm:$0xff]  }
 0xfec   :  { %13284 = vmatmul.mubr.msk.bf16.vlgmr.msra.gmra.mrb[40].mxu1 %vm7277_vm5, %v9718_v49  ;;  %10406 = vmatprep.subr.bf16.mxu0 %v16421_v23  ;;  %v16455_v49 = vld [vmem:[%s21244_s12 + $0x568] ss:$16 sps:$4 sm:$0xff]  }
 0xfed   :  { %9990 = vmatpush1.bf16.msra.mxu1 %v16416_v61  ;;  %10021 = vmatprep.mubr.bf16.mxu1 %v21287_v51  ;;  %v16503_v23 = vld [vmem:[%s21244_s12 + $0x668] ss:$16 sps:$4 sm:$0xff]   ;;  %v16511_v61 = vld [vmem:[%s21244_s12 + $0x68c] ss:$16 sps:$4 sm:$0xff]  }
 0xfee   :  { %9991 = vmatprep.subr.bf16.mxu1 %v16424_v54  ;;  %v16506_v54 = vld [vmem:[%s21244_s12 + $0x560] ss:$16 sps:$4 sm:$0xff]  }
 0xfef   :  { %10407 = vmatpush1.bf16.msra.mxu0 %v16419_v14  ;;  %v16514_v14 = vld [vmem:[%s21244_s12 + $0x584] ss:$16 sps:$4 sm:$0xff]  }
 0xff0   :  { %10408 = vmatprep.subr.bf16.mxu0 %v16427_v9  ;;  %v16509_v9 = vld [vmem:[%s21244_s12 + $0x688] ss:$16 sps:$4 sm:$0xff]  }
 0xff1   :  { %9992 = vmatpush1.bf16.msra.mxu1 %v16422_v26  ;;  %v10840_v26 = vrot.slane %v20266_v6, 4 }
 0xff2   :  { %9993 = vmatprep.subr.bf16.mxu1 %v16430_v58  ;;  %v16517_v58 = vld [vmem:[%s21244_s12 + $0x6ac] ss:$16 sps:$4 sm:$0xff]  }
 0xff3   :  { %10409 = vmatpush1.bf16.msra.mxu0 %v16425_v25  ;;  %v16512_v25 = vld [vmem:[%s21244_s12 + $0x580] ss:$16 sps:$4 sm:$0xff]  }
 0xff4   :  { %10410 = vmatprep.subr.bf16.mxu0 %v16433_v35  ;;  %v16520_v35 = vld [vmem:[%s21244_s12 + $0x5a4] ss:$16 sps:$4 sm:$0xff]  }
 0xff5   :  { %9994 = vmatpush1.bf16.msra.mxu1 %v16428_v60  ;;  %v16515_v60 = vld [vmem:[%s21244_s12 + $0x6a8] ss:$16 sps:$4 sm:$0xff]  }
 0xff6   :  { %9995 = vmatprep.subr.bf16.mxu1 %v16436_v30  ;;  %v16523_v30 = vld [vmem:[%s21244_s12 + $0x6cc] ss:$16 sps:$4 sm:$0xff]  }
 0xff7   :  { %10411 = vmatpush1.bf16.msra.mxu0 %v16431_v46  ;;  %v16518_v46 = vld [vmem:[%s21244_s12 + $0x5a0] ss:$16 sps:$4 sm:$0xff]  }
 0xff8   :  { %10591 = vmatprep.subr.bf16.mxu0 %v16439_v50  ;;  %v16526_v50 = vld [vmem:[%s21244_s12 + $0x5c4] ss:$16 sps:$4 sm:$0xff]  }
 0xff9   :  { %9996 = vmatpush1.bf16.msra.mxu1 %v16434_v5  ;;  %v16521_v5 = vld [vmem:[%s21244_s12 + $0x6c8] ss:$16 sps:$4 sm:$0xff]  }
 0xffa   :  { %13387 = vmatmul.mubr.msk.bf16.vlgmr.msra.gmra.mrb[52].mxu0 %vm7277_vm5, %v10279_v43  ;;  %10175 = vmatprep.subr.bf16.mxu1 %v16442_v4  ;;  %v16529_v4 = vld [vmem:[%s21244_s12 + $0x6ec] ss:$16 sps:$4 sm:$0xff]  }
 0xffb   :  { %10592 = vmatpush1.bf16.msra.mxu0 %v16437_v27  ;;  %10623 = vmatprep.mubr.bf16.mxu0 %v21287_v51  ;;  %v16524_v27 = vld [vmem:[%s21244_s12 + $0x5c0] ss:$16 sps:$4 sm:$0xff]  }
 0xffc   :  { %13318 = vmatmul.mubr.msk.bf16.vlgmr.msra.gmra.mrb[44].mxu1 %vm7277_vm5, %v9905_v52  ;;  %10593 = vmatprep.subr.bf16.mxu0 %v16445_v20  ;;  %v16479_v52 = vld [vmem:[%s21244_s12 + $0x5e8] ss:$16 sps:$4 sm:$0xff]  }
 0xffd   :  { %10176 = vmatpush1.bf16.msra.mxu1 %v16440_v15  ;;  %10207 = vmatprep.mubr.bf16.mxu1 %v21287_v51  ;;  %v16527_v20 = vld [vmem:[%s21244_s12 + $0x6e8] ss:$16 sps:$4 sm:$0xff]   ;;  %v16535_v15 = vld [vmem:[%s21244_s12 + $0x70c] ss:$16 sps:$4 sm:$0xff]  }
 0xffe   :  { %10177 = vmatprep.subr.bf16.mxu1 %v16448_v28  ;;  %v16530_v28 = vld [vmem:[%s21244_s12 + $0x5e0] ss:$16 sps:$4 sm:$0xff]  }
 0xfff   :  { %10594 = vmatpush1.bf16.msra.mxu0 %v16443_v22  ;;  %v16538_v22 = vld [vmem:[%s21244_s12 + $0x604] ss:$16 sps:$4 sm:$0xff]  }
0x1000   :  { %10595 = vmatprep.subr.bf16.mxu0 %v16451_v17  ;;  %v16533_v17 = vld [vmem:[%s21244_s12 + $0x708] ss:$16 sps:$4 sm:$0xff]  }
0x1001   :  { %10178 = vmatpush1.bf16.msra.mxu1 %v16446_v62  ;;  %v11027_v62 = vrot.slane %v20266_v6, 5 }
0x1002   :  { %10179 = vmatprep.subr.bf16.mxu1 %v16454_v56  ;;  %v16541_v56 = vld [vmem:[%s21244_s12 + $0x72c] ss:$16 sps:$4 sm:$0xff]  }
0x1003   :  { %10596 = vmatpush1.bf16.msra.mxu0 %v16449_v53  ;;  %v16536_v53 = vld [vmem:[%s21244_s12 + $0x600] ss:$16 sps:$4 sm:$0xff]  }
0x1004   :  { %10597 = vmatprep.subr.bf16.mxu0 %v16457_v10  ;;  %v16544_v10 = vld [vmem:[%s21244_s12 + $0x624] ss:$16 sps:$4 sm:$0xff]  }
0x1005   :  { %10180 = vmatpush1.bf16.msra.mxu1 %v16452_v24  ;;  %v16539_v24 = vld [vmem:[%s21244_s12 + $0x728] ss:$16 sps:$4 sm:$0xff]  }
0x1006   :  { %10181 = vmatprep.subr.bf16.mxu1 %v16460_v37  ;;  %v16547_v37 = vld [vmem:[%s21244_s12 + $0x74c] ss:$16 sps:$4 sm:$0xff]  }
0x1007   :  { %10598 = vmatpush1.bf16.msra.mxu0 %v16455_v49  ;;  %v16542_v49 = vld [vmem:[%s21244_s12 + $0x620] ss:$16 sps:$4 sm:$0xff]  }
0x1008   :  { %10778 = vmatprep.subr.bf16.mxu0 %v16463_v32  ;;  %v16550_v32 = vld [vmem:[%s21244_s12 + $0x644] ss:$16 sps:$4 sm:$0xff]  }
0x1009   :  { %10182 = vmatpush1.bf16.msra.mxu1 %v16458_v63  ;;  %v16545_v63 = vld [vmem:[%s21244_s12 + $0x748] ss:$16 sps:$4 sm:$0xff]  }
0x100a   :  { %13421 = vmatmul.mubr.msk.bf16.vlgmr.msra.gmra.mrb[56].mxu0 %vm7277_vm5, %v10466_v1  ;;  %10363 = vmatprep.subr.bf16.mxu1 %v16466_v48  ;;  %v16553_v48 = vld [vmem:[%s21244_s12 + $0x76c] ss:$16 sps:$4 sm:$0xff]  }
0x100b   :  { %10779 = vmatpush1.bf16.msra.mxu0 %v16461_v0  ;;  %10810 = vmatprep.mubr.bf16.mxu0 %v21287_v51  ;;  %v16548_v0 = vld [vmem:[%s21244_s12 + $0x640] ss:$16 sps:$4 sm:$0xff]  }
0x100c   :  { %13352 = vmatmul.mubr.msk.bf16.vlgmr.msra.gmra.mrb[48].mxu1 %vm7277_vm5, %v20266_v6  ;;  %10780 = vmatprep.subr.bf16.mxu0 %v16469_v47  ;;  %v16551_v47 = vld [vmem:[%s21244_s12 + $0x768] ss:$16 sps:$4 sm:$0xff]  }
0x100d   :  { %10364 = vmatpush1.bf16.msra.mxu1 %v16464_v7  ;;  %10395 = vmatprep.mubr.bf16.mxu1 %v21287_v51  ;;  %v16559_v7 = vld [vmem:[%s21244_s12 + $0x78c] ss:$16 sps:$4 sm:$0xff]  }
0x100e   :  { %10365 = vmatprep.subr.bf16.mxu1 %v16472_v42  ;;  %v16554_v42 = vld [vmem:[%s21244_s12 + $0x660] ss:$16 sps:$4 sm:$0xff]  }
0x100f   :  { %10781 = vmatpush1.bf16.msra.mxu0 %v16467_v8  ;;  %v16562_v8 = vld [vmem:[%s21244_s12 + $0x684] ss:$16 sps:$4 sm:$0xff]  }
0x1010   :  { %10782 = vmatprep.subr.bf16.mxu0 %v16475_v36  ;;  %v16557_v36 = vld [vmem:[%s21244_s12 + $0x788] ss:$16 sps:$4 sm:$0xff]  }
0x1011   :  { %10366 = vmatpush1.bf16.msra.mxu1 %v16470_v40  ;;  %v11214_v40 = vrot.slane %v20266_v6, 6 }
0x1012   :  { %10367 = vmatprep.subr.bf16.mxu1 %v16478_v19  ;;  %v16565_v19 = vld [vmem:[%s21244_s12 + $0x7ac] ss:$16 sps:$4 sm:$0xff]  }
0x1013   :  { %10783 = vmatpush1.bf16.msra.mxu0 %v16473_v33  ;;  %v16560_v33 = vld [vmem:[%s21244_s12 + $0x680] ss:$16 sps:$4 sm:$0xff]  }
0x1014   :  { %10784 = vmatprep.subr.bf16.mxu0 %v16481_v3  ;;  %v16568_v3 = vld [vmem:[%s21244_s12 + $0x6a4] ss:$16 sps:$4 sm:$0xff]  }
0x1015   :  { %10368 = vmatpush1.bf16.msra.mxu1 %v16476_v21  ;;  %v16563_v21 = vld [vmem:[%s21244_s12 + $0x7a8] ss:$16 sps:$4 sm:$0xff]  }
0x1016   :  { %10369 = vmatprep.subr.bf16.mxu1 %v16484_v41  ;;  %v16571_v41 = vld [vmem:[%s21244_s12 + $0x7cc] ss:$16 sps:$4 sm:$0xff]  }
0x1017   :  { %10785 = vmatpush1.bf16.msra.mxu0 %v16479_v52 }
0x1018   :  { %10965 = vmatprep.subr.bf16.mxu0 %v16487_v55  ;;  %v16566_v55 = vld [vmem:[%s21244_s12 + $0x6a0] ss:$16 sps:$4 sm:$0xff]  }
0x1019   :  { %10370 = vmatpush1.bf16.msra.mxu1 %v16482_v45 }
0x101a   :  { %13455 = vmatmul.mubr.msk.bf16.vlgmr.msra.gmra.mrb[60].mxu0 %vm7277_vm5, %v10653_v29  ;;  %10550 = vmatprep.subr.bf16.mxu1 %v16490_v38  ;;  %v16574_v38 = vld [vmem:[%s21244_s12 + $0x6c4] ss:$16 sps:$4 sm:$0xff]  }
0x101b   :  { %10966 = vmatpush1.bf16.msra.mxu0 %v16485_v12  ;;  %10997 = vmatprep.mubr.bf16.mxu0 %v21287_v51 }
0x101c   :  { %13386 = vmatmul.mubr.msk.bf16.vlgmr.msra.gmra.mrb[52].mxu1 %vm7277_vm5, %v10279_v43  ;;  %10967 = vmatprep.subr.bf16.mxu0 %v16493_v16  ;;  %v16532_v43 = vld [vmem:[%s21244_s12 + $0x5e4] ss:$16 sps:$4 sm:$0xff]   ;;  %v16569_v16 = vld [vmem:[%s21244_s12 + $0x7c8] ss:$16 sps:$4 sm:$0xff]  }
0x101d   :  { %10551 = vmatpush1.bf16.msra.mxu1 %v16488_v34  ;;  %10582 = vmatprep.mubr.bf16.mxu1 %v21287_v51 }
0x101e   :  { %10552 = vmatprep.subr.bf16.mxu1 %v16496_v57 }
0x101f   :  { %10968 = vmatpush1.bf16.msra.mxu0 %v16491_v31  ;;  %v16577_v31 = vld [vmem:[%s21244_s12 + $0x7ec] ss:$16 sps:$4 sm:$0xff]  }
0x1020   :  { %10969 = vmatprep.subr.bf16.mxu0 %v16499_v11 }
0x1021   :  { %10553 = vmatpush1.bf16.msra.mxu1 %v16494_v13  ;;  %v16572_v13 = vld [vmem:[%s21244_s12 + $0x6c0] ss:$16 sps:$4 sm:$0xff]  }
0x1022   :  { %10554 = vmatprep.subr.bf16.mxu1 %v16502_v39 }
0x1023   :  { %10970 = vmatpush1.bf16.msra.mxu0 %v16497_v59  ;;  %v16580_v59 = vld [vmem:[%s21244_s12 + $0x6e4] ss:$16 sps:$4 sm:$0xff]  }
0x1024   :  { %10971 = vmatprep.subr.bf16.mxu0 %v16505_v18  ;;  %v16575_v18 = vld [vmem:[%s21244_s12 + $0x7e8] ss:$16 sps:$4 sm:$0xff]  }
0x1025   :  { %10555 = vmatpush1.bf16.msra.mxu1 %v16500_v44  ;;  %v16578_v44 = vld [vmem:[%s21244_s12 + $0x6e0] ss:$16 sps:$4 sm:$0xff]  }
0x1026   :  { %10556 = vmatprep.subr.bf16.mxu1 %v16508_v2  ;;  %v16583_v2 = vld [vmem:[%s21244_s12 + $0x704] ss:$16 sps:$4 sm:$0xff]  }
0x1027   :  { %10972 = vmatpush1.bf16.msra.mxu0 %v16503_v23  ;;  %v11401_v23 = vrot.slane %v20266_v6, 7 }
0x1028   :  { %11152 = vmatprep.subr.bf16.mxu0 %v16511_v61  ;;  %v16581_v61 = vld [vmem:[%s21244_s12 + $0x700] ss:$16 sps:$4 sm:$0xff]  }
0x1029   :  { %10557 = vmatpush1.bf16.msra.mxu1 %v16506_v54  ;;  %v16586_v54 = vld [vmem:[%s21244_s12 + $0x724] ss:$16 sps:$4 sm:$0xff]  }
0x102a   :  { %13489 = vmatmul.mubr.msk.bf16.vlgmr.msra.gmra.mrb[64].mxu0 %vm7277_vm5, %v10840_v26  ;;  %10737 = vmatprep.subr.bf16.mxu1 %v16514_v14 }
0x102b   :  { %11153 = vmatpush1.bf16.msra.mxu0 %v16509_v9  ;;  %11184 = vmatprep.mubr.bf16.mxu0 %v21287_v51  ;;  %v16584_v9 = vld [vmem:[%s21244_s12 + $0x720] ss:$16 sps:$4 sm:$0xff]  }
0x102c   :  { %13420 = vmatmul.mubr.msk.bf16.vlgmr.msra.gmra.mrb[56].mxu1 %vm7277_vm5, %v10466_v1  ;;  %11154 = vmatprep.subr.bf16.mxu0 %v16517_v58  ;;  %v16556_v1 = vld [vmem:[%s21244_s12 + $0x664] ss:$16 sps:$4 sm:$0xff]  }
0x102d   :  { %10738 = vmatpush1.bf16.msra.mxu1 %v16512_v25  ;;  %10769 = vmatprep.mubr.bf16.mxu1 %v21287_v51  ;;  %v16589_v58 = vld [vmem:[%s21244_s12 + $0x744] ss:$16 sps:$4 sm:$0xff]  }
0x102e   :  { %10739 = vmatprep.subr.bf16.mxu1 %v16520_v35 }
0x102f   :  { %11155 = vmatpush1.bf16.msra.mxu0 %v16515_v60 }
0x1030   :  { %11156 = vmatprep.subr.bf16.mxu0 %v16523_v30 }
0x1031   :  { %10740 = vmatpush1.bf16.msra.mxu1 %v16518_v46 }
0x1032   :  { %10741 = vmatprep.subr.bf16.mxu1 %v16526_v50 }
0x1033   :  { %11157 = vmatpush1.bf16.msra.mxu0 %v16521_v5 }
0x1034   :  { %11158 = vmatprep.subr.bf16.mxu0 %v16529_v4  ;;  %v16587_v4 = vld [vmem:[%s21244_s12 + $0x740] ss:$16 sps:$4 sm:$0xff]  }
0x1035   :  { %10742 = vmatpush1.bf16.msra.mxu1 %v16524_v27 }
0x1036   :  { %10743 = vmatprep.subr.bf16.mxu1 %v16532_v43  ;;  %v16592_v43 = vld [vmem:[%s21244_s12 + $0x764] ss:$16 sps:$4 sm:$0xff]  }
0x1037   :  { %11159 = vmatpush1.bf16.msra.mxu0 %v16527_v20 }
0x1038   :  { %11339 = vmatprep.subr.bf16.mxu0 %v16535_v15 }
0x1039   :  { %10744 = vmatpush1.bf16.msra.mxu1 %v16530_v28  ;;  %v16590_v28 = vld [vmem:[%s21244_s12 + $0x760] ss:$16 sps:$4 sm:$0xff]  }
0x103a   :  { %13523 = vmatmul.mubr.msk.bf16.vlgmr.msra.gmra.mrb[68].mxu0 %vm7277_vm5, %v11027_v62  ;;  %10924 = vmatprep.subr.bf16.mxu1 %v16538_v22  ;;  %v16595_v22 = vld [vmem:[%s21244_s12 + $0x784] ss:$16 sps:$4 sm:$0xff]  }
0x103b   :  { %11340 = vmatpush1.bf16.msra.mxu0 %v16533_v17  ;;  %11371 = vmatprep.mubr.bf16.mxu0 %v21287_v51  ;;  %v16593_v17 = vld [vmem:[%s21244_s12 + $0x780] ss:$16 sps:$4 sm:$0xff]  }
0x103c   :  { %13454 = vmatmul.mubr.msk.bf16.vlgmr.msra.gmra.mrb[60].mxu1 %vm7277_vm5, %v10653_v29  ;;  %11341 = vmatprep.subr.bf16.mxu0 %v16541_v56 }
0x103d   :  { %10925 = vmatpush1.bf16.msra.mxu1 %v16536_v53  ;;  %10956 = vmatprep.mubr.bf16.mxu1 %v21287_v51  ;;  %v16596_v53 = vld [vmem:[%s21244_s12 + $0x7a0] ss:$16 sps:$4 sm:$0xff]  }
0x103e   :  { %10926 = vmatprep.subr.bf16.mxu1 %v16544_v10 }
0x103f   :  { %11342 = vmatpush1.bf16.msra.mxu0 %v16539_v24 }
0x1040   :  { %11343 = vmatprep.subr.bf16.mxu0 %v16547_v37  ;;  %v16601_v37 = vld [vmem:[%s21244_s12 + $0x7c4] ss:$16 sps:$4 sm:$0xff]  }
0x1041   :  { %10927 = vmatpush1.bf16.msra.mxu1 %v16542_v49 }
0x1042   :  { %10928 = vmatprep.subr.bf16.mxu1 %v16550_v32 }
0x1043   :  { %11344 = vmatpush1.bf16.msra.mxu0 %v16545_v63 }
0x1044   :  { %11345 = vmatprep.subr.bf16.mxu0 %v16553_v48 }
0x1045   :  { %10929 = vmatpush1.bf16.msra.mxu1 %v16548_v0 }
0x1046   :  { %10930 = vmatprep.subr.bf16.mxu1 %v16556_v1 }
0x1047   :  { %11346 = vmatpush1.bf16.msra.mxu0 %v16551_v47 }
0x1048   :  { %11526 = vmatprep.subr.bf16.mxu0 %v16559_v7 }
0x1049   :  { %10931 = vmatpush1.bf16.msra.mxu1 %v16554_v42  ;;  %v16604_v42 = vld [vmem:[%s21244_s12 + $0x7e4] ss:$16 sps:$4 sm:$0xff]  }
0x104a   :  { %13557 = vmatmul.mubr.msk.bf16.vlgmr.msra.gmra.mrb[72].mxu0 %vm7277_vm5, %v11214_v40  ;;  %11111 = vmatprep.subr.bf16.mxu1 %v16562_v8  ;;  %v16602_v8 = vld [vmem:[%s21244_s12 + $0x7e0] ss:$16 sps:$4 sm:$0xff]  }
0x104b   :  { %11527 = vmatpush1.bf16.msra.mxu0 %v16557_v36  ;;  %11558 = vmatprep.mubr.bf16.mxu0 %v21287_v51 }
0x104c   :  { %13488 = vmatmul.mubr.msk.bf16.vlgmr.msra.gmra.mrb[64].mxu1 %vm7277_vm5, %v10840_v26  ;;  %11528 = vmatprep.subr.bf16.mxu0 %v16565_v19 }
0x104d   :  { %11112 = vmatpush1.bf16.msra.mxu1 %v16560_v33  ;;  %v8946_v52 = vpop.f32.mrb[20].mxu0  ;;  %11143 = vmatprep.mubr.bf16.mxu1 %v21287_v51 }
0x104e   :  { %v8948_v45 = vpop.f32.mrb[21].mxu0  ;;  %11113 = vmatprep.subr.bf16.mxu1 %v16568_v3 }
0x104f   :  { %11529 = vmatpush1.bf16.msra.mxu0 %v16563_v21  ;;  %v21035_v12 = vpop.f32.mrb[12].mxu1  ;;  %v8950_v29 = vpop.f32.mrb[22].mxu0 }
0x1050   :  { %v21040_v34 = vpop.f32.mrb[13].mxu1  ;;  %v8951_v57 = vpop.f32.mrb[23].mxu0  ;;  %11530 = vmatprep.subr.bf16.mxu0 %v16571_v41 }
0x1051   :  { %11114 = vmatpush1.bf16.msra.mxu1 %v16566_v55  ;;  %v8744_v11 = vpop.f32.mrb[14].mxu1 }
0x1052   :  { %v8745_v39 = vpop.f32.mrb[15].mxu1  ;;  %11115 = vmatprep.subr.bf16.mxu1 %v16574_v38 }
0x1053   :  { %11531 = vmatpush1.bf16.msra.mxu0 %v16569_v16 }
0x1054   :  { %11532 = vmatprep.subr.bf16.mxu0 %v16577_v31 }
0x1055   :  { %11116 = vmatpush1.bf16.msra.mxu1 %v16572_v13 }
0x1056   :  { %11117 = vmatprep.subr.bf16.mxu1 %v16580_v59 }
0x1057   :  { %11533 = vmatpush1.bf16.msra.mxu0 %v16575_v18 }
0x1059   :  { %11118 = vmatpush1.bf16.msra.mxu1 %v16578_v44 }
0x105a   :  { %13591 = vmatmul.mubr.msk.bf16.vlgmr.msra.gmra.mrb[76].mxu0 %vm7277_vm5, %v11401_v23  ;;  %11298 = vmatprep.subr.bf16.mxu1 %v16583_v2 }
0x105c   :  { %13522 = vmatmul.mubr.msk.bf16.vlgmr.msra.gmra.mrb[68].mxu1 %vm7277_vm5, %v11027_v62  ;;  %v16598_v62 = vld [vmem:[%s21244_s12 + $0x7a4] ss:$16 sps:$4 sm:$0xff]  }
0x105d   :  { %v9129_v14 = vpop.f32.mrb[24].mxu0  ;;  %11299 = vmatpush1.bf16.msra.mxu1 %v16581_v61  ;;  %11330 = vmatprep.mubr.bf16.mxu1 %v21287_v51  ;;  %v16606_v61 = vld [vmem:[%s21246_s14 + $0x80] sm:$0xff]  }
0x105e   :  { %v9131_v26 = vpop.f32.mrb[25].mxu0  ;;  %11300 = vmatprep.subr.bf16.mxu1 %v16586_v54  ;;  %v16607_v54 = vld [vmem:[%s21246_s14 + $0xc8] sm:$0xff]  }
0x105f   :  { %v8781_v25 = vpop.f32.mrb[16].mxu1  ;;  %v9133_v35 = vpop.f32.mrb[26].mxu0 }
0x1060   :  { %v8947_v60 = vadd.f32 %v8946_v52, %v8781_v25  ;;  %v8783_v30 = vpop.f32.mrb[17].mxu1  ;;  %v9134_v46 = vpop.f32.mrb[27].mxu0 }
0x1061   :  { %v8949_v50 = vadd.f32 %v8948_v45, %v8783_v30  ;;  %v8785_v5 = vpop.f32.mrb[18].mxu1  ;;  %11301 = vmatpush1.bf16.msra.mxu1 %v16584_v9  ;;  %v16608_v9 = vld [vmem:[%s21246_s14 + $0x88] sm:$0xff]  }
0x1062   :  { %v8786_v27 = vpop.f32.mrb[19].mxu1  ;;  %11302 = vmatprep.subr.bf16.mxu1 %v16589_v58  ;;  %v9138_v20 = vadd.f32 %v9129_v14, %v8947_v60  ;;  %v16609_v5 = vld [vmem:[%s21246_s14 + $0xd0] sm:$0xff]  }
0x1063   :  { %v9139_v15 = vadd.f32 %v9131_v26, %v8949_v50 }
0x1065   :  { %11303 = vmatpush1.bf16.msra.mxu1 %v16587_v4 }
0x1066   :  { %11304 = vmatprep.subr.bf16.mxu1 %v16592_v43  ;;  %v16610_v43 = vld [vmem:[%s21246_s14 + $0x90] sm:$0xff]  }
0x1069   :  { %11305 = vmatpush1.bf16.msra.mxu1 %v16590_v28  ;;  %v16612_v28 = vld [vmem:[%s21246_s14 + $0x98] sm:$0xff]  }
0x106a   :  { %11485 = vmatprep.subr.bf16.mxu1 %v16595_v22  ;;  %v16613_v22 = vld [vmem:[%s21246_s14 + $0xe0] sm:$0xff]  }
0x106c   :  { %13556 = vmatmul.mubr.msk.bf16.vlgmr.msra.gmra.mrb[72].mxu1 %vm7277_vm5, %v11214_v40 }
0x106d   :  { %v9316_v56 = vpop.f32.mrb[28].mxu0  ;;  %11486 = vmatpush1.bf16.msra.mxu1 %v16593_v17  ;;  %11517 = vmatprep.mubr.bf16.mxu1 %v21287_v51  ;;  %v16599_v51 = vld [vmem:[%s21244_s12 + $0x7c0] ss:$16 sps:$4 sm:$0xff]  }
0x106e   :  { %v9325_v10 = vadd.f32 %v9316_v56, %v9138_v20  ;;  %v9318_v24 = vpop.f32.mrb[29].mxu0  ;;  %11487 = vmatprep.subr.bf16.mxu1 %v16598_v62  ;;  %v16614_v17 = vld [vmem:[%s21246_s14 + $0xa0] sm:$0xff]   ;;  %v16615_v62 = vld [vmem:[%s21246_s14 + $0xe8] sm:$0xff]  }
0x106f   :  { %v9326_v49 = vadd.f32 %v9318_v24, %v9139_v15  ;;  %v8905_v32 = vpop.f32.mrb[20].mxu1  ;;  %v9320_v6 = vpop.f32.mrb[30].mxu0  ;;  %v16611_v15 = vld [vmem:[%s21246_s14 + $0xd8] sm:$0xff]  }
0x1070   :  { %v8906_v63 = vadd.f32 %v8905_v32, %v21035_v12  ;;  %v8907_v48 = vpop.f32.mrb[21].mxu1  ;;  %v9321_v0 = vpop.f32.mrb[31].mxu0 }
0x1071   :  { %v8908_v1 = vadd.f32 %v8907_v48, %v21040_v34  ;;  %v8909_v47 = vpop.f32.mrb[22].mxu1  ;;  %11488 = vmatpush1.bf16.msra.mxu1 %v16596_v53  ;;  %v16616_v53 = vld [vmem:[%s21246_s14 + $0xa8] sm:$0xff]   ;;  %v16617_v0 = vld [vmem:[%s21246_s14 + $0xf0] sm:$0xff]  }
0x1072   :  { %v8910_v7 = vpop.f32.mrb[23].mxu1  ;;  %11489 = vmatprep.subr.bf16.mxu1 %v16601_v37 }
0x1075   :  { %11490 = vmatpush1.bf16.msra.mxu1 %v16599_v51  ;;  %v16618_v51 = vld [vmem:[%s21246_s14 + $0xb0] sm:$0xff]  }
0x1076   :  { %11491 = vmatprep.subr.bf16.mxu1 %v16604_v42  ;;  %v16619_v42 = vld [vmem:[%s21246_s14 + $0xf8] sm:$0xff]  }
0x1079   :  { %11492 = vmatpush1.bf16.msra.mxu1 %v16602_v8  ;;  %v16620_v8 = vld [vmem:[%s21246_s14 + $0xb8] sm:$0xff]  }
0x107c   :  { %13590 = vmatmul.mubr.msk.bf16.vlgmr.msra.gmra.mrb[76].mxu1 %vm7277_vm5, %v11401_v23  ;;  %v16605_v23 = vld [vmem:[%s21246_s14 + $0xc0] sm:$0xff]  }
0x107d   :  { %v9503_v36 = vpop.f32.mrb[32].mxu0  ;;  %14612 = vmatprep.subr.bf16.mxu0 %v16605_v23 }
0x107e   :  { %v9512_v40 = vadd.f32 %v9503_v36, %v9325_v10  ;;  %v9505_v19 = vpop.f32.mrb[33].mxu0  ;;  %14613 = vmatpush3.bf16.msra.mxu0 %v16606_v61  ;;  %v16621_v36 = vld [vmem:[%s21246_s14 + $0x40] sm:$0xff]  }
0x107f   :  { %v9513_v33 = vadd.f32 %v9505_v19, %v9326_v49  ;;  %v9088_v3 = vpop.f32.mrb[24].mxu1  ;;  %v9507_v21 = vpop.f32.mrb[34].mxu0  ;;  %14614 = vmatprep.subr.bf16.mxu0 %v16607_v54  ;;  %v16623_v19 = vld [vmem:[%s21246_s14 + $0x48] sm:$0xff]   ;;  %14590 = vmatprep.subr.bf16.mxu1 %v16621_v36 }
0x1080   :  { %v9136_v41 = vadd.f32 %v9088_v3, %v8906_v63  ;;  %v9090_v52 = vpop.f32.mrb[25].mxu1  ;;  %v9508_v55 = vpop.f32.mrb[35].mxu0 }
0x1081   :  { %v9137_v45 = vadd.f32 %v9090_v52, %v8908_v1  ;;  %v9092_v38 = vpop.f32.mrb[26].mxu1 }
0x1082   :  { %v9093_v12 = vpop.f32.mrb[27].mxu1  ;;  %14615 = vmatpush3.bf16.msra.mxu0 %v16608_v9 }
0x1083   :  { %14616 = vmatprep.subr.bf16.mxu0 %v16609_v5  ;;  %v16634_v5 = vld [vmem:[%s21246_s14 + $0x30] sm:$0xff]  }
0x1086   :  { %14617 = vmatpush3.bf16.msra.mxu0 %v16610_v43 }
0x1087   :  { %14618 = vmatprep.subr.bf16.mxu0 %v16611_v15 }
0x108a   :  { %14619 = vmatpush3.bf16.msra.mxu0 %v16612_v28 }
0x108b   :  { %14620 = vmatprep.subr.bf16.mxu0 %v16613_v22 }
0x108d   :  { %v9690_v29 = vpop.f32.mrb[36].mxu0 }
0x108e   :  { %v9699_v16 = vadd.f32 %v9690_v29, %v9512_v40  ;;  %v9692_v34 = vpop.f32.mrb[37].mxu0  ;;  %14621 = vmatpush3.bf16.msra.mxu0 %v16614_v17  ;;  %v16622_v40 = vld [vmem:[%s21246_s14] sm:$0xff]  }
0x108f   :  { %v9700_v57 = vadd.f32 %v9692_v34, %v9513_v33  ;;  %v9275_v31 = vpop.f32.mrb[28].mxu1  ;;  %v9694_v11 = vpop.f32.mrb[38].mxu0  ;;  %14622 = vmatprep.subr.bf16.mxu0 %v16615_v62  ;;  %14591 = vmatpush3.bf16.msra.mxu1 %v16622_v40 }
0x1090   :  { %v9323_v13 = vadd.f32 %v9275_v31, %v9136_v41  ;;  %v9277_v39 = vpop.f32.mrb[29].mxu1  ;;  %v9695_v59 = vpop.f32.mrb[39].mxu0  ;;  %14592 = vmatprep.subr.bf16.mxu1 %v16623_v19  ;;  %v16625_v31 = vld [vmem:[%s21246_s14 + $0x50] sm:$0xff]  }
0x1091   :  { %v9324_v18 = vadd.f32 %v9277_v39, %v9137_v45  ;;  %v9279_v44 = vpop.f32.mrb[30].mxu1  ;;  %v16624_v45 = vld [vmem:[%s21246_s14 + $0x8] sm:$0xff]   ;;  %v16626_v11 = vld [vmem:[%s21246_s14 + $0x10] sm:$0xff]   ;;  %v16628_v39 = vld [vmem:[%s21246_s14 + $0x18] sm:$0xff]  }
0x1092   :  { %v9280_v2 = vpop.f32.mrb[31].mxu1  ;;  %14623 = vmatpush3.bf16.msra.mxu0 %v16616_v53  ;;  %v16629_v59 = vld [vmem:[%s21246_s14 + $0x60] sm:$0xff]   ;;  %v16631_v44 = vld [vmem:[%s21246_s14 + $0x68] sm:$0xff]  }
0x1093   :  { %14624 = vmatprep.subr.bf16.mxu0 %v16617_v0  ;;  %14593 = vmatpush3.bf16.msra.mxu1 %v16624_v45 }
0x1094   :  { %14594 = vmatprep.subr.bf16.mxu1 %v16625_v31 }
0x1096   :  { %14625 = vmatpush3.bf16.msra.mxu0 %v16618_v51 }
0x1097   :  { %14626 = vmatprep.subr.bf16.mxu0 %v16619_v42  ;;  %14595 = vmatpush3.bf16.msra.mxu1 %v16626_v11 }
0x109a   :  { %14627 = vmatpush3.bf16.msra.mxu0 %v16620_v8 }
0x109d   :  { %v9877_v14 = vpop.f32.mrb[40].mxu0 }
0x109e   :  { %v9886_v26 = vadd.f32 %v9877_v14, %v9699_v16  ;;  %v9879_v58 = vpop.f32.mrb[41].mxu0 }
0x109f   :  { %v9887_v25 = vadd.f32 %v9879_v58, %v9700_v57  ;;  %v9462_v35 = vpop.f32.mrb[32].mxu1  ;;  %v9881_v60 = vpop.f32.mrb[42].mxu0 }
0x10a0   :  { %v9510_v30 = vadd.f32 %v9462_v35, %v9323_v13  ;;  %v9464_v46 = vpop.f32.mrb[33].mxu1  ;;  %v9882_v50 = vpop.f32.mrb[43].mxu0  ;;  %v16627_v13 = vld [vmem:[%s21246_s14 + $0x58] sm:$0xff]  }
0x10a1   :  { %v9511_v4 = vadd.f32 %v9464_v46, %v9324_v18  ;;  %v9466_v27 = vpop.f32.mrb[34].mxu1  ;;  %14596 = vmatprep.subr.bf16.mxu1 %v16627_v13  ;;  %v16630_v18 = vld [vmem:[%s21246_s14 + $0x20] sm:$0xff]   ;;  %v16633_v50 = vld [vmem:[%s21246_s14 + $0x70] sm:$0xff]  }
0x10a2   :  { %v9467_v20 = vpop.f32.mrb[35].mxu1  ;;  %14597 = vmatpush3.bf16.msra.mxu1 %v16628_v39  ;;  %v16636_v27 = vld [vmem:[%s21246_s14 + $0x38] sm:$0xff]  }
0x10a3   :  { %14598 = vmatprep.subr.bf16.mxu1 %v16629_v59 }
0x10a6   :  { %14599 = vmatpush3.bf16.msra.mxu1 %v16630_v18 }
0x10a7   :  { %14600 = vmatprep.subr.bf16.mxu1 %v16631_v44 }
0x10ad   :  { %v10064_v56 = vpop.f32.mrb[44].mxu0 }
0x10ae   :  { %v10073_v10 = vadd.f32 %v10064_v56, %v9886_v26  ;;  %v10066_v24 = vpop.f32.mrb[45].mxu0  ;;  %v16632_v26 = vld [vmem:[%s21246_s14 + $0x28] sm:$0xff]  }
0x10af   :  { %v10074_v37 = vadd.f32 %v10066_v24, %v9887_v25  ;;  %v9649_v49 = vpop.f32.mrb[36].mxu1  ;;  %v10068_v32 = vpop.f32.mrb[46].mxu0  ;;  %14601 = vmatpush3.bf16.msra.mxu1 %v16632_v26 }
0x10b0   :  { %v9697_v6 = vadd.f32 %v9649_v49, %v9510_v30  ;;  %v9651_v63 = vpop.f32.mrb[37].mxu1  ;;  %v10069_v48 = vpop.f32.mrb[47].mxu0  ;;  %14602 = vmatprep.subr.bf16.mxu1 %v16633_v50 }
0x10b1   :  { %v9698_v1 = vadd.f32 %v9651_v63, %v9511_v4  ;;  %v9653_v47 = vpop.f32.mrb[38].mxu1  ;;  %v16635_v4 = vld [vmem:[%s21246_s14 + $0x78] sm:$0xff]  }
0x10b2   :  { %v9654_v7 = vpop.f32.mrb[39].mxu1 }
0x10b3   :  { %14603 = vmatpush3.bf16.msra.mxu1 %v16634_v5 }
0x10b4   :  { %14604 = vmatprep.subr.bf16.mxu1 %v16635_v4 }
0x10b7   :  { %14605 = vmatpush3.bf16.msra.mxu1 %v16636_v27  ;;  %v11571_v27 = vld [vmem:[%s21245_s13] sm:$0xf] }
0x10bd   :  { %v10250_v33 = vpop.f32.mrb[48].mxu0 }
0x10be   :  { %v10259_v3 = vadd.f32 %v10250_v33, %v10073_v10  ;;  %v10252_v21 = vpop.f32.mrb[49].mxu0 }
0x10bf   :  { %v10260_v41 = vadd.f32 %v10252_v21, %v10074_v37  ;;  %v9836_v52 = vpop.f32.mrb[40].mxu1  ;;  %v10254_v55 = vpop.f32.mrb[50].mxu0 }
0x10c0   :  { %v9884_v38 = vadd.f32 %v9836_v52, %v9697_v6  ;;  %v9838_v12 = vpop.f32.mrb[41].mxu1  ;;  %v10255_v29 = vpop.f32.mrb[51].mxu0 }
0x10c1   :  { %v9885_v16 = vadd.f32 %v9838_v12, %v9698_v1  ;;  %v9840_v34 = vpop.f32.mrb[42].mxu1 }
0x10c2   :  { %v9841_v57 = vpop.f32.mrb[43].mxu1 }
0x10cd   :  { %v10438_v2 = vpop.f32.mrb[52].mxu0 }
0x10ce   :  { %v10447_v23 = vadd.f32 %v10438_v2, %v10259_v3  ;;  %v10440_v61 = vpop.f32.mrb[53].mxu0 }
0x10cf   :  { %v10448_v54 = vadd.f32 %v10440_v61, %v10260_v41  ;;  %v10023_v14 = vpop.f32.mrb[44].mxu1  ;;  %v10442_v9 = vpop.f32.mrb[54].mxu0 }
0x10d0   :  { %v10071_v58 = vadd.f32 %v10023_v14, %v9884_v38  ;;  %v10025_v25 = vpop.f32.mrb[45].mxu1  ;;  %v10443_v35 = vpop.f32.mrb[55].mxu0 }
0x10d1   :  { %v10072_v60 = vadd.f32 %v10025_v25, %v9885_v16  ;;  %v10027_v30 = vpop.f32.mrb[46].mxu1 }
0x10d2   :  { %v10028_v46 = vpop.f32.mrb[47].mxu1 }
0x10dd   :  { %v10625_v43 = vpop.f32.mrb[56].mxu0 }
0x10de   :  { %v10634_v20 = vadd.f32 %v10625_v43, %v10447_v23  ;;  %v10627_v15 = vpop.f32.mrb[57].mxu0 }
0x10df   :  { %v10635_v28 = vadd.f32 %v10627_v15, %v10448_v54  ;;  %v10209_v22 = vpop.f32.mrb[48].mxu1  ;;  %v10629_v17 = vpop.f32.mrb[58].mxu0 }
0x10e0   :  { %v10257_v62 = vadd.f32 %v10209_v22, %v10071_v58  ;;  %v10211_v56 = vpop.f32.mrb[49].mxu1  ;;  %v10630_v53 = vpop.f32.mrb[59].mxu0 }
0x10e1   :  { %v10258_v10 = vadd.f32 %v10211_v56, %v10072_v60  ;;  %v10213_v24 = vpop.f32.mrb[50].mxu1  ;;  %v11573_v60 = vlaneseq }
0x10e2   :  { %v10214_v37 = vpop.f32.mrb[51].mxu1 }
0x10e3   :  { %v11574_v5 = vshrl.u32 %v11573_v60, 7 }
0x10e5   :  { %v11583_v4 = vsub.s32 2, %v11574_v5  ;;  %v11587_v43 = vsub.s32 3, %v11574_v5 }
0x10ed   :  { %v10812_v49 = vpop.f32.mrb[60].mxu0 }
0x10ee   :  { %v10821_v32 = vadd.f32 %v10812_v49, %v10634_v20  ;;  %v10814_v6 = vpop.f32.mrb[61].mxu0  ;;  %v11584_v20 = vrot.slane %v11571_v27, %v11583_v4 }
0x10ef   :  { %v10822_v63 = vadd.f32 %v10814_v6, %v10635_v28  ;;  %v10397_v48 = vpop.f32.mrb[52].mxu1  ;;  %v10816_v0 = vpop.f32.mrb[62].mxu0  ;;  %v11588_v28 = vrot.slane %v11571_v27, %v11587_v43 }
0x10f0   :  { %v10445_v1 = vadd.f32 %v10397_v48, %v10257_v62  ;;  %v10399_v47 = vpop.f32.mrb[53].mxu1  ;;  %v10817_v51 = vpop.f32.mrb[63].mxu0 }
0x10f1   :  { %v10446_v7 = vadd.f32 %v10399_v47, %v10258_v10  ;;  %v10401_v42 = vpop.f32.mrb[54].mxu1 }
0x10f2   :  { %v10402_v8 = vpop.f32.mrb[55].mxu1 }
0x10fd   :  { %v10999_v36 = vpop.f32.mrb[64].mxu0 }
0x10fe   :  { %v11008_v40 = vadd.f32 %v10999_v36, %v10821_v32  ;;  %v11001_v19 = vpop.f32.mrb[65].mxu0 }
0x10ff   :  { %v11009_v33 = vadd.f32 %v11001_v19, %v10822_v63  ;;  %v10584_v3 = vpop.f32.mrb[56].mxu1  ;;  %v11003_v21 = vpop.f32.mrb[66].mxu0 }
0x1100   :  { %v10632_v41 = vadd.f32 %v10584_v3, %v10445_v1  ;;  %v10586_v52 = vpop.f32.mrb[57].mxu1  ;;  %v11004_v55 = vpop.f32.mrb[67].mxu0  ;;  %v11579_v3 = vsub.s32 1, %v11574_v5 }
0x1101   :  { %v10633_v45 = vadd.f32 %v10586_v52, %v10446_v7  ;;  %v10588_v38 = vpop.f32.mrb[58].mxu1 }
0x1102   :  { %v10589_v12 = vpop.f32.mrb[59].mxu1  ;;  %v11580_v52 = vrot.slane %v11571_v27, %v11579_v3 }
0x110d   :  { %v11186_v29 = vpop.f32.mrb[68].mxu0 }
0x110e   :  { %v11195_v16 = vadd.f32 %v11186_v29, %v11008_v40  ;;  %v11188_v34 = vpop.f32.mrb[69].mxu0 }
0x110f   :  { %v11196_v57 = vadd.f32 %v11188_v34, %v11009_v33  ;;  %v10771_v31 = vpop.f32.mrb[60].mxu1  ;;  %v11190_v11 = vpop.f32.mrb[70].mxu0  ;;  %v11575_v33 = vsub.s32 0, %v11574_v5 }
0x1110   :  { %v10819_v13 = vadd.f32 %v10771_v31, %v10632_v41  ;;  %v10773_v39 = vpop.f32.mrb[61].mxu1  ;;  %v11191_v59 = vpop.f32.mrb[71].mxu0 }
0x1111   :  { %v10820_v18 = vadd.f32 %v10773_v39, %v10633_v45  ;;  %v10775_v44 = vpop.f32.mrb[62].mxu1  ;;  %v11576_v21 = vrot.slane %v11571_v27, %v11575_v33 }
0x1112   :  { %v10776_v2 = vpop.f32.mrb[63].mxu1 }
0x111d   :  { %v11373_v23 = vpop.f32.mrb[72].mxu0 }
0x111e   :  { %v11382_v61 = vadd.f32 %v11373_v23, %v11195_v16  ;;  %v11375_v54 = vpop.f32.mrb[73].mxu0 }
0x111f   :  { %v11383_v14 = vadd.f32 %v11375_v54, %v11196_v57  ;;  %v10958_v9 = vpop.f32.mrb[64].mxu1  ;;  %v11377_v26 = vpop.f32.mrb[74].mxu0 }
0x1120   :  { %v11006_v58 = vadd.f32 %v10958_v9, %v10819_v13  ;;  %v10960_v25 = vpop.f32.mrb[65].mxu1  ;;  %v11378_v35 = vpop.f32.mrb[75].mxu0 }
0x1121   :  { %v11007_v30 = vadd.f32 %v10960_v25, %v10820_v18  ;;  %v10962_v46 = vpop.f32.mrb[66].mxu1 }
0x1122   :  { %v10963_v50 = vpop.f32.mrb[67].mxu1 }
0x112d   :  { %v11560_v15 = vpop.f32.mrb[76].mxu0 }
0x112e   :  { %v11569_v22 = vadd.f32 %v11560_v15, %v11382_v61  ;;  %v11562_v17 = vpop.f32.mrb[77].mxu0  ;;  %v13592_v61 = vld [vmem:[%s21247_s15] ss:$0 sm:$0xff] }
0x112f   :  { %v11570_v62 = vadd.f32 %v11562_v17, %v11383_v14  ;;  %v11145_v56 = vpop.f32.mrb[68].mxu1  ;;  %v11564_v53 = vpop.f32.mrb[78].mxu0 }
0x1130   :  { %v11595_v10 = vadd.f32 %v11584_v20, %v11569_v22  ;;  %v11193_v24 = vadd.f32 %v11145_v56, %v11006_v58  ;;  %v11147_v37 = vpop.f32.mrb[69].mxu1  ;;  %v11565_v49 = vpop.f32.mrb[79].mxu0 }
0x1131   :  { %v11596_v32 = vadd.f32 %v11588_v28, %v11570_v62  ;;  %v11194_v6 = vadd.f32 %v11147_v37, %v11007_v30  ;;  %v11149_v63 = vpop.f32.mrb[70].mxu1 }
0x1132   :  { %v11599_v48 = vmax.f32 %v11595_v10, 0.0  ;;  %v11150_v0 = vpop.f32.mrb[71].mxu1 }
0x1133   :  { %v11600_v1 = vmax.f32 %v11596_v32, 0.0 }
0x1134   :  { %v11603_v51 = vpack.c.bf16 %v11599_v48, %v11599_v48 }
0x1135   :  { %v11604_v47 = vpack.c.bf16 %v11600_v1, %v11600_v1 }
0x1137   :  { %11940 = vmatprep.mubr.bf16.mxu0 %v11604_v47 }
0x1138   :  { %11941 = vmatmul.mubr.bf16.vlgmr.msra.gmra.mrb[80].mxu0 %v11603_v51 }
0x113f   :  { %v11332_v7 = vpop.f32.mrb[72].mxu1 }
0x1140   :  { %v11380_v42 = vadd.f32 %v11332_v7, %v11193_v24  ;;  %v11334_v8 = vpop.f32.mrb[73].mxu1 }
0x1141   :  { %v11381_v36 = vadd.f32 %v11334_v8, %v11194_v6  ;;  %v11336_v40 = vpop.f32.mrb[74].mxu1 }
0x1142   :  { %v11337_v19 = vpop.f32.mrb[75].mxu1 }
0x114f   :  { %v11519_v41 = vpop.f32.mrb[76].mxu1 }
0x1150   :  { %v11567_v55 = vadd.f32 %v11519_v41, %v11380_v42  ;;  %v11521_v45 = vpop.f32.mrb[77].mxu1 }
0x1151   :  { %v11568_v38 = vadd.f32 %v11521_v45, %v11381_v36  ;;  %v11523_v12 = vpop.f32.mrb[78].mxu1 }
0x1152   :  { %v11593_v29 = vadd.f32 %v11576_v21, %v11567_v55  ;;  %v11524_v16 = vpop.f32.mrb[79].mxu1 }
0x1153   :  { %v11594_v34 = vadd.f32 %v11580_v52, %v11568_v38 }
0x1154   :  { %v11597_v57 = vmax.f32 %v11593_v29, 0.0 }
0x1155   :  { %v11598_v31 = vmax.f32 %v11594_v34, 0.0 }
0x1156   :  { %v11601_v13 = vpack.c.bf16 %v11597_v57, %v11597_v57 }
0x1157   :  { %v11602_v11 = vpack.c.bf16 %v11598_v31, %v11598_v31 }
0x1159   :  { %11900 = vmatprep.mubr.bf16.mxu1 %v11602_v11 }
0x115a   :  { %11901 = vmatmul.mubr.bf16.vlgmr.msra.gmra.mrb[100].mxu1 %v11601_v13 }
0x120b   :  { %v14628_v39 = vpop.f32.mrb[80].mxu0 }
0x120c   :  { %v14629_v59 = vpop.f32.mrb[81].mxu0 }
0x120d   :  { %v14630_v18 = vadd.f32 %v14629_v59, %v14628_v39  ;;  %v14631_v44 = vpop.f32.mrb[82].mxu0 }
0x120e   :  { %v14632_v2 = vpop.f32.mrb[83].mxu0 }
0x122d   :  { %v14606_v23 = vpop.f32.mrb[100].mxu1 }
0x122e   :  { %v14607_v54 = vpop.f32.mrb[101].mxu1 }
0x122f   :  { %v14608_v14 = vadd.f32 %v14607_v54, %v14606_v23  ;;  %v14609_v9 = vpop.f32.mrb[102].mxu1 }
0x1230   :  { %v14610_v26 = vpop.f32.mrb[103].mxu1 }
0x1231   :  { %v11903_v58 = vadd.f32 %v14608_v14, %v13592_v61 }
0x1233   :  { %v11943_v25 = vadd.f32 %v14630_v18, %v11903_v58 }
0x1235   :  { %11949 = vst.msk [vmem:[#allocation2] sm:$0x3] %vm11948_vm6, %v11943_v25 }
0x1236   :  { %16648 = shalt.err (!%p16645_p4)
}
0x1237   :  { %s16649_s22 = scalar_lea.hbm %s21248_s16, 32 }
0x1238   :  { %p16650_p5 = scmp.ne.s32.totalorder %s21248_s16, %s16649_s22  ;;  %p16653_p6 = scmp.lt.u32.totalorder %s16649_s22, %s21248_s16 }
0x123a   :  { %p16655_p7 = pnand %p16653_p6, %p16650_p5 }
0x123c   :  { %16658 = shalt.err (!%p16655_p7)
}
0x123d   :  { %11959 = dma.vmem_to_hbm [thread:$0]  %s11957_s1, 32, %s21248_s16, [#allocation3]  }
0x123e   :  { %16659 = dma.done.wait [#allocation3], 32  }
0x123f   :  { %16660 = vsyncadd [#allocation3], 4294967264 }
0x1240   :  { %11963 = vsyncpa [#allocation3], 1 }

</bundles_post_ra>
